<compile_context>
chip_gen: v7x
topology: tpu7x:2x2x1
jax: 0.10.0
libtpu: 0.0.40
codegen_flags: <defaults>
</compile_context>

<pallas_src>
import functools

import numpy as np
import jax
import jax.numpy as jnp
from jax.experimental import pallas as pl
from jax.experimental.pallas import tpu as pltpu


_CONST_NAMES = (
    "rin",
    "ec1_L", "ec1_R", "ec2_L", "ec2_R", "ec3_L", "ec3_R",
    "fc_L", "fc_R", "dfc_L", "dfc_R",
    "dc1_L", "dc1_R", "dc2_L", "dc2_R", "dc3_L", "dc3_R",
    "rout",
    "b_ec1", "b_ec2", "b_ec3", "b_fc", "b_dfc", "b_dc1", "b_dc2", "b_dc3",
)


# --------------------- host-side constant builders -------------------------

def _conv_terms(w_oihw, Hi, Wi, Ho, Wo, stride, pad_top, pad_left, B):
    """PyTorch Conv2d -> k terms (L_t, R_t) with out = sum_t L_t @ X @ R_t.
    X rows = (b, hi), lanes = (wi, cin); out rows = (b, ho), lanes = (wo, cout).
    Zero padding is implicit (out-of-range taps are simply dropped)."""
    O, I, k, _ = w_oihw.shape
    w = np.transpose(w_oihw, (2, 3, 1, 0))          # (ki, kj, cin, cout)
    Ls = np.zeros((k, B * Ho, B * Hi), np.float32)
    Rs = np.zeros((k, Wi * I, Wo * O), np.float32)
    for ki in range(k):
        for b in range(B):
            for ho in range(Ho):
                hi = stride * ho - pad_top + ki
                if 0 <= hi < Hi:
                    Ls[ki, b * Ho + ho, b * Hi + hi] = 1.0
        for wo in range(Wo):
            for kj in range(k):
                wi = stride * wo - pad_left + kj
                if 0 <= wi < Wi:
                    Rs[ki, wi * I:(wi + 1) * I, wo * O:(wo + 1) * O] = w[ki, kj]
    return Ls, Rs


def _convT_terms(w_iokk, Hi, Wi, stride, padding, B):
    """PyTorch ConvTranspose2d -> k terms (L_t, R_t); the scatter pattern
    out[s*hi+ki-p, s*wi+kj-p] += x[hi,wi] * w[:, :, ki, kj] is folded directly
    into the sparsity of L (rows) and the banded structure of R (lanes)."""
    I, O, k, _ = w_iokk.shape
    Ho = (Hi - 1) * stride + k - 2 * padding
    Wo = (Wi - 1) * stride + k - 2 * padding
    Ls = np.zeros((k, B * Ho, B * Hi), np.float32)
    Rs = np.zeros((k, Wi * I, Wo * O), np.float32)
    for ki in range(k):
        for b in range(B):
            for hi in range(Hi):
                ho = stride * hi + ki - padding
                if 0 <= ho < Ho:
                    Ls[ki, b * Ho + ho, b * Hi + hi] = 1.0
        for wi in range(Wi):
            for kj in range(k):
                wo = stride * wi + kj - padding
                if 0 <= wo < Wo:
                    Rs[ki, wi * I:(wi + 1) * I, wo * O:(wo + 1) * O] = \
                        w_iokk[:, :, ki, kj]
    return Ls, Rs


def init_params(key, image_chan, width, z_dim):
    """Parameters in PyTorch layouts (Conv2d (O,I,kh,kw); ConvTranspose2d
    (I,O,kh,kw); Linear weights stored already transposed as (in, out))."""
    px = width * width
    feat = 64 * px // 16
    keys = jax.random.split(key, 18)

    def u(k, shape, fan_in):
        bound = 1.0 / (fan_in ** 0.5)
        return jax.random.uniform(k, shape, jnp.float32, -bound, bound)

    p = {}
    p["ec1_w"] = u(keys[0], (64, image_chan, 4, 4), image_chan * 16)
    p["ec1_b"] = u(keys[1], (64,), image_chan * 16)
    p["ec2_w"] = u(keys[2], (64, 64, 4, 4), 64 * 16)
    p["ec2_b"] = u(keys[3], (64,), 64 * 16)
    p["ec3_w"] = u(keys[4], (64, 64, 4, 4), 64 * 16)
    p["ec3_b"] = u(keys[5], (64,), 64 * 16)
    p["fc_mu_w"] = u(keys[6], (feat, z_dim), feat)
    p["fc_mu_b"] = u(keys[7], (z_dim,), feat)
    p["fc_lv_w"] = u(keys[8], (feat, z_dim), feat)
    p["fc_lv_b"] = u(keys[9], (z_dim,), feat)
    p["dfc_w"] = u(keys[10], (z_dim, feat), z_dim)
    p["dfc_b"] = u(keys[11], (feat,), z_dim)
    p["dc1_w"] = u(keys[12], (64, 64, 4, 4), 64 * 16)
    p["dc1_b"] = u(keys[13], (64,), 64 * 16)
    p["dc2_w"] = u(keys[14], (64, 64, 4, 4), 64 * 16)
    p["dc2_b"] = u(keys[15], (64,), 64 * 16)
    p["dc3_w"] = u(keys[16], (64, image_chan, 4, 4), 64 * 16)
    p["dc3_b"] = u(keys[17], (image_chan,), 64 * 16)
    return p


def prepare_params(p, *, batch, image_chan, width, z_dim):
    """One-time packing of every layer into (L, R, bias) matrices consumed by
    the fused kernel.  L stacks are 0/1 selections (bf16-exact); R stacks hold
    the actual weights (bf16); biases stay f32."""
    B, Cin, CF = batch, image_chan, 64
    f32 = np.float32
    H0 = width
    H1 = (H0 + 2 - 4) // 2 + 1                 # after ec1 (4x4 s2 p1)
    H2 = (H1 + 2 - 4) // 2 + 1                 # after ec2
    Hf = H2                                    # after ZeroPad2d + ec3
    D1 = Hf + 1                                # after dc1 (4x4 s1 p1)
    D2 = 2 * D1 - 2                            # after dc2 (4x4 s2 p2)
    D3 = 2 * D2                                # after dc3 (4x4 s2 p1) == width

    def bf(a):
        return jnp.asarray(a, dtype=jnp.bfloat16)

    c = {}

    # input boundary: NCHW planes -> rows (b, h), lanes (w*Cin + c)
    rin = np.zeros((Cin, H0, H0 * Cin), f32)
    for ch in range(Cin):
        for w in range(H0):
            rin[ch, w, w * Cin + ch] = 1.0
    c["rin"] = jnp.asarray(rin)

    # encoder convolutions (zero padding folded into L/R)
    L, R = _conv_terms(np.asarray(p["ec1_w"], f32), H0, H0, H1, H1, 2, 1, 1, B)
    c["ec1_L"], c["ec1_R"] = bf(L), bf(R)
    c["b_ec1"] = jnp.asarray(np.tile(np.asarray(p["ec1_b"], f32), H1)[None, :])

    L, R = _conv_terms(np.asarray(p["ec2_w"], f32), H1, H1, H2, H2, 2, 1, 1, B)
    c["ec2_L"], c["ec2_R"] = bf(L), bf(R)
    c["b_ec2"] = jnp.asarray(np.tile(np.asarray(p["ec2_b"], f32), H2)[None, :])

    # ZeroPad2d((1,2,1,2)) + valid 4x4 conv == conv with pad_top=pad_left=1
    # (the bottom/right pad of 2 is handled by the implicit bounds check).
    L, R = _conv_terms(np.asarray(p["ec3_w"], f32), H2, H2, Hf, Hf, 1, 1, 1, B)
    c["ec3_L"], c["ec3_R"] = bf(L), bf(R)
    c["b_ec3"] = jnp.asarray(np.tile(np.asarray(p["ec3_b"], f32), Hf)[None, :])

    # fused fc_mu / fc_logvar: one term per feature-map row h
    Wmu = np.asarray(p["fc_mu_w"], f32)
    Wlv = np.asarray(p["fc_lv_w"], f32)
    Ls = np.zeros((Hf, B, B * Hf), f32)
    Rs = np.zeros((Hf, Hf * CF, 2 * z_dim), f32)
    for h in range(Hf):
        for b in range(B):
            Ls[h, b, b * Hf + h] = 1.0
        for w in range(Hf):
            for ch in range(CF):
                f = ch * (Hf * Hf) + h * Hf + w       # NCHW flatten order
                Rs[h, w * CF + ch, :z_dim] = Wmu[f]
                Rs[h, w * CF + ch, z_dim:] = Wlv[f]
    c["fc_L"], c["fc_R"] = bf(Ls), bf(Rs)
    c["b_fc"] = jnp.asarray(
        np.concatenate([np.asarray(p["fc_mu_b"], f32),
                        np.asarray(p["fc_lv_b"], f32)])[None, :])

    # decoder fc: z -> rows (b, h), lanes (w*64 + c)
    Wd = np.asarray(p["dfc_w"], f32)
    Ls = np.zeros((Hf, B * Hf, B), f32)
    Rs = np.zeros((Hf, z_dim, Hf * CF), f32)
    for h in range(Hf):
        for b in range(B):
            Ls[h, b * Hf + h, b] = 1.0
        for w in range(Hf):
            for ch in range(CF):
                f = ch * (Hf * Hf) + h * Hf + w
                Rs[h, :, w * CF + ch] = Wd[:, f]
    c["dfc_L"], c["dfc_R"] = bf(Ls), bf(Rs)
    bd = np.asarray(p["dfc_b"], f32).reshape(CF, Hf, Hf)
    bd = np.transpose(bd, (1, 2, 0)).reshape(Hf, Hf * CF)
    c["b_dfc"] = jnp.asarray(np.tile(bd, (B, 1)))

    # decoder transposed convolutions
    L, R = _convT_terms(np.asarray(p["dc1_w"], f32), Hf, Hf, 1, 1, B)
    c["dc1_L"], c["dc1_R"] = bf(L), bf(R)
    c["b_dc1"] = jnp.asarray(np.tile(np.asarray(p["dc1_b"], f32), D1)[None, :])

    L, R = _convT_terms(np.asarray(p["dc2_w"], f32), D1, D1, 2, 2, B)
    c["dc2_L"], c["dc2_R"] = bf(L), bf(R)
    c["b_dc2"] = jnp.asarray(np.tile(np.asarray(p["dc2_b"], f32), D2)[None, :])

    L, R = _convT_terms(np.asarray(p["dc3_w"], f32), D2, D2, 2, 1, B)
    c["dc3_L"], c["dc3_R"] = bf(L), bf(R)
    c["b_dc3"] = jnp.asarray(np.tile(np.asarray(p["dc3_b"], f32), D3)[None, :])

    # output boundary: rows (b, h), lanes (w*Cin + c) -> NCHW planes
    rout = np.zeros((Cin, D3 * Cin, D3), f32)
    for ch in range(Cin):
        for w in range(D3):
            rout[ch, w * Cin + ch, w] = 1.0
    c["rout"] = jnp.asarray(rout)
    return c


# --------------------------- fused Pallas kernel ----------------------------

def _vae_kernel(*refs, B, image_chan, z_dim, width):
    nC = len(_CONST_NAMES)
    x_ref, eps_ref = refs[0], refs[1]
    C = dict(zip(_CONST_NAMES, refs[2:2 + nC]))
    mu_ref, lv_ref, xr_ref = refs[2 + nC:]
    f32 = jnp.float32

    def layer(x_bf, name, act):
        """act( sum_t L_t @ X @ R_t + bias ); bf16 MXU operands, f32 acc."""
        L, R, bias = C[name + "_L"], C[name + "_R"], C["b_" + name]
        acc = None
        for t in range(L.shape[0]):
            lx = jnp.dot(L[t], x_bf, preferred_element_type=f32)
            lx = lx.astype(jnp.bfloat16)       # exact: L is a 0/1 selection
            y = jnp.dot(lx, R[t], preferred_element_type=f32)
            acc = y if acc is None else acc + y
        acc = acc + bias[...]
        if act == "relu":
            acc = jnp.maximum(acc, 0.0)
        elif act == "sigmoid":
            acc = 1.0 / (1.0 + jnp.exp(-acc))  # exact divide keeps [0, 1]
        return acc

    # ---- input boundary: NCHW -> rows (b, h), lanes (w*Cin + c) ----
    rin = C["rin"]
    blocks = []
    for b in range(B):
        body = None
        for ch in range(image_chan):
            t = jnp.dot(x_ref[b, ch], rin[ch], preferred_element_type=f32)
            body = t if body is None else body + t
        blocks.append(body)
    x0 = jnp.concatenate(blocks, axis=0).astype(jnp.bfloat16)

    # ---- encoder ----
    h = layer(x0, "ec1", "relu").astype(jnp.bfloat16)
    h = layer(h, "ec2", "relu").astype(jnp.bfloat16)
    h = layer(h, "ec3", "relu").astype(jnp.bfloat16)

    # ---- fc_mu + fc_logvar + reparameterize (same kernel, no HBM hop) ----
    fcout = layer(h, "fc", None)                       # (B, 2*z_dim) f32
    mu = fcout[:, :z_dim]
    logvar = fcout[:, z_dim:2 * z_dim]
    mu_ref[...] = mu
    lv_ref[...] = logvar
    z = eps_ref[...] * jnp.exp(0.5 * logvar) + mu      # (B, z_dim) f32

    # ---- decoder ----
    d = layer(z.astype(jnp.bfloat16), "dfc", "relu").astype(jnp.bfloat16)
    d = layer(d, "dc1", "relu").astype(jnp.bfloat16)
    d = layer(d, "dc2", "relu").astype(jnp.bfloat16)
    xr = layer(d, "dc3", "sigmoid")                    # (B*width, width*Cin) f32

    # ---- output boundary: rows/lanes -> NCHW ----
    rout = C["rout"]
    for b in range(B):
        rows = xr[b * width:(b + 1) * width, :]
        for ch in range(image_chan):
            xr_ref[b, ch, :, :] = jnp.dot(rows, rout[ch],
                                          preferred_element_type=f32)


def basic_vae_forward(consts, x, eps, *, B, image_chan, width, z_dim):
    kern = functools.partial(_vae_kernel, B=B, image_chan=image_chan,
                             z_dim=z_dim, width=width)
    n_in = 2 + len(_CONST_NAMES)
    out_shape = (
        jax.ShapeDtypeStruct((B, z_dim), jnp.float32),
        jax.ShapeDtypeStruct((B, z_dim), jnp.float32),
        jax.ShapeDtypeStruct((B, image_chan, width, width), jnp.float32),
    )
    mu, logvar, x_rec = pl.pallas_call(
        kern,
        out_shape=out_shape,
        in_specs=[pl.BlockSpec(memory_space=pltpu.MemorySpace.VMEM)] * n_in,
        out_specs=tuple(pl.BlockSpec(memory_space=pltpu.MemorySpace.VMEM)
                        for _ in range(3)),
        compiler_params=pltpu.CompilerParams(
            vmem_limit_bytes=32 * 1024 * 1024),
    )(x, eps, *[consts[n] for n in _CONST_NAMES])
    return mu, logvar, x_rec


# ---------------- pure-JAX reference (element-wise validation) --------------

def reference_forward(p, x, eps, *, width):
    f32, bfl = jnp.float32, jnp.bfloat16
    q = lambda a: a.astype(bfl).astype(f32)    # emulate the kernel's bf16 ops

    def conv(h, w, b, stride, padding):
        o = jax.lax.conv_general_dilated(
            q(h), q(w), (stride, stride),
            [(padding, padding), (padding, padding)],
            dimension_numbers=("NCHW", "OIHW", "NCHW"))
        return o + b.reshape(1, -1, 1, 1)

    def convT(h, w_iokk, b, stride, padding):
        k = w_iokk.shape[2]
        w_oihw = jnp.transpose(jnp.flip(w_iokk, axis=(2, 3)), (1, 0, 2, 3))
        o = jax.lax.conv_general_dilated(
            q(h), q(w_oihw), (1, 1),
            [(k - 1 - padding,) * 2, (k - 1 - padding,) * 2],
            lhs_dilation=(stride, stride),
            dimension_numbers=("NCHW", "OIHW", "NCHW"))
        return o + b.reshape(1, -1, 1, 1)

    relu = lambda a: jnp.maximum(a, 0.0)
    h = relu(conv(x, p["ec1_w"], p["ec1_b"], 2, 1))
    h = relu(conv(h, p["ec2_w"], p["ec2_b"], 2, 1))
    h = jnp.pad(h, ((0, 0), (0, 0), (1, 2), (1, 2)))   # ZeroPad2d((1,2,1,2))
    h = relu(conv(h, p["ec3_w"], p["ec3_b"], 1, 0))
    hf = h.reshape(h.shape[0], -1)
    mu = q(hf) @ q(p["fc_mu_w"]) + p["fc_mu_b"]
    logvar = q(hf) @ q(p["fc_lv_w"]) + p["fc_lv_b"]
    z = eps * jnp.exp(0.5 * logvar) + mu
    t = relu(q(z) @ q(p["dfc_w"]) + p["dfc_b"])
    t = t.reshape(t.shape[0], 64, width // 4, width // 4)
    d = relu(convT(t, p["dc1_w"], p["dc1_b"], 1, 1))
    d = relu(convT(d, p["dc2_w"], p["dc2_b"], 2, 2))
    xr = jax.nn.sigmoid(convT(d, p["dc3_w"], p["dc3_b"], 2, 1))
    return mu, logvar, xr


if __name__ == "__main__":
    B, C, W, Z = 2, 3, 16, 8   # batch, image_chan, width, z_dim
    key = jax.random.PRNGKey(0)
    kp, kx, ke = jax.random.split(key, 3)

    params = init_params(kp, image_chan=C, width=W, z_dim=Z)
    consts = prepare_params(params, batch=B, image_chan=C, width=W, z_dim=Z)

    x = jax.random.uniform(kx, (B, C, W, W), jnp.float32)
    eps = jax.random.normal(ke, (B, Z), jnp.float32)   # torch.randn_like(mu)

    fwd = jax.jit(functools.partial(basic_vae_forward, B=B, image_chan=C,
                                    width=W, z_dim=Z))
    mu, logvar, x_rec = fwd(consts, x, eps)
    jax.block_until_ready((mu, logvar, x_rec))

    assert mu.shape == (B, Z), mu.shape
    assert logvar.shape == (B, Z), logvar.shape
    assert x_rec.shape == (B, C, W, W), x_rec.shape
    assert bool(jnp.all(jnp.isfinite(mu)))
    assert bool(jnp.all(jnp.isfinite(logvar)))
    assert bool(jnp.all(jnp.isfinite(x_rec)))
    assert bool(jnp.all((x_rec >= 0.0) & (x_rec <= 1.0)))   # sigmoid output

    # element-wise validation against a pure-JAX/XLA reference
    mu_r, lv_r, xr_r = reference_forward(params, x, eps, width=W)
    assert float(jnp.max(jnp.abs(mu - mu_r))) < 1e-2
    assert float(jnp.max(jnp.abs(logvar - lv_r))) < 1e-2
    assert float(jnp.max(jnp.abs(x_rec - xr_r))) < 1e-2

    print("KERNEL_OK")
</pallas_src>

<mosaic_0001>
module attributes {stable_mosaic.version = 11 : i64} {
  func.func @_vae_kernel(%arg0: memref<2x3x16x16xf32, #tpu.memory_space<vmem>>, %arg1: memref<2x8xf32, #tpu.memory_space<vmem>>, %arg2: memref<3x16x48xf32, #tpu.memory_space<vmem>>, %arg3: memref<4x16x32xbf16, #tpu.memory_space<vmem>>, %arg4: memref<4x48x512xbf16, #tpu.memory_space<vmem>>, %arg5: memref<4x8x16xbf16, #tpu.memory_space<vmem>>, %arg6: memref<4x512x256xbf16, #tpu.memory_space<vmem>>, %arg7: memref<4x8x8xbf16, #tpu.memory_space<vmem>>, %arg8: memref<4x256x256xbf16, #tpu.memory_space<vmem>>, %arg9: memref<4x2x8xbf16, #tpu.memory_space<vmem>>, %arg10: memref<4x256x16xbf16, #tpu.memory_space<vmem>>, %arg11: memref<4x8x2xbf16, #tpu.memory_space<vmem>>, %arg12: memref<4x8x256xbf16, #tpu.memory_space<vmem>>, %arg13: memref<4x10x8xbf16, #tpu.memory_space<vmem>>, %arg14: memref<4x256x320xbf16, #tpu.memory_space<vmem>>, %arg15: memref<4x16x10xbf16, #tpu.memory_space<vmem>>, %arg16: memref<4x320x512xbf16, #tpu.memory_space<vmem>>, %arg17: memref<4x32x16xbf16, #tpu.memory_space<vmem>>, %arg18: memref<4x512x48xbf16, #tpu.memory_space<vmem>>, %arg19: memref<3x48x16xf32, #tpu.memory_space<vmem>>, %arg20: memref<1x512xf32, #tpu.memory_space<vmem>>, %arg21: memref<1x256xf32, #tpu.memory_space<vmem>>, %arg22: memref<1x256xf32, #tpu.memory_space<vmem>>, %arg23: memref<1x16xf32, #tpu.memory_space<vmem>>, %arg24: memref<8x256xf32, #tpu.memory_space<vmem>>, %arg25: memref<1x320xf32, #tpu.memory_space<vmem>>, %arg26: memref<1x512xf32, #tpu.memory_space<vmem>>, %arg27: memref<1x48xf32, #tpu.memory_space<vmem>>, %arg28: memref<2x8xf32, #tpu.memory_space<vmem>>, %arg29: memref<2x8xf32, #tpu.memory_space<vmem>>, %arg30: memref<2x3x16x16xf32, #tpu.memory_space<vmem>>) attributes {dimension_semantics = [], scalar_prefetch = 0 : i64, scratch_operands = 0 : i64, tpu.core_type = #tpu.core_type<tc>} {
    %c0 = arith.constant 0 : index
    %c0_0 = arith.constant 0 : index
    %c0_1 = arith.constant 0 : index
    %c0_2 = arith.constant 0 : index
    %0 = vector.load %arg0[%c0, %c0_0, %c0_1, %c0_2] : memref<2x3x16x16xf32, #tpu.memory_space<vmem>>, vector<1x1x16x16xf32>
    %1 = vector.shape_cast %0 : vector<1x1x16x16xf32> to vector<16x16xf32>
    %c0_3 = arith.constant 0 : index
    %c0_4 = arith.constant 0 : index
    %c0_5 = arith.constant 0 : index
    %2 = vector.load %arg2[%c0_3, %c0_4, %c0_5] : memref<3x16x48xf32, #tpu.memory_space<vmem>>, vector<1x16x48xf32>
    %3 = vector.shape_cast %2 : vector<1x16x48xf32> to vector<16x48xf32>
    %cst = arith.constant dense<0.000000e+00> : vector<16x48xf32>
    %4 = tpu.matmul %1, %3, %cst {dimension_numbers = #tpu.dot_dimension_numbers<[1], [0], [0], [1], [0, 0, 1, 1], [], []>} : vector<16x16xf32>, vector<16x48xf32>, vector<16x48xf32> -> vector<16x48xf32>
    %c0_6 = arith.constant 0 : index
    %c1 = arith.constant 1 : index
    %c0_7 = arith.constant 0 : index
    %c0_8 = arith.constant 0 : index
    %5 = vector.load %arg0[%c0_6, %c1, %c0_7, %c0_8] : memref<2x3x16x16xf32, #tpu.memory_space<vmem>>, vector<1x1x16x16xf32>
    %6 = vector.shape_cast %5 : vector<1x1x16x16xf32> to vector<16x16xf32>
    %c1_9 = arith.constant 1 : index
    %c0_10 = arith.constant 0 : index
    %c0_11 = arith.constant 0 : index
    %7 = vector.load %arg2[%c1_9, %c0_10, %c0_11] : memref<3x16x48xf32, #tpu.memory_space<vmem>>, vector<1x16x48xf32>
    %8 = vector.shape_cast %7 : vector<1x16x48xf32> to vector<16x48xf32>
    %cst_12 = arith.constant dense<0.000000e+00> : vector<16x48xf32>
    %9 = tpu.matmul %6, %8, %cst_12 {dimension_numbers = #tpu.dot_dimension_numbers<[1], [0], [0], [1], [0, 0, 1, 1], [], []>} : vector<16x16xf32>, vector<16x48xf32>, vector<16x48xf32> -> vector<16x48xf32>
    %10 = arith.addf %4, %9 : vector<16x48xf32>
    %c0_13 = arith.constant 0 : index
    %c2 = arith.constant 2 : index
    %c0_14 = arith.constant 0 : index
    %c0_15 = arith.constant 0 : index
    %11 = vector.load %arg0[%c0_13, %c2, %c0_14, %c0_15] : memref<2x3x16x16xf32, #tpu.memory_space<vmem>>, vector<1x1x16x16xf32>
    %12 = vector.shape_cast %11 : vector<1x1x16x16xf32> to vector<16x16xf32>
    %c2_16 = arith.constant 2 : index
    %c0_17 = arith.constant 0 : index
    %c0_18 = arith.constant 0 : index
    %13 = vector.load %arg2[%c2_16, %c0_17, %c0_18] : memref<3x16x48xf32, #tpu.memory_space<vmem>>, vector<1x16x48xf32>
    %14 = vector.shape_cast %13 : vector<1x16x48xf32> to vector<16x48xf32>
    %cst_19 = arith.constant dense<0.000000e+00> : vector<16x48xf32>
    %15 = tpu.matmul %12, %14, %cst_19 {dimension_numbers = #tpu.dot_dimension_numbers<[1], [0], [0], [1], [0, 0, 1, 1], [], []>} : vector<16x16xf32>, vector<16x48xf32>, vector<16x48xf32> -> vector<16x48xf32>
    %16 = arith.addf %10, %15 : vector<16x48xf32>
    %c1_20 = arith.constant 1 : index
    %c0_21 = arith.constant 0 : index
    %c0_22 = arith.constant 0 : index
    %c0_23 = arith.constant 0 : index
    %17 = vector.load %arg0[%c1_20, %c0_21, %c0_22, %c0_23] : memref<2x3x16x16xf32, #tpu.memory_space<vmem>>, vector<1x1x16x16xf32>
    %18 = vector.shape_cast %17 : vector<1x1x16x16xf32> to vector<16x16xf32>
    %c0_24 = arith.constant 0 : index
    %c0_25 = arith.constant 0 : index
    %c0_26 = arith.constant 0 : index
    %19 = vector.load %arg2[%c0_24, %c0_25, %c0_26] : memref<3x16x48xf32, #tpu.memory_space<vmem>>, vector<1x16x48xf32>
    %20 = vector.shape_cast %19 : vector<1x16x48xf32> to vector<16x48xf32>
    %cst_27 = arith.constant dense<0.000000e+00> : vector<16x48xf32>
    %21 = tpu.matmul %18, %20, %cst_27 {dimension_numbers = #tpu.dot_dimension_numbers<[1], [0], [0], [1], [0, 0, 1, 1], [], []>} : vector<16x16xf32>, vector<16x48xf32>, vector<16x48xf32> -> vector<16x48xf32>
    %c1_28 = arith.constant 1 : index
    %c1_29 = arith.constant 1 : index
    %c0_30 = arith.constant 0 : index
    %c0_31 = arith.constant 0 : index
    %22 = vector.load %arg0[%c1_28, %c1_29, %c0_30, %c0_31] : memref<2x3x16x16xf32, #tpu.memory_space<vmem>>, vector<1x1x16x16xf32>
    %23 = vector.shape_cast %22 : vector<1x1x16x16xf32> to vector<16x16xf32>
    %c1_32 = arith.constant 1 : index
    %c0_33 = arith.constant 0 : index
    %c0_34 = arith.constant 0 : index
    %24 = vector.load %arg2[%c1_32, %c0_33, %c0_34] : memref<3x16x48xf32, #tpu.memory_space<vmem>>, vector<1x16x48xf32>
    %25 = vector.shape_cast %24 : vector<1x16x48xf32> to vector<16x48xf32>
    %cst_35 = arith.constant dense<0.000000e+00> : vector<16x48xf32>
    %26 = tpu.matmul %23, %25, %cst_35 {dimension_numbers = #tpu.dot_dimension_numbers<[1], [0], [0], [1], [0, 0, 1, 1], [], []>} : vector<16x16xf32>, vector<16x48xf32>, vector<16x48xf32> -> vector<16x48xf32>
    %27 = arith.addf %21, %26 : vector<16x48xf32>
    %c1_36 = arith.constant 1 : index
    %c2_37 = arith.constant 2 : index
    %c0_38 = arith.constant 0 : index
    %c0_39 = arith.constant 0 : index
    %28 = vector.load %arg0[%c1_36, %c2_37, %c0_38, %c0_39] : memref<2x3x16x16xf32, #tpu.memory_space<vmem>>, vector<1x1x16x16xf32>
    %29 = vector.shape_cast %28 : vector<1x1x16x16xf32> to vector<16x16xf32>
    %c2_40 = arith.constant 2 : index
    %c0_41 = arith.constant 0 : index
    %c0_42 = arith.constant 0 : index
    %30 = vector.load %arg2[%c2_40, %c0_41, %c0_42] : memref<3x16x48xf32, #tpu.memory_space<vmem>>, vector<1x16x48xf32>
    %31 = vector.shape_cast %30 : vector<1x16x48xf32> to vector<16x48xf32>
    %cst_43 = arith.constant dense<0.000000e+00> : vector<16x48xf32>
    %32 = tpu.matmul %29, %31, %cst_43 {dimension_numbers = #tpu.dot_dimension_numbers<[1], [0], [0], [1], [0, 0, 1, 1], [], []>} : vector<16x16xf32>, vector<16x48xf32>, vector<16x48xf32> -> vector<16x48xf32>
    %33 = arith.addf %27, %32 : vector<16x48xf32>
    %34 = tpu.concatenate %16, %33 in 0 : vector<16x48xf32>, vector<16x48xf32> -> vector<32x48xf32>
    %35 = arith.truncf %34 : vector<32x48xf32> to vector<32x48xbf16>
    %c0_44 = arith.constant 0 : index
    %c0_45 = arith.constant 0 : index
    %c0_46 = arith.constant 0 : index
    %36 = vector.load %arg3[%c0_44, %c0_45, %c0_46] : memref<4x16x32xbf16, #tpu.memory_space<vmem>>, vector<1x16x32xbf16>
    %37 = vector.shape_cast %36 : vector<1x16x32xbf16> to vector<16x32xbf16>
    %cst_47 = arith.constant dense<0.000000e+00> : vector<16x48xf32>
    %38 = tpu.matmul %37, %35, %cst_47 {dimension_numbers = #tpu.dot_dimension_numbers<[1], [0], [0], [1], [0, 0, 1, 1], [], []>} : vector<16x32xbf16>, vector<32x48xbf16>, vector<16x48xf32> -> vector<16x48xf32>
    %39 = arith.truncf %38 : vector<16x48xf32> to vector<16x48xbf16>
    %c0_48 = arith.constant 0 : index
    %c0_49 = arith.constant 0 : index
    %c0_50 = arith.constant 0 : index
    %40 = vector.load %arg4[%c0_48, %c0_49, %c0_50] : memref<4x48x512xbf16, #tpu.memory_space<vmem>>, vector<1x48x512xbf16>
    %41 = vector.shape_cast %40 : vector<1x48x512xbf16> to vector<48x512xbf16>
    %cst_51 = arith.constant dense<0.000000e+00> : vector<16x512xf32>
    %42 = tpu.matmul %39, %41, %cst_51 {dimension_numbers = #tpu.dot_dimension_numbers<[1], [0], [0], [1], [0, 0, 1, 1], [], []>} : vector<16x48xbf16>, vector<48x512xbf16>, vector<16x512xf32> -> vector<16x512xf32>
    %c1_52 = arith.constant 1 : index
    %c0_53 = arith.constant 0 : index
    %c0_54 = arith.constant 0 : index
    %43 = vector.load %arg3[%c1_52, %c0_53, %c0_54] : memref<4x16x32xbf16, #tpu.memory_space<vmem>>, vector<1x16x32xbf16>
    %44 = vector.shape_cast %43 : vector<1x16x32xbf16> to vector<16x32xbf16>
    %cst_55 = arith.constant dense<0.000000e+00> : vector<16x48xf32>
    %45 = tpu.matmul %44, %35, %cst_55 {dimension_numbers = #tpu.dot_dimension_numbers<[1], [0], [0], [1], [0, 0, 1, 1], [], []>} : vector<16x32xbf16>, vector<32x48xbf16>, vector<16x48xf32> -> vector<16x48xf32>
    %46 = arith.truncf %45 : vector<16x48xf32> to vector<16x48xbf16>
    %c1_56 = arith.constant 1 : index
    %c0_57 = arith.constant 0 : index
    %c0_58 = arith.constant 0 : index
    %47 = vector.load %arg4[%c1_56, %c0_57, %c0_58] : memref<4x48x512xbf16, #tpu.memory_space<vmem>>, vector<1x48x512xbf16>
    %48 = vector.shape_cast %47 : vector<1x48x512xbf16> to vector<48x512xbf16>
    %cst_59 = arith.constant dense<0.000000e+00> : vector<16x512xf32>
    %49 = tpu.matmul %46, %48, %cst_59 {dimension_numbers = #tpu.dot_dimension_numbers<[1], [0], [0], [1], [0, 0, 1, 1], [], []>} : vector<16x48xbf16>, vector<48x512xbf16>, vector<16x512xf32> -> vector<16x512xf32>
    %50 = arith.addf %42, %49 : vector<16x512xf32>
    %c2_60 = arith.constant 2 : index
    %c0_61 = arith.constant 0 : index
    %c0_62 = arith.constant 0 : index
    %51 = vector.load %arg3[%c2_60, %c0_61, %c0_62] : memref<4x16x32xbf16, #tpu.memory_space<vmem>>, vector<1x16x32xbf16>
    %52 = vector.shape_cast %51 : vector<1x16x32xbf16> to vector<16x32xbf16>
    %cst_63 = arith.constant dense<0.000000e+00> : vector<16x48xf32>
    %53 = tpu.matmul %52, %35, %cst_63 {dimension_numbers = #tpu.dot_dimension_numbers<[1], [0], [0], [1], [0, 0, 1, 1], [], []>} : vector<16x32xbf16>, vector<32x48xbf16>, vector<16x48xf32> -> vector<16x48xf32>
    %54 = arith.truncf %53 : vector<16x48xf32> to vector<16x48xbf16>
    %c2_64 = arith.constant 2 : index
    %c0_65 = arith.constant 0 : index
    %c0_66 = arith.constant 0 : index
    %55 = vector.load %arg4[%c2_64, %c0_65, %c0_66] : memref<4x48x512xbf16, #tpu.memory_space<vmem>>, vector<1x48x512xbf16>
    %56 = vector.shape_cast %55 : vector<1x48x512xbf16> to vector<48x512xbf16>
    %cst_67 = arith.constant dense<0.000000e+00> : vector<16x512xf32>
    %57 = tpu.matmul %54, %56, %cst_67 {dimension_numbers = #tpu.dot_dimension_numbers<[1], [0], [0], [1], [0, 0, 1, 1], [], []>} : vector<16x48xbf16>, vector<48x512xbf16>, vector<16x512xf32> -> vector<16x512xf32>
    %58 = arith.addf %50, %57 : vector<16x512xf32>
    %c3 = arith.constant 3 : index
    %c0_68 = arith.constant 0 : index
    %c0_69 = arith.constant 0 : index
    %59 = vector.load %arg3[%c3, %c0_68, %c0_69] : memref<4x16x32xbf16, #tpu.memory_space<vmem>>, vector<1x16x32xbf16>
    %60 = vector.shape_cast %59 : vector<1x16x32xbf16> to vector<16x32xbf16>
    %cst_70 = arith.constant dense<0.000000e+00> : vector<16x48xf32>
    %61 = tpu.matmul %60, %35, %cst_70 {dimension_numbers = #tpu.dot_dimension_numbers<[1], [0], [0], [1], [0, 0, 1, 1], [], []>} : vector<16x32xbf16>, vector<32x48xbf16>, vector<16x48xf32> -> vector<16x48xf32>
    %62 = arith.truncf %61 : vector<16x48xf32> to vector<16x48xbf16>
    %c3_71 = arith.constant 3 : index
    %c0_72 = arith.constant 0 : index
    %c0_73 = arith.constant 0 : index
    %63 = vector.load %arg4[%c3_71, %c0_72, %c0_73] : memref<4x48x512xbf16, #tpu.memory_space<vmem>>, vector<1x48x512xbf16>
    %64 = vector.shape_cast %63 : vector<1x48x512xbf16> to vector<48x512xbf16>
    %cst_74 = arith.constant dense<0.000000e+00> : vector<16x512xf32>
    %65 = tpu.matmul %62, %64, %cst_74 {dimension_numbers = #tpu.dot_dimension_numbers<[1], [0], [0], [1], [0, 0, 1, 1], [], []>} : vector<16x48xbf16>, vector<48x512xbf16>, vector<16x512xf32> -> vector<16x512xf32>
    %66 = arith.addf %58, %65 : vector<16x512xf32>
    %c0_75 = arith.constant 0 : index
    %c0_76 = arith.constant 0 : index
    %67 = vector.load %arg20[%c0_75, %c0_76] : memref<1x512xf32, #tpu.memory_space<vmem>>, vector<1x512xf32>
    %68 = vector.broadcast %67 : vector<1x512xf32> to vector<16x512xf32>
    %69 = arith.addf %66, %68 : vector<16x512xf32>
    %cst_77 = arith.constant 0.000000e+00 : f32
    %70 = vector.broadcast %cst_77 : f32 to vector<16x512xf32>
    %71 = arith.maximumf %69, %70 : vector<16x512xf32>
    %72 = arith.truncf %71 : vector<16x512xf32> to vector<16x512xbf16>
    %c0_78 = arith.constant 0 : index
    %c0_79 = arith.constant 0 : index
    %c0_80 = arith.constant 0 : index
    %73 = vector.load %arg5[%c0_78, %c0_79, %c0_80] : memref<4x8x16xbf16, #tpu.memory_space<vmem>>, vector<1x8x16xbf16>
    %74 = vector.shape_cast %73 : vector<1x8x16xbf16> to vector<8x16xbf16>
    %cst_81 = arith.constant dense<0.000000e+00> : vector<8x512xf32>
    %75 = tpu.matmul %74, %72, %cst_81 {dimension_numbers = #tpu.dot_dimension_numbers<[1], [0], [0], [1], [0, 0, 1, 1], [], []>} : vector<8x16xbf16>, vector<16x512xbf16>, vector<8x512xf32> -> vector<8x512xf32>
    %76 = arith.truncf %75 : vector<8x512xf32> to vector<8x512xbf16>
    %c0_82 = arith.constant 0 : index
    %c0_83 = arith.constant 0 : index
    %c0_84 = arith.constant 0 : index
    %77 = vector.load %arg6[%c0_82, %c0_83, %c0_84] : memref<4x512x256xbf16, #tpu.memory_space<vmem>>, vector<1x512x256xbf16>
    %78 = vector.shape_cast %77 : vector<1x512x256xbf16> to vector<512x256xbf16>
    %cst_85 = arith.constant dense<0.000000e+00> : vector<8x256xf32>
    %79 = tpu.matmul %76, %78, %cst_85 {dimension_numbers = #tpu.dot_dimension_numbers<[1], [0], [0], [1], [0, 0, 1, 1], [], []>} : vector<8x512xbf16>, vector<512x256xbf16>, vector<8x256xf32> -> vector<8x256xf32>
    %c1_86 = arith.constant 1 : index
    %c0_87 = arith.constant 0 : index
    %c0_88 = arith.constant 0 : index
    %80 = vector.load %arg5[%c1_86, %c0_87, %c0_88] : memref<4x8x16xbf16, #tpu.memory_space<vmem>>, vector<1x8x16xbf16>
    %81 = vector.shape_cast %80 : vector<1x8x16xbf16> to vector<8x16xbf16>
    %cst_89 = arith.constant dense<0.000000e+00> : vector<8x512xf32>
    %82 = tpu.matmul %81, %72, %cst_89 {dimension_numbers = #tpu.dot_dimension_numbers<[1], [0], [0], [1], [0, 0, 1, 1], [], []>} : vector<8x16xbf16>, vector<16x512xbf16>, vector<8x512xf32> -> vector<8x512xf32>
    %83 = arith.truncf %82 : vector<8x512xf32> to vector<8x512xbf16>
    %c1_90 = arith.constant 1 : index
    %c0_91 = arith.constant 0 : index
    %c0_92 = arith.constant 0 : index
    %84 = vector.load %arg6[%c1_90, %c0_91, %c0_92] : memref<4x512x256xbf16, #tpu.memory_space<vmem>>, vector<1x512x256xbf16>
    %85 = vector.shape_cast %84 : vector<1x512x256xbf16> to vector<512x256xbf16>
    %cst_93 = arith.constant dense<0.000000e+00> : vector<8x256xf32>
    %86 = tpu.matmul %83, %85, %cst_93 {dimension_numbers = #tpu.dot_dimension_numbers<[1], [0], [0], [1], [0, 0, 1, 1], [], []>} : vector<8x512xbf16>, vector<512x256xbf16>, vector<8x256xf32> -> vector<8x256xf32>
    %87 = arith.addf %79, %86 : vector<8x256xf32>
    %c2_94 = arith.constant 2 : index
    %c0_95 = arith.constant 0 : index
    %c0_96 = arith.constant 0 : index
    %88 = vector.load %arg5[%c2_94, %c0_95, %c0_96] : memref<4x8x16xbf16, #tpu.memory_space<vmem>>, vector<1x8x16xbf16>
    %89 = vector.shape_cast %88 : vector<1x8x16xbf16> to vector<8x16xbf16>
    %cst_97 = arith.constant dense<0.000000e+00> : vector<8x512xf32>
    %90 = tpu.matmul %89, %72, %cst_97 {dimension_numbers = #tpu.dot_dimension_numbers<[1], [0], [0], [1], [0, 0, 1, 1], [], []>} : vector<8x16xbf16>, vector<16x512xbf16>, vector<8x512xf32> -> vector<8x512xf32>
    %91 = arith.truncf %90 : vector<8x512xf32> to vector<8x512xbf16>
    %c2_98 = arith.constant 2 : index
    %c0_99 = arith.constant 0 : index
    %c0_100 = arith.constant 0 : index
    %92 = vector.load %arg6[%c2_98, %c0_99, %c0_100] : memref<4x512x256xbf16, #tpu.memory_space<vmem>>, vector<1x512x256xbf16>
    %93 = vector.shape_cast %92 : vector<1x512x256xbf16> to vector<512x256xbf16>
    %cst_101 = arith.constant dense<0.000000e+00> : vector<8x256xf32>
    %94 = tpu.matmul %91, %93, %cst_101 {dimension_numbers = #tpu.dot_dimension_numbers<[1], [0], [0], [1], [0, 0, 1, 1], [], []>} : vector<8x512xbf16>, vector<512x256xbf16>, vector<8x256xf32> -> vector<8x256xf32>
    %95 = arith.addf %87, %94 : vector<8x256xf32>
    %c3_102 = arith.constant 3 : index
    %c0_103 = arith.constant 0 : index
    %c0_104 = arith.constant 0 : index
    %96 = vector.load %arg5[%c3_102, %c0_103, %c0_104] : memref<4x8x16xbf16, #tpu.memory_space<vmem>>, vector<1x8x16xbf16>
    %97 = vector.shape_cast %96 : vector<1x8x16xbf16> to vector<8x16xbf16>
    %cst_105 = arith.constant dense<0.000000e+00> : vector<8x512xf32>
    %98 = tpu.matmul %97, %72, %cst_105 {dimension_numbers = #tpu.dot_dimension_numbers<[1], [0], [0], [1], [0, 0, 1, 1], [], []>} : vector<8x16xbf16>, vector<16x512xbf16>, vector<8x512xf32> -> vector<8x512xf32>
    %99 = arith.truncf %98 : vector<8x512xf32> to vector<8x512xbf16>
    %c3_106 = arith.constant 3 : index
    %c0_107 = arith.constant 0 : index
    %c0_108 = arith.constant 0 : index
    %100 = vector.load %arg6[%c3_106, %c0_107, %c0_108] : memref<4x512x256xbf16, #tpu.memory_space<vmem>>, vector<1x512x256xbf16>
    %101 = vector.shape_cast %100 : vector<1x512x256xbf16> to vector<512x256xbf16>
    %cst_109 = arith.constant dense<0.000000e+00> : vector<8x256xf32>
    %102 = tpu.matmul %99, %101, %cst_109 {dimension_numbers = #tpu.dot_dimension_numbers<[1], [0], [0], [1], [0, 0, 1, 1], [], []>} : vector<8x512xbf16>, vector<512x256xbf16>, vector<8x256xf32> -> vector<8x256xf32>
    %103 = arith.addf %95, %102 : vector<8x256xf32>
    %c0_110 = arith.constant 0 : index
    %c0_111 = arith.constant 0 : index
    %104 = vector.load %arg21[%c0_110, %c0_111] : memref<1x256xf32, #tpu.memory_space<vmem>>, vector<1x256xf32>
    %105 = vector.broadcast %104 : vector<1x256xf32> to vector<8x256xf32>
    %106 = arith.addf %103, %105 : vector<8x256xf32>
    %cst_112 = arith.constant 0.000000e+00 : f32
    %107 = vector.broadcast %cst_112 : f32 to vector<8x256xf32>
    %108 = arith.maximumf %106, %107 : vector<8x256xf32>
    %109 = arith.truncf %108 : vector<8x256xf32> to vector<8x256xbf16>
    %c0_113 = arith.constant 0 : index
    %c0_114 = arith.constant 0 : index
    %c0_115 = arith.constant 0 : index
    %110 = vector.load %arg7[%c0_113, %c0_114, %c0_115] : memref<4x8x8xbf16, #tpu.memory_space<vmem>>, vector<1x8x8xbf16>
    %111 = vector.shape_cast %110 : vector<1x8x8xbf16> to vector<8x8xbf16>
    %cst_116 = arith.constant dense<0.000000e+00> : vector<8x256xf32>
    %112 = tpu.matmul %111, %109, %cst_116 {dimension_numbers = #tpu.dot_dimension_numbers<[1], [0], [0], [1], [0, 0, 1, 1], [], []>} : vector<8x8xbf16>, vector<8x256xbf16>, vector<8x256xf32> -> vector<8x256xf32>
    %113 = arith.truncf %112 : vector<8x256xf32> to vector<8x256xbf16>
    %c0_117 = arith.constant 0 : index
    %c0_118 = arith.constant 0 : index
    %c0_119 = arith.constant 0 : index
    %114 = vector.load %arg8[%c0_117, %c0_118, %c0_119] : memref<4x256x256xbf16, #tpu.memory_space<vmem>>, vector<1x256x256xbf16>
    %115 = vector.shape_cast %114 : vector<1x256x256xbf16> to vector<256x256xbf16>
    %cst_120 = arith.constant dense<0.000000e+00> : vector<8x256xf32>
    %116 = tpu.matmul %113, %115, %cst_120 {dimension_numbers = #tpu.dot_dimension_numbers<[1], [0], [0], [1], [0, 0, 1, 1], [], []>} : vector<8x256xbf16>, vector<256x256xbf16>, vector<8x256xf32> -> vector<8x256xf32>
    %c1_121 = arith.constant 1 : index
    %c0_122 = arith.constant 0 : index
    %c0_123 = arith.constant 0 : index
    %117 = vector.load %arg7[%c1_121, %c0_122, %c0_123] : memref<4x8x8xbf16, #tpu.memory_space<vmem>>, vector<1x8x8xbf16>
    %118 = vector.shape_cast %117 : vector<1x8x8xbf16> to vector<8x8xbf16>
    %cst_124 = arith.constant dense<0.000000e+00> : vector<8x256xf32>
    %119 = tpu.matmul %118, %109, %cst_124 {dimension_numbers = #tpu.dot_dimension_numbers<[1], [0], [0], [1], [0, 0, 1, 1], [], []>} : vector<8x8xbf16>, vector<8x256xbf16>, vector<8x256xf32> -> vector<8x256xf32>
    %120 = arith.truncf %119 : vector<8x256xf32> to vector<8x256xbf16>
    %c1_125 = arith.constant 1 : index
    %c0_126 = arith.constant 0 : index
    %c0_127 = arith.constant 0 : index
    %121 = vector.load %arg8[%c1_125, %c0_126, %c0_127] : memref<4x256x256xbf16, #tpu.memory_space<vmem>>, vector<1x256x256xbf16>
    %122 = vector.shape_cast %121 : vector<1x256x256xbf16> to vector<256x256xbf16>
    %cst_128 = arith.constant dense<0.000000e+00> : vector<8x256xf32>
    %123 = tpu.matmul %120, %122, %cst_128 {dimension_numbers = #tpu.dot_dimension_numbers<[1], [0], [0], [1], [0, 0, 1, 1], [], []>} : vector<8x256xbf16>, vector<256x256xbf16>, vector<8x256xf32> -> vector<8x256xf32>
    %124 = arith.addf %116, %123 : vector<8x256xf32>
    %c2_129 = arith.constant 2 : index
    %c0_130 = arith.constant 0 : index
    %c0_131 = arith.constant 0 : index
    %125 = vector.load %arg7[%c2_129, %c0_130, %c0_131] : memref<4x8x8xbf16, #tpu.memory_space<vmem>>, vector<1x8x8xbf16>
    %126 = vector.shape_cast %125 : vector<1x8x8xbf16> to vector<8x8xbf16>
    %cst_132 = arith.constant dense<0.000000e+00> : vector<8x256xf32>
    %127 = tpu.matmul %126, %109, %cst_132 {dimension_numbers = #tpu.dot_dimension_numbers<[1], [0], [0], [1], [0, 0, 1, 1], [], []>} : vector<8x8xbf16>, vector<8x256xbf16>, vector<8x256xf32> -> vector<8x256xf32>
    %128 = arith.truncf %127 : vector<8x256xf32> to vector<8x256xbf16>
    %c2_133 = arith.constant 2 : index
    %c0_134 = arith.constant 0 : index
    %c0_135 = arith.constant 0 : index
    %129 = vector.load %arg8[%c2_133, %c0_134, %c0_135] : memref<4x256x256xbf16, #tpu.memory_space<vmem>>, vector<1x256x256xbf16>
    %130 = vector.shape_cast %129 : vector<1x256x256xbf16> to vector<256x256xbf16>
    %cst_136 = arith.constant dense<0.000000e+00> : vector<8x256xf32>
    %131 = tpu.matmul %128, %130, %cst_136 {dimension_numbers = #tpu.dot_dimension_numbers<[1], [0], [0], [1], [0, 0, 1, 1], [], []>} : vector<8x256xbf16>, vector<256x256xbf16>, vector<8x256xf32> -> vector<8x256xf32>
    %132 = arith.addf %124, %131 : vector<8x256xf32>
    %c3_137 = arith.constant 3 : index
    %c0_138 = arith.constant 0 : index
    %c0_139 = arith.constant 0 : index
    %133 = vector.load %arg7[%c3_137, %c0_138, %c0_139] : memref<4x8x8xbf16, #tpu.memory_space<vmem>>, vector<1x8x8xbf16>
    %134 = vector.shape_cast %133 : vector<1x8x8xbf16> to vector<8x8xbf16>
    %cst_140 = arith.constant dense<0.000000e+00> : vector<8x256xf32>
    %135 = tpu.matmul %134, %109, %cst_140 {dimension_numbers = #tpu.dot_dimension_numbers<[1], [0], [0], [1], [0, 0, 1, 1], [], []>} : vector<8x8xbf16>, vector<8x256xbf16>, vector<8x256xf32> -> vector<8x256xf32>
    %136 = arith.truncf %135 : vector<8x256xf32> to vector<8x256xbf16>
    %c3_141 = arith.constant 3 : index
    %c0_142 = arith.constant 0 : index
    %c0_143 = arith.constant 0 : index
    %137 = vector.load %arg8[%c3_141, %c0_142, %c0_143] : memref<4x256x256xbf16, #tpu.memory_space<vmem>>, vector<1x256x256xbf16>
    %138 = vector.shape_cast %137 : vector<1x256x256xbf16> to vector<256x256xbf16>
    %cst_144 = arith.constant dense<0.000000e+00> : vector<8x256xf32>
    %139 = tpu.matmul %136, %138, %cst_144 {dimension_numbers = #tpu.dot_dimension_numbers<[1], [0], [0], [1], [0, 0, 1, 1], [], []>} : vector<8x256xbf16>, vector<256x256xbf16>, vector<8x256xf32> -> vector<8x256xf32>
    %140 = arith.addf %132, %139 : vector<8x256xf32>
    %c0_145 = arith.constant 0 : index
    %c0_146 = arith.constant 0 : index
    %141 = vector.load %arg22[%c0_145, %c0_146] : memref<1x256xf32, #tpu.memory_space<vmem>>, vector<1x256xf32>
    %142 = vector.broadcast %141 : vector<1x256xf32> to vector<8x256xf32>
    %143 = arith.addf %140, %142 : vector<8x256xf32>
    %cst_147 = arith.constant 0.000000e+00 : f32
    %144 = vector.broadcast %cst_147 : f32 to vector<8x256xf32>
    %145 = arith.maximumf %143, %144 : vector<8x256xf32>
    %146 = arith.truncf %145 : vector<8x256xf32> to vector<8x256xbf16>
    %c0_148 = arith.constant 0 : index
    %c0_149 = arith.constant 0 : index
    %c0_150 = arith.constant 0 : index
    %147 = vector.load %arg9[%c0_148, %c0_149, %c0_150] : memref<4x2x8xbf16, #tpu.memory_space<vmem>>, vector<1x2x8xbf16>
    %148 = vector.shape_cast %147 : vector<1x2x8xbf16> to vector<2x8xbf16>
    %cst_151 = arith.constant dense<0.000000e+00> : vector<2x256xf32>
    %149 = tpu.matmul %148, %146, %cst_151 {dimension_numbers = #tpu.dot_dimension_numbers<[1], [0], [0], [1], [0, 0, 1, 1], [], []>} : vector<2x8xbf16>, vector<8x256xbf16>, vector<2x256xf32> -> vector<2x256xf32>
    %150 = arith.truncf %149 : vector<2x256xf32> to vector<2x256xbf16>
    %c0_152 = arith.constant 0 : index
    %c0_153 = arith.constant 0 : index
    %c0_154 = arith.constant 0 : index
    %151 = vector.load %arg10[%c0_152, %c0_153, %c0_154] : memref<4x256x16xbf16, #tpu.memory_space<vmem>>, vector<1x256x16xbf16>
    %152 = vector.shape_cast %151 : vector<1x256x16xbf16> to vector<256x16xbf16>
    %cst_155 = arith.constant dense<0.000000e+00> : vector<2x16xf32>
    %153 = tpu.matmul %150, %152, %cst_155 {dimension_numbers = #tpu.dot_dimension_numbers<[1], [0], [0], [1], [0, 0, 1, 1], [], []>} : vector<2x256xbf16>, vector<256x16xbf16>, vector<2x16xf32> -> vector<2x16xf32>
    %c1_156 = arith.constant 1 : index
    %c0_157 = arith.constant 0 : index
    %c0_158 = arith.constant 0 : index
    %154 = vector.load %arg9[%c1_156, %c0_157, %c0_158] : memref<4x2x8xbf16, #tpu.memory_space<vmem>>, vector<1x2x8xbf16>
    %155 = vector.shape_cast %154 : vector<1x2x8xbf16> to vector<2x8xbf16>
    %cst_159 = arith.constant dense<0.000000e+00> : vector<2x256xf32>
    %156 = tpu.matmul %155, %146, %cst_159 {dimension_numbers = #tpu.dot_dimension_numbers<[1], [0], [0], [1], [0, 0, 1, 1], [], []>} : vector<2x8xbf16>, vector<8x256xbf16>, vector<2x256xf32> -> vector<2x256xf32>
    %157 = arith.truncf %156 : vector<2x256xf32> to vector<2x256xbf16>
    %c1_160 = arith.constant 1 : index
    %c0_161 = arith.constant 0 : index
    %c0_162 = arith.constant 0 : index
    %158 = vector.load %arg10[%c1_160, %c0_161, %c0_162] : memref<4x256x16xbf16, #tpu.memory_space<vmem>>, vector<1x256x16xbf16>
    %159 = vector.shape_cast %158 : vector<1x256x16xbf16> to vector<256x16xbf16>
    %cst_163 = arith.constant dense<0.000000e+00> : vector<2x16xf32>
    %160 = tpu.matmul %157, %159, %cst_163 {dimension_numbers = #tpu.dot_dimension_numbers<[1], [0], [0], [1], [0, 0, 1, 1], [], []>} : vector<2x256xbf16>, vector<256x16xbf16>, vector<2x16xf32> -> vector<2x16xf32>
    %161 = arith.addf %153, %160 : vector<2x16xf32>
    %c2_164 = arith.constant 2 : index
    %c0_165 = arith.constant 0 : index
    %c0_166 = arith.constant 0 : index
    %162 = vector.load %arg9[%c2_164, %c0_165, %c0_166] : memref<4x2x8xbf16, #tpu.memory_space<vmem>>, vector<1x2x8xbf16>
    %163 = vector.shape_cast %162 : vector<1x2x8xbf16> to vector<2x8xbf16>
    %cst_167 = arith.constant dense<0.000000e+00> : vector<2x256xf32>
    %164 = tpu.matmul %163, %146, %cst_167 {dimension_numbers = #tpu.dot_dimension_numbers<[1], [0], [0], [1], [0, 0, 1, 1], [], []>} : vector<2x8xbf16>, vector<8x256xbf16>, vector<2x256xf32> -> vector<2x256xf32>
    %165 = arith.truncf %164 : vector<2x256xf32> to vector<2x256xbf16>
    %c2_168 = arith.constant 2 : index
    %c0_169 = arith.constant 0 : index
    %c0_170 = arith.constant 0 : index
    %166 = vector.load %arg10[%c2_168, %c0_169, %c0_170] : memref<4x256x16xbf16, #tpu.memory_space<vmem>>, vector<1x256x16xbf16>
    %167 = vector.shape_cast %166 : vector<1x256x16xbf16> to vector<256x16xbf16>
    %cst_171 = arith.constant dense<0.000000e+00> : vector<2x16xf32>
    %168 = tpu.matmul %165, %167, %cst_171 {dimension_numbers = #tpu.dot_dimension_numbers<[1], [0], [0], [1], [0, 0, 1, 1], [], []>} : vector<2x256xbf16>, vector<256x16xbf16>, vector<2x16xf32> -> vector<2x16xf32>
    %169 = arith.addf %161, %168 : vector<2x16xf32>
    %c3_172 = arith.constant 3 : index
    %c0_173 = arith.constant 0 : index
    %c0_174 = arith.constant 0 : index
    %170 = vector.load %arg9[%c3_172, %c0_173, %c0_174] : memref<4x2x8xbf16, #tpu.memory_space<vmem>>, vector<1x2x8xbf16>
    %171 = vector.shape_cast %170 : vector<1x2x8xbf16> to vector<2x8xbf16>
    %cst_175 = arith.constant dense<0.000000e+00> : vector<2x256xf32>
    %172 = tpu.matmul %171, %146, %cst_175 {dimension_numbers = #tpu.dot_dimension_numbers<[1], [0], [0], [1], [0, 0, 1, 1], [], []>} : vector<2x8xbf16>, vector<8x256xbf16>, vector<2x256xf32> -> vector<2x256xf32>
    %173 = arith.truncf %172 : vector<2x256xf32> to vector<2x256xbf16>
    %c3_176 = arith.constant 3 : index
    %c0_177 = arith.constant 0 : index
    %c0_178 = arith.constant 0 : index
    %174 = vector.load %arg10[%c3_176, %c0_177, %c0_178] : memref<4x256x16xbf16, #tpu.memory_space<vmem>>, vector<1x256x16xbf16>
    %175 = vector.shape_cast %174 : vector<1x256x16xbf16> to vector<256x16xbf16>
    %cst_179 = arith.constant dense<0.000000e+00> : vector<2x16xf32>
    %176 = tpu.matmul %173, %175, %cst_179 {dimension_numbers = #tpu.dot_dimension_numbers<[1], [0], [0], [1], [0, 0, 1, 1], [], []>} : vector<2x256xbf16>, vector<256x16xbf16>, vector<2x16xf32> -> vector<2x16xf32>
    %177 = arith.addf %169, %176 : vector<2x16xf32>
    %c0_180 = arith.constant 0 : index
    %c0_181 = arith.constant 0 : index
    %178 = vector.load %arg23[%c0_180, %c0_181] : memref<1x16xf32, #tpu.memory_space<vmem>>, vector<1x16xf32>
    %179 = vector.broadcast %178 : vector<1x16xf32> to vector<2x16xf32>
    %180 = arith.addf %177, %179 : vector<2x16xf32>
    %181 = vector.extract_strided_slice %180 {offsets = [0, 0], sizes = [2, 8], strides = [1, 1]} : vector<2x16xf32> to vector<2x8xf32>
    %182 = vector.extract_strided_slice %180 {offsets = [0, 8], sizes = [2, 8], strides = [1, 1]} : vector<2x16xf32> to vector<2x8xf32>
    %c0_182 = arith.constant 0 : index
    %c0_183 = arith.constant 0 : index
    %183 = vector.load %arg28[%c0_182, %c0_183] : memref<2x8xf32, #tpu.memory_space<vmem>>, vector<2x8xf32>
    tpu.vector_store %arg28[%c0_182, %c0_183], %181 {strides = array<i32>} : memref<2x8xf32, #tpu.memory_space<vmem>>, vector<2x8xf32>,
    %c0_184 = arith.constant 0 : index
    %c0_185 = arith.constant 0 : index
    %184 = vector.load %arg29[%c0_184, %c0_185] : memref<2x8xf32, #tpu.memory_space<vmem>>, vector<2x8xf32>
    tpu.vector_store %arg29[%c0_184, %c0_185], %182 {strides = array<i32>} : memref<2x8xf32, #tpu.memory_space<vmem>>, vector<2x8xf32>,
    %c0_186 = arith.constant 0 : index
    %c0_187 = arith.constant 0 : index
    %185 = vector.load %arg1[%c0_186, %c0_187] : memref<2x8xf32, #tpu.memory_space<vmem>>, vector<2x8xf32>
    %cst_188 = arith.constant 5.000000e-01 : f32
    %186 = vector.broadcast %cst_188 : f32 to vector<2x8xf32>
    %187 = arith.mulf %186, %182 : vector<2x8xf32>
    %188 = math.exp %187 : vector<2x8xf32>
    %189 = arith.mulf %185, %188 : vector<2x8xf32>
    %190 = arith.addf %189, %181 : vector<2x8xf32>
    %191 = arith.truncf %190 : vector<2x8xf32> to vector<2x8xbf16>
    %c0_189 = arith.constant 0 : index
    %c0_190 = arith.constant 0 : index
    %c0_191 = arith.constant 0 : index
    %192 = vector.load %arg11[%c0_189, %c0_190, %c0_191] : memref<4x8x2xbf16, #tpu.memory_space<vmem>>, vector<1x8x2xbf16>
    %193 = vector.shape_cast %192 : vector<1x8x2xbf16> to vector<8x2xbf16>
    %cst_192 = arith.constant dense<0.000000e+00> : vector<8x8xf32>
    %194 = tpu.matmul %193, %191, %cst_192 {dimension_numbers = #tpu.dot_dimension_numbers<[1], [0], [0], [1], [0, 0, 1, 1], [], []>} : vector<8x2xbf16>, vector<2x8xbf16>, vector<8x8xf32> -> vector<8x8xf32>
    %195 = arith.truncf %194 : vector<8x8xf32> to vector<8x8xbf16>
    %c0_193 = arith.constant 0 : index
    %c0_194 = arith.constant 0 : index
    %c0_195 = arith.constant 0 : index
    %196 = vector.load %arg12[%c0_193, %c0_194, %c0_195] : memref<4x8x256xbf16, #tpu.memory_space<vmem>>, vector<1x8x256xbf16>
    %197 = vector.shape_cast %196 : vector<1x8x256xbf16> to vector<8x256xbf16>
    %cst_196 = arith.constant dense<0.000000e+00> : vector<8x256xf32>
    %198 = tpu.matmul %195, %197, %cst_196 {dimension_numbers = #tpu.dot_dimension_numbers<[1], [0], [0], [1], [0, 0, 1, 1], [], []>} : vector<8x8xbf16>, vector<8x256xbf16>, vector<8x256xf32> -> vector<8x256xf32>
    %c1_197 = arith.constant 1 : index
    %c0_198 = arith.constant 0 : index
    %c0_199 = arith.constant 0 : index
    %199 = vector.load %arg11[%c1_197, %c0_198, %c0_199] : memref<4x8x2xbf16, #tpu.memory_space<vmem>>, vector<1x8x2xbf16>
    %200 = vector.shape_cast %199 : vector<1x8x2xbf16> to vector<8x2xbf16>
    %cst_200 = arith.constant dense<0.000000e+00> : vector<8x8xf32>
    %201 = tpu.matmul %200, %191, %cst_200 {dimension_numbers = #tpu.dot_dimension_numbers<[1], [0], [0], [1], [0, 0, 1, 1], [], []>} : vector<8x2xbf16>, vector<2x8xbf16>, vector<8x8xf32> -> vector<8x8xf32>
    %202 = arith.truncf %201 : vector<8x8xf32> to vector<8x8xbf16>
    %c1_201 = arith.constant 1 : index
    %c0_202 = arith.constant 0 : index
    %c0_203 = arith.constant 0 : index
    %203 = vector.load %arg12[%c1_201, %c0_202, %c0_203] : memref<4x8x256xbf16, #tpu.memory_space<vmem>>, vector<1x8x256xbf16>
    %204 = vector.shape_cast %203 : vector<1x8x256xbf16> to vector<8x256xbf16>
    %cst_204 = arith.constant dense<0.000000e+00> : vector<8x256xf32>
    %205 = tpu.matmul %202, %204, %cst_204 {dimension_numbers = #tpu.dot_dimension_numbers<[1], [0], [0], [1], [0, 0, 1, 1], [], []>} : vector<8x8xbf16>, vector<8x256xbf16>, vector<8x256xf32> -> vector<8x256xf32>
    %206 = arith.addf %198, %205 : vector<8x256xf32>
    %c2_205 = arith.constant 2 : index
    %c0_206 = arith.constant 0 : index
    %c0_207 = arith.constant 0 : index
    %207 = vector.load %arg11[%c2_205, %c0_206, %c0_207] : memref<4x8x2xbf16, #tpu.memory_space<vmem>>, vector<1x8x2xbf16>
    %208 = vector.shape_cast %207 : vector<1x8x2xbf16> to vector<8x2xbf16>
    %cst_208 = arith.constant dense<0.000000e+00> : vector<8x8xf32>
    %209 = tpu.matmul %208, %191, %cst_208 {dimension_numbers = #tpu.dot_dimension_numbers<[1], [0], [0], [1], [0, 0, 1, 1], [], []>} : vector<8x2xbf16>, vector<2x8xbf16>, vector<8x8xf32> -> vector<8x8xf32>
    %210 = arith.truncf %209 : vector<8x8xf32> to vector<8x8xbf16>
    %c2_209 = arith.constant 2 : index
    %c0_210 = arith.constant 0 : index
    %c0_211 = arith.constant 0 : index
    %211 = vector.load %arg12[%c2_209, %c0_210, %c0_211] : memref<4x8x256xbf16, #tpu.memory_space<vmem>>, vector<1x8x256xbf16>
    %212 = vector.shape_cast %211 : vector<1x8x256xbf16> to vector<8x256xbf16>
    %cst_212 = arith.constant dense<0.000000e+00> : vector<8x256xf32>
    %213 = tpu.matmul %210, %212, %cst_212 {dimension_numbers = #tpu.dot_dimension_numbers<[1], [0], [0], [1], [0, 0, 1, 1], [], []>} : vector<8x8xbf16>, vector<8x256xbf16>, vector<8x256xf32> -> vector<8x256xf32>
    %214 = arith.addf %206, %213 : vector<8x256xf32>
    %c3_213 = arith.constant 3 : index
    %c0_214 = arith.constant 0 : index
    %c0_215 = arith.constant 0 : index
    %215 = vector.load %arg11[%c3_213, %c0_214, %c0_215] : memref<4x8x2xbf16, #tpu.memory_space<vmem>>, vector<1x8x2xbf16>
    %216 = vector.shape_cast %215 : vector<1x8x2xbf16> to vector<8x2xbf16>
    %cst_216 = arith.constant dense<0.000000e+00> : vector<8x8xf32>
    %217 = tpu.matmul %216, %191, %cst_216 {dimension_numbers = #tpu.dot_dimension_numbers<[1], [0], [0], [1], [0, 0, 1, 1], [], []>} : vector<8x2xbf16>, vector<2x8xbf16>, vector<8x8xf32> -> vector<8x8xf32>
    %218 = arith.truncf %217 : vector<8x8xf32> to vector<8x8xbf16>
    %c3_217 = arith.constant 3 : index
    %c0_218 = arith.constant 0 : index
    %c0_219 = arith.constant 0 : index
    %219 = vector.load %arg12[%c3_217, %c0_218, %c0_219] : memref<4x8x256xbf16, #tpu.memory_space<vmem>>, vector<1x8x256xbf16>
    %220 = vector.shape_cast %219 : vector<1x8x256xbf16> to vector<8x256xbf16>
    %cst_220 = arith.constant dense<0.000000e+00> : vector<8x256xf32>
    %221 = tpu.matmul %218, %220, %cst_220 {dimension_numbers = #tpu.dot_dimension_numbers<[1], [0], [0], [1], [0, 0, 1, 1], [], []>} : vector<8x8xbf16>, vector<8x256xbf16>, vector<8x256xf32> -> vector<8x256xf32>
    %222 = arith.addf %214, %221 : vector<8x256xf32>
    %c0_221 = arith.constant 0 : index
    %c0_222 = arith.constant 0 : index
    %223 = vector.load %arg24[%c0_221, %c0_222] : memref<8x256xf32, #tpu.memory_space<vmem>>, vector<8x256xf32>
    %224 = arith.addf %222, %223 : vector<8x256xf32>
    %cst_223 = arith.constant 0.000000e+00 : f32
    %225 = vector.broadcast %cst_223 : f32 to vector<8x256xf32>
    %226 = arith.maximumf %224, %225 : vector<8x256xf32>
    %227 = arith.truncf %226 : vector<8x256xf32> to vector<8x256xbf16>
    %c0_224 = arith.constant 0 : index
    %c0_225 = arith.constant 0 : index
    %c0_226 = arith.constant 0 : index
    %228 = vector.load %arg13[%c0_224, %c0_225, %c0_226] : memref<4x10x8xbf16, #tpu.memory_space<vmem>>, vector<1x10x8xbf16>
    %229 = vector.shape_cast %228 : vector<1x10x8xbf16> to vector<10x8xbf16>
    %cst_227 = arith.constant dense<0.000000e+00> : vector<10x256xf32>
    %230 = tpu.matmul %229, %227, %cst_227 {dimension_numbers = #tpu.dot_dimension_numbers<[1], [0], [0], [1], [0, 0, 1, 1], [], []>} : vector<10x8xbf16>, vector<8x256xbf16>, vector<10x256xf32> -> vector<10x256xf32>
    %231 = arith.truncf %230 : vector<10x256xf32> to vector<10x256xbf16>
    %c0_228 = arith.constant 0 : index
    %c0_229 = arith.constant 0 : index
    %c0_230 = arith.constant 0 : index
    %232 = vector.load %arg14[%c0_228, %c0_229, %c0_230] : memref<4x256x320xbf16, #tpu.memory_space<vmem>>, vector<1x256x320xbf16>
    %233 = vector.shape_cast %232 : vector<1x256x320xbf16> to vector<256x320xbf16>
    %cst_231 = arith.constant dense<0.000000e+00> : vector<10x320xf32>
    %234 = tpu.matmul %231, %233, %cst_231 {dimension_numbers = #tpu.dot_dimension_numbers<[1], [0], [0], [1], [0, 0, 1, 1], [], []>} : vector<10x256xbf16>, vector<256x320xbf16>, vector<10x320xf32> -> vector<10x320xf32>
    %c1_232 = arith.constant 1 : index
    %c0_233 = arith.constant 0 : index
    %c0_234 = arith.constant 0 : index
    %235 = vector.load %arg13[%c1_232, %c0_233, %c0_234] : memref<4x10x8xbf16, #tpu.memory_space<vmem>>, vector<1x10x8xbf16>
    %236 = vector.shape_cast %235 : vector<1x10x8xbf16> to vector<10x8xbf16>
    %cst_235 = arith.constant dense<0.000000e+00> : vector<10x256xf32>
    %237 = tpu.matmul %236, %227, %cst_235 {dimension_numbers = #tpu.dot_dimension_numbers<[1], [0], [0], [1], [0, 0, 1, 1], [], []>} : vector<10x8xbf16>, vector<8x256xbf16>, vector<10x256xf32> -> vector<10x256xf32>
    %238 = arith.truncf %237 : vector<10x256xf32> to vector<10x256xbf16>
    %c1_236 = arith.constant 1 : index
    %c0_237 = arith.constant 0 : index
    %c0_238 = arith.constant 0 : index
    %239 = vector.load %arg14[%c1_236, %c0_237, %c0_238] : memref<4x256x320xbf16, #tpu.memory_space<vmem>>, vector<1x256x320xbf16>
    %240 = vector.shape_cast %239 : vector<1x256x320xbf16> to vector<256x320xbf16>
    %cst_239 = arith.constant dense<0.000000e+00> : vector<10x320xf32>
    %241 = tpu.matmul %238, %240, %cst_239 {dimension_numbers = #tpu.dot_dimension_numbers<[1], [0], [0], [1], [0, 0, 1, 1], [], []>} : vector<10x256xbf16>, vector<256x320xbf16>, vector<10x320xf32> -> vector<10x320xf32>
    %242 = arith.addf %234, %241 : vector<10x320xf32>
    %c2_240 = arith.constant 2 : index
    %c0_241 = arith.constant 0 : index
    %c0_242 = arith.constant 0 : index
    %243 = vector.load %arg13[%c2_240, %c0_241, %c0_242] : memref<4x10x8xbf16, #tpu.memory_space<vmem>>, vector<1x10x8xbf16>
    %244 = vector.shape_cast %243 : vector<1x10x8xbf16> to vector<10x8xbf16>
    %cst_243 = arith.constant dense<0.000000e+00> : vector<10x256xf32>
    %245 = tpu.matmul %244, %227, %cst_243 {dimension_numbers = #tpu.dot_dimension_numbers<[1], [0], [0], [1], [0, 0, 1, 1], [], []>} : vector<10x8xbf16>, vector<8x256xbf16>, vector<10x256xf32> -> vector<10x256xf32>
    %246 = arith.truncf %245 : vector<10x256xf32> to vector<10x256xbf16>
    %c2_244 = arith.constant 2 : index
    %c0_245 = arith.constant 0 : index
    %c0_246 = arith.constant 0 : index
    %247 = vector.load %arg14[%c2_244, %c0_245, %c0_246] : memref<4x256x320xbf16, #tpu.memory_space<vmem>>, vector<1x256x320xbf16>
    %248 = vector.shape_cast %247 : vector<1x256x320xbf16> to vector<256x320xbf16>
    %cst_247 = arith.constant dense<0.000000e+00> : vector<10x320xf32>
    %249 = tpu.matmul %246, %248, %cst_247 {dimension_numbers = #tpu.dot_dimension_numbers<[1], [0], [0], [1], [0, 0, 1, 1], [], []>} : vector<10x256xbf16>, vector<256x320xbf16>, vector<10x320xf32> -> vector<10x320xf32>
    %250 = arith.addf %242, %249 : vector<10x320xf32>
    %c3_248 = arith.constant 3 : index
    %c0_249 = arith.constant 0 : index
    %c0_250 = arith.constant 0 : index
    %251 = vector.load %arg13[%c3_248, %c0_249, %c0_250] : memref<4x10x8xbf16, #tpu.memory_space<vmem>>, vector<1x10x8xbf16>
    %252 = vector.shape_cast %251 : vector<1x10x8xbf16> to vector<10x8xbf16>
    %cst_251 = arith.constant dense<0.000000e+00> : vector<10x256xf32>
    %253 = tpu.matmul %252, %227, %cst_251 {dimension_numbers = #tpu.dot_dimension_numbers<[1], [0], [0], [1], [0, 0, 1, 1], [], []>} : vector<10x8xbf16>, vector<8x256xbf16>, vector<10x256xf32> -> vector<10x256xf32>
    %254 = arith.truncf %253 : vector<10x256xf32> to vector<10x256xbf16>
    %c3_252 = arith.constant 3 : index
    %c0_253 = arith.constant 0 : index
    %c0_254 = arith.constant 0 : index
    %255 = vector.load %arg14[%c3_252, %c0_253, %c0_254] : memref<4x256x320xbf16, #tpu.memory_space<vmem>>, vector<1x256x320xbf16>
    %256 = vector.shape_cast %255 : vector<1x256x320xbf16> to vector<256x320xbf16>
    %cst_255 = arith.constant dense<0.000000e+00> : vector<10x320xf32>
    %257 = tpu.matmul %254, %256, %cst_255 {dimension_numbers = #tpu.dot_dimension_numbers<[1], [0], [0], [1], [0, 0, 1, 1], [], []>} : vector<10x256xbf16>, vector<256x320xbf16>, vector<10x320xf32> -> vector<10x320xf32>
    %258 = arith.addf %250, %257 : vector<10x320xf32>
    %c0_256 = arith.constant 0 : index
    %c0_257 = arith.constant 0 : index
    %259 = vector.load %arg25[%c0_256, %c0_257] : memref<1x320xf32, #tpu.memory_space<vmem>>, vector<1x320xf32>
    %260 = vector.broadcast %259 : vector<1x320xf32> to vector<10x320xf32>
    %261 = arith.addf %258, %260 : vector<10x320xf32>
    %cst_258 = arith.constant 0.000000e+00 : f32
    %262 = vector.broadcast %cst_258 : f32 to vector<10x320xf32>
    %263 = arith.maximumf %261, %262 : vector<10x320xf32>
    %264 = arith.truncf %263 : vector<10x320xf32> to vector<10x320xbf16>
    %c0_259 = arith.constant 0 : index
    %c0_260 = arith.constant 0 : index
    %c0_261 = arith.constant 0 : index
    %265 = vector.load %arg15[%c0_259, %c0_260, %c0_261] : memref<4x16x10xbf16, #tpu.memory_space<vmem>>, vector<1x16x10xbf16>
    %266 = vector.shape_cast %265 : vector<1x16x10xbf16> to vector<16x10xbf16>
    %cst_262 = arith.constant dense<0.000000e+00> : vector<16x320xf32>
    %267 = tpu.matmul %266, %264, %cst_262 {dimension_numbers = #tpu.dot_dimension_numbers<[1], [0], [0], [1], [0, 0, 1, 1], [], []>} : vector<16x10xbf16>, vector<10x320xbf16>, vector<16x320xf32> -> vector<16x320xf32>
    %268 = arith.truncf %267 : vector<16x320xf32> to vector<16x320xbf16>
    %c0_263 = arith.constant 0 : index
    %c0_264 = arith.constant 0 : index
    %c0_265 = arith.constant 0 : index
    %269 = vector.load %arg16[%c0_263, %c0_264, %c0_265] : memref<4x320x512xbf16, #tpu.memory_space<vmem>>, vector<1x320x512xbf16>
    %270 = vector.shape_cast %269 : vector<1x320x512xbf16> to vector<320x512xbf16>
    %cst_266 = arith.constant dense<0.000000e+00> : vector<16x512xf32>
    %271 = tpu.matmul %268, %270, %cst_266 {dimension_numbers = #tpu.dot_dimension_numbers<[1], [0], [0], [1], [0, 0, 1, 1], [], []>} : vector<16x320xbf16>, vector<320x512xbf16>, vector<16x512xf32> -> vector<16x512xf32>
    %c1_267 = arith.constant 1 : index
    %c0_268 = arith.constant 0 : index
    %c0_269 = arith.constant 0 : index
    %272 = vector.load %arg15[%c1_267, %c0_268, %c0_269] : memref<4x16x10xbf16, #tpu.memory_space<vmem>>, vector<1x16x10xbf16>
    %273 = vector.shape_cast %272 : vector<1x16x10xbf16> to vector<16x10xbf16>
    %cst_270 = arith.constant dense<0.000000e+00> : vector<16x320xf32>
    %274 = tpu.matmul %273, %264, %cst_270 {dimension_numbers = #tpu.dot_dimension_numbers<[1], [0], [0], [1], [0, 0, 1, 1], [], []>} : vector<16x10xbf16>, vector<10x320xbf16>, vector<16x320xf32> -> vector<16x320xf32>
    %275 = arith.truncf %274 : vector<16x320xf32> to vector<16x320xbf16>
    %c1_271 = arith.constant 1 : index
    %c0_272 = arith.constant 0 : index
    %c0_273 = arith.constant 0 : index
    %276 = vector.load %arg16[%c1_271, %c0_272, %c0_273] : memref<4x320x512xbf16, #tpu.memory_space<vmem>>, vector<1x320x512xbf16>
    %277 = vector.shape_cast %276 : vector<1x320x512xbf16> to vector<320x512xbf16>
    %cst_274 = arith.constant dense<0.000000e+00> : vector<16x512xf32>
    %278 = tpu.matmul %275, %277, %cst_274 {dimension_numbers = #tpu.dot_dimension_numbers<[1], [0], [0], [1], [0, 0, 1, 1], [], []>} : vector<16x320xbf16>, vector<320x512xbf16>, vector<16x512xf32> -> vector<16x512xf32>
    %279 = arith.addf %271, %278 : vector<16x512xf32>
    %c2_275 = arith.constant 2 : index
    %c0_276 = arith.constant 0 : index
    %c0_277 = arith.constant 0 : index
    %280 = vector.load %arg15[%c2_275, %c0_276, %c0_277] : memref<4x16x10xbf16, #tpu.memory_space<vmem>>, vector<1x16x10xbf16>
    %281 = vector.shape_cast %280 : vector<1x16x10xbf16> to vector<16x10xbf16>
    %cst_278 = arith.constant dense<0.000000e+00> : vector<16x320xf32>
    %282 = tpu.matmul %281, %264, %cst_278 {dimension_numbers = #tpu.dot_dimension_numbers<[1], [0], [0], [1], [0, 0, 1, 1], [], []>} : vector<16x10xbf16>, vector<10x320xbf16>, vector<16x320xf32> -> vector<16x320xf32>
    %283 = arith.truncf %282 : vector<16x320xf32> to vector<16x320xbf16>
    %c2_279 = arith.constant 2 : index
    %c0_280 = arith.constant 0 : index
    %c0_281 = arith.constant 0 : index
    %284 = vector.load %arg16[%c2_279, %c0_280, %c0_281] : memref<4x320x512xbf16, #tpu.memory_space<vmem>>, vector<1x320x512xbf16>
    %285 = vector.shape_cast %284 : vector<1x320x512xbf16> to vector<320x512xbf16>
    %cst_282 = arith.constant dense<0.000000e+00> : vector<16x512xf32>
    %286 = tpu.matmul %283, %285, %cst_282 {dimension_numbers = #tpu.dot_dimension_numbers<[1], [0], [0], [1], [0, 0, 1, 1], [], []>} : vector<16x320xbf16>, vector<320x512xbf16>, vector<16x512xf32> -> vector<16x512xf32>
    %287 = arith.addf %279, %286 : vector<16x512xf32>
    %c3_283 = arith.constant 3 : index
    %c0_284 = arith.constant 0 : index
    %c0_285 = arith.constant 0 : index
    %288 = vector.load %arg15[%c3_283, %c0_284, %c0_285] : memref<4x16x10xbf16, #tpu.memory_space<vmem>>, vector<1x16x10xbf16>
    %289 = vector.shape_cast %288 : vector<1x16x10xbf16> to vector<16x10xbf16>
    %cst_286 = arith.constant dense<0.000000e+00> : vector<16x320xf32>
    %290 = tpu.matmul %289, %264, %cst_286 {dimension_numbers = #tpu.dot_dimension_numbers<[1], [0], [0], [1], [0, 0, 1, 1], [], []>} : vector<16x10xbf16>, vector<10x320xbf16>, vector<16x320xf32> -> vector<16x320xf32>
    %291 = arith.truncf %290 : vector<16x320xf32> to vector<16x320xbf16>
    %c3_287 = arith.constant 3 : index
    %c0_288 = arith.constant 0 : index
    %c0_289 = arith.constant 0 : index
    %292 = vector.load %arg16[%c3_287, %c0_288, %c0_289] : memref<4x320x512xbf16, #tpu.memory_space<vmem>>, vector<1x320x512xbf16>
    %293 = vector.shape_cast %292 : vector<1x320x512xbf16> to vector<320x512xbf16>
    %cst_290 = arith.constant dense<0.000000e+00> : vector<16x512xf32>
    %294 = tpu.matmul %291, %293, %cst_290 {dimension_numbers = #tpu.dot_dimension_numbers<[1], [0], [0], [1], [0, 0, 1, 1], [], []>} : vector<16x320xbf16>, vector<320x512xbf16>, vector<16x512xf32> -> vector<16x512xf32>
    %295 = arith.addf %287, %294 : vector<16x512xf32>
    %c0_291 = arith.constant 0 : index
    %c0_292 = arith.constant 0 : index
    %296 = vector.load %arg26[%c0_291, %c0_292] : memref<1x512xf32, #tpu.memory_space<vmem>>, vector<1x512xf32>
    %297 = vector.broadcast %296 : vector<1x512xf32> to vector<16x512xf32>
    %298 = arith.addf %295, %297 : vector<16x512xf32>
    %cst_293 = arith.constant 0.000000e+00 : f32
    %299 = vector.broadcast %cst_293 : f32 to vector<16x512xf32>
    %300 = arith.maximumf %298, %299 : vector<16x512xf32>
    %301 = arith.truncf %300 : vector<16x512xf32> to vector<16x512xbf16>
    %c0_294 = arith.constant 0 : index
    %c0_295 = arith.constant 0 : index
    %c0_296 = arith.constant 0 : index
    %302 = vector.load %arg17[%c0_294, %c0_295, %c0_296] : memref<4x32x16xbf16, #tpu.memory_space<vmem>>, vector<1x32x16xbf16>
    %303 = vector.shape_cast %302 : vector<1x32x16xbf16> to vector<32x16xbf16>
    %cst_297 = arith.constant dense<0.000000e+00> : vector<32x512xf32>
    %304 = tpu.matmul %303, %301, %cst_297 {dimension_numbers = #tpu.dot_dimension_numbers<[1], [0], [0], [1], [0, 0, 1, 1], [], []>} : vector<32x16xbf16>, vector<16x512xbf16>, vector<32x512xf32> -> vector<32x512xf32>
    %305 = arith.truncf %304 : vector<32x512xf32> to vector<32x512xbf16>
    %c0_298 = arith.constant 0 : index
    %c0_299 = arith.constant 0 : index
    %c0_300 = arith.constant 0 : index
    %306 = vector.load %arg18[%c0_298, %c0_299, %c0_300] : memref<4x512x48xbf16, #tpu.memory_space<vmem>>, vector<1x512x48xbf16>
    %307 = vector.shape_cast %306 : vector<1x512x48xbf16> to vector<512x48xbf16>
    %cst_301 = arith.constant dense<0.000000e+00> : vector<32x48xf32>
    %308 = tpu.matmul %305, %307, %cst_301 {dimension_numbers = #tpu.dot_dimension_numbers<[1], [0], [0], [1], [0, 0, 1, 1], [], []>} : vector<32x512xbf16>, vector<512x48xbf16>, vector<32x48xf32> -> vector<32x48xf32>
    %c1_302 = arith.constant 1 : index
    %c0_303 = arith.constant 0 : index
    %c0_304 = arith.constant 0 : index
    %309 = vector.load %arg17[%c1_302, %c0_303, %c0_304] : memref<4x32x16xbf16, #tpu.memory_space<vmem>>, vector<1x32x16xbf16>
    %310 = vector.shape_cast %309 : vector<1x32x16xbf16> to vector<32x16xbf16>
    %cst_305 = arith.constant dense<0.000000e+00> : vector<32x512xf32>
    %311 = tpu.matmul %310, %301, %cst_305 {dimension_numbers = #tpu.dot_dimension_numbers<[1], [0], [0], [1], [0, 0, 1, 1], [], []>} : vector<32x16xbf16>, vector<16x512xbf16>, vector<32x512xf32> -> vector<32x512xf32>
    %312 = arith.truncf %311 : vector<32x512xf32> to vector<32x512xbf16>
    %c1_306 = arith.constant 1 : index
    %c0_307 = arith.constant 0 : index
    %c0_308 = arith.constant 0 : index
    %313 = vector.load %arg18[%c1_306, %c0_307, %c0_308] : memref<4x512x48xbf16, #tpu.memory_space<vmem>>, vector<1x512x48xbf16>
    %314 = vector.shape_cast %313 : vector<1x512x48xbf16> to vector<512x48xbf16>
    %cst_309 = arith.constant dense<0.000000e+00> : vector<32x48xf32>
    %315 = tpu.matmul %312, %314, %cst_309 {dimension_numbers = #tpu.dot_dimension_numbers<[1], [0], [0], [1], [0, 0, 1, 1], [], []>} : vector<32x512xbf16>, vector<512x48xbf16>, vector<32x48xf32> -> vector<32x48xf32>
    %316 = arith.addf %308, %315 : vector<32x48xf32>
    %c2_310 = arith.constant 2 : index
    %c0_311 = arith.constant 0 : index
    %c0_312 = arith.constant 0 : index
    %317 = vector.load %arg17[%c2_310, %c0_311, %c0_312] : memref<4x32x16xbf16, #tpu.memory_space<vmem>>, vector<1x32x16xbf16>
    %318 = vector.shape_cast %317 : vector<1x32x16xbf16> to vector<32x16xbf16>
    %cst_313 = arith.constant dense<0.000000e+00> : vector<32x512xf32>
    %319 = tpu.matmul %318, %301, %cst_313 {dimension_numbers = #tpu.dot_dimension_numbers<[1], [0], [0], [1], [0, 0, 1, 1], [], []>} : vector<32x16xbf16>, vector<16x512xbf16>, vector<32x512xf32> -> vector<32x512xf32>
    %320 = arith.truncf %319 : vector<32x512xf32> to vector<32x512xbf16>
    %c2_314 = arith.constant 2 : index
    %c0_315 = arith.constant 0 : index
    %c0_316 = arith.constant 0 : index
    %321 = vector.load %arg18[%c2_314, %c0_315, %c0_316] : memref<4x512x48xbf16, #tpu.memory_space<vmem>>, vector<1x512x48xbf16>
    %322 = vector.shape_cast %321 : vector<1x512x48xbf16> to vector<512x48xbf16>
    %cst_317 = arith.constant dense<0.000000e+00> : vector<32x48xf32>
    %323 = tpu.matmul %320, %322, %cst_317 {dimension_numbers = #tpu.dot_dimension_numbers<[1], [0], [0], [1], [0, 0, 1, 1], [], []>} : vector<32x512xbf16>, vector<512x48xbf16>, vector<32x48xf32> -> vector<32x48xf32>
    %324 = arith.addf %316, %323 : vector<32x48xf32>
    %c3_318 = arith.constant 3 : index
    %c0_319 = arith.constant 0 : index
    %c0_320 = arith.constant 0 : index
    %325 = vector.load %arg17[%c3_318, %c0_319, %c0_320] : memref<4x32x16xbf16, #tpu.memory_space<vmem>>, vector<1x32x16xbf16>
    %326 = vector.shape_cast %325 : vector<1x32x16xbf16> to vector<32x16xbf16>
    %cst_321 = arith.constant dense<0.000000e+00> : vector<32x512xf32>
    %327 = tpu.matmul %326, %301, %cst_321 {dimension_numbers = #tpu.dot_dimension_numbers<[1], [0], [0], [1], [0, 0, 1, 1], [], []>} : vector<32x16xbf16>, vector<16x512xbf16>, vector<32x512xf32> -> vector<32x512xf32>
    %328 = arith.truncf %327 : vector<32x512xf32> to vector<32x512xbf16>
    %c3_322 = arith.constant 3 : index
    %c0_323 = arith.constant 0 : index
    %c0_324 = arith.constant 0 : index
    %329 = vector.load %arg18[%c3_322, %c0_323, %c0_324] : memref<4x512x48xbf16, #tpu.memory_space<vmem>>, vector<1x512x48xbf16>
    %330 = vector.shape_cast %329 : vector<1x512x48xbf16> to vector<512x48xbf16>
    %cst_325 = arith.constant dense<0.000000e+00> : vector<32x48xf32>
    %331 = tpu.matmul %328, %330, %cst_325 {dimension_numbers = #tpu.dot_dimension_numbers<[1], [0], [0], [1], [0, 0, 1, 1], [], []>} : vector<32x512xbf16>, vector<512x48xbf16>, vector<32x48xf32> -> vector<32x48xf32>
    %332 = arith.addf %324, %331 : vector<32x48xf32>
    %c0_326 = arith.constant 0 : index
    %c0_327 = arith.constant 0 : index
    %333 = vector.load %arg27[%c0_326, %c0_327] : memref<1x48xf32, #tpu.memory_space<vmem>>, vector<1x48xf32>
    %334 = vector.broadcast %333 : vector<1x48xf32> to vector<32x48xf32>
    %335 = arith.addf %332, %334 : vector<32x48xf32>
    %cst_328 = arith.constant 0.000000e+00 : f32
    %336 = vector.broadcast %cst_328 : f32 to vector<32x48xf32>
    %337 = arith.subf %336, %335 : vector<32x48xf32>
    %338 = math.exp %337 : vector<32x48xf32>
    %cst_329 = arith.constant 1.000000e+00 : f32
    %339 = vector.broadcast %cst_329 : f32 to vector<32x48xf32>
    %340 = arith.addf %339, %338 : vector<32x48xf32>
    %cst_330 = arith.constant 1.000000e+00 : f32
    %341 = vector.broadcast %cst_330 : f32 to vector<32x48xf32>
    %342 = arith.divf %341, %340 : vector<32x48xf32>
    %343 = vector.extract_strided_slice %342 {offsets = [0, 0], sizes = [16, 48], strides = [1, 1]} : vector<32x48xf32> to vector<16x48xf32>
    %c0_331 = arith.constant 0 : index
    %c0_332 = arith.constant 0 : index
    %c0_333 = arith.constant 0 : index
    %344 = vector.load %arg19[%c0_331, %c0_332, %c0_333] : memref<3x48x16xf32, #tpu.memory_space<vmem>>, vector<1x48x16xf32>
    %345 = vector.shape_cast %344 : vector<1x48x16xf32> to vector<48x16xf32>
    %cst_334 = arith.constant dense<0.000000e+00> : vector<16x16xf32>
    %346 = tpu.matmul %343, %345, %cst_334 {dimension_numbers = #tpu.dot_dimension_numbers<[1], [0], [0], [1], [0, 0, 1, 1], [], []>} : vector<16x48xf32>, vector<48x16xf32>, vector<16x16xf32> -> vector<16x16xf32>
    %c0_335 = arith.constant 0 : index
    %c0_336 = arith.constant 0 : index
    %c0_337 = arith.constant 0 : index
    %c0_338 = arith.constant 0 : index
    %347 = vector.load %arg30[%c0_335, %c0_336, %c0_337, %c0_338] : memref<2x3x16x16xf32, #tpu.memory_space<vmem>>, vector<1x1x16x16xf32>
    %348 = vector.shape_cast %347 : vector<1x1x16x16xf32> to vector<16x16xf32>
    %349 = vector.shape_cast %346 : vector<16x16xf32> to vector<1x1x16x16xf32>
    tpu.vector_store %arg30[%c0_335, %c0_336, %c0_337, %c0_338], %349 {strides = array<i32>} : memref<2x3x16x16xf32, #tpu.memory_space<vmem>>, vector<1x1x16x16xf32>,
    %c1_339 = arith.constant 1 : index
    %c0_340 = arith.constant 0 : index
    %c0_341 = arith.constant 0 : index
    %350 = vector.load %arg19[%c1_339, %c0_340, %c0_341] : memref<3x48x16xf32, #tpu.memory_space<vmem>>, vector<1x48x16xf32>
    %351 = vector.shape_cast %350 : vector<1x48x16xf32> to vector<48x16xf32>
    %cst_342 = arith.constant dense<0.000000e+00> : vector<16x16xf32>
    %352 = tpu.matmul %343, %351, %cst_342 {dimension_numbers = #tpu.dot_dimension_numbers<[1], [0], [0], [1], [0, 0, 1, 1], [], []>} : vector<16x48xf32>, vector<48x16xf32>, vector<16x16xf32> -> vector<16x16xf32>
    %c0_343 = arith.constant 0 : index
    %c1_344 = arith.constant 1 : index
    %c0_345 = arith.constant 0 : index
    %c0_346 = arith.constant 0 : index
    %353 = vector.load %arg30[%c0_343, %c1_344, %c0_345, %c0_346] : memref<2x3x16x16xf32, #tpu.memory_space<vmem>>, vector<1x1x16x16xf32>
    %354 = vector.shape_cast %353 : vector<1x1x16x16xf32> to vector<16x16xf32>
    %355 = vector.shape_cast %352 : vector<16x16xf32> to vector<1x1x16x16xf32>
    tpu.vector_store %arg30[%c0_343, %c1_344, %c0_345, %c0_346], %355 {strides = array<i32>} : memref<2x3x16x16xf32, #tpu.memory_space<vmem>>, vector<1x1x16x16xf32>,
    %c2_347 = arith.constant 2 : index
    %c0_348 = arith.constant 0 : index
    %c0_349 = arith.constant 0 : index
    %356 = vector.load %arg19[%c2_347, %c0_348, %c0_349] : memref<3x48x16xf32, #tpu.memory_space<vmem>>, vector<1x48x16xf32>
    %357 = vector.shape_cast %356 : vector<1x48x16xf32> to vector<48x16xf32>
    %cst_350 = arith.constant dense<0.000000e+00> : vector<16x16xf32>
    %358 = tpu.matmul %343, %357, %cst_350 {dimension_numbers = #tpu.dot_dimension_numbers<[1], [0], [0], [1], [0, 0, 1, 1], [], []>} : vector<16x48xf32>, vector<48x16xf32>, vector<16x16xf32> -> vector<16x16xf32>
    %c0_351 = arith.constant 0 : index
    %c2_352 = arith.constant 2 : index
    %c0_353 = arith.constant 0 : index
    %c0_354 = arith.constant 0 : index
    %359 = vector.load %arg30[%c0_351, %c2_352, %c0_353, %c0_354] : memref<2x3x16x16xf32, #tpu.memory_space<vmem>>, vector<1x1x16x16xf32>
    %360 = vector.shape_cast %359 : vector<1x1x16x16xf32> to vector<16x16xf32>
    %361 = vector.shape_cast %358 : vector<16x16xf32> to vector<1x1x16x16xf32>
    tpu.vector_store %arg30[%c0_351, %c2_352, %c0_353, %c0_354], %361 {strides = array<i32>} : memref<2x3x16x16xf32, #tpu.memory_space<vmem>>, vector<1x1x16x16xf32>,
    %362 = vector.extract_strided_slice %342 {offsets = [16, 0], sizes = [16, 48], strides = [1, 1]} : vector<32x48xf32> to vector<16x48xf32>
    %c0_355 = arith.constant 0 : index
    %c0_356 = arith.constant 0 : index
    %c0_357 = arith.constant 0 : index
    %363 = vector.load %arg19[%c0_355, %c0_356, %c0_357] : memref<3x48x16xf32, #tpu.memory_space<vmem>>, vector<1x48x16xf32>
    %364 = vector.shape_cast %363 : vector<1x48x16xf32> to vector<48x16xf32>
    %cst_358 = arith.constant dense<0.000000e+00> : vector<16x16xf32>
    %365 = tpu.matmul %362, %364, %cst_358 {dimension_numbers = #tpu.dot_dimension_numbers<[1], [0], [0], [1], [0, 0, 1, 1], [], []>} : vector<16x48xf32>, vector<48x16xf32>, vector<16x16xf32> -> vector<16x16xf32>
    %c1_359 = arith.constant 1 : index
    %c0_360 = arith.constant 0 : index
    %c0_361 = arith.constant 0 : index
    %c0_362 = arith.constant 0 : index
    %366 = vector.load %arg30[%c1_359, %c0_360, %c0_361, %c0_362] : memref<2x3x16x16xf32, #tpu.memory_space<vmem>>, vector<1x1x16x16xf32>
    %367 = vector.shape_cast %366 : vector<1x1x16x16xf32> to vector<16x16xf32>
    %368 = vector.shape_cast %365 : vector<16x16xf32> to vector<1x1x16x16xf32>
    tpu.vector_store %arg30[%c1_359, %c0_360, %c0_361, %c0_362], %368 {strides = array<i32>} : memref<2x3x16x16xf32, #tpu.memory_space<vmem>>, vector<1x1x16x16xf32>,
    %c1_363 = arith.constant 1 : index
    %c0_364 = arith.constant 0 : index
    %c0_365 = arith.constant 0 : index
    %369 = vector.load %arg19[%c1_363, %c0_364, %c0_365] : memref<3x48x16xf32, #tpu.memory_space<vmem>>, vector<1x48x16xf32>
    %370 = vector.shape_cast %369 : vector<1x48x16xf32> to vector<48x16xf32>
    %cst_366 = arith.constant dense<0.000000e+00> : vector<16x16xf32>
    %371 = tpu.matmul %362, %370, %cst_366 {dimension_numbers = #tpu.dot_dimension_numbers<[1], [0], [0], [1], [0, 0, 1, 1], [], []>} : vector<16x48xf32>, vector<48x16xf32>, vector<16x16xf32> -> vector<16x16xf32>
    %c1_367 = arith.constant 1 : index
    %c1_368 = arith.constant 1 : index
    %c0_369 = arith.constant 0 : index
    %c0_370 = arith.constant 0 : index
    %372 = vector.load %arg30[%c1_367, %c1_368, %c0_369, %c0_370] : memref<2x3x16x16xf32, #tpu.memory_space<vmem>>, vector<1x1x16x16xf32>
    %373 = vector.shape_cast %372 : vector<1x1x16x16xf32> to vector<16x16xf32>
    %374 = vector.shape_cast %371 : vector<16x16xf32> to vector<1x1x16x16xf32>
    tpu.vector_store %arg30[%c1_367, %c1_368, %c0_369, %c0_370], %374 {strides = array<i32>} : memref<2x3x16x16xf32, #tpu.memory_space<vmem>>, vector<1x1x16x16xf32>,
    %c2_371 = arith.constant 2 : index
    %c0_372 = arith.constant 0 : index
    %c0_373 = arith.constant 0 : index
    %375 = vector.load %arg19[%c2_371, %c0_372, %c0_373] : memref<3x48x16xf32, #tpu.memory_space<vmem>>, vector<1x48x16xf32>
    %376 = vector.shape_cast %375 : vector<1x48x16xf32> to vector<48x16xf32>
    %cst_374 = arith.constant dense<0.000000e+00> : vector<16x16xf32>
    %377 = tpu.matmul %362, %376, %cst_374 {dimension_numbers = #tpu.dot_dimension_numbers<[1], [0], [0], [1], [0, 0, 1, 1], [], []>} : vector<16x48xf32>, vector<48x16xf32>, vector<16x16xf32> -> vector<16x16xf32>
    %c1_375 = arith.constant 1 : index
    %c2_376 = arith.constant 2 : index
    %c0_377 = arith.constant 0 : index
    %c0_378 = arith.constant 0 : index
    %378 = vector.load %arg30[%c1_375, %c2_376, %c0_377, %c0_378] : memref<2x3x16x16xf32, #tpu.memory_space<vmem>>, vector<1x1x16x16xf32>
    %379 = vector.shape_cast %378 : vector<1x1x16x16xf32> to vector<16x16xf32>
    %380 = vector.shape_cast %377 : vector<16x16xf32> to vector<1x1x16x16xf32>
    tpu.vector_store %arg30[%c1_375, %c2_376, %c0_377, %c0_378], %380 {strides = array<i32>} : memref<2x3x16x16xf32, #tpu.memory_space<vmem>>, vector<1x1x16x16xf32>,
    return
  }
}

</mosaic_0001>

<bundles_post_ra>
// kernel: basic_vae_forward.1
= control target key start
LH: loop header
LB: loop body
LE: loop exit
PB: predicated region body
PF: predicated region fallthrough
CT: control target
= control target key end

     0   :  { %s19110_s6 = smov 1   ;;  %s19111_s10 = smov 2   ;;  %s20986_s0 = inlined_call_operand.smem [shape: u32[31], index: -1, kind: input, shape index: {}] }
   0x1   :  { %s19165_s5 = sld [smem:[%s20986_s0]]   ;;  %s19112_s14 = smov 3  }
   0x2   :  { %s19170_s9 = sld [smem:[%s20986_s0 + %s19110_s6]]   ;;  %s19113_s18 = smov 4  }
   0x3   :  { %s19175_s13 = sld [smem:[%s20986_s0 + %s19111_s10]]   ;;  %s19114_s22 = smov 5  }
   0x4   :  { %s19180_s17 = sld [smem:[%s20986_s0 + %s19112_s14]]   ;;  %s19115_s26 = smov 6  }
   0x5   :  { %s19185_s21 = sld [smem:[%s20986_s0 + %s19113_s18]]   ;;  %s19116_s30 = smov 7  }
   0x6   :  { %s19190_s25 = sld [smem:[%s20986_s0 + %s19114_s22]]   ;;  %s19117_s4 = smov 8  }
   0x7   :  { %s19195_s29 = sld [smem:[%s20986_s0 + %s19115_s26]]   ;;  %s19118_s10 = smov 9  }
   0x8   :  { %20998 = sst [smem:[#allocation27_spill]] %s19170_s9  ;;  %s19119_s15 = smov 10  }
   0x9   :  { %s19200_s3 = sld [smem:[%s20986_s0 + %s19116_s30]]   ;;  %s19120_s20 = smov 11  }
   0xa   :  { %s19205_s8 = sld [smem:[%s20986_s0 + %s19117_s4]]   ;;  %s19121_s26 = smov 12  }
   0xb   :  { %s19210_s14 = sld [smem:[%s20986_s0 + %s19118_s10]]   ;;  %s19122_s1 = smov 13  }
   0xc   :  { %s19215_s19 = sld [smem:[%s20986_s0 + %s19119_s15]]   ;;  %s19123_s7 = smov 14  }
   0xd   :  { %s19220_s24 = sld [smem:[%s20986_s0 + %s19120_s20]]   ;;  %s19124_s15 = smov 15  }
   0xe   :  { %s19225_s30 = sld [smem:[%s20986_s0 + %s19121_s26]]   ;;  %s19125_s22 = smov 16  }
   0xf   :  { %s19230_s6 = sld [smem:[%s20986_s0 + %s19122_s1]]   ;;  %s19126_s28 = smov 17  }
  0x10   :  { %s19235_s12 = sld [smem:[%s20986_s0 + %s19123_s7]]   ;;  %s19127_s7 = smov 18  }
  0x11   :  { %20999 = sst [smem:[#allocation28_spill]] %s19210_s14 }
  0x12   :  { %21000 = sst [smem:[#allocation29_spill]] %s19215_s19 }
  0x13   :  { %21001 = sst [smem:[#allocation30_spill]] %s19220_s24 }
  0x14   :  { %21002 = sst [smem:[#allocation31_spill]] %s19225_s30 }
  0x15   :  { %21003 = sst [smem:[#allocation32_spill]] %s19230_s6 }
  0x16   :  { %21004 = sst [smem:[#allocation33_spill]] %s19235_s12 }
  0x17   :  { %s19240_s20 = sld [smem:[%s20986_s0 + %s19124_s15]]   ;;  %s19128_s15 = smov 19  }
  0x18   :  { %s19245_s27 = sld [smem:[%s20986_s0 + %s19125_s22]]   ;;  %s19129_s22 = smov 20  }
  0x19   :  { %s19250_s4 = sld [smem:[%s20986_s0 + %s19126_s28]]   ;;  %s19130_s28 = smov 21  }
  0x1a   :  { %s19255_s6 = sld [smem:[%s20986_s0 + %s19127_s7]]   ;;  %s19131_s7 = smov 22  }
  0x1d   :  { %21005 = sst [smem:[#allocation34_spill]] %s19240_s20 }
  0x1e   :  { %21006 = sst [smem:[#allocation35_spill]] %s19245_s27 }
  0x1f   :  { %21007 = sst [smem:[#allocation36_spill]] %s19250_s4 }
  0x20   :  { %21008 = sst [smem:[#allocation37_spill]] %s19255_s6 }
  0x21   :  { %s19260_s20 = sld [smem:[%s20986_s0 + %s19128_s15]]   ;;  %s19132_s15 = smov 23  }
  0x22   :  { %s19265_s27 = sld [smem:[%s20986_s0 + %s19129_s22]]   ;;  %s19133_s22 = smov 24  }
  0x23   :  { %s19270_s4 = sld [smem:[%s20986_s0 + %s19130_s28]]   ;;  %s19134_s28 = smov 25  }
  0x24   :  { %s19275_s6 = sld [smem:[%s20986_s0 + %s19131_s7]]   ;;  %s19135_s7 = smov 26  }
  0x25   :  { %s19285_s12 = sld [smem:[%s20986_s0 + %s19133_s22]]   ;;  %s19137_s22 = smov 28  }
  0x26   :  { %s19290_s24 = sld [smem:[%s20986_s0 + %s19134_s28]]   ;;  %s19138_s28 = smov 29  }
  0x27   :  { %21009 = sst [smem:[#allocation38_spill]] %s19260_s20 }
  0x28   :  { %s19280_s20 = sld [smem:[%s20986_s0 + %s19132_s15]]   ;;  %s19136_s15 = smov 27  }
  0x29   :  { %s19295_s30 = sld [smem:[%s20986_s0 + %s19135_s7]]   ;;  %s19139_s7 = smov 30  }
  0x2a   :  { %s19300_s9 = sld [smem:[%s20986_s0 + %s19136_s15]]  }
  0x2b   :  { %s19305_s14 = sld [smem:[%s20986_s0 + %s19137_s22]]  }
  0x2c   :  { %21010 = sst [smem:[#allocation39_spill]] %s19290_s24 }
  0x2d   :  { %s19310_s24 = sld [smem:[%s20986_s0 + %s19138_s28]]  }
  0x2e   :  { %s19315_s19 = sld [smem:[%s20986_s0 + %s19139_s7]]  }
  0x2f   :  { %67 = vsyncpa [#allocation3], 0 }
  0x30   :  { %68 = vsyncpa [#allocation6], 0 }
  0x31   :  { %69 = vsyncpa [#allocation9], 0 }
  0x32   :  { %70 = vsyncpa [#allocation12], 0 }
  0x33   :  { %71 = vsyncpa [#allocation15], 0 }
  0x34   :  { %72 = vsyncpa [#allocation4], 0 }
  0x35   :  { %73 = vsyncpa [#allocation18], 0  ;;  %s19140_s15 = smov [#allocation5]   ;;  %s19141_s18 = smov [#allocation8]  }
  0x36   :  { %s130_s16 = sshll.u32 %s19140_s15, 4  ;;  %s150_s22 = sshll.u32 %s19141_s18, 4  ;;  %s131_s16 = int_to_ptr.vmem [resolvable:$true] %s130_s16  ;;  %s151_s22 = int_to_ptr.vmem [resolvable:$true] %s150_s22 }
  0x37   :  { %s18854_s23 = scalar_lea.hbm %s19265_s27, 64 }
  0x38   :  { %p18855_p0 = scmp.ne.s32.totalorder %s19265_s27, %s18854_s23  ;;  %p18858_p1 = scmp.lt.u32.totalorder %s18854_s23, %s19265_s27 }
  0x3a   :  { %p18860_p2 = pnand %p18858_p1, %p18855_p0 }
  0x3c   :  { %18863 = shalt.err (!%p18860_p2)
}
  0x3d   :  { %s18864_s0 = scalar_lea.vmem %s131_s16, 64  ;;  %p18869_p4 = scmp.lt.s32.totalorder %s131_s16, %s131_s16 }
  0x3e   :  { %p18865_p3 = scmp.ne.s32.totalorder %s131_s16, %s18864_s0  ;;  %p18870_p5 = scmp.lt.s32.totalorder %s18864_s0, %s18864_s0 }
  0x40   :  { %p18871_p6 = por %p18870_p5, %p18869_p4 }
  0x42   :  { %p18872_p7 = pnand %p18871_p6, %p18865_p3 }
  0x44   :  { %18875 = shalt.err (!%p18872_p7)
}
  0x45   :  { %133 = dma.hbm_to_vmem [thread:$0]  %s19265_s27, 64, %s131_s16, [#allocation6]  }
  0x46   :  { %s18876_s26 = scalar_lea.hbm %s19275_s6, 32 }
  0x47   :  { %p18877_p8 = scmp.ne.s32.totalorder %s19275_s6, %s18876_s26  ;;  %p18880_p9 = scmp.lt.u32.totalorder %s18876_s26, %s19275_s6 }
  0x49   :  { %p18882_p10 = pnand %p18880_p9, %p18877_p8 }
  0x4b   :  { %18885 = shalt.err (!%p18882_p10)
}
  0x4c   :  { %s18886_s28 = scalar_lea.vmem %s151_s22, 32  ;;  %p18891_p12 = scmp.lt.s32.totalorder %s151_s22, %s151_s22 }
  0x4d   :  { %p18887_p11 = scmp.ne.s32.totalorder %s151_s22, %s18886_s28  ;;  %p18892_p13 = scmp.lt.s32.totalorder %s18886_s28, %s18886_s28 }
  0x4f   :  { %p18893_p0 = por %p18892_p13, %p18891_p12 }
  0x51   :  { %p18894_p1 = pnand %p18893_p0, %p18887_p11 }
  0x53   :  { %18897 = shalt.err (!%p18894_p1)
}
  0x54   :  { %153 = dma.hbm_to_vmem [thread:$0]  %s19275_s6, 32, %s151_s22, [#allocation9]  }
  0x55   :  { %s19142_s1 = smov [#allocation11]   ;;  %s19143_s27 = smov [#allocation2]  }
  0x56   :  { %s170_s2 = sshll.u32 %s19142_s1, 4  ;;  %s95_s7 = sshll.u32 %s19143_s27, 4  ;;  %s171_s2 = int_to_ptr.vmem [resolvable:$true] %s170_s2  ;;  %s19325_s7 = int_to_ptr.vmem [resolvable:$true] %s95_s7 }
  0x57   :  { %s18898_s10 = scalar_lea.hbm %s19285_s12, 256 }
  0x58   :  { %p18899_p2 = scmp.ne.s32.totalorder %s19285_s12, %s18898_s10  ;;  %p18902_p3 = scmp.lt.u32.totalorder %s18898_s10, %s19285_s12 }
  0x5a   :  { %p18904_p4 = pnand %p18902_p3, %p18899_p2 }
  0x5c   :  { %18907 = shalt.err (!%p18904_p4)
}
  0x5d   :  { %s18908_s11 = scalar_lea.vmem %s171_s2, 256  ;;  %p18913_p6 = scmp.lt.s32.totalorder %s171_s2, %s171_s2 }
  0x5e   :  { %p18909_p5 = scmp.ne.s32.totalorder %s171_s2, %s18908_s11  ;;  %p18914_p7 = scmp.lt.s32.totalorder %s18908_s11, %s18908_s11 }
  0x60   :  { %p18915_p8 = por %p18914_p7, %p18913_p6 }
  0x62   :  { %p18916_p9 = pnand %p18915_p8, %p18909_p5 }
  0x64   :  { %18919 = shalt.err (!%p18916_p9)
}
  0x65   :  { %173 = dma.hbm_to_vmem [thread:$0]  %s19285_s12, 256, %s171_s2, [#allocation12]  }
  0x66   :  { %s18920_s6 = scalar_lea.hbm %s19205_s8, 16384 }
  0x67   :  { %p18921_p10 = scmp.ne.s32.totalorder %s19205_s8, %s18920_s6  ;;  %p18924_p11 = scmp.lt.u32.totalorder %s18920_s6, %s19205_s8 }
  0x69   :  { %p18926_p12 = pnand %p18924_p11, %p18921_p10 }
  0x6b   :  { %18929 = shalt.err (!%p18926_p12)
}
  0x6c   :  { %s18930_s15 = scalar_lea.vmem %s19325_s7, 16384  ;;  %p18935_p0 = scmp.lt.s32.totalorder %s19325_s7, %s19325_s7 }
  0x6d   :  { %p18931_p13 = scmp.ne.s32.totalorder %s19325_s7, %s18930_s15  ;;  %p18936_p1 = scmp.lt.s32.totalorder %s18930_s15, %s18930_s15 }
  0x6f   :  { %p18937_p2 = por %p18936_p1, %p18935_p0 }
  0x71   :  { %p18938_p3 = pnand %p18937_p2, %p18931_p13 }
  0x73   :  { %18941 = shalt.err (!%p18938_p3)
}
  0x74   :  { %s19144_s16 = smov 128   ;;  %s19145_s12 = smov 8  }
  0x75   :  { %101 = dma.hbm_to_vmem [thread:$0]  %s19205_s8, 16384, %s19325_s7, [#allocation3], %s19144_s16, %s19144_s16, %s19145_s12  }
  0x76   :  { %s19146_s18 = smov [#allocation7]   ;;  %s19147_s23 = smov [#allocation10]  }
  0x77   :  { %s140_s22 = sshll.u32 %s19146_s18, 4  ;;  %s160_s0 = sshll.u32 %s19147_s23, 4  ;;  %s141_s22 = int_to_ptr.vmem [resolvable:$true] %s140_s22  ;;  %s161_s0 = int_to_ptr.vmem [resolvable:$true] %s160_s0 }
  0x78   :  { %s18942_s26 = scalar_lea.hbm %s19270_s4, 32 }
  0x79   :  { %p18943_p4 = scmp.ne.s32.totalorder %s19270_s4, %s18942_s26  ;;  %p18946_p5 = scmp.lt.u32.totalorder %s18942_s26, %s19270_s4 }
  0x7b   :  { %p18948_p6 = pnand %p18946_p5, %p18943_p4 }
  0x7d   :  { %18951 = shalt.err (!%p18948_p6)
}
  0x7e   :  { %s18952_s28 = scalar_lea.vmem %s141_s22, 32  ;;  %p18957_p8 = scmp.lt.s32.totalorder %s141_s22, %s141_s22 }
  0x7f   :  { %p18953_p7 = scmp.ne.s32.totalorder %s141_s22, %s18952_s28  ;;  %p18958_p9 = scmp.lt.s32.totalorder %s18952_s28, %s18952_s28 }
  0x81   :  { %p18959_p10 = por %p18958_p9, %p18957_p8 }
  0x83   :  { %p18960_p11 = pnand %p18959_p10, %p18953_p7 }
  0x85   :  { %18963 = shalt.err (!%p18960_p11)
}
  0x86   :  { %143 = dma.hbm_to_vmem [thread:$0]  %s19270_s4, 32, %s141_s22, [#allocation6]  }
  0x87   :  { %s18964_s8 = scalar_lea.hbm %s19280_s20, 16 }
  0x88   :  { %p18965_p12 = scmp.ne.s32.totalorder %s19280_s20, %s18964_s8  ;;  %p18968_p13 = scmp.lt.u32.totalorder %s18964_s8, %s19280_s20 }
  0x8a   :  { %p18970_p0 = pnand %p18968_p13, %p18965_p12 }
  0x8c   :  { %18973 = shalt.err (!%p18970_p0)
}
  0x8d   :  { %s18974_s1 = scalar_lea.vmem %s161_s0, 16  ;;  %s18978_s2 = scalar_lea.vmem %s161_s0, 32 }
  0x8e   :  { %p18975_p1 = scmp.ne.s32.totalorder %s161_s0, %s18974_s1  ;;  %p18979_p2 = scmp.lt.s32.totalorder %s161_s0, %s161_s0 }
  0x8f   :  { %p18980_p3 = scmp.lt.s32.totalorder %s18978_s2, %s18974_s1 }
  0x91   :  { %p18981_p4 = por %p18980_p3, %p18979_p2 }
  0x93   :  { %p18982_p5 = pnand %p18981_p4, %p18975_p1 }
  0x95   :  { %18985 = shalt.err (!%p18982_p5)
}
  0x96   :  { %163 = dma.hbm_to_vmem [thread:$0]  %s19280_s20, 16, %s161_s0, [#allocation9]  }
  0x97   :  { %s19148_s27 = smov [#allocation13]   ;;  %s19149_s7 = smov [#allocation14]  }
  0x98   :  { %s182_s4 = sshll.u32 %s19148_s27, 4  ;;  %s192_s10 = sshll.u32 %s19149_s7, 4  ;;  %s183_s4 = int_to_ptr.vmem [resolvable:$true] %s182_s4  ;;  %s193_s10 = int_to_ptr.vmem [resolvable:$true] %s192_s10 }
  0x99   :  { %s18986_s11 = scalar_lea.hbm %s19295_s30, 64 }
  0x9a   :  { %p18987_p6 = scmp.ne.s32.totalorder %s19295_s30, %s18986_s11  ;;  %p18990_p7 = scmp.lt.u32.totalorder %s18986_s11, %s19295_s30 }
  0x9c   :  { %p18992_p8 = pnand %p18990_p7, %p18987_p6 }
  0x9e   :  { %18995 = shalt.err (!%p18992_p8)
}
  0x9f   :  { %s18996_s6 = scalar_lea.vmem %s183_s4, 64  ;;  %p19001_p10 = scmp.lt.s32.totalorder %s183_s4, %s183_s4 }
  0xa0   :  { %p18997_p9 = scmp.ne.s32.totalorder %s183_s4, %s18996_s6  ;;  %p19002_p11 = scmp.lt.s32.totalorder %s18996_s6, %s18996_s6 }
  0xa2   :  { %p19003_p12 = por %p19002_p11, %p19001_p10 }
  0xa4   :  { %p19004_p13 = pnand %p19003_p12, %p18997_p9 }
  0xa6   :  { %19007 = shalt.err (!%p19004_p13)
}
  0xa7   :  { %185 = dma.hbm_to_vmem [thread:$0]  %s19295_s30, 64, %s183_s4, [#allocation12]  }
  0xa8   :  { %s19008_s20 = scalar_lea.hbm %s19300_s9, 16 }
  0xa9   :  { %p19009_p0 = scmp.ne.s32.totalorder %s19300_s9, %s19008_s20  ;;  %p19012_p1 = scmp.lt.u32.totalorder %s19008_s20, %s19300_s9 }
  0xab   :  { %p19014_p2 = pnand %p19012_p1, %p19009_p0 }
  0xad   :  { %19017 = shalt.err (!%p19014_p2)
}
  0xae   :  { %s19018_s15 = scalar_lea.vmem %s193_s10, 16  ;;  %s19022_s18 = scalar_lea.vmem %s193_s10, 32 }
  0xaf   :  { %p19019_p3 = scmp.ne.s32.totalorder %s193_s10, %s19018_s15  ;;  %p19023_p4 = scmp.lt.s32.totalorder %s193_s10, %s193_s10 }
  0xb0   :  { %p19024_p5 = scmp.lt.s32.totalorder %s19022_s18, %s19018_s15 }
  0xb2   :  { %p19025_p6 = por %p19024_p5, %p19023_p4 }
  0xb4   :  { %p19026_p7 = pnand %p19025_p6, %p19019_p3 }
  0xb6   :  { %19029 = shalt.err (!%p19026_p7)
}
  0xb7   :  { %195 = dma.hbm_to_vmem [thread:$0]  %s19300_s9, 16, %s193_s10, [#allocation15]  }
  0xb8   :  { %19096 = dma.done.wait [#allocation3], 16384  }
  0xb9   :  { %19097 = vsyncadd [#allocation3], 4294950912 }
  0xba   :  { %19098 = dma.done.wait [#allocation6], 96  }
  0xbb   :  { %19099 = vsyncadd [#allocation6], 4294967200 }
  0xbc   :  { %19100 = dma.done.wait [#allocation9], 48  }
  0xbd   :  { %19101 = vsyncadd [#allocation9], 4294967248 }
  0xbe   :  { %19102 = dma.done.wait [#allocation12], 320  }
  0xbf   :  { %19103 = vsyncadd [#allocation12], 4294966976 }
  0xc0   :  { %19104 = dma.done.wait [#allocation15], 16  }
  0xc1   :  { %19105 = vsyncadd [#allocation15], 4294967280  ;;  %vm231_vm0 = vcmask 130048   ;;  %v13966_v0 = vld [vmem:[%s19175_s13 + $0x10] sm:$0xff]  ;;  %v13967_v1 = vld [vmem:[%s19175_s13 + $0x18] sm:$0xff]  ;;  %v19150_v21 = vmov 0.0  }
  0xc2   :  { %v13964_v2 = vld [vmem:[%s19165_s5 + $0x10] sm:$0xff]  ;;  %v16989_v3 = vpack.c.bf16 %v13967_v1, %v13966_v0  ;;  %v223_v4 = vld [vmem:[%s19175_s13] sm:$0xff]  ;;  %v224_v5 = vld [vmem:[%s19175_s13 + $0x8] sm:$0xff]  ;;  %vm19151_vm1 = vmmov 0   ;;  %vm746_vm2 = vcmask 261120   ;;  %v19152_v47 = vmov 0  }
  0xc3   :  { %16781 = vmatprep.mubr.msk.f32.mxu0 %vm231_vm0, %v13964_v2  ;;  %v16993_v6 = vpack.c.bf16 %v224_v5, %v223_v4  ;;  %v13978_v7 = vld [vmem:[%s19165_s5 + $0x30] sm:$0xff]  ;;  %v13974_v8 = vld [vmem:[%s19175_s13 + $0x20] sm:$0xff]  ;;  %v13975_v9 = vld [vmem:[%s19175_s13 + $0x28] sm:$0xff]  ;;  %vm930_vm3 = vcmask 392192   ;;  %vm3914_vm4 = vcmask 1043456   ;;  %vm3910_vm5 = vcmask 64512  }
  0xc4   :  { %16990 = vmatprep.subr.bf16.mxu0 %v16989_v3  ;;  %16809 = vmatprep.mubr.msk.f32.mxu1 %vm231_vm0, %v13978_v7  ;;  %v13965_v10 = vld [vmem:[%s19165_s5 + $0x18] sm:$0xff]  ;;  %v16997_v11 = vpack.c.bf16 %v13975_v9, %v13974_v8  ;;  %v221_v13 = vld [vmem:[%s19165_s5] sm:$0xff]  ;;  %v13986_v14 = vld [vmem:[%s19165_s5 + $0x50] sm:$0xff]  ;;  %s21012_s9 = sld [smem:[#allocation28_spill]]  ;;  %s21013_s13 = sld [smem:[#allocation27_spill]]  ;;  %vm5947_vm6 = vcmask 58368  }
  0xc5   :  { %16992 = vmatpush3.bf16.msra.mxu0 %v16989_v3  ;;  %17006 = vmatprep.subr.bf16.mxu1 %v16993_v6  ;;  %v13979_v12 = vld [vmem:[%s19165_s5 + $0x38] sm:$0xff]  ;;  %v222_v15 = vld [vmem:[%s19165_s5 + $0x8] sm:$0xff]  ;;  %v13972_v17 = vld [vmem:[%s19165_s5 + $0x20] sm:$0xff]  ;;  %vm5970_vm7 = vcmask 1040384   ;;  %vm5966_vm8 = vcmask 15360   ;;  %s21018_s30 = sld [smem:[#allocation35_spill]] }
  0xc6   :  { %17008 = vmatpush3.bf16.msra.mxu1 %v16993_v6  ;;  %16994 = vmatprep.subr.bf16.mxu0 %v16993_v6  ;;  %v13987_v16 = vld [vmem:[%s19165_s5 + $0x58] sm:$0xff]  ;;  %v13973_v18 = vld [vmem:[%s19165_s5 + $0x28] sm:$0xff]  ;;  %v13980_v19 = vld [vmem:[%s19165_s5 + $0x40] sm:$0xff]  ;;  %s21019_s22 = sld [smem:[#allocation39_spill]]  ;;  %s21020_s23 = sld [smem:[#allocation34_spill]]  ;;  %vm8295_vm9 = vcmask 1044480  }
  0xc7   :  { %17010 = vmatprep.subr.bf16.mxu1 %v16997_v11  ;;  %v13981_v20 = vld [vmem:[%s19165_s5 + $0x48] sm:$0xff]  ;;  %v17236_v30 = vld [vmem:[%s19185_s21 + $0x64] ss:$16 sps:$4 sm:$0xff]   ;;  %v17234_v36 = vld [vmem:[%s19185_s21 + $0x60] ss:$16 sps:$4 sm:$0xff]   ;;  %s21011_s5 = sld [smem:[#allocation29_spill]] }
  0xc8   :  { %16782 = vmatmul.mubr.msk.f32.vlgmr.msra.gmra.mrb[0].mxu0 %vm231_vm0, %v13965_v10  ;;  %v17239_v31 = vld [vmem:[%s19185_s21 + $0x6c] ss:$16 sps:$4 sm:$0xff]   ;;  %v17233_v34 = vld [vmem:[%s19180_s17] sm:$0xff]   ;;  %v17237_v37 = vld [vmem:[%s19185_s21 + $0x68] ss:$16 sps:$4 sm:$0xff]   ;;  %vm8291_vm10 = vcmask 80896  }
  0xc9   :  { %16810 = vmatmul.mubr.msk.f32.vlgmr.msra.gmra.mrb[0].mxu1 %vm231_vm0, %v13979_v12  ;;  %16996 = vmatpush3.bf16.msra.mxu0 %v16993_v6  ;;  %v17232_v33 = vld [vmem:[%s19180_s17 + $0x8] sm:$0xff]   ;;  %v17242_v38 = vld [vmem:[%s19185_s21 + $0x84] ss:$16 sps:$4 sm:$0xff]   ;;  %v17240_v40 = vld [vmem:[%s19185_s21 + $0x80] ss:$16 sps:$4 sm:$0xff]   ;;  %vm9051_vm11 = vcmask 523264  }
  0xca   :  { %16788 = vmatprep.mubr.msk.f32.mxu0 %vm231_vm0, %v221_v13  ;;  %17012 = vmatpush3.bf16.msra.mxu1 %v16997_v11  ;;  %v17245_v39 = vld [vmem:[%s19185_s21 + $0x8c] ss:$16 sps:$4 sm:$0xff]   ;;  %v17243_v41 = vld [vmem:[%s19185_s21 + $0x88] ss:$16 sps:$4 sm:$0xff]   ;;  %v17248_v42 = vld [vmem:[%s19185_s21 + $0xa4] ss:$16 sps:$4 sm:$0xff]  }
  0xcb   :  { %16816 = vmatprep.mubr.msk.f32.mxu1 %vm231_vm0, %v13986_v14  ;;  %16998 = vmatprep.subr.bf16.mxu0 %v16997_v11  ;;  %v17246_v43 = vld [vmem:[%s19185_s21 + $0xa0] ss:$16 sps:$4 sm:$0xff]   ;;  %v17251_v44 = vld [vmem:[%s19185_s21 + $0xac] ss:$16 sps:$4 sm:$0xff]   ;;  %v17249_v45 = vld [vmem:[%s19185_s21 + $0xa8] ss:$16 sps:$4 sm:$0xff]  }
  0xcc   :  { %16827 = vmatprep.subr.bf16.mxu1 %v19150_v21  ;;  %v17254_v46 = vld [vmem:[%s19185_s21 + $0x4] ss:$16 sps:$4 sm:$0xff]   ;;  %v17257_v48 = vld [vmem:[%s19185_s21 + $0xc] ss:$16 sps:$4 sm:$0xff]   ;;  %v17252_v50 = vld [vmem:[%s19185_s21] ss:$16 sps:$4 sm:$0xff]  }
  0xcd   :  { %v17255_v51 = vld [vmem:[%s19185_s21 + $0x8] ss:$16 sps:$4 sm:$0xff]   ;;  %v17260_v54 = vld [vmem:[%s19185_s21 + $0x24] ss:$16 sps:$4 sm:$0xff]   ;;  %v17263_v55 = vld [vmem:[%s19185_s21 + $0x2c] ss:$16 sps:$4 sm:$0xff]  }
  0xce   :  { %v17258_v63 = vld [vmem:[%s19185_s21 + $0x20] ss:$16 sps:$4 sm:$0xff]   ;;  %v17261_v0 = vld [vmem:[%s19185_s21 + $0x28] ss:$16 sps:$4 sm:$0xff]   ;;  %v17266_v1 = vld [vmem:[%s19185_s21 + $0x44] ss:$16 sps:$4 sm:$0xff]  }
  0xcf   :  { %v17269_v2 = vld [vmem:[%s19185_s21 + $0x4c] ss:$16 sps:$4 sm:$0xff]   ;;  %v17267_v4 = vld [vmem:[%s19185_s21 + $0x48] ss:$16 sps:$4 sm:$0xff]   ;;  %v17276_v8 = vld [vmem:[%s19185_s21 + $0xc4] ss:$16 sps:$4 sm:$0xff]  }
  0xd0   :  { %16789 = vmatmul.mubr.msk.f32.vlgmr.msra.gmra.mrb[0].mxu0 %vm231_vm0, %v222_v15  ;;  %v17273_v5 = vld [vmem:[%s19185_s21 + $0xcc] ss:$16 sps:$4 sm:$0xff]   ;;  %v17271_v6 = vld [vmem:[%s19185_s21 + $0xc8] ss:$16 sps:$4 sm:$0xff]   ;;  %v17270_v10 = vld [vmem:[%s19180_s17 + $0x10] sm:$0xff]   ;;  %s21021_s0 = sld [smem:[#allocation37_spill]] }
  0xd1   :  { %16817 = vmatmul.mubr.msk.f32.vlgmr.msra.gmra.mrb[0].mxu1 %vm231_vm0, %v13987_v16  ;;  %17000 = vmatpush3.bf16.msra.mxu0 %v16997_v11  ;;  %v17279_v7 = vld [vmem:[%s19185_s21 + $0xec] ss:$16 sps:$4 sm:$0xff]   ;;  %v17277_v9 = vld [vmem:[%s19185_s21 + $0xe8] ss:$16 sps:$4 sm:$0xff]   ;;  %v17274_v11 = vld [vmem:[%s19185_s21 + $0xc0] ss:$16 sps:$4 sm:$0xff]  }
  0xd2   :  { %16795 = vmatprep.mubr.msk.f32.mxu0 %vm231_vm0, %v13972_v17  ;;  %17002 = vmatprep.subr.bf16.mxu0 %v16989_v3  ;;  %v17282_v12 = vld [vmem:[%s19185_s21 + $0xe4] ss:$16 sps:$4 sm:$0xff]   ;;  %v17280_v13 = vld [vmem:[%s19185_s21 + $0xe0] ss:$16 sps:$4 sm:$0xff]   ;;  %v17285_v14 = vld [vmem:[%s19185_s21 + $0x10c] ss:$16 sps:$4 sm:$0xff]  }
  0xd3   :  { %16831 = vmatprep.mubr.msk.bf16.mxu1 %vm19151_vm1, %v19150_v21  ;;  %v17283_v15 = vld [vmem:[%s19185_s21 + $0x108] ss:$16 sps:$4 sm:$0xff]   ;;  %v17288_v16 = vld [vmem:[%s19185_s21 + $0x104] ss:$16 sps:$4 sm:$0xff]   ;;  %v17286_v17 = vld [vmem:[%s19185_s21 + $0x100] ss:$16 sps:$4 sm:$0xff]  }
  0xd4   :  { %s21022_s26 = sld [smem:[#allocation36_spill]]  ;;  %s21023_s28 = sld [smem:[#allocation38_spill]] }
  0xd5   :  { %s19154_s8 = smov [#allocation17]   ;;  %s19155_s2 = smov [#allocation16]  }
  0xd6   :  { %s13902_s1 = sshll.u32 %s19154_s8, 4  ;;  %s13892_s27 = sshll.u32 %s19155_s2, 4  ;;  %s13903_s1 = int_to_ptr.vmem [resolvable:$true] %s13902_s1  ;;  %s13893_s27 = int_to_ptr.vmem [resolvable:$true] %s13892_s27 }
  0xd7   :  { %s19030_s4 = scalar_lea.vmem %s13903_s1, 32  ;;  %p19035_p9 = scmp.lt.s32.totalorder %s13903_s1, %s13903_s1 }
  0xd8   :  { %16796 = vmatmul.mubr.msk.f32.vlgmr.msra.gmra.mrb[0].mxu0 %vm231_vm0, %v13973_v18  ;;  %v17292_v18 = vld [vmem:[%s19185_s21 + $0x124] ss:$16 sps:$4 sm:$0xff]   ;;  %p19031_p8 = scmp.ne.s32.totalorder %s13903_s1, %s19030_s4  ;;  %p19036_p10 = scmp.lt.s32.totalorder %s19030_s4, %s19030_s4 }
  0xd9   :  { %17004 = vmatpush3.bf16.msra.mxu0 %v16989_v3  ;;  %16802 = vmatprep.mubr.msk.f32.mxu0 %vm231_vm0, %v13980_v19  ;;  %v17264_v3 = vld [vmem:[%s19185_s21 + $0x40] ss:$16 sps:$4 sm:$0xff]  }
  0xda   :  { %16819 = vmatprep.subr.bf16.mxu0 %v19150_v21  ;;  %p19037_p11 = por %p19036_p10, %p19035_p9 }
  0xdc   :  { %16803 = vmatmul.mubr.msk.f32.vlgmr.msra.gmra.mrb[2].mxu0 %vm231_vm0, %v13981_v20  ;;  %p19038_p12 = pnand %p19037_p11, %p19031_p8 }
  0xdd   :  { %16823 = vmatprep.mubr.msk.bf16.mxu0 %vm19151_vm1, %v19150_v21 }
 0x1a4   :  { %v16818_v22 = vpop.f32.mrb[0].mxu1 }
 0x1a5   :  { %v726_v23 = vpop.f32.mrb[1].mxu1 }
 0x1ab   :  { %v16797_v24 = vpop.f32.mrb[0].mxu0 }
 0x1ac   :  { %v472_v25 = vpop.f32.mrb[1].mxu0 }
 0x1ad   :  { %v19395_v26 = vpack.c.bf16 %v16797_v24, %v472_v25  ;;  %v17290_v25 = vld [vmem:[%s19185_s21 + $0x120] ss:$16 sps:$4 sm:$0xff]  }
 0x1af   :  { %v16804_v27 = vpop.f32.mrb[2].mxu0  ;;  %16820 = vmatpush3.bf16.msra.mxu0 %v19395_v26  ;;  %16828 = vmatpush3.bf16.msra.mxu1 %v19395_v26 }
 0x1b0   :  { %v17085_v28 = vadd.f32 %v16818_v22, %v16804_v27  ;;  %v561_v29 = vpop.f32.mrb[3].mxu0  ;;  %16821 = vmatprep.subr.bf16.mxu0 %v19150_v21  ;;  %16829 = vmatprep.subr.bf16.mxu1 %v19150_v21  ;;  %v17298_v27 = vld [vmem:[%s19185_s21 + $0x144] ss:$16 sps:$4 sm:$0xff]  }
 0x1b1   :  { %v17086_v32 = vadd.f32 %v726_v23, %v561_v29  ;;  %v17296_v29 = vld [vmem:[%s19185_s21 + $0x140] ss:$16 sps:$4 sm:$0xff]  }
 0x1b3   :  { %v19405_v35 = vpack.c.bf16 %v17085_v28, %v17086_v32  ;;  %v17295_v28 = vld [vmem:[%s19185_s21 + $0x12c] ss:$16 sps:$4 sm:$0xff]   ;;  %v17299_v32 = vld [vmem:[%s19185_s21 + $0x148] ss:$16 sps:$4 sm:$0xff]  }
 0x1b5   :  { %16822 = vmatpush3.bf16.msra.mxu0 %v19405_v35  ;;  %16830 = vmatpush3.bf16.msra.mxu1 %v19405_v35 }
 0x1b6   :  { %934 = vmatprep.subr.bf16.mxu0 %v17236_v30  ;;  %977 = vmatprep.subr.bf16.mxu1 %v17239_v31  ;;  %v17289_v30 = vld [vmem:[%s19180_s17 + $0x18] sm:$0xff]   ;;  %s21014_s17 = sld [smem:[#allocation31_spill]] }
 0x1b7   :  { %v17301_v31 = vld [vmem:[%s19185_s21 + $0x14c] ss:$16 sps:$4 sm:$0xff]  }
 0x1b8   :  { %16832 = vmatmul.mubr.msk.bf16.vlgmr.msra.gmra.mrb[4].mxu1 %vm746_vm2, %v17232_v33  ;;  %16824 = vmatmul.mubr.msk.bf16.vlgmr.msra.gmra.mrb[4].mxu0 %vm746_vm2, %v17233_v34  ;;  %v17304_v33 = vld [vmem:[%s19185_s21 + $0x164] ss:$16 sps:$4 sm:$0xff]   ;;  %v17307_v34 = vld [vmem:[%s19185_s21 + $0x16c] ss:$16 sps:$4 sm:$0xff]  }
 0x1b9   :  { %935 = vmatpush1.bf16.msra.mxu0 %v17234_v36  ;;  %978 = vmatpush1.bf16.msra.mxu1 %v17237_v37  ;;  %v17302_v36 = vld [vmem:[%s19185_s21 + $0x160] ss:$16 sps:$4 sm:$0xff]   ;;  %v17305_v37 = vld [vmem:[%s19185_s21 + $0x168] ss:$16 sps:$4 sm:$0xff]  }
 0x1ba   :  { %936 = vmatprep.subr.bf16.mxu0 %v17242_v38  ;;  %979 = vmatprep.subr.bf16.mxu1 %v17245_v39 }
 0x1bb   :  { %966 = vmatprep.mubr.bf16.mxu0 %v19152_v47  ;;  %1009 = vmatprep.mubr.bf16.mxu1 %v19152_v47 }
 0x1bd   :  { %937 = vmatpush1.bf16.msra.mxu0 %v17240_v40  ;;  %980 = vmatpush1.bf16.msra.mxu1 %v17243_v41 }
 0x1be   :  { %938 = vmatprep.subr.bf16.mxu0 %v17248_v42  ;;  %981 = vmatprep.subr.bf16.mxu1 %v17251_v44  ;;  %v1617_v42 = vlaneseq }
 0x1c1   :  { %939 = vmatpush1.bf16.msra.mxu0 %v17246_v43  ;;  %982 = vmatpush1.bf16.msra.mxu1 %v17249_v45  ;;  %v19491_v43 = vshrl.u32 %v1617_v42, 7  ;;  %v17343_v42 = vld [vmem:[%s19195_s29 + $0x354] ss:$8 sps:$4 sm:$0xff]  }
 0x1c2   :  { %1083 = vmatprep.subr.bf16.mxu0 %v17254_v46  ;;  %1126 = vmatprep.subr.bf16.mxu1 %v17257_v48  ;;  %v1615_v46 = vld [vmem:[#allocation5] sm:$0xf] }
 0x1c3   :  { %v19494_v44 = vsub.s32 0, %v19491_v43  ;;  %v19497_v45 = vsub.s32 2, %v19491_v43  ;;  %v19500_v48 = vsub.s32 1, %v19491_v43 }
 0x28b   :  { %v849_v49 = vpop.f32.mrb[4].mxu1  ;;  %v784_v52 = vpop.f32.mrb[4].mxu0 }
 0x28c   :  { %v16833_v53 = vpop.f32.mrb[5].mxu1  ;;  %v16825_v56 = vpop.f32.mrb[5].mxu0 }
 0x28d   :  { %v852_v57 = vpop.f32.mrb[6].mxu1  ;;  %v787_v58 = vpop.f32.mrb[6].mxu0 }
 0x28e   :  { %v856_v59 = vpack.c.bf16 %v852_v57, %v849_v49  ;;  %v16834_v60 = vpop.f32.mrb[7].mxu1  ;;  %v791_v61 = vpack.c.bf16 %v787_v58, %v784_v52  ;;  %v16826_v62 = vpop.f32.mrb[7].mxu0  ;;  %v1631_v49 = vsub.s32 3, %v19491_v43  ;;  %v1624_v52 = vrot.slane %v1615_v46, %v19500_v48 }
 0x290   :  { %14020 = vmatmul.mubr.msk.bf16.vlgmr.msra.gmra.mrb[8].mxu0 %vm930_vm3, %v856_v59  ;;  %14021 = vmatmul.mubr.msk.bf16.vlgmr.msra.gmra.mrb[8].mxu1 %vm930_vm3, %v856_v59  ;;  %v1632_v53 = vrot.slane %v1615_v46, %v1631_v49 }
 0x291   :  { %1084 = vmatpush1.bf16.msra.mxu0 %v17252_v50  ;;  %1127 = vmatpush1.bf16.msra.mxu1 %v17255_v51  ;;  %v1620_v50 = vrot.slane %v1615_v46, %v19494_v44  ;;  %v1628_v51 = vrot.slane %v1615_v46, %v19497_v45  ;;  %v17338_v46 = vld [vmem:[%s19195_s29 + $0x250] ss:$8 sps:$4 sm:$0xff]  }
 0x292   :  { %1085 = vmatprep.subr.bf16.mxu0 %v17260_v54  ;;  %1128 = vmatprep.subr.bf16.mxu1 %v17263_v55 }
 0x293   :  { %1115 = vmatprep.mubr.bf16.mxu0 %v19152_v47  ;;  %1158 = vmatprep.mubr.bf16.mxu1 %v19152_v47 }
 0x295   :  { %1086 = vmatpush1.bf16.msra.mxu0 %v17258_v63  ;;  %1129 = vmatpush1.bf16.msra.mxu1 %v17261_v0 }
 0x296   :  { %1087 = vmatprep.subr.bf16.mxu0 %v17266_v1  ;;  %1130 = vmatprep.subr.bf16.mxu1 %v17269_v2 }
 0x299   :  { %1088 = vmatpush1.bf16.msra.mxu0 %v17264_v3  ;;  %1131 = vmatpush1.bf16.msra.mxu1 %v17267_v4 }
 0x29a   :  { %16835 = vmatprep.subr.bf16.mxu0 %v19150_v21  ;;  %1341 = vmatprep.subr.bf16.mxu1 %v17273_v5 }
 0x29c   :  { %14034 = vmatmul.mubr.msk.bf16.vlgmr.msra.gmra.mrb[8].mxu0 %vm930_vm3, %v791_v61  ;;  %14035 = vmatmul.mubr.msk.bf16.vlgmr.msra.gmra.mrb[8].mxu1 %vm930_vm3, %v791_v61 }
 0x29d   :  { %16836 = vmatpush3.bf16.msra.mxu0 %v19395_v26  ;;  %16839 = vmatprep.mubr.msk.bf16.mxu0 %vm19151_vm1, %v19150_v21 }
 0x29e   :  { %16837 = vmatprep.subr.bf16.mxu0 %v19150_v21  ;;  %1342 = vmatpush1.bf16.msra.mxu1 %v17271_v6 }
 0x29f   :  { %1343 = vmatprep.subr.bf16.mxu1 %v17279_v7  ;;  %1373 = vmatprep.mubr.bf16.mxu1 %v19152_v47 }
 0x2a1   :  { %16838 = vmatpush3.bf16.msra.mxu0 %v19405_v35 }
 0x2a2   :  { %1298 = vmatprep.subr.bf16.mxu0 %v17276_v8  ;;  %1344 = vmatpush1.bf16.msra.mxu1 %v17277_v9 }
 0x2a3   :  { %1345 = vmatprep.subr.bf16.mxu1 %v17285_v14 }
 0x2a4   :  { %16840 = vmatmul.mubr.msk.bf16.vlgmr.msra.gmra.mrb[12].mxu0 %vm746_vm2, %v17270_v10 }
 0x2a5   :  { %1299 = vmatpush1.bf16.msra.mxu0 %v17274_v11  ;;  %1330 = vmatprep.mubr.bf16.mxu0 %v19152_v47 }
 0x2a6   :  { %1300 = vmatprep.subr.bf16.mxu0 %v17282_v12  ;;  %1346 = vmatpush1.bf16.msra.mxu1 %v17283_v15 }
 0x2a7   :  { %16843 = vmatprep.subr.bf16.mxu1 %v19150_v21 }
 0x2a9   :  { %1301 = vmatpush1.bf16.msra.mxu0 %v17280_v13 }
 0x2aa   :  { %1302 = vmatprep.subr.bf16.mxu0 %v17288_v16 }
 0x2ad   :  { %1303 = vmatpush1.bf16.msra.mxu0 %v17286_v17 }
 0x2ae   :  { %1521 = vmatprep.subr.bf16.mxu0 %v17292_v18  ;;  %v1657_v18 = vld [vmem:[%s19190_s25] sm:$0xf] }
 0x377   :  { %v1214_v19 = vpop.f32.mrb[12].mxu0 }
 0x378   :  { %v16841_v20 = vpop.f32.mrb[13].mxu0 }
 0x379   :  { %v1217_v22 = vpop.f32.mrb[14].mxu0  ;;  %v17313_v20 = vld [vmem:[%s19195_s29 + $0x304] ss:$8 sps:$4 sm:$0xff]  }
 0x37a   :  { %v1221_v23 = vpack.c.bf16 %v1217_v22, %v1214_v19  ;;  %v16842_v24 = vpop.f32.mrb[15].mxu0  ;;  %v17310_v19 = vld [vmem:[%s19195_s29 + $0x204] ss:$8 sps:$4 sm:$0xff]  }
 0x37b   :  { %v14098_v22 = vld [vmem:[%s19190_s25 + $0x4] sm:$0xf]  ;;  %v17311_v24 = vld [vmem:[%s19195_s29 + $0x300] ss:$8 sps:$4 sm:$0xff]  }
 0x37c   :  { %14064 = vmatmul.mubr.msk.bf16.vlgmr.msra.gmra.mrb[8].mxu0 %vm930_vm3, %v1221_v23  ;;  %14065 = vmatmul.mubr.msk.bf16.vlgmr.msra.gmra.mrb[8].mxu1 %vm930_vm3, %v1221_v23  ;;  %v17308_v23 = vld [vmem:[%s19195_s29 + $0x200] ss:$8 sps:$4 sm:$0xff]  }
 0x37d   :  { %16844 = vmatpush3.bf16.msra.mxu1 %v19395_v26  ;;  %16847 = vmatprep.mubr.msk.bf16.mxu1 %vm19151_vm1, %v19150_v21  ;;  %v17293_v26 = vld [vmem:[%s19185_s21 + $0x128] ss:$16 sps:$4 sm:$0xff]   ;;  %s21015_s21 = sld [smem:[#allocation30_spill]] }
 0x37e   :  { %16845 = vmatprep.subr.bf16.mxu1 %v19150_v21  ;;  %1522 = vmatpush1.bf16.msra.mxu0 %v17290_v25  ;;  %v17316_v25 = vld [vmem:[%s19195_s29 + $0x214] ss:$8 sps:$4 sm:$0xff]  }
 0x37f   :  { %1523 = vmatprep.subr.bf16.mxu0 %v17298_v27  ;;  %1553 = vmatprep.mubr.bf16.mxu0 %v19152_v47  ;;  %v17319_v27 = vld [vmem:[%s19195_s29 + $0x314] ss:$8 sps:$4 sm:$0xff]  }
 0x381   :  { %16846 = vmatpush3.bf16.msra.mxu1 %v19405_v35 }
 0x382   :  { %1564 = vmatprep.subr.bf16.mxu1 %v17295_v28  ;;  %1524 = vmatpush1.bf16.msra.mxu0 %v17296_v29  ;;  %v17314_v28 = vld [vmem:[%s19195_s29 + $0x210] ss:$8 sps:$4 sm:$0xff]  }
 0x383   :  { %1525 = vmatprep.subr.bf16.mxu0 %v17304_v33  ;;  %v17317_v29 = vld [vmem:[%s19195_s29 + $0x310] ss:$8 sps:$4 sm:$0xff]   ;;  %v17328_v33 = vld [vmem:[%s19195_s29 + $0x234] ss:$8 sps:$4 sm:$0xff]  }
 0x384   :  { %16848 = vmatmul.mubr.msk.bf16.vlgmr.msra.gmra.mrb[12].mxu1 %vm746_vm2, %v17289_v30  ;;  %v17322_v30 = vld [vmem:[%s19195_s29 + $0x224] ss:$8 sps:$4 sm:$0xff]  }
 0x385   :  { %1565 = vmatpush1.bf16.msra.mxu1 %v17293_v26  ;;  %1596 = vmatprep.mubr.bf16.mxu1 %v19152_v47  ;;  %v17325_v26 = vld [vmem:[%s19195_s29 + $0x324] ss:$8 sps:$4 sm:$0xff]  }
 0x386   :  { %1566 = vmatprep.subr.bf16.mxu1 %v17301_v31  ;;  %1526 = vmatpush1.bf16.msra.mxu0 %v17302_v36  ;;  %v17320_v31 = vld [vmem:[%s19195_s29 + $0x220] ss:$8 sps:$4 sm:$0xff]   ;;  %v17326_v36 = vld [vmem:[%s19195_s29 + $0x230] ss:$8 sps:$4 sm:$0xff]  }
 0x389   :  { %1567 = vmatpush1.bf16.msra.mxu1 %v17299_v32  ;;  %v17323_v32 = vld [vmem:[%s19195_s29 + $0x320] ss:$8 sps:$4 sm:$0xff]  }
 0x38a   :  { %1568 = vmatprep.subr.bf16.mxu1 %v17307_v34  ;;  %v17331_v34 = vld [vmem:[%s19195_s29 + $0x334] ss:$8 sps:$4 sm:$0xff]  }
 0x38d   :  { %1569 = vmatpush1.bf16.msra.mxu1 %v17305_v37  ;;  %v17329_v37 = vld [vmem:[%s19195_s29 + $0x330] ss:$8 sps:$4 sm:$0xff]  }
 0x457   :  { %v1437_v35 = vpop.f32.mrb[12].mxu1 }
 0x458   :  { %v16849_v38 = vpop.f32.mrb[13].mxu1 }
 0x459   :  { %v1440_v39 = vpop.f32.mrb[14].mxu1  ;;  %v17337_v38 = vld [vmem:[%s19195_s29 + $0x344] ss:$8 sps:$4 sm:$0xff]  }
 0x45a   :  { %v1444_v40 = vpack.c.bf16 %v1440_v39, %v1437_v35  ;;  %v16850_v41 = vpop.f32.mrb[15].mxu1  ;;  %v17334_v35 = vld [vmem:[%s19195_s29 + $0x244] ss:$8 sps:$4 sm:$0xff]   ;;  %v17332_v39 = vld [vmem:[%s19195_s29 + $0x240] ss:$8 sps:$4 sm:$0xff]  }
 0x45b   :  { %v17340_v41 = vld [vmem:[%s19195_s29 + $0x254] ss:$8 sps:$4 sm:$0xff]  }
 0x45c   :  { %14094 = vmatmul.mubr.msk.bf16.vlgmr.msra.gmra.mrb[8].mxu0 %vm930_vm3, %v1444_v40  ;;  %14095 = vmatmul.mubr.msk.bf16.vlgmr.msra.gmra.mrb[8].mxu1 %vm930_vm3, %v1444_v40  ;;  %v17335_v40 = vld [vmem:[%s19195_s29 + $0x340] ss:$8 sps:$4 sm:$0xff]  }
 0x45d   :  { %1693 = vmatprep.mubr.bf16.mxu0 %v19152_v47  ;;  %1734 = vmatprep.mubr.bf16.mxu1 %v19152_v47 }
 0x52f   :  { %v1555_v54 = vpop.f32.mrb[8].mxu0  ;;  %v1598_v55 = vpop.f32.mrb[8].mxu1 }
 0x530   :  { %v1637_v56 = vadd.f32 %v1620_v50, %v1555_v54  ;;  %v1639_v57 = vadd.f32 %v1628_v51, %v1598_v55  ;;  %v1557_v58 = vpop.f32.mrb[9].mxu0  ;;  %v1600_v59 = vpop.f32.mrb[9].mxu1  ;;  %v17347_v54 = vld [vmem:[%s19195_s29 + $0x360] ss:$8 sps:$4 sm:$0xff]   ;;  %v17352_v55 = vld [vmem:[%s19195_s29 + $0x274] ss:$8 sps:$4 sm:$0xff]  }
 0x531   :  { %v1638_v60 = vadd.f32 %v1624_v52, %v1557_v58  ;;  %v1640_v61 = vadd.f32 %v1632_v53, %v1600_v59  ;;  %v1559_v62 = vpop.f32.mrb[10].mxu0  ;;  %v1602_v63 = vpop.f32.mrb[10].mxu1  ;;  %v17353_v58 = vld [vmem:[%s19195_s29 + $0x370] ss:$8 sps:$4 sm:$0xff]   ;;  %v17358_v59 = vld [vmem:[%s19195_s29 + $0x284] ss:$8 sps:$4 sm:$0xff]  }
 0x532   :  { %v1641_v0 = vadd.f32 %v1620_v50, %v1559_v62  ;;  %v1643_v1 = vadd.f32 %v1628_v51, %v1602_v63  ;;  %v1561_v2 = vpop.f32.mrb[11].mxu0  ;;  %v1604_v3 = vpop.f32.mrb[11].mxu1  ;;  %v1645_v6 = vmax.f32 %v1637_v56, 0.0  ;;  %v1647_v7 = vmax.f32 %v1639_v57, 0.0  ;;  %v17341_v50 = vld [vmem:[%s19195_s29 + $0x350] ss:$8 sps:$4 sm:$0xff]  }
 0x533   :  { %v1642_v4 = vadd.f32 %v1624_v52, %v1561_v2  ;;  %v1644_v5 = vadd.f32 %v1632_v53, %v1604_v3  ;;  %v1646_v10 = vmax.f32 %v1638_v60, 0.0  ;;  %v1648_v11 = vmax.f32 %v1640_v61, 0.0  ;;  %v17346_v51 = vld [vmem:[%s19195_s29 + $0x264] ss:$8 sps:$4 sm:$0xff]   ;;  %v17344_v53 = vld [vmem:[%s19195_s29 + $0x260] ss:$8 sps:$4 sm:$0xff]  }
 0x534   :  { %v1649_v8 = vmax.f32 %v1641_v0, 0.0  ;;  %v1651_v9 = vmax.f32 %v1643_v1, 0.0  ;;  %v17349_v52 = vld [vmem:[%s19195_s29 + $0x364] ss:$8 sps:$4 sm:$0xff]   ;;  %v17355_v56 = vld [vmem:[%s19195_s29 + $0x374] ss:$8 sps:$4 sm:$0xff]  }
 0x535   :  { %v1650_v12 = vmax.f32 %v1642_v4, 0.0  ;;  %v1652_v13 = vmax.f32 %v1644_v5, 0.0  ;;  %v17350_v57 = vld [vmem:[%s19195_s29 + $0x270] ss:$8 sps:$4 sm:$0xff]   ;;  %v17361_v60 = vld [vmem:[%s19195_s29 + $0x384] ss:$8 sps:$4 sm:$0xff]  }
 0x536   :  { %v19508_v14 = vpack.c.bf16 %v1649_v8, %v1645_v6  ;;  %v19510_v15 = vpack.c.bf16 %v1651_v9, %v1647_v7  ;;  %v17356_v61 = vld [vmem:[%s19195_s29 + $0x280] ss:$8 sps:$4 sm:$0xff]   ;;  %v17364_v63 = vld [vmem:[%s19195_s29 + $0x294] ss:$8 sps:$4 sm:$0xff]   ;;  %v17362_v1 = vld [vmem:[%s19195_s29 + $0x290] ss:$8 sps:$4 sm:$0xff]  }
 0x537   :  { %v19512_v16 = vpack.c.bf16 %v1650_v12, %v1646_v10  ;;  %v19514_v17 = vpack.c.bf16 %v1652_v13, %v1648_v11  ;;  %v17359_v62 = vld [vmem:[%s19195_s29 + $0x380] ss:$8 sps:$4 sm:$0xff]   ;;  %v17367_v0 = vld [vmem:[%s19195_s29 + $0x394] ss:$8 sps:$4 sm:$0xff]   ;;  %v17365_v2 = vld [vmem:[%s19195_s29 + $0x390] ss:$8 sps:$4 sm:$0xff]  }
 0x538   :  { %v17370_v3 = vld [vmem:[%s19195_s29 + $0x2a4] ss:$8 sps:$4 sm:$0xff]   ;;  %v17368_v5 = vld [vmem:[%s19195_s29 + $0x2a0] ss:$8 sps:$4 sm:$0xff]   ;;  %v17376_v7 = vld [vmem:[%s19195_s29 + $0x2b4] ss:$8 sps:$4 sm:$0xff]  }
 0x539   :  { %1661 = vmatprep.subr.bf16.mxu0 %v19512_v16  ;;  %1702 = vmatprep.subr.bf16.mxu1 %v19514_v17  ;;  %v17373_v4 = vld [vmem:[%s19195_s29 + $0x3a4] ss:$8 sps:$4 sm:$0xff]   ;;  %v17371_v6 = vld [vmem:[%s19195_s29 + $0x3a0] ss:$8 sps:$4 sm:$0xff]   ;;  %v17379_v8 = vld [vmem:[%s19195_s29 + $0x3b4] ss:$8 sps:$4 sm:$0xff]  }
 0x53a   :  { %1662 = vmatpush1.bf16.msra.mxu0 %v19508_v14  ;;  %1703 = vmatpush1.bf16.msra.mxu1 %v19510_v15  ;;  %v17374_v9 = vld [vmem:[%s19195_s29 + $0x2b0] ss:$8 sps:$4 sm:$0xff]   ;;  %v17382_v11 = vld [vmem:[%s19195_s29 + $0x2c4] ss:$8 sps:$4 sm:$0xff]   ;;  %v17380_v13 = vld [vmem:[%s19195_s29 + $0x2c0] ss:$8 sps:$4 sm:$0xff]  }
 0x53b   :  { %1816 = vmatprep.subr.bf16.mxu0 %v19512_v16  ;;  %1857 = vmatprep.subr.bf16.mxu1 %v19514_v17  ;;  %v17377_v10 = vld [vmem:[%s19195_s29 + $0x3b0] ss:$8 sps:$4 sm:$0xff]   ;;  %v17385_v12 = vld [vmem:[%s19195_s29 + $0x3c4] ss:$8 sps:$4 sm:$0xff]  }
 0x53d   :  { %14096 = vmatmul.mubr.msk.bf16.vlgmr.msra.gmra.mrb[16].mxu0 %vm231_vm0, %v1657_v18  ;;  %14097 = vmatmul.mubr.msk.bf16.vlgmr.msra.gmra.mrb[16].mxu1 %vm231_vm0, %v1657_v18  ;;  %v17383_v18 = vld [vmem:[%s19195_s29 + $0x3c0] ss:$8 sps:$4 sm:$0xff]  }
 0x53e   :  { %1817 = vmatpush1.bf16.msra.mxu0 %v19508_v14  ;;  %1858 = vmatpush1.bf16.msra.mxu1 %v19510_v15 }
 0x53f   :  { %1848 = vmatprep.mubr.bf16.mxu0 %v19152_v47  ;;  %1889 = vmatprep.mubr.bf16.mxu1 %v19152_v47 }
 0x540   :  { %2287 = vmatprep.subr.bf16.mxu0 %v17310_v19  ;;  %2328 = vmatprep.subr.bf16.mxu1 %v17313_v20  ;;  %v17388_v19 = vld [vmem:[%s19195_s29 + $0x2d4] ss:$8 sps:$4 sm:$0xff]  }
 0x541   :  { %v17391_v20 = vld [vmem:[%s19195_s29 + $0x3d4] ss:$8 sps:$4 sm:$0xff]  }
 0x545   :  { %14099 = vmatmul.mubr.msk.bf16.vlgmr.msra.gmra.mrb[20].mxu0 %vm231_vm0, %v14098_v22  ;;  %14100 = vmatmul.mubr.msk.bf16.vlgmr.msra.gmra.mrb[20].mxu1 %vm231_vm0, %v14098_v22  ;;  %v17386_v22 = vld [vmem:[%s19195_s29 + $0x2d0] ss:$8 sps:$4 sm:$0xff]  }
 0x546   :  { %2288 = vmatpush1.bf16.msra.mxu0 %v17308_v23  ;;  %2329 = vmatpush1.bf16.msra.mxu1 %v17311_v24  ;;  %v17389_v23 = vld [vmem:[%s19195_s29 + $0x3d0] ss:$8 sps:$4 sm:$0xff]   ;;  %v17392_v24 = vld [vmem:[%s19195_s29 + $0x2e0] ss:$8 sps:$4 sm:$0xff]  }
 0x547   :  { %2289 = vmatprep.subr.bf16.mxu0 %v17316_v25  ;;  %2330 = vmatprep.subr.bf16.mxu1 %v17319_v27  ;;  %v17394_v25 = vld [vmem:[%s19195_s29 + $0x2e4] ss:$8 sps:$4 sm:$0xff]   ;;  %v17395_v27 = vld [vmem:[%s19195_s29 + $0x3e0] ss:$8 sps:$4 sm:$0xff]  }
 0x54a   :  { %2290 = vmatpush1.bf16.msra.mxu0 %v17314_v28  ;;  %2331 = vmatpush1.bf16.msra.mxu1 %v17317_v29  ;;  %v17397_v28 = vld [vmem:[%s19195_s29 + $0x3e4] ss:$8 sps:$4 sm:$0xff]   ;;  %v17400_v29 = vld [vmem:[%s19195_s29 + $0x2f4] ss:$8 sps:$4 sm:$0xff]  }
 0x54b   :  { %2291 = vmatprep.subr.bf16.mxu0 %v17322_v30  ;;  %2332 = vmatprep.subr.bf16.mxu1 %v17325_v26  ;;  %v17403_v30 = vld [vmem:[%s19195_s29 + $0x3f4] ss:$8 sps:$4 sm:$0xff]   ;;  %v17398_v26 = vld [vmem:[%s19195_s29 + $0x2f0] ss:$8 sps:$4 sm:$0xff]  }
 0x54e   :  { %2292 = vmatpush1.bf16.msra.mxu0 %v17320_v31  ;;  %2333 = vmatpush1.bf16.msra.mxu1 %v17323_v32  ;;  %v17401_v31 = vld [vmem:[%s19195_s29 + $0x3f0] ss:$8 sps:$4 sm:$0xff]   ;;  %v17406_v32 = vld [vmem:[%s19195_s29 + $0x4] ss:$8 sps:$4 sm:$0xff]  }
 0x54f   :  { %2293 = vmatprep.subr.bf16.mxu0 %v17328_v33  ;;  %2334 = vmatprep.subr.bf16.mxu1 %v17331_v34  ;;  %v17409_v33 = vld [vmem:[%s19195_s29 + $0x104] ss:$8 sps:$4 sm:$0xff]  }
 0x552   :  { %2294 = vmatpush1.bf16.msra.mxu0 %v17326_v36  ;;  %2335 = vmatpush1.bf16.msra.mxu1 %v17329_v37 }
 0x553   :  { %2295 = vmatprep.subr.bf16.mxu0 %v17334_v35  ;;  %2336 = vmatprep.subr.bf16.mxu1 %v17337_v38 }
 0x556   :  { %2296 = vmatpush1.bf16.msra.mxu0 %v17332_v39  ;;  %2337 = vmatpush1.bf16.msra.mxu1 %v17335_v40 }
 0x557   :  { %2297 = vmatprep.subr.bf16.mxu0 %v17340_v41  ;;  %2338 = vmatprep.subr.bf16.mxu1 %v17343_v42 }
 0x55a   :  { %2298 = vmatpush1.bf16.msra.mxu0 %v17338_v46  ;;  %2339 = vmatpush1.bf16.msra.mxu1 %v17341_v50 }
 0x55b   :  { %2299 = vmatprep.subr.bf16.mxu0 %v17346_v51  ;;  %2340 = vmatprep.subr.bf16.mxu1 %v17349_v52 }
 0x55e   :  { %2300 = vmatpush1.bf16.msra.mxu0 %v17344_v53  ;;  %2341 = vmatpush1.bf16.msra.mxu1 %v17347_v54 }
 0x55f   :  { %2301 = vmatprep.subr.bf16.mxu0 %v17352_v55  ;;  %2342 = vmatprep.subr.bf16.mxu1 %v17355_v56  ;;  %v17404_v56 = vld [vmem:[%s19195_s29] ss:$8 sps:$4 sm:$0xff]  }
 0x562   :  { %2302 = vmatpush1.bf16.msra.mxu0 %v17350_v57  ;;  %2343 = vmatpush1.bf16.msra.mxu1 %v17353_v58  ;;  %v17407_v57 = vld [vmem:[%s19195_s29 + $0x100] ss:$8 sps:$4 sm:$0xff]  }
 0x563   :  { %2303 = vmatprep.subr.bf16.mxu0 %v17358_v59  ;;  %2344 = vmatprep.subr.bf16.mxu1 %v17361_v60 }
 0x566   :  { %2304 = vmatpush1.bf16.msra.mxu0 %v17356_v61  ;;  %2345 = vmatpush1.bf16.msra.mxu1 %v17359_v62  ;;  %v17412_v62 = vld [vmem:[%s19195_s29 + $0x14] ss:$8 sps:$4 sm:$0xff]  }
 0x567   :  { %2305 = vmatprep.subr.bf16.mxu0 %v17364_v63  ;;  %2346 = vmatprep.subr.bf16.mxu1 %v17367_v0  ;;  %v17415_v63 = vld [vmem:[%s19195_s29 + $0x114] ss:$8 sps:$4 sm:$0xff]  }
 0x56a   :  { %2306 = vmatpush1.bf16.msra.mxu0 %v17362_v1  ;;  %2347 = vmatpush1.bf16.msra.mxu1 %v17365_v2  ;;  %v17410_v2 = vld [vmem:[%s19195_s29 + $0x10] ss:$8 sps:$4 sm:$0xff]  }
 0x56b   :  { %2307 = vmatprep.subr.bf16.mxu0 %v17370_v3  ;;  %2348 = vmatprep.subr.bf16.mxu1 %v17373_v4  ;;  %v17413_v3 = vld [vmem:[%s19195_s29 + $0x110] ss:$8 sps:$4 sm:$0xff]   ;;  %v17418_v4 = vld [vmem:[%s19195_s29 + $0x24] ss:$8 sps:$4 sm:$0xff]  }
 0x56e   :  { %2308 = vmatpush1.bf16.msra.mxu0 %v17368_v5  ;;  %2349 = vmatpush1.bf16.msra.mxu1 %v17371_v6  ;;  %v17421_v5 = vld [vmem:[%s19195_s29 + $0x124] ss:$8 sps:$4 sm:$0xff]   ;;  %v17416_v6 = vld [vmem:[%s19195_s29 + $0x20] ss:$8 sps:$4 sm:$0xff]  }
 0x56f   :  { %2309 = vmatprep.subr.bf16.mxu0 %v17376_v7  ;;  %2350 = vmatprep.subr.bf16.mxu1 %v17379_v8  ;;  %v17419_v7 = vld [vmem:[%s19195_s29 + $0x120] ss:$8 sps:$4 sm:$0xff]   ;;  %v17424_v8 = vld [vmem:[%s19195_s29 + $0x34] ss:$8 sps:$4 sm:$0xff]  }
 0x572   :  { %2310 = vmatpush1.bf16.msra.mxu0 %v17374_v9  ;;  %2351 = vmatpush1.bf16.msra.mxu1 %v17377_v10  ;;  %v17427_v9 = vld [vmem:[%s19195_s29 + $0x134] ss:$8 sps:$4 sm:$0xff]   ;;  %v17422_v10 = vld [vmem:[%s19195_s29 + $0x30] ss:$8 sps:$4 sm:$0xff]  }
 0x573   :  { %2311 = vmatprep.subr.bf16.mxu0 %v17382_v11  ;;  %2352 = vmatprep.subr.bf16.mxu1 %v17385_v12  ;;  %v17425_v11 = vld [vmem:[%s19195_s29 + $0x130] ss:$8 sps:$4 sm:$0xff]   ;;  %v17430_v12 = vld [vmem:[%s19195_s29 + $0x44] ss:$8 sps:$4 sm:$0xff]  }
 0x576   :  { %2312 = vmatpush1.bf16.msra.mxu0 %v17380_v13  ;;  %2353 = vmatpush1.bf16.msra.mxu1 %v17383_v18  ;;  %v17433_v13 = vld [vmem:[%s19195_s29 + $0x144] ss:$8 sps:$4 sm:$0xff]   ;;  %v17428_v18 = vld [vmem:[%s19195_s29 + $0x40] ss:$8 sps:$4 sm:$0xff]  }
 0x577   :  { %2313 = vmatprep.subr.bf16.mxu0 %v17388_v19  ;;  %2354 = vmatprep.subr.bf16.mxu1 %v17391_v20  ;;  %v17431_v19 = vld [vmem:[%s19195_s29 + $0x140] ss:$8 sps:$4 sm:$0xff]   ;;  %v17436_v20 = vld [vmem:[%s19195_s29 + $0x54] ss:$8 sps:$4 sm:$0xff]  }
 0x57a   :  { %2314 = vmatpush1.bf16.msra.mxu0 %v17386_v22  ;;  %2355 = vmatpush1.bf16.msra.mxu1 %v17389_v23  ;;  %v17439_v22 = vld [vmem:[%s19195_s29 + $0x154] ss:$8 sps:$4 sm:$0xff]   ;;  %v17434_v23 = vld [vmem:[%s19195_s29 + $0x50] ss:$8 sps:$4 sm:$0xff]  }
 0x57b   :  { %2315 = vmatprep.subr.bf16.mxu0 %v17394_v25  ;;  %2356 = vmatprep.subr.bf16.mxu1 %v17397_v28  ;;  %v17442_v25 = vld [vmem:[%s19195_s29 + $0x64] ss:$8 sps:$4 sm:$0xff]   ;;  %v17440_v28 = vld [vmem:[%s19195_s29 + $0x60] ss:$8 sps:$4 sm:$0xff]  }
 0x57e   :  { %2316 = vmatpush1.bf16.msra.mxu0 %v17392_v24  ;;  %2357 = vmatpush1.bf16.msra.mxu1 %v17395_v27  ;;  %v17437_v24 = vld [vmem:[%s19195_s29 + $0x150] ss:$8 sps:$4 sm:$0xff]   ;;  %v17445_v27 = vld [vmem:[%s19195_s29 + $0x164] ss:$8 sps:$4 sm:$0xff]  }
 0x57f   :  { %2317 = vmatprep.subr.bf16.mxu0 %v17400_v29  ;;  %2358 = vmatprep.subr.bf16.mxu1 %v17403_v30  ;;  %v17443_v29 = vld [vmem:[%s19195_s29 + $0x160] ss:$8 sps:$4 sm:$0xff]   ;;  %v17448_v30 = vld [vmem:[%s19195_s29 + $0x74] ss:$8 sps:$4 sm:$0xff]  }
 0x582   :  { %2318 = vmatpush1.bf16.msra.mxu0 %v17398_v26  ;;  %2359 = vmatpush1.bf16.msra.mxu1 %v17401_v31  ;;  %v17451_v26 = vld [vmem:[%s19195_s29 + $0x174] ss:$8 sps:$4 sm:$0xff]   ;;  %v17446_v31 = vld [vmem:[%s19195_s29 + $0x70] ss:$8 sps:$4 sm:$0xff]  }
 0x583   :  { %2689 = vmatprep.subr.bf16.mxu0 %v17406_v32  ;;  %2730 = vmatprep.subr.bf16.mxu1 %v17409_v33  ;;  %v17449_v32 = vld [vmem:[%s19195_s29 + $0x170] ss:$8 sps:$4 sm:$0xff]   ;;  %v17454_v33 = vld [vmem:[%s19195_s29 + $0x84] ss:$8 sps:$4 sm:$0xff]  }
 0x610   :  { %v19598_v34 = vpop.f32.mrb[16].mxu0  ;;  %v19600_v36 = vpop.f32.mrb[16].mxu1 }
 0x611   :  { %v1697_v37 = vpop.f32.mrb[17].mxu0  ;;  %v1738_v35 = vpop.f32.mrb[17].mxu1 }
 0x612   :  { %v1699_v38 = vpop.f32.mrb[18].mxu0  ;;  %v1740_v39 = vpop.f32.mrb[18].mxu1  ;;  %v1744_v0 = vpack.c.bf16 %v1697_v37, %v1697_v37  ;;  %v1746_v1 = vpack.c.bf16 %v1738_v35, %v1738_v35  ;;  %v17457_v37 = vld [vmem:[%s19195_s29 + $0x184] ss:$8 sps:$4 sm:$0xff]   ;;  %v17452_v35 = vld [vmem:[%s19195_s29 + $0x80] ss:$8 sps:$4 sm:$0xff]  }
 0x613   :  { %v1700_v40 = vpop.f32.mrb[19].mxu0  ;;  %v1741_v41 = vpop.f32.mrb[19].mxu1  ;;  %v17455_v38 = vld [vmem:[%s19195_s29 + $0x180] ss:$8 sps:$4 sm:$0xff]   ;;  %v17460_v39 = vld [vmem:[%s19195_s29 + $0x94] ss:$8 sps:$4 sm:$0xff]  }
 0x614   :  { %v17463_v40 = vld [vmem:[%s19195_s29 + $0x194] ss:$8 sps:$4 sm:$0xff]   ;;  %v17458_v41 = vld [vmem:[%s19195_s29 + $0x90] ss:$8 sps:$4 sm:$0xff]  }
 0x618   :  { %v1850_v42 = vpop.f32.mrb[20].mxu0  ;;  %v1891_v46 = vpop.f32.mrb[20].mxu1 }
 0x619   :  { %v1852_v50 = vpop.f32.mrb[21].mxu0  ;;  %v1893_v51 = vpop.f32.mrb[21].mxu1  ;;  %v1898_v58 = vpack.c.bf16 %v1850_v42, %v1850_v42  ;;  %v1900_v59 = vpack.c.bf16 %v1891_v46, %v1891_v46  ;;  %v17461_v42 = vld [vmem:[%s19195_s29 + $0x190] ss:$8 sps:$4 sm:$0xff]   ;;  %v17466_v46 = vld [vmem:[%s19195_s29 + $0xa4] ss:$8 sps:$4 sm:$0xff]  }
 0x61a   :  { %v1899_v52 = vpack.c.bf16 %v1852_v50, %v1852_v50  ;;  %v1901_v53 = vpack.c.bf16 %v1893_v51, %v1893_v51  ;;  %v1854_v54 = vpop.f32.mrb[22].mxu0  ;;  %v1895_v55 = vpop.f32.mrb[22].mxu1  ;;  %v17469_v50 = vld [vmem:[%s19195_s29 + $0x1a4] ss:$8 sps:$4 sm:$0xff]   ;;  %v17464_v51 = vld [vmem:[%s19195_s29 + $0xa0] ss:$8 sps:$4 sm:$0xff]  }
 0x61b   :  { %v1855_v60 = vpop.f32.mrb[23].mxu0  ;;  %v1896_v61 = vpop.f32.mrb[23].mxu1  ;;  %v17475_v54 = vld [vmem:[%s19195_s29 + $0x1b4] ss:$8 sps:$4 sm:$0xff]   ;;  %v17470_v55 = vld [vmem:[%s19195_s29 + $0xb0] ss:$8 sps:$4 sm:$0xff]  }
 0x61c   :  { %2319 = vmatprep.mubr.bf16.mxu0 %v1899_v52  ;;  %2360 = vmatprep.mubr.bf16.mxu1 %v1901_v53  ;;  %v17467_v52 = vld [vmem:[%s19195_s29 + $0x1a0] ss:$8 sps:$4 sm:$0xff]   ;;  %v17472_v53 = vld [vmem:[%s19195_s29 + $0xb4] ss:$8 sps:$4 sm:$0xff]  }
 0x61d   :  { %2320 = vmatmul.mubr.bf16.vlgmr.msra.gmra.mrb[24].mxu0 %v1898_v58  ;;  %2361 = vmatmul.mubr.bf16.vlgmr.msra.gmra.mrb[24].mxu1 %v1900_v59  ;;  %v17481_v58 = vld [vmem:[%s19195_s29 + $0x1c4] ss:$8 sps:$4 sm:$0xff]   ;;  %v17476_v59 = vld [vmem:[%s19195_s29 + $0xc0] ss:$8 sps:$4 sm:$0xff]   ;;  %v17484_v61 = vld [vmem:[%s19195_s29 + $0xd4] ss:$8 sps:$4 sm:$0xff]  }
 0x61e   :  { %2690 = vmatpush1.bf16.msra.mxu0 %v17404_v56  ;;  %2731 = vmatpush1.bf16.msra.mxu1 %v17407_v57  ;;  %v17473_v56 = vld [vmem:[%s19195_s29 + $0x1b0] ss:$8 sps:$4 sm:$0xff]   ;;  %v17478_v57 = vld [vmem:[%s19195_s29 + $0xc4] ss:$8 sps:$4 sm:$0xff]   ;;  %v17479_v60 = vld [vmem:[%s19195_s29 + $0x1c0] ss:$8 sps:$4 sm:$0xff]  }
 0x61f   :  { %2721 = vmatprep.mubr.bf16.mxu0 %v1744_v0  ;;  %2762 = vmatprep.mubr.bf16.mxu1 %v1746_v1  ;;  %v17485_v0 = vld [vmem:[%s19195_s29 + $0x1d0] ss:$8 sps:$4 sm:$0xff]   ;;  %v17490_v1 = vld [vmem:[%s19195_s29 + $0xe4] ss:$8 sps:$4 sm:$0xff]  }
 0x620   :  { %2691 = vmatprep.subr.bf16.mxu0 %v17412_v62  ;;  %2732 = vmatprep.subr.bf16.mxu1 %v17415_v63  ;;  %v17487_v62 = vld [vmem:[%s19195_s29 + $0x1d4] ss:$8 sps:$4 sm:$0xff]   ;;  %v17482_v63 = vld [vmem:[%s19195_s29 + $0xd0] ss:$8 sps:$4 sm:$0xff]  }
 0x622   :  { %2692 = vmatpush1.bf16.msra.mxu0 %v17410_v2  ;;  %2733 = vmatpush1.bf16.msra.mxu1 %v17413_v3  ;;  %v17493_v2 = vld [vmem:[%s19195_s29 + $0x1e4] ss:$8 sps:$4 sm:$0xff]   ;;  %v17488_v3 = vld [vmem:[%s19195_s29 + $0xe0] ss:$8 sps:$4 sm:$0xff]  }
 0x623   :  { %2693 = vmatprep.subr.bf16.mxu0 %v17418_v4  ;;  %2734 = vmatprep.subr.bf16.mxu1 %v17421_v5  ;;  %v17491_v4 = vld [vmem:[%s19195_s29 + $0x1e0] ss:$8 sps:$4 sm:$0xff]   ;;  %v17496_v5 = vld [vmem:[%s19195_s29 + $0xf4] ss:$8 sps:$4 sm:$0xff]  }
 0x626   :  { %2694 = vmatpush1.bf16.msra.mxu0 %v17416_v6  ;;  %2735 = vmatpush1.bf16.msra.mxu1 %v17419_v7  ;;  %v17499_v6 = vld [vmem:[%s19195_s29 + $0x1f4] ss:$8 sps:$4 sm:$0xff]   ;;  %v17494_v7 = vld [vmem:[%s19195_s29 + $0xf0] ss:$8 sps:$4 sm:$0xff]  }
 0x627   :  { %2695 = vmatprep.subr.bf16.mxu0 %v17424_v8  ;;  %2736 = vmatprep.subr.bf16.mxu1 %v17427_v9  ;;  %v17497_v8 = vld [vmem:[%s19195_s29 + $0x1f0] ss:$8 sps:$4 sm:$0xff]   ;;  %v1743_v9 = vpack.c.bf16 %v19598_v34, %v19598_v34  ;;  %v17500_v34 = vld [vmem:[%s19195_s29 + $0x400] ss:$8 sps:$4 sm:$0xff]  }
 0x62a   :  { %2696 = vmatpush1.bf16.msra.mxu0 %v17422_v10  ;;  %2737 = vmatpush1.bf16.msra.mxu1 %v17425_v11  ;;  %v1745_v10 = vpack.c.bf16 %v19600_v36, %v19600_v36  ;;  %v17502_v11 = vld [vmem:[%s19195_s29 + $0x404] ss:$8 sps:$4 sm:$0xff]   ;;  %v17503_v36 = vld [vmem:[%s19195_s29 + $0x500] ss:$8 sps:$4 sm:$0xff]  }
 0x62b   :  { %2697 = vmatprep.subr.bf16.mxu0 %v17430_v12  ;;  %2738 = vmatprep.subr.bf16.mxu1 %v17433_v13  ;;  %v17505_v12 = vld [vmem:[%s19195_s29 + $0x504] ss:$8 sps:$4 sm:$0xff]   ;;  %v14293_v13 = vld [vmem:[%s19190_s25 + $0x8] sm:$0xf] }
 0x62e   :  { %2698 = vmatpush1.bf16.msra.mxu0 %v17428_v18  ;;  %2739 = vmatpush1.bf16.msra.mxu1 %v17431_v19  ;;  %v17508_v18 = vld [vmem:[%s19195_s29 + $0x414] ss:$8 sps:$4 sm:$0xff]  }
 0x62f   :  { %2699 = vmatprep.subr.bf16.mxu0 %v17436_v20  ;;  %2740 = vmatprep.subr.bf16.mxu1 %v17439_v22  ;;  %v17511_v19 = vld [vmem:[%s19195_s29 + $0x514] ss:$8 sps:$4 sm:$0xff]   ;;  %v17506_v20 = vld [vmem:[%s19195_s29 + $0x410] ss:$8 sps:$4 sm:$0xff]  }
 0x630   :  { %v17509_v22 = vld [vmem:[%s19195_s29 + $0x510] ss:$8 sps:$4 sm:$0xff]  }
 0x632   :  { %2700 = vmatpush1.bf16.msra.mxu0 %v17434_v23  ;;  %2741 = vmatpush1.bf16.msra.mxu1 %v17437_v24  ;;  %v17514_v23 = vld [vmem:[%s19195_s29 + $0x424] ss:$8 sps:$4 sm:$0xff]  }
 0x633   :  { %2701 = vmatprep.subr.bf16.mxu0 %v17442_v25  ;;  %2742 = vmatprep.subr.bf16.mxu1 %v17445_v27  ;;  %v17517_v24 = vld [vmem:[%s19195_s29 + $0x524] ss:$8 sps:$4 sm:$0xff]   ;;  %v17512_v25 = vld [vmem:[%s19195_s29 + $0x420] ss:$8 sps:$4 sm:$0xff]  }
 0x634   :  { %v17515_v27 = vld [vmem:[%s19195_s29 + $0x520] ss:$8 sps:$4 sm:$0xff]  }
 0x636   :  { %2702 = vmatpush1.bf16.msra.mxu0 %v17440_v28  ;;  %2743 = vmatpush1.bf16.msra.mxu1 %v17443_v29  ;;  %v17520_v28 = vld [vmem:[%s19195_s29 + $0x434] ss:$8 sps:$4 sm:$0xff]  }
 0x637   :  { %2703 = vmatprep.subr.bf16.mxu0 %v17448_v30  ;;  %2744 = vmatprep.subr.bf16.mxu1 %v17451_v26  ;;  %v17523_v29 = vld [vmem:[%s19195_s29 + $0x534] ss:$8 sps:$4 sm:$0xff]   ;;  %v17518_v30 = vld [vmem:[%s19195_s29 + $0x430] ss:$8 sps:$4 sm:$0xff]  }
 0x638   :  { %v17521_v26 = vld [vmem:[%s19195_s29 + $0x530] ss:$8 sps:$4 sm:$0xff]  }
 0x63a   :  { %2704 = vmatpush1.bf16.msra.mxu0 %v17446_v31  ;;  %2745 = vmatpush1.bf16.msra.mxu1 %v17449_v32  ;;  %v17526_v31 = vld [vmem:[%s19195_s29 + $0x444] ss:$8 sps:$4 sm:$0xff]  }
 0x63b   :  { %2705 = vmatprep.subr.bf16.mxu0 %v17454_v33  ;;  %2746 = vmatprep.subr.bf16.mxu1 %v17457_v37  ;;  %v17529_v32 = vld [vmem:[%s19195_s29 + $0x544] ss:$8 sps:$4 sm:$0xff]   ;;  %v17524_v33 = vld [vmem:[%s19195_s29 + $0x440] ss:$8 sps:$4 sm:$0xff]  }
 0x63c   :  { %v17527_v37 = vld [vmem:[%s19195_s29 + $0x540] ss:$8 sps:$4 sm:$0xff]  }
 0x63e   :  { %2706 = vmatpush1.bf16.msra.mxu0 %v17452_v35  ;;  %2747 = vmatpush1.bf16.msra.mxu1 %v17455_v38  ;;  %v17532_v35 = vld [vmem:[%s19195_s29 + $0x454] ss:$8 sps:$4 sm:$0xff]  }
 0x63f   :  { %2707 = vmatprep.subr.bf16.mxu0 %v17460_v39  ;;  %2748 = vmatprep.subr.bf16.mxu1 %v17463_v40  ;;  %v17535_v38 = vld [vmem:[%s19195_s29 + $0x554] ss:$8 sps:$4 sm:$0xff]   ;;  %v17530_v39 = vld [vmem:[%s19195_s29 + $0x450] ss:$8 sps:$4 sm:$0xff]  }
 0x640   :  { %v17533_v40 = vld [vmem:[%s19195_s29 + $0x550] ss:$8 sps:$4 sm:$0xff]  }
 0x642   :  { %2708 = vmatpush1.bf16.msra.mxu0 %v17458_v41  ;;  %2749 = vmatpush1.bf16.msra.mxu1 %v17461_v42  ;;  %v17538_v41 = vld [vmem:[%s19195_s29 + $0x464] ss:$8 sps:$4 sm:$0xff]  }
 0x643   :  { %2709 = vmatprep.subr.bf16.mxu0 %v17466_v46  ;;  %2750 = vmatprep.subr.bf16.mxu1 %v17469_v50  ;;  %v17541_v42 = vld [vmem:[%s19195_s29 + $0x564] ss:$8 sps:$4 sm:$0xff]   ;;  %v17536_v46 = vld [vmem:[%s19195_s29 + $0x460] ss:$8 sps:$4 sm:$0xff]  }
 0x644   :  { %v17539_v50 = vld [vmem:[%s19195_s29 + $0x560] ss:$8 sps:$4 sm:$0xff]  }
 0x646   :  { %2710 = vmatpush1.bf16.msra.mxu0 %v17464_v51  ;;  %2751 = vmatpush1.bf16.msra.mxu1 %v17467_v52  ;;  %v17544_v51 = vld [vmem:[%s19195_s29 + $0x474] ss:$8 sps:$4 sm:$0xff]  }
 0x647   :  { %2711 = vmatprep.subr.bf16.mxu0 %v17472_v53  ;;  %2752 = vmatprep.subr.bf16.mxu1 %v17475_v54  ;;  %v17547_v52 = vld [vmem:[%s19195_s29 + $0x574] ss:$8 sps:$4 sm:$0xff]   ;;  %v17542_v53 = vld [vmem:[%s19195_s29 + $0x470] ss:$8 sps:$4 sm:$0xff]  }
 0x648   :  { %v17545_v54 = vld [vmem:[%s19195_s29 + $0x570] ss:$8 sps:$4 sm:$0xff]  }
 0x64a   :  { %2712 = vmatpush1.bf16.msra.mxu0 %v17470_v55  ;;  %2753 = vmatpush1.bf16.msra.mxu1 %v17473_v56  ;;  %v17550_v55 = vld [vmem:[%s19195_s29 + $0x484] ss:$8 sps:$4 sm:$0xff]  }
 0x64b   :  { %2713 = vmatprep.subr.bf16.mxu0 %v17478_v57  ;;  %2754 = vmatprep.subr.bf16.mxu1 %v17481_v58  ;;  %v17553_v56 = vld [vmem:[%s19195_s29 + $0x584] ss:$8 sps:$4 sm:$0xff]   ;;  %v17548_v57 = vld [vmem:[%s19195_s29 + $0x480] ss:$8 sps:$4 sm:$0xff]  }
 0x64c   :  { %v17551_v58 = vld [vmem:[%s19195_s29 + $0x580] ss:$8 sps:$4 sm:$0xff]  }
 0x64e   :  { %2714 = vmatpush1.bf16.msra.mxu0 %v17476_v59  ;;  %2755 = vmatpush1.bf16.msra.mxu1 %v17479_v60  ;;  %v17556_v59 = vld [vmem:[%s19195_s29 + $0x494] ss:$8 sps:$4 sm:$0xff]  }
 0x64f   :  { %2715 = vmatprep.subr.bf16.mxu0 %v17484_v61  ;;  %2756 = vmatprep.subr.bf16.mxu1 %v17487_v62  ;;  %v17559_v60 = vld [vmem:[%s19195_s29 + $0x594] ss:$8 sps:$4 sm:$0xff]   ;;  %v17554_v61 = vld [vmem:[%s19195_s29 + $0x490] ss:$8 sps:$4 sm:$0xff]  }
 0x650   :  { %v17557_v62 = vld [vmem:[%s19195_s29 + $0x590] ss:$8 sps:$4 sm:$0xff]  }
 0x652   :  { %2716 = vmatpush1.bf16.msra.mxu0 %v17482_v63  ;;  %2757 = vmatpush1.bf16.msra.mxu1 %v17485_v0  ;;  %v17562_v63 = vld [vmem:[%s19195_s29 + $0x4a4] ss:$8 sps:$4 sm:$0xff]  }
 0x653   :  { %2717 = vmatprep.subr.bf16.mxu0 %v17490_v1  ;;  %2758 = vmatprep.subr.bf16.mxu1 %v17493_v2  ;;  %v17565_v0 = vld [vmem:[%s19195_s29 + $0x5a4] ss:$8 sps:$4 sm:$0xff]   ;;  %v17560_v1 = vld [vmem:[%s19195_s29 + $0x4a0] ss:$8 sps:$4 sm:$0xff]  }
 0x654   :  { %v17563_v2 = vld [vmem:[%s19195_s29 + $0x5a0] ss:$8 sps:$4 sm:$0xff]  }
 0x656   :  { %2718 = vmatpush1.bf16.msra.mxu0 %v17488_v3  ;;  %2759 = vmatpush1.bf16.msra.mxu1 %v17491_v4  ;;  %v17568_v3 = vld [vmem:[%s19195_s29 + $0x4b4] ss:$8 sps:$4 sm:$0xff]  }
 0x657   :  { %2719 = vmatprep.subr.bf16.mxu0 %v17496_v5  ;;  %2760 = vmatprep.subr.bf16.mxu1 %v17499_v6  ;;  %v17571_v4 = vld [vmem:[%s19195_s29 + $0x5b4] ss:$8 sps:$4 sm:$0xff]   ;;  %v17566_v5 = vld [vmem:[%s19195_s29 + $0x4b0] ss:$8 sps:$4 sm:$0xff]  }
 0x658   :  { %v17569_v6 = vld [vmem:[%s19195_s29 + $0x5b0] ss:$8 sps:$4 sm:$0xff]  }
 0x65a   :  { %2720 = vmatpush1.bf16.msra.mxu0 %v17494_v7  ;;  %2761 = vmatpush1.bf16.msra.mxu1 %v17497_v8  ;;  %v17574_v7 = vld [vmem:[%s19195_s29 + $0x4c4] ss:$8 sps:$4 sm:$0xff]  }
 0x65b   :  { %2776 = vmatprep.subr.bf16.mxu0 %v19512_v16  ;;  %2817 = vmatprep.subr.bf16.mxu1 %v19514_v17  ;;  %v17577_v8 = vld [vmem:[%s19195_s29 + $0x5c4] ss:$8 sps:$4 sm:$0xff]  }
 0x65d   :  { %2722 = vmatmul.mubr.bf16.vlgmr.msra.gmra.mrb[28].mxu0 %v1743_v9  ;;  %2763 = vmatmul.mubr.bf16.vlgmr.msra.gmra.mrb[28].mxu1 %v1745_v10  ;;  %v17572_v9 = vld [vmem:[%s19195_s29 + $0x4c0] ss:$8 sps:$4 sm:$0xff]  }
 0x65e   :  { %2777 = vmatpush1.bf16.msra.mxu0 %v19508_v14  ;;  %2818 = vmatpush1.bf16.msra.mxu1 %v19510_v15  ;;  %v17575_v10 = vld [vmem:[%s19195_s29 + $0x5c0] ss:$8 sps:$4 sm:$0xff]  }
 0x65f   :  { %2808 = vmatprep.mubr.bf16.mxu0 %v19152_v47  ;;  %2849 = vmatprep.mubr.bf16.mxu1 %v19152_v47 }
 0x660   :  { %3247 = vmatprep.subr.bf16.mxu0 %v17502_v11  ;;  %3288 = vmatprep.subr.bf16.mxu1 %v17505_v12  ;;  %v17580_v11 = vld [vmem:[%s19195_s29 + $0x4d4] ss:$8 sps:$4 sm:$0xff]  }
 0x661   :  { %v17583_v12 = vld [vmem:[%s19195_s29 + $0x5d4] ss:$8 sps:$4 sm:$0xff]  }
 0x665   :  { %14294 = vmatmul.mubr.msk.bf16.vlgmr.msra.gmra.mrb[32].mxu0 %vm231_vm0, %v14293_v13  ;;  %14295 = vmatmul.mubr.msk.bf16.vlgmr.msra.gmra.mrb[32].mxu1 %vm231_vm0, %v14293_v13  ;;  %v17586_v13 = vld [vmem:[%s19195_s29 + $0x4e4] ss:$8 sps:$4 sm:$0xff]  }
 0x666   :  { %3248 = vmatpush1.bf16.msra.mxu0 %v17500_v34  ;;  %3289 = vmatpush1.bf16.msra.mxu1 %v17503_v36  ;;  %v17578_v34 = vld [vmem:[%s19195_s29 + $0x4d0] ss:$8 sps:$4 sm:$0xff]  }
 0x667   :  { %3249 = vmatprep.subr.bf16.mxu0 %v17508_v18  ;;  %3290 = vmatprep.subr.bf16.mxu1 %v17511_v19  ;;  %v17581_v36 = vld [vmem:[%s19195_s29 + $0x5d0] ss:$8 sps:$4 sm:$0xff]   ;;  %v17589_v18 = vld [vmem:[%s19195_s29 + $0x5e4] ss:$8 sps:$4 sm:$0xff]   ;;  %v17584_v19 = vld [vmem:[%s19195_s29 + $0x4e0] ss:$8 sps:$4 sm:$0xff]  }
 0x66a   :  { %3250 = vmatpush1.bf16.msra.mxu0 %v17506_v20  ;;  %3291 = vmatpush1.bf16.msra.mxu1 %v17509_v22  ;;  %v17587_v20 = vld [vmem:[%s19195_s29 + $0x5e0] ss:$8 sps:$4 sm:$0xff]   ;;  %v17592_v22 = vld [vmem:[%s19195_s29 + $0x4f4] ss:$8 sps:$4 sm:$0xff]  }
 0x66b   :  { %3251 = vmatprep.subr.bf16.mxu0 %v17514_v23  ;;  %3292 = vmatprep.subr.bf16.mxu1 %v17517_v24  ;;  %v17595_v23 = vld [vmem:[%s19195_s29 + $0x5f4] ss:$8 sps:$4 sm:$0xff]   ;;  %v17590_v24 = vld [vmem:[%s19195_s29 + $0x4f0] ss:$8 sps:$4 sm:$0xff]  }
 0x66e   :  { %3252 = vmatpush1.bf16.msra.mxu0 %v17512_v25  ;;  %3293 = vmatpush1.bf16.msra.mxu1 %v17515_v27  ;;  %v17593_v25 = vld [vmem:[%s19195_s29 + $0x5f0] ss:$8 sps:$4 sm:$0xff]  }
 0x66f   :  { %3253 = vmatprep.subr.bf16.mxu0 %v17520_v28  ;;  %3294 = vmatprep.subr.bf16.mxu1 %v17523_v29 }
 0x672   :  { %3254 = vmatpush1.bf16.msra.mxu0 %v17518_v30  ;;  %3295 = vmatpush1.bf16.msra.mxu1 %v17521_v26 }
 0x673   :  { %3255 = vmatprep.subr.bf16.mxu0 %v17526_v31  ;;  %3296 = vmatprep.subr.bf16.mxu1 %v17529_v32 }
 0x676   :  { %3256 = vmatpush1.bf16.msra.mxu0 %v17524_v33  ;;  %3297 = vmatpush1.bf16.msra.mxu1 %v17527_v37 }
 0x677   :  { %3257 = vmatprep.subr.bf16.mxu0 %v17532_v35  ;;  %3298 = vmatprep.subr.bf16.mxu1 %v17535_v38 }
 0x67a   :  { %3258 = vmatpush1.bf16.msra.mxu0 %v17530_v39  ;;  %3299 = vmatpush1.bf16.msra.mxu1 %v17533_v40 }
 0x67b   :  { %3259 = vmatprep.subr.bf16.mxu0 %v17538_v41  ;;  %3300 = vmatprep.subr.bf16.mxu1 %v17541_v42 }
 0x67e   :  { %3260 = vmatpush1.bf16.msra.mxu0 %v17536_v46  ;;  %3301 = vmatpush1.bf16.msra.mxu1 %v17539_v50 }
 0x67f   :  { %3261 = vmatprep.subr.bf16.mxu0 %v17544_v51  ;;  %3302 = vmatprep.subr.bf16.mxu1 %v17547_v52 }
 0x682   :  { %3262 = vmatpush1.bf16.msra.mxu0 %v17542_v53  ;;  %3303 = vmatpush1.bf16.msra.mxu1 %v17545_v54 }
 0x683   :  { %3263 = vmatprep.subr.bf16.mxu0 %v17550_v55  ;;  %3304 = vmatprep.subr.bf16.mxu1 %v17553_v56 }
 0x686   :  { %3264 = vmatpush1.bf16.msra.mxu0 %v17548_v57  ;;  %3305 = vmatpush1.bf16.msra.mxu1 %v17551_v58 }
 0x687   :  { %3265 = vmatprep.subr.bf16.mxu0 %v17556_v59  ;;  %3306 = vmatprep.subr.bf16.mxu1 %v17559_v60 }
 0x68a   :  { %3266 = vmatpush1.bf16.msra.mxu0 %v17554_v61  ;;  %3307 = vmatpush1.bf16.msra.mxu1 %v17557_v62 }
 0x68b   :  { %3267 = vmatprep.subr.bf16.mxu0 %v17562_v63  ;;  %3308 = vmatprep.subr.bf16.mxu1 %v17565_v0 }
 0x68e   :  { %3268 = vmatpush1.bf16.msra.mxu0 %v17560_v1  ;;  %3309 = vmatpush1.bf16.msra.mxu1 %v17563_v2  ;;  %v17598_v2 = vld [vmem:[%s19195_s29 + $0x604] ss:$8 sps:$4 sm:$0xff]  }
 0x68f   :  { %3269 = vmatprep.subr.bf16.mxu0 %v17568_v3  ;;  %3310 = vmatprep.subr.bf16.mxu1 %v17571_v4  ;;  %v17601_v3 = vld [vmem:[%s19195_s29 + $0x704] ss:$8 sps:$4 sm:$0xff]  }
 0x690   :  { %v14424_v4 = vld [vmem:[%s19190_s25 + $0xc] sm:$0xf]  ;;  %s19153_s25 = smov 120  }
 0x692   :  { %3270 = vmatpush1.bf16.msra.mxu0 %v17566_v5  ;;  %3311 = vmatpush1.bf16.msra.mxu1 %v17569_v6  ;;  %v17596_v5 = vld [vmem:[%s19195_s29 + $0x600] ss:$8 sps:$4 sm:$0xff]  }
 0x693   :  { %3271 = vmatprep.subr.bf16.mxu0 %v17574_v7  ;;  %3312 = vmatprep.subr.bf16.mxu1 %v17577_v8  ;;  %v17599_v6 = vld [vmem:[%s19195_s29 + $0x700] ss:$8 sps:$4 sm:$0xff]   ;;  %v17604_v7 = vld [vmem:[%s19195_s29 + $0x614] ss:$8 sps:$4 sm:$0xff]  }
 0x694   :  { %v17607_v8 = vld [vmem:[%s19195_s29 + $0x714] ss:$8 sps:$4 sm:$0xff]  }
 0x696   :  { %3272 = vmatpush1.bf16.msra.mxu0 %v17572_v9  ;;  %3313 = vmatpush1.bf16.msra.mxu1 %v17575_v10  ;;  %v17610_v9 = vld [vmem:[%s19195_s29 + $0x624] ss:$8 sps:$4 sm:$0xff]  }
 0x697   :  { %3273 = vmatprep.subr.bf16.mxu0 %v17580_v11  ;;  %3314 = vmatprep.subr.bf16.mxu1 %v17583_v12  ;;  %v17613_v10 = vld [vmem:[%s19195_s29 + $0x724] ss:$8 sps:$4 sm:$0xff]   ;;  %v17608_v11 = vld [vmem:[%s19195_s29 + $0x620] ss:$8 sps:$4 sm:$0xff]  }
 0x698   :  { %v17611_v12 = vld [vmem:[%s19195_s29 + $0x720] ss:$8 sps:$4 sm:$0xff]  }
 0x69a   :  { %3274 = vmatpush1.bf16.msra.mxu0 %v17578_v34  ;;  %3315 = vmatpush1.bf16.msra.mxu1 %v17581_v36  ;;  %v17616_v34 = vld [vmem:[%s19195_s29 + $0x634] ss:$8 sps:$4 sm:$0xff]  }
 0x69b   :  { %3275 = vmatprep.subr.bf16.mxu0 %v17586_v13  ;;  %3316 = vmatprep.subr.bf16.mxu1 %v17589_v18  ;;  %v17619_v36 = vld [vmem:[%s19195_s29 + $0x734] ss:$8 sps:$4 sm:$0xff]   ;;  %v17614_v13 = vld [vmem:[%s19195_s29 + $0x630] ss:$8 sps:$4 sm:$0xff]  }
 0x69c   :  { %v17617_v18 = vld [vmem:[%s19195_s29 + $0x730] ss:$8 sps:$4 sm:$0xff]  }
 0x69e   :  { %3276 = vmatpush1.bf16.msra.mxu0 %v17584_v19  ;;  %3317 = vmatpush1.bf16.msra.mxu1 %v17587_v20  ;;  %v17622_v19 = vld [vmem:[%s19195_s29 + $0x644] ss:$8 sps:$4 sm:$0xff]  }
 0x69f   :  { %3277 = vmatprep.subr.bf16.mxu0 %v17592_v22  ;;  %3318 = vmatprep.subr.bf16.mxu1 %v17595_v23  ;;  %v17625_v20 = vld [vmem:[%s19195_s29 + $0x744] ss:$8 sps:$4 sm:$0xff]   ;;  %v17620_v22 = vld [vmem:[%s19195_s29 + $0x640] ss:$8 sps:$4 sm:$0xff]  }
 0x6a0   :  { %v17623_v23 = vld [vmem:[%s19195_s29 + $0x740] ss:$8 sps:$4 sm:$0xff]  }
 0x6a2   :  { %3278 = vmatpush1.bf16.msra.mxu0 %v17590_v24  ;;  %3319 = vmatpush1.bf16.msra.mxu1 %v17593_v25  ;;  %v17628_v24 = vld [vmem:[%s19195_s29 + $0x654] ss:$8 sps:$4 sm:$0xff]  }
 0x6a3   :  { %3336 = vmatprep.subr.bf16.mxu0 %v19512_v16  ;;  %3377 = vmatprep.subr.bf16.mxu1 %v19514_v17  ;;  %v17631_v25 = vld [vmem:[%s19195_s29 + $0x754] ss:$8 sps:$4 sm:$0xff]  }
 0x6f0   :  { %v2321_v27 = vpop.f32.mrb[24].mxu0  ;;  %v2362_v28 = vpop.f32.mrb[24].mxu1 }
 0x6f1   :  { %v2363_v29 = vadd.f32 %v2362_v28, %v2321_v27  ;;  %v2323_v30 = vpop.f32.mrb[25].mxu0  ;;  %v2364_v26 = vpop.f32.mrb[25].mxu1  ;;  %v17626_v27 = vld [vmem:[%s19195_s29 + $0x650] ss:$8 sps:$4 sm:$0xff]  }
 0x6f2   :  { %v2365_v31 = vadd.f32 %v2364_v26, %v2323_v30  ;;  %v2325_v32 = vpop.f32.mrb[26].mxu0  ;;  %v2366_v33 = vpop.f32.mrb[26].mxu1  ;;  %v17629_v28 = vld [vmem:[%s19195_s29 + $0x750] ss:$8 sps:$4 sm:$0xff]   ;;  %v17637_v30 = vld [vmem:[%s19195_s29 + $0x764] ss:$8 sps:$4 sm:$0xff]  }
 0x6f3   :  { %v2326_v37 = vpop.f32.mrb[27].mxu0  ;;  %v2367_v35 = vpop.f32.mrb[27].mxu1  ;;  %v17632_v26 = vld [vmem:[%s19195_s29 + $0x660] ss:$8 sps:$4 sm:$0xff]   ;;  %v17640_v32 = vld [vmem:[%s19195_s29 + $0x674] ss:$8 sps:$4 sm:$0xff]  }
 0x6f4   :  { %v17643_v33 = vld [vmem:[%s19195_s29 + $0x774] ss:$8 sps:$4 sm:$0xff]   ;;  %v17638_v37 = vld [vmem:[%s19195_s29 + $0x670] ss:$8 sps:$4 sm:$0xff]  }
 0x6f5   :  { %v17641_v35 = vld [vmem:[%s19195_s29 + $0x770] ss:$8 sps:$4 sm:$0xff]  }
 0x730   :  { %v2723_v38 = vpop.f32.mrb[28].mxu0  ;;  %v2764_v39 = vpop.f32.mrb[28].mxu1 }
 0x731   :  { %v2724_v40 = vadd.f32 %v2723_v38, %v2363_v29  ;;  %v2725_v41 = vpop.f32.mrb[29].mxu0  ;;  %v2766_v42 = vpop.f32.mrb[29].mxu1  ;;  %v17634_v29 = vld [vmem:[%s19195_s29 + $0x664] ss:$8 sps:$4 sm:$0xff]  }
 0x732   :  { %v2726_v46 = vadd.f32 %v2725_v41, %v2365_v31  ;;  %v2727_v50 = vpop.f32.mrb[30].mxu0  ;;  %v2768_v16 = vpop.f32.mrb[30].mxu1  ;;  %v17635_v31 = vld [vmem:[%s19195_s29 + $0x760] ss:$8 sps:$4 sm:$0xff]   ;;  %v17646_v38 = vld [vmem:[%s19195_s29 + $0x684] ss:$8 sps:$4 sm:$0xff]  }
 0x733   :  { %v19743_v51 = vadd.f32 %v2764_v39, %v2724_v40  ;;  %v2728_v17 = vpop.f32.mrb[31].mxu0  ;;  %v2769_v52 = vpop.f32.mrb[31].mxu1  ;;  %v17649_v39 = vld [vmem:[%s19195_s29 + $0x784] ss:$8 sps:$4 sm:$0xff]   ;;  %v17644_v40 = vld [vmem:[%s19195_s29 + $0x680] ss:$8 sps:$4 sm:$0xff]  }
 0x734   :  { %v19745_v53 = vadd.f32 %v2766_v42, %v2726_v46  ;;  %v17647_v41 = vld [vmem:[%s19195_s29 + $0x780] ss:$8 sps:$4 sm:$0xff]   ;;  %v17652_v42 = vld [vmem:[%s19195_s29 + $0x694] ss:$8 sps:$4 sm:$0xff]   ;;  %v17650_v50 = vld [vmem:[%s19195_s29 + $0x690] ss:$8 sps:$4 sm:$0xff]  }
 0x735   :  { %v17655_v46 = vld [vmem:[%s19195_s29 + $0x794] ss:$8 sps:$4 sm:$0xff]   ;;  %v17653_v16 = vld [vmem:[%s19195_s29 + $0x790] ss:$8 sps:$4 sm:$0xff]   ;;  %v17658_v17 = vld [vmem:[%s19195_s29 + $0x6a4] ss:$8 sps:$4 sm:$0xff]  }
 0x736   :  { %v17661_v52 = vld [vmem:[%s19195_s29 + $0x7a4] ss:$8 sps:$4 sm:$0xff]  }
 0x738   :  { %v2810_v54 = vpop.f32.mrb[32].mxu0  ;;  %v2851_v55 = vpop.f32.mrb[32].mxu1 }
 0x739   :  { %v2812_v56 = vpop.f32.mrb[33].mxu0  ;;  %v2853_v57 = vpop.f32.mrb[33].mxu1  ;;  %v2858_v62 = vpack.c.bf16 %v2810_v54, %v2810_v54  ;;  %v2860_v63 = vpack.c.bf16 %v2851_v55, %v2851_v55  ;;  %v17656_v54 = vld [vmem:[%s19195_s29 + $0x6a0] ss:$8 sps:$4 sm:$0xff]  }
 0x73a   :  { %v2859_v58 = vpack.c.bf16 %v2812_v56, %v2812_v56  ;;  %v2861_v59 = vpack.c.bf16 %v2853_v57, %v2853_v57  ;;  %v2814_v60 = vpop.f32.mrb[34].mxu0  ;;  %v2855_v61 = vpop.f32.mrb[34].mxu1  ;;  %v17659_v55 = vld [vmem:[%s19195_s29 + $0x7a0] ss:$8 sps:$4 sm:$0xff]   ;;  %v17664_v56 = vld [vmem:[%s19195_s29 + $0x6b4] ss:$8 sps:$4 sm:$0xff]  }
 0x73b   :  { %v2815_v0 = vpop.f32.mrb[35].mxu0  ;;  %v2856_v1 = vpop.f32.mrb[35].mxu1  ;;  %v17667_v57 = vld [vmem:[%s19195_s29 + $0x7b4] ss:$8 sps:$4 sm:$0xff]   ;;  %v17670_v60 = vld [vmem:[%s19195_s29 + $0x6c4] ss:$8 sps:$4 sm:$0xff]  }
 0x73c   :  { %3279 = vmatprep.mubr.bf16.mxu0 %v2859_v58  ;;  %3320 = vmatprep.mubr.bf16.mxu1 %v2861_v59  ;;  %v17662_v58 = vld [vmem:[%s19195_s29 + $0x6b0] ss:$8 sps:$4 sm:$0xff]   ;;  %v17673_v61 = vld [vmem:[%s19195_s29 + $0x7c4] ss:$8 sps:$4 sm:$0xff]   ;;  %v17676_v0 = vld [vmem:[%s19195_s29 + $0x6d4] ss:$8 sps:$4 sm:$0xff]  }
 0x73d   :  { %3280 = vmatmul.mubr.bf16.vlgmr.msra.gmra.mrb[36].mxu0 %v2858_v62  ;;  %3321 = vmatmul.mubr.bf16.vlgmr.msra.gmra.mrb[36].mxu1 %v2860_v63  ;;  %v17665_v59 = vld [vmem:[%s19195_s29 + $0x7b0] ss:$8 sps:$4 sm:$0xff]   ;;  %v17668_v62 = vld [vmem:[%s19195_s29 + $0x6c0] ss:$8 sps:$4 sm:$0xff]   ;;  %v17679_v1 = vld [vmem:[%s19195_s29 + $0x7d4] ss:$8 sps:$4 sm:$0xff]  }
 0x73e   :  { %3337 = vmatpush1.bf16.msra.mxu0 %v19508_v14  ;;  %3378 = vmatpush1.bf16.msra.mxu1 %v19510_v15  ;;  %v17602_v14 = vld [vmem:[%s19195_s29 + $0x610] ss:$8 sps:$4 sm:$0xff]   ;;  %v17671_v63 = vld [vmem:[%s19195_s29 + $0x7c0] ss:$8 sps:$4 sm:$0xff]  }
 0x73f   :  { %3368 = vmatprep.mubr.bf16.mxu0 %v19152_v47  ;;  %3409 = vmatprep.mubr.bf16.mxu1 %v19152_v47  ;;  %v17605_v15 = vld [vmem:[%s19195_s29 + $0x710] ss:$8 sps:$4 sm:$0xff]  }
 0x740   :  { %3807 = vmatprep.subr.bf16.mxu0 %v17598_v2  ;;  %3848 = vmatprep.subr.bf16.mxu1 %v17601_v3  ;;  %v17674_v2 = vld [vmem:[%s19195_s29 + $0x6d0] ss:$8 sps:$4 sm:$0xff]  }
 0x741   :  { %v17677_v3 = vld [vmem:[%s19195_s29 + $0x7d0] ss:$8 sps:$4 sm:$0xff]  }
 0x745   :  { %14425 = vmatmul.mubr.msk.bf16.vlgmr.msra.gmra.mrb[40].mxu0 %vm231_vm0, %v14424_v4  ;;  %14426 = vmatmul.mubr.msk.bf16.vlgmr.msra.gmra.mrb[40].mxu1 %vm231_vm0, %v14424_v4  ;;  %v17680_v4 = vld [vmem:[%s19195_s29 + $0x6e0] ss:$8 sps:$4 sm:$0xff]  }
 0x746   :  { %3808 = vmatpush1.bf16.msra.mxu0 %v17596_v5  ;;  %3849 = vmatpush1.bf16.msra.mxu1 %v17599_v6  ;;  %v17682_v5 = vld [vmem:[%s19195_s29 + $0x6e4] ss:$8 sps:$4 sm:$0xff]   ;;  %v17683_v6 = vld [vmem:[%s19195_s29 + $0x7e0] ss:$8 sps:$4 sm:$0xff]  }
 0x747   :  { %3809 = vmatprep.subr.bf16.mxu0 %v17604_v7  ;;  %3850 = vmatprep.subr.bf16.mxu1 %v17607_v8  ;;  %v17685_v7 = vld [vmem:[%s19195_s29 + $0x7e4] ss:$8 sps:$4 sm:$0xff]   ;;  %v17688_v8 = vld [vmem:[%s19195_s29 + $0x6f4] ss:$8 sps:$4 sm:$0xff]  }
 0x74a   :  { %3810 = vmatpush1.bf16.msra.mxu0 %v17602_v14  ;;  %3851 = vmatpush1.bf16.msra.mxu1 %v17605_v15  ;;  %v17691_v14 = vld [vmem:[%s19195_s29 + $0x7f4] ss:$8 sps:$4 sm:$0xff]   ;;  %v17686_v15 = vld [vmem:[%s19195_s29 + $0x6f0] ss:$8 sps:$4 sm:$0xff]  }
 0x74b   :  { %3811 = vmatprep.subr.bf16.mxu0 %v17610_v9  ;;  %3852 = vmatprep.subr.bf16.mxu1 %v17613_v10  ;;  %v17689_v9 = vld [vmem:[%s19195_s29 + $0x7f0] ss:$8 sps:$4 sm:$0xff]   ;;  %s21016_s29 = sld [smem:[#allocation33_spill]] }
 0x74e   :  { %3812 = vmatpush1.bf16.msra.mxu0 %v17608_v11  ;;  %3853 = vmatpush1.bf16.msra.mxu1 %v17611_v12 }
 0x74f   :  { %3813 = vmatprep.subr.bf16.mxu0 %v17616_v34  ;;  %3854 = vmatprep.subr.bf16.mxu1 %v17619_v36 }
 0x752   :  { %3814 = vmatpush1.bf16.msra.mxu0 %v17614_v13  ;;  %3855 = vmatpush1.bf16.msra.mxu1 %v17617_v18 }
 0x753   :  { %3815 = vmatprep.subr.bf16.mxu0 %v17622_v19  ;;  %3856 = vmatprep.subr.bf16.mxu1 %v17625_v20 }
 0x756   :  { %3816 = vmatpush1.bf16.msra.mxu0 %v17620_v22  ;;  %3857 = vmatpush1.bf16.msra.mxu1 %v17623_v23 }
 0x757   :  { %3817 = vmatprep.subr.bf16.mxu0 %v17628_v24  ;;  %3858 = vmatprep.subr.bf16.mxu1 %v17631_v25 }
 0x75a   :  { %3818 = vmatpush1.bf16.msra.mxu0 %v17626_v27  ;;  %3859 = vmatpush1.bf16.msra.mxu1 %v17629_v28 }
 0x75b   :  { %3819 = vmatprep.subr.bf16.mxu0 %v17634_v29  ;;  %3860 = vmatprep.subr.bf16.mxu1 %v17637_v30 }
 0x75e   :  { %3820 = vmatpush1.bf16.msra.mxu0 %v17632_v26  ;;  %3861 = vmatpush1.bf16.msra.mxu1 %v17635_v31 }
 0x75f   :  { %3821 = vmatprep.subr.bf16.mxu0 %v17640_v32  ;;  %3862 = vmatprep.subr.bf16.mxu1 %v17643_v33 }
 0x762   :  { %3822 = vmatpush1.bf16.msra.mxu0 %v17638_v37  ;;  %3863 = vmatpush1.bf16.msra.mxu1 %v17641_v35 }
 0x763   :  { %3823 = vmatprep.subr.bf16.mxu0 %v17646_v38  ;;  %3864 = vmatprep.subr.bf16.mxu1 %v17649_v39 }
 0x766   :  { %3824 = vmatpush1.bf16.msra.mxu0 %v17644_v40  ;;  %3865 = vmatpush1.bf16.msra.mxu1 %v17647_v41 }
 0x767   :  { %3825 = vmatprep.subr.bf16.mxu0 %v17652_v42  ;;  %3866 = vmatprep.subr.bf16.mxu1 %v17655_v46 }
 0x76a   :  { %3826 = vmatpush1.bf16.msra.mxu0 %v17650_v50  ;;  %3867 = vmatpush1.bf16.msra.mxu1 %v17653_v16 }
 0x76b   :  { %3827 = vmatprep.subr.bf16.mxu0 %v17658_v17  ;;  %3868 = vmatprep.subr.bf16.mxu1 %v17661_v52 }
 0x76e   :  { %3828 = vmatpush1.bf16.msra.mxu0 %v17656_v54  ;;  %3869 = vmatpush1.bf16.msra.mxu1 %v17659_v55 }
 0x76f   :  { %3829 = vmatprep.subr.bf16.mxu0 %v17664_v56  ;;  %3870 = vmatprep.subr.bf16.mxu1 %v17667_v57 }
 0x772   :  { %3830 = vmatpush1.bf16.msra.mxu0 %v17662_v58  ;;  %3871 = vmatpush1.bf16.msra.mxu1 %v17665_v59 }
 0x773   :  { %3831 = vmatprep.subr.bf16.mxu0 %v17670_v60  ;;  %3872 = vmatprep.subr.bf16.mxu1 %v17673_v61 }
 0x776   :  { %3832 = vmatpush1.bf16.msra.mxu0 %v17668_v62  ;;  %3873 = vmatpush1.bf16.msra.mxu1 %v17671_v63 }
 0x777   :  { %3833 = vmatprep.subr.bf16.mxu0 %v17676_v0  ;;  %3874 = vmatprep.subr.bf16.mxu1 %v17679_v1  ;;  %v17694_v0 = vld [vmem:[#allocation2 + $0x104] ss:$8 sps:$4 sm:$0xff]  }
 0x778   :  { %v17742_v1 = vld [vmem:[#allocation2 + $0x4] ss:$8 sps:$4 sm:$0xff]  }
 0x77a   :  { %3834 = vmatpush1.bf16.msra.mxu0 %v17674_v2  ;;  %3875 = vmatpush1.bf16.msra.mxu1 %v17677_v3  ;;  %v3909_v3 = vld [vmem:[%s19200_s3] sm:$0xf] }
 0x77b   :  { %3835 = vmatprep.subr.bf16.mxu0 %v17682_v5  ;;  %3876 = vmatprep.subr.bf16.mxu1 %v17685_v7  ;;  %v17692_v5 = vld [vmem:[#allocation2 + $0x100] ss:$8 sps:$4 sm:$0xff]   ;;  %v17697_v7 = vld [vmem:[#allocation2 + $0x114] ss:$8 sps:$4 sm:$0xff]  }
 0x77e   :  { %3836 = vmatpush1.bf16.msra.mxu0 %v17680_v4  ;;  %3877 = vmatpush1.bf16.msra.mxu1 %v17683_v6  ;;  %v14557_v4 = vld [vmem:[%s19200_s3 + $0x4] sm:$0xf]  ;;  %v17740_v6 = vld [vmem:[#allocation2] ss:$8 sps:$4 sm:$0xff]  }
 0x77f   :  { %3837 = vmatprep.subr.bf16.mxu0 %v17688_v8  ;;  %3878 = vmatprep.subr.bf16.mxu1 %v17691_v14  ;;  %v17745_v8 = vld [vmem:[#allocation2 + $0x14] ss:$8 sps:$4 sm:$0xff]   ;;  %v17695_v14 = vld [vmem:[#allocation2 + $0x110] ss:$8 sps:$4 sm:$0xff]  }
 0x782   :  { %3838 = vmatpush1.bf16.msra.mxu0 %v17686_v15  ;;  %3879 = vmatpush1.bf16.msra.mxu1 %v17689_v9  ;;  %v17743_v15 = vld [vmem:[#allocation2 + $0x10] ss:$8 sps:$4 sm:$0xff]   ;;  %v17700_v9 = vld [vmem:[#allocation2 + $0x124] ss:$8 sps:$4 sm:$0xff]  }
 0x810   :  { %v3281_v10 = vpop.f32.mrb[36].mxu0  ;;  %v3322_v11 = vpop.f32.mrb[36].mxu1 }
 0x811   :  { %v3323_v12 = vadd.f32 %v3322_v11, %v3281_v10  ;;  %v3283_v34 = vpop.f32.mrb[37].mxu0  ;;  %v3324_v36 = vpop.f32.mrb[37].mxu1  ;;  %v17748_v10 = vld [vmem:[#allocation2 + $0x24] ss:$8 sps:$4 sm:$0xff]   ;;  %v17698_v11 = vld [vmem:[#allocation2 + $0x120] ss:$8 sps:$4 sm:$0xff]  }
 0x812   :  { %v3325_v13 = vadd.f32 %v3324_v36, %v3283_v34  ;;  %v3285_v18 = vpop.f32.mrb[38].mxu0  ;;  %v3326_v19 = vpop.f32.mrb[38].mxu1  ;;  %v17703_v34 = vld [vmem:[#allocation2 + $0x134] ss:$8 sps:$4 sm:$0xff]  }
 0x813   :  { %v3329_v20 = vadd.f32 %v3323_v12, %v19743_v51  ;;  %v3286_v22 = vpop.f32.mrb[39].mxu0  ;;  %v3327_v23 = vpop.f32.mrb[39].mxu1  ;;  %v3891_v51 = vld [vmem:[#allocation7] sm:$0x3]  ;;  %v17746_v12 = vld [vmem:[#allocation2 + $0x20] ss:$8 sps:$4 sm:$0xff]  }
 0x814   :  { %v3330_v24 = vadd.f32 %v3325_v13, %v19745_v53  ;;  %v3896_v41 = vrot.slane %v3891_v51, %v19494_v44  ;;  %v3900_v16 = vrot.slane %v3891_v51, %v19500_v48  ;;  %v17751_v36 = vld [vmem:[#allocation2 + $0x34] ss:$8 sps:$4 sm:$0xff]   ;;  %v17701_v13 = vld [vmem:[#allocation2 + $0x130] ss:$8 sps:$4 sm:$0xff]   ;;  %v17706_v19 = vld [vmem:[#allocation2 + $0x144] ss:$8 sps:$4 sm:$0xff]  }
 0x815   :  { %v17749_v18 = vld [vmem:[#allocation2 + $0x30] ss:$8 sps:$4 sm:$0xff]   ;;  %v17704_v22 = vld [vmem:[#allocation2 + $0x140] ss:$8 sps:$4 sm:$0xff]   ;;  %v17766_v51 = vld [vmem:[#allocation2 + $0x84] ss:$8 sps:$4 sm:$0xff]  }
 0x816   :  { %v17752_v23 = vld [vmem:[#allocation2 + $0x40] ss:$8 sps:$4 sm:$0xff]  }
 0x818   :  { %v3370_v25 = vpop.f32.mrb[40].mxu0  ;;  %v3411_v27 = vpop.f32.mrb[40].mxu1 }
 0x819   :  { %v3372_v28 = vpop.f32.mrb[41].mxu0  ;;  %v3413_v29 = vpop.f32.mrb[41].mxu1  ;;  %v3418_v33 = vpack.c.bf16 %v3370_v25, %v3370_v25  ;;  %v3420_v37 = vpack.c.bf16 %v3411_v27, %v3411_v27  ;;  %v17757_v25 = vld [vmem:[#allocation2 + $0x54] ss:$8 sps:$4 sm:$0xff]   ;;  %v17707_v27 = vld [vmem:[#allocation2 + $0x150] ss:$8 sps:$4 sm:$0xff]  }
 0x81a   :  { %v3419_v30 = vpack.c.bf16 %v3372_v28, %v3372_v28  ;;  %v3421_v26 = vpack.c.bf16 %v3413_v29, %v3413_v29  ;;  %v3374_v31 = vpop.f32.mrb[42].mxu0  ;;  %v3415_v32 = vpop.f32.mrb[42].mxu1  ;;  %v17755_v28 = vld [vmem:[#allocation2 + $0x50] ss:$8 sps:$4 sm:$0xff]   ;;  %v17712_v29 = vld [vmem:[#allocation2 + $0x164] ss:$8 sps:$4 sm:$0xff]  }
 0x81b   :  { %v3375_v35 = vpop.f32.mrb[43].mxu0  ;;  %v3416_v38 = vpop.f32.mrb[43].mxu1  ;;  %v17758_v31 = vld [vmem:[#allocation2 + $0x60] ss:$8 sps:$4 sm:$0xff]   ;;  %v17715_v32 = vld [vmem:[#allocation2 + $0x174] ss:$8 sps:$4 sm:$0xff]  }
 0x81c   :  { %3839 = vmatprep.mubr.bf16.mxu0 %v3419_v30  ;;  %3880 = vmatprep.mubr.bf16.mxu1 %v3421_v26  ;;  %v17760_v30 = vld [vmem:[#allocation2 + $0x64] ss:$8 sps:$4 sm:$0xff]   ;;  %v17710_v26 = vld [vmem:[#allocation2 + $0x160] ss:$8 sps:$4 sm:$0xff]   ;;  %v17761_v35 = vld [vmem:[#allocation2 + $0x70] ss:$8 sps:$4 sm:$0xff]  }
 0x81d   :  { %3840 = vmatmul.mubr.bf16.vlgmr.msra.gmra.mrb[44].mxu0 %v3418_v33  ;;  %3881 = vmatmul.mubr.bf16.vlgmr.msra.gmra.mrb[44].mxu1 %v3420_v37  ;;  %v17763_v33 = vld [vmem:[#allocation2 + $0x74] ss:$8 sps:$4 sm:$0xff]   ;;  %v17713_v37 = vld [vmem:[#allocation2 + $0x170] ss:$8 sps:$4 sm:$0xff]   ;;  %v17718_v38 = vld [vmem:[#allocation2 + $0x184] ss:$8 sps:$4 sm:$0xff]  }
 0x81e   :  { %3953 = vmatprep.mubr.bf16.mxu0 %v19152_v47  ;;  %4033 = vmatprep.mubr.bf16.mxu1 %v19152_v47 }
 0x8f0   :  { %v3841_v53 = vpop.f32.mrb[44].mxu0  ;;  %v3882_v39 = vpop.f32.mrb[44].mxu1 }
 0x8f1   :  { %v3883_v40 = vadd.f32 %v3882_v39, %v3841_v53  ;;  %v3843_v42 = vpop.f32.mrb[45].mxu0  ;;  %v3884_v46 = vpop.f32.mrb[45].mxu1  ;;  %v17716_v53 = vld [vmem:[#allocation2 + $0x180] ss:$8 sps:$4 sm:$0xff]  }
 0x8f2   :  { %v3885_v50 = vadd.f32 %v3884_v46, %v3843_v42  ;;  %v3845_v17 = vpop.f32.mrb[46].mxu0  ;;  %v3886_v52 = vpop.f32.mrb[46].mxu1  ;;  %v17764_v39 = vld [vmem:[#allocation2 + $0x80] ss:$8 sps:$4 sm:$0xff]   ;;  %v17719_v42 = vld [vmem:[#allocation2 + $0x190] ss:$8 sps:$4 sm:$0xff]  }
 0x8f3   :  { %v3889_v54 = vadd.f32 %v3883_v40, %v3329_v20  ;;  %v3846_v55 = vpop.f32.mrb[47].mxu0  ;;  %v3887_v56 = vpop.f32.mrb[47].mxu1  ;;  %v17754_v20 = vld [vmem:[#allocation2 + $0x44] ss:$8 sps:$4 sm:$0xff]   ;;  %v17721_v40 = vld [vmem:[#allocation2 + $0x194] ss:$8 sps:$4 sm:$0xff]  }
 0x8f4   :  { %v3890_v57 = vadd.f32 %v3885_v50, %v3330_v24  ;;  %v17709_v24 = vld [vmem:[#allocation2 + $0x154] ss:$8 sps:$4 sm:$0xff]   ;;  %v17767_v46 = vld [vmem:[#allocation2 + $0x90] ss:$8 sps:$4 sm:$0xff]   ;;  %v17724_v50 = vld [vmem:[#allocation2 + $0x1a4] ss:$8 sps:$4 sm:$0xff]  }
 0x8f5   :  { %v3903_v58 = vadd.f32 %v3896_v41, %v3889_v54  ;;  %v17769_v41 = vld [vmem:[#allocation2 + $0x94] ss:$8 sps:$4 sm:$0xff]   ;;  %v17722_v17 = vld [vmem:[#allocation2 + $0x1a0] ss:$8 sps:$4 sm:$0xff]   ;;  %v17725_v56 = vld [vmem:[#allocation2 + $0x1b0] ss:$8 sps:$4 sm:$0xff]  }
 0x8f6   :  { %v3904_v59 = vadd.f32 %v3900_v16, %v3890_v57  ;;  %v17772_v16 = vld [vmem:[#allocation2 + $0xa4] ss:$8 sps:$4 sm:$0xff]   ;;  %v17770_v52 = vld [vmem:[#allocation2 + $0xa0] ss:$8 sps:$4 sm:$0xff]   ;;  %v17727_v54 = vld [vmem:[#allocation2 + $0x1b4] ss:$8 sps:$4 sm:$0xff]  }
 0x8f7   :  { %v3905_v60 = vmax.f32 %v3903_v58, 0.0  ;;  %v17775_v55 = vld [vmem:[#allocation2 + $0xb4] ss:$8 sps:$4 sm:$0xff]   ;;  %v17773_v57 = vld [vmem:[#allocation2 + $0xb0] ss:$8 sps:$4 sm:$0xff]  }
 0x8f8   :  { %v3906_v61 = vmax.f32 %v3904_v59, 0.0  ;;  %v17730_v58 = vld [vmem:[#allocation2 + $0x1c4] ss:$8 sps:$4 sm:$0xff]  }
 0x8f9   :  { %v3907_v62 = vpack.c.bf16 %v3905_v60, %v3905_v60  ;;  %v17778_v59 = vld [vmem:[#allocation2 + $0xc4] ss:$8 sps:$4 sm:$0xff]   ;;  %v17728_v60 = vld [vmem:[#allocation2 + $0x1c0] ss:$8 sps:$4 sm:$0xff]  }
 0x8fa   :  { %v19824_v63 = vpack.c.bf16 %v3906_v61, %v3906_v61  ;;  %v17776_v61 = vld [vmem:[#allocation2 + $0xc0] ss:$8 sps:$4 sm:$0xff]  }
 0x8fb   :  { %v19827_v2 = vsel %vm3914_vm4, %v3907_v62, 0  ;;  %v17733_v62 = vld [vmem:[#allocation2 + $0x1d4] ss:$8 sps:$4 sm:$0xff]  }
 0x8fc   :  { %14555 = vmatprep.subr.msk.bf16.mxu0 %vm3914_vm4, %v19824_v63  ;;  %14558 = vmatprep.subr.msk.bf16.mxu1 %vm3914_vm4, %v19824_v63 }
 0x8fd   :  { %3922 = vmatpush1.bf16.msra.mxu0 %v19827_v2  ;;  %4002 = vmatpush1.bf16.msra.mxu1 %v19827_v2 }
 0x8fe   :  { %4237 = vmatprep.subr.bf16.mxu0 %v17694_v0  ;;  %4438 = vmatprep.subr.bf16.mxu1 %v17742_v1  ;;  %v17781_v0 = vld [vmem:[#allocation2 + $0xd4] ss:$8 sps:$4 sm:$0xff]   ;;  %v17731_v1 = vld [vmem:[#allocation2 + $0x1d0] ss:$8 sps:$4 sm:$0xff]  }
 0x900   :  { %14556 = vmatmul.mubr.msk.bf16.vlgmr.msra.gmra.mrb[48].mxu0 %vm3910_vm5, %v3909_v3  ;;  %14559 = vmatmul.mubr.msk.bf16.vlgmr.msra.gmra.mrb[48].mxu1 %vm3910_vm5, %v14557_v4  ;;  %v17779_v3 = vld [vmem:[#allocation2 + $0xd0] ss:$8 sps:$4 sm:$0xff]   ;;  %v17736_v4 = vld [vmem:[#allocation2 + $0x1e4] ss:$8 sps:$4 sm:$0xff]  }
 0x901   :  { %4238 = vmatpush1.bf16.msra.mxu0 %v17692_v5  ;;  %4439 = vmatpush1.bf16.msra.mxu1 %v17740_v6  ;;  %v17784_v5 = vld [vmem:[#allocation2 + $0xe4] ss:$8 sps:$4 sm:$0xff]   ;;  %v17734_v6 = vld [vmem:[#allocation2 + $0x1e0] ss:$8 sps:$4 sm:$0xff]  }
 0x902   :  { %4239 = vmatprep.subr.bf16.mxu0 %v17697_v7  ;;  %4440 = vmatprep.subr.bf16.mxu1 %v17745_v8  ;;  %v17782_v7 = vld [vmem:[#allocation2 + $0xe0] ss:$8 sps:$4 sm:$0xff]   ;;  %v17739_v8 = vld [vmem:[#allocation2 + $0x1f4] ss:$8 sps:$4 sm:$0xff]  }
 0x905   :  { %4240 = vmatpush1.bf16.msra.mxu0 %v17695_v14  ;;  %4441 = vmatpush1.bf16.msra.mxu1 %v17743_v15  ;;  %v17737_v14 = vld [vmem:[#allocation2 + $0x1f0] ss:$8 sps:$4 sm:$0xff]   ;;  %v17787_v15 = vld [vmem:[#allocation2 + $0xf4] ss:$8 sps:$4 sm:$0xff]  }
 0x906   :  { %4241 = vmatprep.subr.bf16.mxu0 %v17700_v9  ;;  %4442 = vmatprep.subr.bf16.mxu1 %v17748_v10  ;;  %v17785_v9 = vld [vmem:[#allocation2 + $0xf0] ss:$8 sps:$4 sm:$0xff]   ;;  %v17790_v10 = vld [vmem:[#allocation2 + $0x204] ss:$8 sps:$4 sm:$0xff]  }
 0x909   :  { %4242 = vmatpush1.bf16.msra.mxu0 %v17698_v11  ;;  %4443 = vmatpush1.bf16.msra.mxu1 %v17746_v12 }
 0x90a   :  { %4243 = vmatprep.subr.bf16.mxu0 %v17703_v34  ;;  %4444 = vmatprep.subr.bf16.mxu1 %v17751_v36 }
 0x90d   :  { %4244 = vmatpush1.bf16.msra.mxu0 %v17701_v13  ;;  %4445 = vmatpush1.bf16.msra.mxu1 %v17749_v18 }
 0x90e   :  { %4245 = vmatprep.subr.bf16.mxu0 %v17706_v19  ;;  %4446 = vmatprep.subr.bf16.mxu1 %v17754_v20 }
 0x911   :  { %4246 = vmatpush1.bf16.msra.mxu0 %v17704_v22  ;;  %4447 = vmatpush1.bf16.msra.mxu1 %v17752_v23 }
 0x912   :  { %4247 = vmatprep.subr.bf16.mxu0 %v17709_v24  ;;  %4448 = vmatprep.subr.bf16.mxu1 %v17757_v25 }
 0x915   :  { %4248 = vmatpush1.bf16.msra.mxu0 %v17707_v27  ;;  %4449 = vmatpush1.bf16.msra.mxu1 %v17755_v28  ;;  %v17788_v27 = vld [vmem:[#allocation2 + $0x200] ss:$8 sps:$4 sm:$0xff]   ;;  %v17793_v28 = vld [vmem:[#allocation2 + $0x214] ss:$8 sps:$4 sm:$0xff]  }
 0x916   :  { %4249 = vmatprep.subr.bf16.mxu0 %v17712_v29  ;;  %4450 = vmatprep.subr.bf16.mxu1 %v17760_v30  ;;  %v17791_v29 = vld [vmem:[#allocation2 + $0x210] ss:$8 sps:$4 sm:$0xff]   ;;  %v17796_v30 = vld [vmem:[#allocation2 + $0x224] ss:$8 sps:$4 sm:$0xff]  }
 0x919   :  { %4250 = vmatpush1.bf16.msra.mxu0 %v17710_v26  ;;  %4451 = vmatpush1.bf16.msra.mxu1 %v17758_v31  ;;  %v14624_v26 = vld [vmem:[%s19200_s3 + $0x8] sm:$0xf] }
 0x91a   :  { %4251 = vmatprep.subr.bf16.mxu0 %v17715_v32  ;;  %4452 = vmatprep.subr.bf16.mxu1 %v17763_v33  ;;  %v17794_v31 = vld [vmem:[#allocation2 + $0x220] ss:$8 sps:$4 sm:$0xff]   ;;  %v17799_v32 = vld [vmem:[#allocation2 + $0x304] ss:$8 sps:$4 sm:$0xff]   ;;  %v17802_v33 = vld [vmem:[#allocation2 + $0x234] ss:$8 sps:$4 sm:$0xff]  }
 0x91d   :  { %4252 = vmatpush1.bf16.msra.mxu0 %v17713_v37  ;;  %4453 = vmatpush1.bf16.msra.mxu1 %v17761_v35  ;;  %v17808_v37 = vld [vmem:[#allocation2 + $0x244] ss:$8 sps:$4 sm:$0xff]  }
 0x91e   :  { %4253 = vmatprep.subr.bf16.mxu0 %v17718_v38  ;;  %4454 = vmatprep.subr.bf16.mxu1 %v17766_v51  ;;  %v14659_v35 = vld [vmem:[%s19200_s3 + $0xc] sm:$0xf]  ;;  %v17797_v38 = vld [vmem:[#allocation2 + $0x300] ss:$8 sps:$4 sm:$0xff]   ;;  %v17805_v51 = vld [vmem:[#allocation2 + $0x314] ss:$8 sps:$4 sm:$0xff]  }
 0x91f   :  { %s21017_s3 = sld [smem:[#allocation32_spill]] }
 0x921   :  { %4254 = vmatpush1.bf16.msra.mxu0 %v17716_v53  ;;  %4455 = vmatpush1.bf16.msra.mxu1 %v17764_v39  ;;  %v17806_v53 = vld [vmem:[#allocation2 + $0x240] ss:$8 sps:$4 sm:$0xff]   ;;  %v17814_v39 = vld [vmem:[#allocation2 + $0x254] ss:$8 sps:$4 sm:$0xff]  }
 0x922   :  { %4255 = vmatprep.subr.bf16.mxu0 %v17721_v40  ;;  %4456 = vmatprep.subr.bf16.mxu1 %v17769_v41  ;;  %v17803_v40 = vld [vmem:[#allocation2 + $0x310] ss:$8 sps:$4 sm:$0xff]  }
 0x923   :  { %v17812_v41 = vld [vmem:[#allocation2 + $0x250] ss:$8 sps:$4 sm:$0xff]  }
 0x925   :  { %4256 = vmatpush1.bf16.msra.mxu0 %v17719_v42  ;;  %4457 = vmatpush1.bf16.msra.mxu1 %v17767_v46  ;;  %v17820_v42 = vld [vmem:[#allocation2 + $0x264] ss:$8 sps:$4 sm:$0xff]   ;;  %v17809_v46 = vld [vmem:[#allocation2 + $0x320] ss:$8 sps:$4 sm:$0xff]  }
 0x926   :  { %4257 = vmatprep.subr.bf16.mxu0 %v17724_v50  ;;  %4458 = vmatprep.subr.bf16.mxu1 %v17772_v16  ;;  %v17817_v50 = vld [vmem:[#allocation2 + $0x334] ss:$8 sps:$4 sm:$0xff]   ;;  %v17818_v16 = vld [vmem:[#allocation2 + $0x260] ss:$8 sps:$4 sm:$0xff]  }
 0x929   :  { %4258 = vmatpush1.bf16.msra.mxu0 %v17722_v17  ;;  %4459 = vmatpush1.bf16.msra.mxu1 %v17770_v52  ;;  %v17826_v17 = vld [vmem:[#allocation2 + $0x274] ss:$8 sps:$4 sm:$0xff]   ;;  %v17815_v52 = vld [vmem:[#allocation2 + $0x330] ss:$8 sps:$4 sm:$0xff]  }
 0x92a   :  { %4259 = vmatprep.subr.bf16.mxu0 %v17727_v54  ;;  %4460 = vmatprep.subr.bf16.mxu1 %v17775_v55  ;;  %v17823_v54 = vld [vmem:[#allocation2 + $0x344] ss:$8 sps:$4 sm:$0xff]   ;;  %v17824_v55 = vld [vmem:[#allocation2 + $0x270] ss:$8 sps:$4 sm:$0xff]  }
 0x92d   :  { %4260 = vmatpush1.bf16.msra.mxu0 %v17725_v56  ;;  %4461 = vmatpush1.bf16.msra.mxu1 %v17773_v57  ;;  %v17832_v56 = vld [vmem:[#allocation2 + $0x284] ss:$8 sps:$4 sm:$0xff]   ;;  %v17821_v57 = vld [vmem:[#allocation2 + $0x340] ss:$8 sps:$4 sm:$0xff]  }
 0x92e   :  { %4261 = vmatprep.subr.bf16.mxu0 %v17730_v58  ;;  %4462 = vmatprep.subr.bf16.mxu1 %v17778_v59  ;;  %v17829_v58 = vld [vmem:[#allocation2 + $0x354] ss:$8 sps:$4 sm:$0xff]   ;;  %v17830_v59 = vld [vmem:[#allocation2 + $0x280] ss:$8 sps:$4 sm:$0xff]  }
 0x931   :  { %4262 = vmatpush1.bf16.msra.mxu0 %v17728_v60  ;;  %4463 = vmatpush1.bf16.msra.mxu1 %v17776_v61  ;;  %v17838_v60 = vld [vmem:[#allocation2 + $0x294] ss:$8 sps:$4 sm:$0xff]   ;;  %v17827_v61 = vld [vmem:[#allocation2 + $0x350] ss:$8 sps:$4 sm:$0xff]  }
 0x932   :  { %4263 = vmatprep.subr.bf16.mxu0 %v17733_v62  ;;  %4464 = vmatprep.subr.bf16.mxu1 %v17781_v0  ;;  %v17835_v62 = vld [vmem:[#allocation2 + $0x364] ss:$8 sps:$4 sm:$0xff]   ;;  %v17836_v0 = vld [vmem:[#allocation2 + $0x290] ss:$8 sps:$4 sm:$0xff]  }
 0x935   :  { %4264 = vmatpush1.bf16.msra.mxu0 %v17731_v1  ;;  %4465 = vmatpush1.bf16.msra.mxu1 %v17779_v3  ;;  %v17844_v1 = vld [vmem:[#allocation2 + $0x2a4] ss:$8 sps:$4 sm:$0xff]   ;;  %v17833_v3 = vld [vmem:[#allocation2 + $0x360] ss:$8 sps:$4 sm:$0xff]  }
 0x936   :  { %4265 = vmatprep.subr.bf16.mxu0 %v17736_v4  ;;  %4466 = vmatprep.subr.bf16.mxu1 %v17784_v5  ;;  %v17841_v4 = vld [vmem:[#allocation2 + $0x374] ss:$8 sps:$4 sm:$0xff]   ;;  %v17842_v5 = vld [vmem:[#allocation2 + $0x2a0] ss:$8 sps:$4 sm:$0xff]  }
 0x939   :  { %4266 = vmatpush1.bf16.msra.mxu0 %v17734_v6  ;;  %4467 = vmatpush1.bf16.msra.mxu1 %v17782_v7  ;;  %v17850_v6 = vld [vmem:[#allocation2 + $0x2b4] ss:$8 sps:$4 sm:$0xff]   ;;  %v17839_v7 = vld [vmem:[#allocation2 + $0x370] ss:$8 sps:$4 sm:$0xff]  }
 0x93a   :  { %4267 = vmatprep.subr.bf16.mxu0 %v17739_v8  ;;  %4468 = vmatprep.subr.bf16.mxu1 %v17787_v15  ;;  %v17847_v8 = vld [vmem:[#allocation2 + $0x384] ss:$8 sps:$4 sm:$0xff]  }
 0x93b   :  { %v17856_v15 = vld [vmem:[#allocation2 + $0x2c4] ss:$8 sps:$4 sm:$0xff]  }
 0x93d   :  { %4268 = vmatpush1.bf16.msra.mxu0 %v17737_v14  ;;  %4469 = vmatpush1.bf16.msra.mxu1 %v17785_v9  ;;  %v17848_v14 = vld [vmem:[#allocation2 + $0x2b0] ss:$8 sps:$4 sm:$0xff]   ;;  %v17845_v9 = vld [vmem:[#allocation2 + $0x380] ss:$8 sps:$4 sm:$0xff]  }
 0x93e   :  { %14625 = vmatprep.subr.msk.bf16.mxu0 %vm3914_vm4, %v19824_v63  ;;  %4720 = vmatprep.subr.bf16.mxu1 %v17790_v10  ;;  %v17853_v10 = vld [vmem:[#allocation2 + $0x394] ss:$8 sps:$4 sm:$0xff]  }
 0x9d3   :  { %v3955_v11 = vpop.f32.mrb[48].mxu0  ;;  %v4035_v12 = vpop.f32.mrb[48].mxu1 }
 0x9d4   :  { %v3962_v34 = vpack.c.bf16 %v3955_v11, %v3955_v11  ;;  %v3957_v36 = vpop.f32.mrb[49].mxu0  ;;  %v4037_v13 = vpop.f32.mrb[49].mxu1  ;;  %v4042_v23 = vpack.c.bf16 %v4035_v12, %v4035_v12  ;;  %v17854_v11 = vld [vmem:[#allocation2 + $0x2c0] ss:$8 sps:$4 sm:$0xff]   ;;  %v17851_v12 = vld [vmem:[#allocation2 + $0x390] ss:$8 sps:$4 sm:$0xff]  }
 0x9d5   :  { %v3963_v18 = vpack.c.bf16 %v3957_v36, %v3957_v36  ;;  %v4043_v19 = vpack.c.bf16 %v4037_v13, %v4037_v13  ;;  %v4039_v20 = vpop.f32.mrb[50].mxu1  ;;  %v3959_v22 = vpop.f32.mrb[50].mxu0  ;;  %v17857_v36 = vld [vmem:[#allocation2 + $0x3a0] ss:$8 sps:$4 sm:$0xff]   ;;  %v17862_v13 = vld [vmem:[#allocation2 + $0x2d4] ss:$8 sps:$4 sm:$0xff]  }
 0x9d6   :  { %v4040_v24 = vpop.f32.mrb[51].mxu1  ;;  %v3960_v25 = vpop.f32.mrb[51].mxu0  ;;  %v17863_v20 = vld [vmem:[#allocation2 + $0x3b0] ss:$8 sps:$4 sm:$0xff]   ;;  %v17866_v22 = vld [vmem:[#allocation2 + $0x2e0] ss:$8 sps:$4 sm:$0xff]  }
 0x9d7   :  { %4269 = vmatprep.mubr.bf16.mxu0 %v4043_v19  ;;  %4470 = vmatprep.mubr.bf16.mxu1 %v3963_v18  ;;  %v17865_v18 = vld [vmem:[#allocation2 + $0x3b4] ss:$8 sps:$4 sm:$0xff]   ;;  %v17860_v19 = vld [vmem:[#allocation2 + $0x2d0] ss:$8 sps:$4 sm:$0xff]   ;;  %v17869_v24 = vld [vmem:[#allocation2 + $0x3c0] ss:$8 sps:$4 sm:$0xff]  }
 0x9d8   :  { %4270 = vmatmul.mubr.bf16.vlgmr.msra.gmra.mrb[52].mxu0 %v4042_v23  ;;  %4471 = vmatmul.mubr.bf16.vlgmr.msra.gmra.mrb[52].mxu1 %v3962_v34  ;;  %v17859_v34 = vld [vmem:[#allocation2 + $0x3a4] ss:$8 sps:$4 sm:$0xff]  }
 0x9d9   :  { %4485 = vmatpush1.bf16.msra.mxu0 %v19827_v2  ;;  %4516 = vmatprep.mubr.bf16.mxu0 %v19152_v47  ;;  %v17868_v23 = vld [vmem:[#allocation2 + $0x2e4] ss:$8 sps:$4 sm:$0xff]  }
 0x9da   :  { %14660 = vmatprep.subr.msk.bf16.mxu0 %vm3914_vm4, %v19824_v63  ;;  %4721 = vmatpush1.bf16.msra.mxu1 %v17788_v27  ;;  %v17800_v63 = vld [vmem:[#allocation2 + $0x230] ss:$8 sps:$4 sm:$0xff]   ;;  %v17871_v25 = vld [vmem:[#allocation2 + $0x3c4] ss:$8 sps:$4 sm:$0xff]   ;;  %v17874_v27 = vld [vmem:[#allocation2 + $0x2f4] ss:$8 sps:$4 sm:$0xff]  }
 0x9db   :  { %4722 = vmatprep.subr.bf16.mxu1 %v17793_v28  ;;  %v17877_v28 = vld [vmem:[#allocation2 + $0x3d4] ss:$8 sps:$4 sm:$0xff]  }
 0x9de   :  { %4723 = vmatpush1.bf16.msra.mxu1 %v17791_v29  ;;  %v17872_v29 = vld [vmem:[#allocation2 + $0x2f0] ss:$8 sps:$4 sm:$0xff]  }
 0x9df   :  { %4724 = vmatprep.subr.bf16.mxu1 %v17796_v30  ;;  %v17875_v30 = vld [vmem:[#allocation2 + $0x3d0] ss:$8 sps:$4 sm:$0xff]  }
 0x9e0   :  { %14626 = vmatmul.mubr.msk.bf16.vlgmr.msra.gmra.mrb[56].mxu0 %vm3910_vm5, %v14624_v26  ;;  %v17880_v26 = vld [vmem:[#allocation2 + $0x3e4] ss:$8 sps:$4 sm:$0xff]  }
 0x9e1   :  { %4769 = vmatpush1.bf16.msra.mxu0 %v19827_v2  ;;  %4800 = vmatprep.mubr.bf16.mxu0 %v19152_v47  ;;  %v17811_v2 = vld [vmem:[#allocation2 + $0x324] ss:$8 sps:$4 sm:$0xff]  }
 0x9e2   :  { %5004 = vmatprep.subr.bf16.mxu0 %v17799_v32  ;;  %4725 = vmatpush1.bf16.msra.mxu1 %v17794_v31  ;;  %v17878_v31 = vld [vmem:[#allocation2 + $0x3e0] ss:$8 sps:$4 sm:$0xff]   ;;  %v17883_v32 = vld [vmem:[#allocation2 + $0x3f4] ss:$8 sps:$4 sm:$0xff]  }
 0x9e3   :  { %4726 = vmatprep.subr.bf16.mxu1 %v17802_v33  ;;  %v17881_v33 = vld [vmem:[#allocation2 + $0x3f0] ss:$8 sps:$4 sm:$0xff]  }
 0x9e6   :  { %4727 = vmatpush1.bf16.msra.mxu1 %v17800_v63  ;;  %v17884_v63 = vld [vmem:[%s21011_s5 + $0xc0] sm:$0xff]  }
 0x9e7   :  { %4728 = vmatprep.subr.bf16.mxu1 %v17808_v37 }
 0x9e8   :  { %14661 = vmatmul.mubr.msk.bf16.vlgmr.msra.gmra.mrb[60].mxu0 %vm3910_vm5, %v14659_v35 }
 0x9e9   :  { %5005 = vmatpush1.bf16.msra.mxu0 %v17797_v38 }
 0x9ea   :  { %5006 = vmatprep.subr.bf16.mxu0 %v17805_v51  ;;  %4729 = vmatpush1.bf16.msra.mxu1 %v17806_v53 }
 0x9eb   :  { %4730 = vmatprep.subr.bf16.mxu1 %v17814_v39 }
 0x9ed   :  { %5007 = vmatpush1.bf16.msra.mxu0 %v17803_v40 }
 0x9ee   :  { %5008 = vmatprep.subr.bf16.mxu0 %v17811_v2  ;;  %4731 = vmatpush1.bf16.msra.mxu1 %v17812_v41 }
 0x9ef   :  { %4732 = vmatprep.subr.bf16.mxu1 %v17820_v42 }
 0x9f1   :  { %5009 = vmatpush1.bf16.msra.mxu0 %v17809_v46 }
 0x9f2   :  { %5010 = vmatprep.subr.bf16.mxu0 %v17817_v50  ;;  %4733 = vmatpush1.bf16.msra.mxu1 %v17818_v16 }
 0x9f3   :  { %4734 = vmatprep.subr.bf16.mxu1 %v17826_v17 }
 0x9f5   :  { %5011 = vmatpush1.bf16.msra.mxu0 %v17815_v52 }
 0x9f6   :  { %5012 = vmatprep.subr.bf16.mxu0 %v17823_v54  ;;  %4735 = vmatpush1.bf16.msra.mxu1 %v17824_v55 }
 0x9f7   :  { %4736 = vmatprep.subr.bf16.mxu1 %v17832_v56 }
 0x9f9   :  { %5013 = vmatpush1.bf16.msra.mxu0 %v17821_v57 }
 0x9fa   :  { %5014 = vmatprep.subr.bf16.mxu0 %v17829_v58  ;;  %4737 = vmatpush1.bf16.msra.mxu1 %v17830_v59  ;;  %v17885_v59 = vld [vmem:[%s21011_s5 + $0x80] sm:$0xff]  }
 0x9fb   :  { %4738 = vmatprep.subr.bf16.mxu1 %v17838_v60 }
 0x9fd   :  { %5015 = vmatpush1.bf16.msra.mxu0 %v17827_v61 }
 0x9fe   :  { %5016 = vmatprep.subr.bf16.mxu0 %v17835_v62  ;;  %4739 = vmatpush1.bf16.msra.mxu1 %v17836_v0  ;;  %v17886_v62 = vld [vmem:[%s21011_s5 + $0xc8] sm:$0xff]  }
 0x9ff   :  { %4740 = vmatprep.subr.bf16.mxu1 %v17844_v1  ;;  %v17887_v0 = vld [vmem:[%s21011_s5 + $0x88] sm:$0xff]   ;;  %v17888_v1 = vld [vmem:[%s21011_s5 + $0xd0] sm:$0xff]  }
 0xa01   :  { %5017 = vmatpush1.bf16.msra.mxu0 %v17833_v3  ;;  %v17889_v3 = vld [vmem:[%s21011_s5 + $0x90] sm:$0xff]  }
 0xa02   :  { %5018 = vmatprep.subr.bf16.mxu0 %v17841_v4  ;;  %4741 = vmatpush1.bf16.msra.mxu1 %v17842_v5  ;;  %v17890_v4 = vld [vmem:[%s21011_s5 + $0xd8] sm:$0xff]  }
 0xa03   :  { %4742 = vmatprep.subr.bf16.mxu1 %v17850_v6  ;;  %v17891_v5 = vld [vmem:[%s21011_s5 + $0x98] sm:$0xff]   ;;  %v17892_v6 = vld [vmem:[%s21011_s5 + $0xe0] sm:$0xff]  }
 0xa05   :  { %5019 = vmatpush1.bf16.msra.mxu0 %v17839_v7  ;;  %v17893_v7 = vld [vmem:[%s21011_s5 + $0xa0] sm:$0xff]  }
 0xa06   :  { %5020 = vmatprep.subr.bf16.mxu0 %v17847_v8  ;;  %4743 = vmatpush1.bf16.msra.mxu1 %v17848_v14  ;;  %v17894_v8 = vld [vmem:[%s21011_s5 + $0xe8] sm:$0xff]  }
 0xa07   :  { %4744 = vmatprep.subr.bf16.mxu1 %v17856_v15  ;;  %v17895_v14 = vld [vmem:[%s21011_s5 + $0xa8] sm:$0xff]   ;;  %v17896_v15 = vld [vmem:[%s21011_s5 + $0xf0] sm:$0xff]  }
 0xa09   :  { %5021 = vmatpush1.bf16.msra.mxu0 %v17845_v9  ;;  %v17897_v9 = vld [vmem:[%s21011_s5 + $0xb0] sm:$0xff]  }
 0xa0a   :  { %5022 = vmatprep.subr.bf16.mxu0 %v17853_v10  ;;  %4745 = vmatpush1.bf16.msra.mxu1 %v17854_v11  ;;  %v17898_v10 = vld [vmem:[%s21011_s5 + $0xf8] sm:$0xff]  }
 0xa0b   :  { %4746 = vmatprep.subr.bf16.mxu1 %v17862_v13  ;;  %v17899_v11 = vld [vmem:[%s21011_s5 + $0xb8] sm:$0xff]  }
 0xa0d   :  { %5023 = vmatpush1.bf16.msra.mxu0 %v17851_v12 }
 0xa0e   :  { %5024 = vmatprep.subr.bf16.mxu0 %v17859_v34  ;;  %4747 = vmatpush1.bf16.msra.mxu1 %v17860_v19 }
 0xa0f   :  { %4748 = vmatprep.subr.bf16.mxu1 %v17868_v23 }
 0xa11   :  { %5025 = vmatpush1.bf16.msra.mxu0 %v17857_v36 }
 0xa12   :  { %5026 = vmatprep.subr.bf16.mxu0 %v17865_v18  ;;  %4749 = vmatpush1.bf16.msra.mxu1 %v17866_v22 }
 0xa13   :  { %4750 = vmatprep.subr.bf16.mxu1 %v17874_v27 }
 0xa15   :  { %5027 = vmatpush1.bf16.msra.mxu0 %v17863_v20  ;;  %v5047_v20 = vld [vmem:[#allocation8] sm:$0x3] }
 0xa16   :  { %5028 = vmatprep.subr.bf16.mxu0 %v17871_v25  ;;  %4751 = vmatpush1.bf16.msra.mxu1 %v17872_v29  ;;  %v5052_v22 = vrot.slane %v5047_v20, %v19494_v44 }
 0xa19   :  { %5029 = vmatpush1.bf16.msra.mxu0 %v17869_v24  ;;  %v5056_v24 = vrot.slane %v5047_v20, %v19500_v48  ;;  %v17925_v20 = vld [vmem:[%s21011_s5 + $0x1c8] sm:$0xff]  }
 0xa1a   :  { %5030 = vmatprep.subr.bf16.mxu0 %v17877_v28 }
 0xa1d   :  { %5031 = vmatpush1.bf16.msra.mxu0 %v17875_v30 }
 0xa1e   :  { %5032 = vmatprep.subr.bf16.mxu0 %v17880_v26 }
 0xa21   :  { %5033 = vmatpush1.bf16.msra.mxu0 %v17878_v31 }
 0xa22   :  { %5034 = vmatprep.subr.bf16.mxu0 %v17883_v32 }
 0xa25   :  { %5035 = vmatpush1.bf16.msra.mxu0 %v17881_v33 }
 0xa26   :  { %16313 = vmatprep.subr.bf16.mxu0 %v17884_v63 }
 0xaab   :  { %v4271_v37 = vpop.f32.mrb[52].mxu0  ;;  %v4472_v35 = vpop.f32.mrb[52].mxu1 }
 0xaac   :  { %v4473_v38 = vadd.f32 %v4472_v35, %v4271_v37  ;;  %v4273_v51 = vpop.f32.mrb[53].mxu0  ;;  %v4474_v53 = vpop.f32.mrb[53].mxu1 }
 0xaad   :  { %v4475_v39 = vadd.f32 %v4474_v53, %v4273_v51  ;;  %v4275_v40 = vpop.f32.mrb[54].mxu0  ;;  %v4476_v2 = vpop.f32.mrb[54].mxu1  ;;  %v17900_v51 = vld [vmem:[%s21011_s5 + $0x40] sm:$0xff]  }
 0xaae   :  { %v4276_v41 = vpop.f32.mrb[55].mxu0  ;;  %v4477_v42 = vpop.f32.mrb[55].mxu1  ;;  %v14696_v53 = vld [vmem:[%s21012_s9 + $0x1] sm:$0x1]  ;;  %v17902_v40 = vld [vmem:[%s21011_s5 + $0x48] sm:$0xff]  }
 0xaaf   :  { %v17903_v2 = vld [vmem:[%s21011_s5 + $0x8] sm:$0xff]   ;;  %v17904_v41 = vld [vmem:[%s21011_s5 + $0x50] sm:$0xff]  }
 0xab0   :  { %v17905_v42 = vld [vmem:[%s21011_s5 + $0x10] sm:$0xff]  }
 0xab3   :  { %v4518_v46 = vpop.f32.mrb[56].mxu0 }
 0xab4   :  { %v4520_v50 = vpop.f32.mrb[57].mxu0  ;;  %v4525_v52 = vpack.c.bf16 %v4518_v46, %v4518_v46  ;;  %v17906_v46 = vld [vmem:[%s21011_s5 + $0x58] sm:$0xff]  }
 0xab5   :  { %v4526_v16 = vpack.c.bf16 %v4520_v50, %v4520_v50  ;;  %v4522_v17 = vpop.f32.mrb[58].mxu0  ;;  %v17907_v50 = vld [vmem:[%s21011_s5 + $0x18] sm:$0xff]  }
 0xab6   :  { %v4523_v54 = vpop.f32.mrb[59].mxu0  ;;  %v17909_v17 = vld [vmem:[%s21011_s5 + $0x20] sm:$0xff]  }
 0xab7   :  { %4752 = vmatprep.mubr.bf16.mxu1 %v4526_v16  ;;  %v17908_v16 = vld [vmem:[%s21011_s5 + $0x60] sm:$0xff]   ;;  %v17911_v54 = vld [vmem:[%s21011_s5 + $0x28] sm:$0xff]  }
 0xab8   :  { %4753 = vmatmul.mubr.bf16.vlgmr.msra.gmra.mrb[56].mxu1 %v4525_v52  ;;  %v17910_v52 = vld [vmem:[%s21011_s5 + $0x68] sm:$0xff]  }
 0xab9   :  { %5107 = vmatprep.mubr.bf16.mxu1 %v19152_v47 }
 0xabb   :  { %v4802_v55 = vpop.f32.mrb[60].mxu0 }
 0xabc   :  { %v4804_v56 = vpop.f32.mrb[61].mxu0  ;;  %v4809_v60 = vpack.c.bf16 %v4802_v55, %v4802_v55  ;;  %v17912_v55 = vld [vmem:[%s21011_s5 + $0x70] sm:$0xff]  }
 0xabd   :  { %v4810_v57 = vpack.c.bf16 %v4804_v56, %v4804_v56  ;;  %v4806_v58 = vpop.f32.mrb[62].mxu0  ;;  %v17913_v56 = vld [vmem:[%s21011_s5 + $0x30] sm:$0xff]  }
 0xabe   :  { %v4807_v61 = vpop.f32.mrb[63].mxu0  ;;  %v17915_v58 = vld [vmem:[%s21011_s5 + $0x38] sm:$0xff]  }
 0xabf   :  { %5036 = vmatprep.mubr.bf16.mxu0 %v4810_v57  ;;  %v17914_v57 = vld [vmem:[%s21011_s5 + $0x78] sm:$0xff]  }
 0xac0   :  { %5037 = vmatmul.mubr.bf16.vlgmr.msra.gmra.mrb[64].mxu0 %v4809_v60 }
 0xac1   :  { %16314 = vmatpush3.bf16.msra.mxu0 %v17885_v59  ;;  %v17916_v59 = vld [vmem:[%s21011_s5 + $0x140] sm:$0xff]  }
 0xac2   :  { %16315 = vmatprep.subr.bf16.mxu0 %v17886_v62 }
 0xac5   :  { %16316 = vmatpush3.bf16.msra.mxu0 %v17887_v0 }
 0xac6   :  { %16317 = vmatprep.subr.bf16.mxu0 %v17888_v1  ;;  %v17917_v1 = vld [vmem:[%s21011_s5 + $0x100] sm:$0xff]  }
 0xac9   :  { %16318 = vmatpush3.bf16.msra.mxu0 %v17889_v3 }
 0xaca   :  { %16319 = vmatprep.subr.bf16.mxu0 %v17890_v4 }
 0xacd   :  { %16320 = vmatpush3.bf16.msra.mxu0 %v17891_v5  ;;  %v17918_v5 = vld [vmem:[%s21011_s5 + $0x148] sm:$0xff]  }
 0xace   :  { %16321 = vmatprep.subr.bf16.mxu0 %v17892_v6  ;;  %v17919_v6 = vld [vmem:[%s21011_s5 + $0x108] sm:$0xff]  }
 0xad1   :  { %16322 = vmatpush3.bf16.msra.mxu0 %v17893_v7  ;;  %v17920_v7 = vld [vmem:[%s21011_s5 + $0x150] sm:$0xff]  }
 0xad2   :  { %16323 = vmatprep.subr.bf16.mxu0 %v17894_v8 }
 0xad5   :  { %16324 = vmatpush3.bf16.msra.mxu0 %v17895_v14 }
 0xad6   :  { %16325 = vmatprep.subr.bf16.mxu0 %v17896_v15 }
 0xad9   :  { %16326 = vmatpush3.bf16.msra.mxu0 %v17897_v9 }
 0xada   :  { %16327 = vmatprep.subr.bf16.mxu0 %v17898_v10 }
 0xadd   :  { %16328 = vmatpush3.bf16.msra.mxu0 %v17899_v11 }
 0xb8b   :  { %v4754_v12 = vpop.f32.mrb[56].mxu1 }
 0xb8c   :  { %v4761_v34 = vadd.f32 %v4754_v12, %v4473_v38  ;;  %v4756_v36 = vpop.f32.mrb[57].mxu1  ;;  %v5065_v38 = vld [vmem:[%s21012_s9] sm:$0x1]  ;;  %v17922_v12 = vld [vmem:[%s21011_s5 + $0x110] sm:$0xff]  }
 0xb8d   :  { %v4762_v13 = vadd.f32 %v4756_v36, %v4475_v39  ;;  %v4758_v18 = vpop.f32.mrb[58].mxu1  ;;  %v17901_v39 = vld [vmem:[%s21011_s5] sm:$0xff]  }
 0xb8e   :  { %v4759_v19 = vpop.f32.mrb[59].mxu1  ;;  %v17921_v36 = vld [vmem:[%s21011_s5 + $0x1c0] sm:$0xff]  }
 0xb8f   :  { %v17923_v18 = vld [vmem:[%s21011_s5 + $0x180] sm:$0xff]   ;;  %v17924_v19 = vld [vmem:[%s21011_s5 + $0x158] sm:$0xff]  }
 0xb93   :  { %v5038_v23 = vpop.f32.mrb[64].mxu0 }
 0xb94   :  { %v5045_v25 = vadd.f32 %v5038_v23, %v4761_v34  ;;  %v5040_v27 = vpop.f32.mrb[65].mxu0  ;;  %v14763_v34 = vld [vmem:[%s21012_s9 + $0x2] sm:$0x1]  ;;  %v17927_v23 = vld [vmem:[%s21011_s5 + $0x188] sm:$0xff]  }
 0xb95   :  { %v5046_v28 = vadd.f32 %v5040_v27, %v4762_v13  ;;  %v5042_v29 = vpop.f32.mrb[66].mxu0  ;;  %v14814_v13 = vld [vmem:[%s21012_s9 + $0x3] sm:$0x1] }
 0xb96   :  { %v5059_v30 = vadd.f32 %v5052_v22, %v5045_v25  ;;  %v5043_v26 = vpop.f32.mrb[67].mxu0  ;;  %v17926_v22 = vld [vmem:[%s21011_s5 + $0x118] sm:$0xff]   ;;  %v17929_v25 = vld [vmem:[%s21011_s5 + $0x1d0] sm:$0xff]   ;;  %v17930_v27 = vld [vmem:[%s21011_s5 + $0x120] sm:$0xff]  }
 0xb97   :  { %v5060_v31 = vadd.f32 %v5056_v24, %v5046_v28  ;;  %v17928_v24 = vld [vmem:[%s21011_s5 + $0x160] sm:$0xff]   ;;  %v17931_v28 = vld [vmem:[%s21011_s5 + $0x190] sm:$0xff]   ;;  %v17932_v29 = vld [vmem:[%s21011_s5 + $0x168] sm:$0xff]  }
 0xb98   :  { %v5061_v32 = vmax.f32 %v5059_v30, 0.0  ;;  %v17933_v30 = vld [vmem:[%s21011_s5 + $0x1d8] sm:$0xff]   ;;  %v17934_v26 = vld [vmem:[%s21011_s5 + $0x128] sm:$0xff]  }
 0xb99   :  { %v5062_v33 = vmax.f32 %v5060_v31, 0.0  ;;  %v17935_v31 = vld [vmem:[%s21011_s5 + $0x198] sm:$0xff]  }
 0xb9a   :  { %v5063_v63 = vpack.c.bf16 %v5061_v32, %v5061_v32  ;;  %v17936_v32 = vld [vmem:[%s21011_s5 + $0x170] sm:$0xff]  }
 0xb9b   :  { %v19870_v37 = vpack.c.bf16 %v5062_v33, %v5062_v33  ;;  %v17937_v33 = vld [vmem:[%s21011_s5 + $0x1e0] sm:$0xff]  }
 0xb9c   :  { %v19873_v35 = vsel %vm3914_vm4, %v5063_v63, 0  ;;  %v17938_v63 = vld [vmem:[%s21011_s5 + $0x130] sm:$0xff]  }
 0xb9d   :  { %14694 = vmatprep.subr.msk.bf16.mxu1 %vm3914_vm4, %v19870_v37  ;;  %14764 = vmatprep.subr.msk.bf16.mxu0 %vm3914_vm4, %v19870_v37 }
 0xb9e   :  { %5076 = vmatpush1.bf16.msra.mxu1 %v19873_v35 }
 0xb9f   :  { %14697 = vmatprep.subr.msk.bf16.mxu1 %vm3914_vm4, %v19870_v37 }
 0xba1   :  { %14695 = vmatmul.mubr.msk.bf16.vlgmr.msra.gmra.mrb[60].mxu1 %vm3910_vm5, %v5065_v38  ;;  %v17941_v38 = vld [vmem:[%s21011_s5 + $0x1e8] sm:$0xff]  }
 0xba2   :  { %5156 = vmatpush1.bf16.msra.mxu1 %v19873_v35  ;;  %5187 = vmatprep.mubr.bf16.mxu1 %v19152_v47 }
 0xba3   :  { %16335 = vmatprep.subr.bf16.mxu1 %v17900_v51  ;;  %v17942_v51 = vld [vmem:[%s21011_s5 + $0x138] sm:$0xff]  }
 0xba9   :  { %14698 = vmatmul.mubr.msk.bf16.vlgmr.msra.gmra.mrb[64].mxu1 %vm3910_vm5, %v14696_v53  ;;  %v17943_v53 = vld [vmem:[%s21011_s5 + $0x1a8] sm:$0xff]  }
 0xbaa   :  { %16336 = vmatpush3.bf16.msra.mxu1 %v17901_v39  ;;  %v17944_v39 = vld [vmem:[%s21011_s5 + $0x1f0] sm:$0xff]  }
 0xbab   :  { %16337 = vmatprep.subr.bf16.mxu1 %v17902_v40  ;;  %v17945_v40 = vld [vmem:[%s21011_s5 + $0x1b0] sm:$0xff]  }
 0xbae   :  { %16338 = vmatpush3.bf16.msra.mxu1 %v17903_v2  ;;  %v17946_v2 = vld [vmem:[%s21011_s5 + $0x1f8] sm:$0xff]  }
 0xbaf   :  { %16339 = vmatprep.subr.bf16.mxu1 %v17904_v41  ;;  %v17947_v41 = vld [vmem:[%s21011_s5 + $0x1b8] sm:$0xff]  }
 0xbb2   :  { %16340 = vmatpush3.bf16.msra.mxu1 %v17905_v42 }
 0xbb3   :  { %16341 = vmatprep.subr.bf16.mxu1 %v17906_v46 }
 0xbb6   :  { %16342 = vmatpush3.bf16.msra.mxu1 %v17907_v50 }
 0xbb7   :  { %16343 = vmatprep.subr.bf16.mxu1 %v17908_v16 }
 0xbba   :  { %16344 = vmatpush3.bf16.msra.mxu1 %v17909_v17 }
 0xbbb   :  { %16345 = vmatprep.subr.bf16.mxu1 %v17910_v52 }
 0xbbe   :  { %16346 = vmatpush3.bf16.msra.mxu1 %v17911_v54 }
 0xbbf   :  { %16347 = vmatprep.subr.bf16.mxu1 %v17912_v55 }
 0xbc2   :  { %16348 = vmatpush3.bf16.msra.mxu1 %v17913_v56 }
 0xbc3   :  { %16349 = vmatprep.subr.bf16.mxu1 %v17914_v57 }
 0xbc6   :  { %16350 = vmatpush3.bf16.msra.mxu1 %v17915_v58 }
 0xbc7   :  { %16357 = vmatprep.subr.bf16.mxu1 %v17916_v59 }
 0xc74   :  { %v5109_v60 = vpop.f32.mrb[60].mxu1 }
 0xc75   :  { %v5111_v61 = vpop.f32.mrb[61].mxu1  ;;  %v5116_v3 = vpack.c.bf16 %v5109_v60, %v5109_v60 }
 0xc76   :  { %v5117_v62 = vpack.c.bf16 %v5111_v61, %v5111_v61  ;;  %v5113_v0 = vpop.f32.mrb[62].mxu1 }
 0xc77   :  { %v5114_v4 = vpop.f32.mrb[63].mxu1 }
 0xc78   :  { %5495 = vmatprep.mubr.bf16.mxu1 %v5117_v62 }
 0xc79   :  { %5496 = vmatmul.mubr.bf16.vlgmr.msra.gmra.mrb[68].mxu1 %v5116_v3 }
 0xc7a   :  { %16358 = vmatpush3.bf16.msra.mxu1 %v17917_v1 }
 0xc7b   :  { %16359 = vmatprep.subr.bf16.mxu1 %v17918_v5 }
 0xc7c   :  { %v5189_v8 = vpop.f32.mrb[64].mxu1 }
 0xc7d   :  { %v5191_v14 = vpop.f32.mrb[65].mxu1  ;;  %v5196_v10 = vpack.c.bf16 %v5189_v8, %v5189_v8 }
 0xc7e   :  { %v5197_v15 = vpack.c.bf16 %v5191_v14, %v5191_v14  ;;  %v5193_v9 = vpop.f32.mrb[66].mxu1  ;;  %16360 = vmatpush3.bf16.msra.mxu1 %v17919_v6 }
 0xc7f   :  { %v5194_v11 = vpop.f32.mrb[67].mxu1  ;;  %16361 = vmatprep.subr.bf16.mxu1 %v17920_v7 }
 0xc80   :  { %5359 = vmatprep.mubr.bf16.mxu0 %v5197_v15 }
 0xc81   :  { %5360 = vmatmul.mubr.bf16.vlgmr.msra.gmra.mrb[68].mxu0 %v5196_v10 }
 0xc82   :  { %5509 = vmatpush1.bf16.msra.mxu0 %v19873_v35  ;;  %5540 = vmatprep.mubr.bf16.mxu0 %v19152_v47 }
 0xc83   :  { %14815 = vmatprep.subr.msk.bf16.mxu0 %vm3914_vm4, %v19870_v37  ;;  %16362 = vmatpush3.bf16.msra.mxu1 %v17922_v12  ;;  %v17939_v37 = vld [vmem:[%s21011_s5 + $0x1a0] sm:$0xff]  }
 0xc84   :  { %16363 = vmatprep.subr.bf16.mxu1 %v17924_v19  ;;  %v14865_v19 = vld [vmem:[#allocation10] ss:$0 sm:$0xff] }
 0xc87   :  { %16364 = vmatpush3.bf16.msra.mxu1 %v17926_v22 }
 0xc88   :  { %16365 = vmatprep.subr.bf16.mxu1 %v17928_v24 }
 0xc89   :  { %14765 = vmatmul.mubr.msk.bf16.vlgmr.msra.gmra.mrb[72].mxu0 %vm3910_vm5, %v14763_v34 }
 0xc8a   :  { %5727 = vmatpush1.bf16.msra.mxu0 %v19873_v35  ;;  %5758 = vmatprep.mubr.bf16.mxu0 %v19152_v47  ;;  %v17940_v35 = vld [vmem:[%s21011_s5 + $0x178] sm:$0xff]  }
 0xc8b   :  { %16379 = vmatprep.subr.bf16.mxu0 %v17921_v36  ;;  %16366 = vmatpush3.bf16.msra.mxu1 %v17930_v27 }
 0xc8c   :  { %16367 = vmatprep.subr.bf16.mxu1 %v17932_v29 }
 0xc8f   :  { %16368 = vmatpush3.bf16.msra.mxu1 %v17934_v26 }
 0xc90   :  { %16369 = vmatprep.subr.bf16.mxu1 %v17936_v32 }
 0xc91   :  { %14816 = vmatmul.mubr.msk.bf16.vlgmr.msra.gmra.mrb[76].mxu0 %vm3910_vm5, %v14814_v13 }
 0xc92   :  { %16380 = vmatpush3.bf16.msra.mxu0 %v17923_v18 }
 0xc93   :  { %16381 = vmatprep.subr.bf16.mxu0 %v17925_v20  ;;  %16370 = vmatpush3.bf16.msra.mxu1 %v17938_v63 }
 0xc94   :  { %16371 = vmatprep.subr.bf16.mxu1 %v17940_v35 }
 0xc96   :  { %16382 = vmatpush3.bf16.msra.mxu0 %v17927_v23 }
 0xc97   :  { %16383 = vmatprep.subr.bf16.mxu0 %v17929_v25  ;;  %16372 = vmatpush3.bf16.msra.mxu1 %v17942_v51 }
 0xc98   :  { %16851 = vmatprep.subr.bf16.mxu1 %v19150_v21 }
 0xc9a   :  { %16384 = vmatpush3.bf16.msra.mxu0 %v17931_v28  ;;  %v5954_v28 = vld [vmem:[%s21013_s13] sm:$0x3] }
 0xc9b   :  { %16385 = vmatprep.subr.bf16.mxu0 %v17933_v30 }
 0xc9e   :  { %16386 = vmatpush3.bf16.msra.mxu0 %v17935_v31 }
 0xc9f   :  { %16387 = vmatprep.subr.bf16.mxu0 %v17937_v33  ;;  %v6015_v33 = vld [vmem:[%s21014_s17] sm:$0xff] }
 0xca0   :  { %v14875_v35 = vcombine.high %v6015_v33, %v6015_v33  ;;  %v14874_v51 = vcombine.low %v6015_v33, %v6015_v33 }
 0xca2   :  { %16388 = vmatpush3.bf16.msra.mxu0 %v17939_v37  ;;  %v5965_v37 = vld [vmem:[%s21015_s21] sm:$0xf] }
 0xca3   :  { %16389 = vmatprep.subr.bf16.mxu0 %v17941_v38  ;;  %v14867_v38 = vld [vmem:[%s21015_s21 + $0x4] sm:$0xf] }
 0xca6   :  { %16390 = vmatpush3.bf16.msra.mxu0 %v17943_v53  ;;  %v6128_v53 = vsel %vm3914_vm4, %v14874_v51, 0 }
 0xca7   :  { %16391 = vmatprep.subr.bf16.mxu0 %v17944_v39  ;;  %v14869_v39 = vld [vmem:[%s21014_s17 + $0x8] sm:$0xff] }
 0xcaa   :  { %16392 = vmatpush3.bf16.msra.mxu0 %v17945_v40  ;;  %v14871_v40 = vcombine.high %v14869_v39, %v14869_v39 }
 0xcab   :  { %16393 = vmatprep.subr.bf16.mxu0 %v17946_v2  ;;  %v14870_v2 = vcombine.low %v14869_v39, %v14869_v39 }
 0xcae   :  { %16394 = vmatpush3.bf16.msra.mxu0 %v17947_v41  ;;  %v6073_v41 = vsel %vm3914_vm4, %v14870_v2, 0 }
 0xcaf   :  { %14872 = vmatprep.subr.msk.bf16.mxu0 %vm3914_vm4, %v14871_v40 }
 0xd4c   :  { %v16351_v42 = vpop.f32.mrb[68].mxu1 }
 0xd4d   :  { %v16352_v46 = vpop.f32.mrb[69].mxu1 }
 0xd4e   :  { %v16353_v50 = vadd.f32 %v16352_v46, %v16351_v42  ;;  %v16354_v16 = vpop.f32.mrb[70].mxu1 }
 0xd4f   :  { %v16355_v17 = vpop.f32.mrb[71].mxu1 }
 0xd54   :  { %v16329_v52 = vpop.f32.mrb[68].mxu0 }
 0xd55   :  { %v16330_v54 = vpop.f32.mrb[69].mxu0 }
 0xd56   :  { %v16331_v55 = vadd.f32 %v16330_v54, %v16329_v52  ;;  %v16332_v56 = vpop.f32.mrb[70].mxu0 }
 0xd57   :  { %v16333_v57 = vpop.f32.mrb[71].mxu0 }
 0xd58   :  { %v5498_v58 = vadd.f32 %v16353_v50, %v16331_v55 }
 0xd5c   :  { %v5542_v59 = vpop.f32.mrb[72].mxu0 }
 0xd5d   :  { %v5544_v60 = vpop.f32.mrb[73].mxu0  ;;  %v5549_v0 = vpack.c.bf16 %v5542_v59, %v5542_v59  ;;  %v14885_v59 = vld [vmem:[%s21015_s21 + $0xc] sm:$0xf] }
 0xd5e   :  { %v5550_v61 = vpack.c.bf16 %v5544_v60, %v5544_v60  ;;  %v5546_v62 = vpop.f32.mrb[74].mxu0  ;;  %v14880_v60 = vld [vmem:[%s21014_s17 + $0x10] sm:$0xff] }
 0xd5f   :  { %v5547_v1 = vpop.f32.mrb[75].mxu0  ;;  %v14881_v62 = vcombine.low %v14880_v60, %v14880_v60 }
 0xd60   :  { %5712 = vmatprep.mubr.bf16.mxu1 %v5550_v61  ;;  %v14882_v61 = vcombine.high %v14880_v60, %v14880_v60  ;;  %v14887_v1 = vld [vmem:[%s21014_s17 + $0x18] sm:$0xff] }
 0xd61   :  { %5713 = vmatmul.mubr.bf16.vlgmr.msra.gmra.mrb[72].mxu1 %v5549_v0  ;;  %v6231_v0 = vsel %vm3914_vm4, %v14881_v62, 0  ;;  %v17961_v60 = vld [vmem:[%s21016_s29 + $0x198] ss:$12 sps:$4 sm:$0xff]   ;;  %v17966_v62 = vld [vmem:[%s21016_s29 + $0x1b4] ss:$12 sps:$4 sm:$0xff]  }
 0xd62   :  { %16853 = vmatprep.mubr.msk.bf16.mxu1 %vm19151_vm1, %v19150_v21 }
 0xd64   :  { %v5760_v3 = vpop.f32.mrb[76].mxu0 }
 0xd65   :  { %v5762_v4 = vpop.f32.mrb[77].mxu0  ;;  %v5767_v7 = vpack.c.bf16 %v5760_v3, %v5760_v3  ;;  %v14889_v3 = vcombine.high %v14887_v1, %v14887_v1 }
 0xd66   :  { %v5768_v5 = vpack.c.bf16 %v5762_v4, %v5762_v4  ;;  %v5764_v6 = vpop.f32.mrb[78].mxu0 }
 0xd67   :  { %v5765_v8 = vpop.f32.mrb[79].mxu0 }
 0xd68   :  { %5930 = vmatprep.mubr.bf16.mxu0 %v5768_v5 }
 0xd69   :  { %5931 = vmatmul.mubr.bf16.vlgmr.msra.gmra.mrb[80].mxu0 %v5767_v7 }
 0xd6a   :  { %6110 = vmatprep.mubr.bf16.mxu0 %v19152_v47  ;;  %6079 = vmatpush1.bf16.msra.mxu0 %v6073_v41 }
 0xd6b   :  { %16863 = vmatprep.subr.bf16.mxu0 %v19150_v21 }
 0xe34   :  { %v16373_v14 = vpop.f32.mrb[72].mxu1 }
 0xe35   :  { %v16374_v15 = vpop.f32.mrb[73].mxu1 }
 0xe36   :  { %v16375_v9 = vadd.f32 %v16374_v15, %v16373_v14  ;;  %v16376_v10 = vpop.f32.mrb[74].mxu1 }
 0xe37   :  { %v16377_v11 = vpop.f32.mrb[75].mxu1 }
 0xe38   :  { %v5720_v12 = vadd.f32 %v16375_v9, %v5498_v58  ;;  %v14878_v58 = vld [vmem:[%s21015_s21 + $0x8] sm:$0xf] }
 0xe3c   :  { %v16395_v34 = vpop.f32.mrb[80].mxu0 }
 0xe3d   :  { %v16396_v36 = vpop.f32.mrb[81].mxu0 }
 0xe3e   :  { %v16397_v13 = vadd.f32 %v16396_v36, %v16395_v34  ;;  %v16398_v18 = vpop.f32.mrb[82].mxu0 }
 0xe3f   :  { %v16399_v20 = vpop.f32.mrb[83].mxu0 }
 0xe40   :  { %v5938_v22 = vadd.f32 %v16397_v13, %v5720_v12  ;;  %v14888_v12 = vcombine.low %v14887_v1, %v14887_v1  ;;  %v17964_v1 = vld [vmem:[%s21016_s29 + $0x1b0] ss:$12 sps:$4 sm:$0xff]  }
 0xe42   :  { %v5946_v23 = vadd.f32 %v14865_v19, %v5938_v22  ;;  %v6336_v18 = vsel %vm3914_vm4, %v14888_v12, 0  ;;  %v17973_v12 = vld [vmem:[%s21016_s29 + $0x1f8] ss:$12 sps:$4 sm:$0xff]  }
 0xe44   :  { %v5955_v24 = vmul.f32 0.5, %v5946_v23  ;;  %5948 = vst.msk [vmem:[#allocation16] sm:$0x3] %vm5947_vm6, %v5946_v23 }
 0xe46   :  { %v5956_v25 = vmul.f32 1.442695, %v5955_v24 }
 0xe48   :  { %18836 = vpow2.f32 %v5956_v25 }
 0xe52   :  { %v18837_v27 = vpop.eup %18836 }
 0xe53   :  { %5959 = vrot.lane.b32.xlu0 %v18837_v27, %s19153_s25 }
 0xe57   :  { %5950 = vrot.lane.b32.xlu0 %v5946_v23, %s19153_s25 }
 0xec5   :  { %v5960_v29 = vpop.permute.xlu0 %5959 }
 0xec6   :  { %v5962_v30 = vmul.f32 %v5960_v29, %v5954_v28 }
 0xec8   :  { %v5963_v26 = vadd.f32 %v5962_v30, %v5946_v23 }
 0xec9   :  { %v5951_v31 = vpop.permute.xlu0 %5950 }
 0xeca   :  { %v5964_v32 = vpack.c.bf16 %v5963_v26, %v5963_v26  ;;  %5953 = vst.msk [vmem:[#allocation17] sm:$0x3] %vm5947_vm6, %v5951_v31 }
 0xecc   :  { %v5972_v63 = vsel %vm5970_vm7, %v5964_v32, 0 }
 0xecd   :  { %16852 = vmatpush3.bf16.msra.mxu1 %v5972_v63 }
 0xece   :  { %16857 = vmatprep.subr.bf16.mxu1 %v19150_v21 }
 0xed0   :  { %16854 = vmatmul.mubr.msk.bf16.vlgmr.msra.gmra.mrb[76].mxu1 %vm5966_vm8, %v5965_v37 }
 0xed1   :  { %16858 = vmatpush3.bf16.msra.mxu1 %v5972_v63  ;;  %16859 = vmatprep.mubr.msk.bf16.mxu1 %vm19151_vm1, %v19150_v21 }
 0xed2   :  { %14876 = vmatprep.subr.msk.bf16.mxu1 %vm3914_vm4, %v14875_v35 }
 0xed8   :  { %16860 = vmatmul.mubr.msk.bf16.vlgmr.msra.gmra.mrb[80].mxu1 %vm5966_vm8, %v14867_v38  ;;  %v6385_v38 = vld [vmem:[#allocation11 + $0x8] sm:$0xff] }
 0xed9   :  { %6165 = vmatprep.mubr.bf16.mxu1 %v19152_v47  ;;  %6134 = vmatpush1.bf16.msra.mxu1 %v6128_v53 }
 0xeda   :  { %14883 = vmatprep.subr.msk.bf16.mxu1 %vm3914_vm4, %v14882_v61  ;;  %v17991_v61 = vld [vmem:[%s21016_s29 + $0x1a0] ss:$12 sps:$4 sm:$0xff]  }
 0xfa3   :  { %v6008_v42 = vpop.f32.mrb[76].mxu1 }
 0xfa4   :  { %v6014_v46 = vpack.c.bf16 %v6008_v42, %v6008_v42  ;;  %v16855_v50 = vpop.f32.mrb[77].mxu1 }
 0xfa5   :  { %v6011_v16 = vpop.f32.mrb[78].mxu1 }
 0xfa6   :  { %v16856_v17 = vpop.f32.mrb[79].mxu1  ;;  %14877 = vmatmul.mubr.msk.bf16.vlgmr.msra.gmra.mrb[84].mxu1 %vm3910_vm5, %v6014_v46  ;;  %v17960_v16 = vld [vmem:[%s21016_s29 + $0x184] ss:$12 sps:$4 sm:$0xff]  }
 0xfa7   :  { %6268 = vmatprep.mubr.bf16.mxu1 %v19152_v47  ;;  %6237 = vmatpush1.bf16.msra.mxu1 %v6231_v0  ;;  %v17985_v17 = vld [vmem:[%s21016_s29 + $0x248] ss:$12 sps:$4 sm:$0xff]   ;;  %v17995_v0 = vld [vmem:[%s21016_s29 + $0x278] ss:$12 sps:$4 sm:$0xff]  }
 0xfa8   :  { %14890 = vmatprep.subr.msk.bf16.mxu1 %vm3914_vm4, %v14889_v3  ;;  %v17996_v3 = vld [vmem:[%s21016_s29 + $0x1b8] ss:$12 sps:$4 sm:$0xff]  }
 0xfab   :  { %v6055_v52 = vpop.f32.mrb[80].mxu1 }
 0xfac   :  { %v6061_v54 = vpack.c.bf16 %v6055_v52, %v6055_v52  ;;  %v16861_v55 = vpop.f32.mrb[81].mxu1 }
 0xfad   :  { %v6058_v56 = vpop.f32.mrb[82].mxu1  ;;  %v17957_v55 = vld [vmem:[%s21017_s3] sm:$0x1f]  }
 0xfae   :  { %v16862_v57 = vpop.f32.mrb[83].mxu1  ;;  %14873 = vmatmul.mubr.msk.bf16.vlgmr.msra.gmra.mrb[84].mxu0 %vm3910_vm5, %v6061_v54  ;;  %v17956_v54 = vld [vmem:[%s21017_s3 + $0x8] sm:$0x1f]  }
 0xfaf   :  { %16864 = vmatpush3.bf16.msra.mxu0 %v5972_v63  ;;  %16865 = vmatprep.mubr.msk.bf16.mxu0 %vm19151_vm1, %v19150_v21  ;;  %v17958_v56 = vld [vmem:[%s21016_s29 + $0x180] ss:$12 sps:$4 sm:$0xff]   ;;  %v17986_v57 = vld [vmem:[%s21016_s29 + $0x188] ss:$12 sps:$4 sm:$0xff]  }
 0xfb0   :  { %16869 = vmatprep.subr.bf16.mxu0 %v19150_v21 }
 0xfb6   :  { %16866 = vmatmul.mubr.msk.bf16.vlgmr.msra.gmra.mrb[88].mxu0 %vm5966_vm8, %v14878_v58  ;;  %v17963_v58 = vld [vmem:[%s21016_s29 + $0x19c] ss:$12 sps:$4 sm:$0xff]  }
 0xfb7   :  { %16870 = vmatpush3.bf16.msra.mxu0 %v5972_v63  ;;  %16871 = vmatprep.mubr.msk.bf16.mxu0 %vm19151_vm1, %v19150_v21  ;;  %v6384_v63 = vld [vmem:[#allocation11] sm:$0xff] }
 0xfbe   :  { %16872 = vmatmul.mubr.msk.bf16.vlgmr.msra.gmra.mrb[92].mxu0 %vm5966_vm8, %v14885_v59  ;;  %v17990_v59 = vld [vmem:[%s21016_s29 + $0x260] ss:$12 sps:$4 sm:$0xff]  }
 0xfbf   :  { %6440 = vmatprep.mubr.bf16.mxu0 %v19152_v47 }
0x1079   :  { %v6167_v4 = vpop.f32.mrb[84].mxu1 }
0x107a   :  { %v6169_v5 = vpop.f32.mrb[85].mxu1 }
0x107b   :  { %v6171_v6 = vpop.f32.mrb[86].mxu1 }
0x107c   :  { %v6172_v7 = vpop.f32.mrb[87].mxu1  ;;  %v17967_v6 = vld [vmem:[%s21016_s29 + $0x1c8] ss:$12 sps:$4 sm:$0xff]  }
0x107d   :  { %v18001_v7 = vld [vmem:[%s21016_s29 + $0x1d0] ss:$12 sps:$4 sm:$0xff]  }
0x1081   :  { %v6112_v8 = vpop.f32.mrb[84].mxu0 }
0x1082   :  { %v6168_v14 = vadd.f32 %v6167_v4, %v6112_v8  ;;  %v6114_v15 = vpop.f32.mrb[85].mxu0  ;;  %v17969_v4 = vld [vmem:[%s21016_s29 + $0x1cc] ss:$12 sps:$4 sm:$0xff]   ;;  %v17972_v8 = vld [vmem:[%s21016_s29 + $0x1e4] ss:$12 sps:$4 sm:$0xff]  }
0x1083   :  { %v6170_v9 = vadd.f32 %v6169_v5, %v6114_v15  ;;  %v6116_v10 = vpop.f32.mrb[86].mxu0  ;;  %v18000_v5 = vld [vmem:[%s21016_s29 + $0x290] ss:$12 sps:$4 sm:$0xff]   ;;  %v17970_v15 = vld [vmem:[%s21016_s29 + $0x1e0] ss:$12 sps:$4 sm:$0xff]  }
0x1084   :  { %v6117_v11 = vpop.f32.mrb[87].mxu0  ;;  %v17975_v10 = vld [vmem:[%s21016_s29 + $0x1fc] ss:$12 sps:$4 sm:$0xff]  }
0x1085   :  { %v18010_v11 = vld [vmem:[%s21016_s29 + $0x2c0] ss:$12 sps:$4 sm:$0xff]  }
0x1089   :  { %v6213_v34 = vpop.f32.mrb[88].mxu0 }
0x108a   :  { %v6219_v36 = vpack.c.bf16 %v6213_v34, %v6213_v34  ;;  %v16867_v13 = vpop.f32.mrb[89].mxu0  ;;  %v18011_v34 = vld [vmem:[%s21016_s29 + $0x200] ss:$12 sps:$4 sm:$0xff]  }
0x108b   :  { %v6216_v19 = vpop.f32.mrb[90].mxu0  ;;  %v18015_v13 = vld [vmem:[%s21016_s29 + $0x2d8] ss:$12 sps:$4 sm:$0xff]  }
0x108c   :  { %v16868_v20 = vpop.f32.mrb[91].mxu0  ;;  %14884 = vmatmul.mubr.msk.bf16.vlgmr.msra.gmra.mrb[88].mxu1 %vm3910_vm5, %v6219_v36  ;;  %v17978_v36 = vld [vmem:[%s21016_s29 + $0x214] ss:$12 sps:$4 sm:$0xff]   ;;  %v18016_v19 = vld [vmem:[%s21016_s29 + $0x218] ss:$12 sps:$4 sm:$0xff]  }
0x108d   :  { %6342 = vmatpush1.bf16.msra.mxu1 %v6336_v18  ;;  %6373 = vmatprep.mubr.bf16.mxu1 %v19152_v47  ;;  %v17976_v18 = vld [vmem:[%s21016_s29 + $0x210] ss:$12 sps:$4 sm:$0xff]   ;;  %v17981_v20 = vld [vmem:[%s21016_s29 + $0x22c] ss:$12 sps:$4 sm:$0xff]  }
0x1091   :  { %v6318_v22 = vpop.f32.mrb[92].mxu0 }
0x1092   :  { %v6324_v23 = vpack.c.bf16 %v6318_v22, %v6318_v22  ;;  %v16873_v24 = vpop.f32.mrb[93].mxu0  ;;  %v17979_v22 = vld [vmem:[%s21016_s29 + $0x228] ss:$12 sps:$4 sm:$0xff]  }
0x1093   :  { %v6321_v25 = vpop.f32.mrb[94].mxu0  ;;  %v17982_v24 = vld [vmem:[%s21016_s29 + $0x240] ss:$12 sps:$4 sm:$0xff]  }
0x1094   :  { %v16874_v27 = vpop.f32.mrb[95].mxu0  ;;  %14891 = vmatmul.mubr.msk.bf16.vlgmr.msra.gmra.mrb[92].mxu1 %vm3910_vm5, %v6324_v23  ;;  %v17984_v23 = vld [vmem:[%s21016_s29 + $0x244] ss:$12 sps:$4 sm:$0xff]   ;;  %v17989_v25 = vld [vmem:[%s21016_s29 + $0x25c] ss:$12 sps:$4 sm:$0xff]  }
0x1095   :  { %6560 = vmatprep.mubr.bf16.mxu1 %v19152_v47  ;;  %v17987_v27 = vld [vmem:[%s21016_s29 + $0x258] ss:$12 sps:$4 sm:$0xff]  }
0x115f   :  { %v6270_v28 = vpop.f32.mrb[88].mxu1 }
0x1160   :  { %v6277_v29 = vadd.f32 %v6270_v28, %v6168_v14  ;;  %v6272_v30 = vpop.f32.mrb[89].mxu1  ;;  %v18005_v14 = vld [vmem:[%s21016_s29 + $0x2a8] ss:$12 sps:$4 sm:$0xff]  }
0x1161   :  { %v6278_v26 = vadd.f32 %v6272_v30, %v6170_v9  ;;  %v6274_v31 = vpop.f32.mrb[90].mxu1  ;;  %v18006_v9 = vld [vmem:[%s21016_s29 + $0x1e8] ss:$12 sps:$4 sm:$0xff]   ;;  %v17999_v30 = vld [vmem:[%s21016_s29 + $0x28c] ss:$12 sps:$4 sm:$0xff]  }
0x1162   :  { %v6275_v32 = vpop.f32.mrb[91].mxu1  ;;  %v17994_v28 = vld [vmem:[%s21016_s29 + $0x274] ss:$12 sps:$4 sm:$0xff]   ;;  %v18004_v31 = vld [vmem:[%s21016_s29 + $0x2a4] ss:$12 sps:$4 sm:$0xff]  }
0x1163   :  { %v18002_v32 = vld [vmem:[%s21016_s29 + $0x2a0] ss:$12 sps:$4 sm:$0xff]  }
0x1167   :  { %v6375_v33 = vpop.f32.mrb[92].mxu1 }
0x1168   :  { %v6382_v37 = vadd.f32 %v6375_v33, %v6277_v29  ;;  %v6377_v35 = vpop.f32.mrb[93].mxu1  ;;  %v17992_v29 = vld [vmem:[%s21016_s29 + $0x270] ss:$12 sps:$4 sm:$0xff]  }
0x1169   :  { %v6383_v51 = vadd.f32 %v6377_v35, %v6278_v26  ;;  %v6379_v53 = vpop.f32.mrb[94].mxu1  ;;  %v17997_v26 = vld [vmem:[%s21016_s29 + $0x288] ss:$12 sps:$4 sm:$0xff]   ;;  %v18012_v35 = vld [vmem:[%s21016_s29 + $0x2d0] ss:$12 sps:$4 sm:$0xff]  }
0x116a   :  { %v6386_v39 = vadd.f32 %v6384_v63, %v6382_v37  ;;  %v6380_v40 = vpop.f32.mrb[95].mxu1  ;;  %v18009_v33 = vld [vmem:[%s21016_s29 + $0x2bc] ss:$12 sps:$4 sm:$0xff]   ;;  %v18007_v63 = vld [vmem:[%s21016_s29 + $0x2b8] ss:$12 sps:$4 sm:$0xff]  }
0x116b   :  { %v6387_v2 = vadd.f32 %v6385_v38, %v6383_v51  ;;  %v18014_v37 = vld [vmem:[%s21016_s29 + $0x2d4] ss:$12 sps:$4 sm:$0xff]   ;;  %v18019_v38 = vld [vmem:[%s21016_s29 + $0x2ec] ss:$12 sps:$4 sm:$0xff]   ;;  %v18020_v51 = vld [vmem:[%s21016_s29 + $0x2f0] ss:$12 sps:$4 sm:$0xff]  }
0x116c   :  { %v6388_v41 = vmax.f32 %v6386_v39, 0.0  ;;  %v18017_v53 = vld [vmem:[%s21016_s29 + $0x2e8] ss:$12 sps:$4 sm:$0xff]   ;;  %v18021_v39 = vld [vmem:[%s21016_s29 + $0x230] ss:$12 sps:$4 sm:$0xff]  }
0x116d   :  { %v6389_v42 = vmax.f32 %v6387_v2, 0.0  ;;  %v18024_v40 = vld [vmem:[%s21016_s29 + $0x4] ss:$12 sps:$4 sm:$0xff]   ;;  %v18025_v2 = vld [vmem:[%s21016_s29 + $0xc8] ss:$12 sps:$4 sm:$0xff]  }
0x116e   :  { %v6390_v46 = vpack.c.bf16 %v6388_v41, %v6388_v41 }
0x116f   :  { %v19991_v50 = vpack.c.bf16 %v6389_v42, %v6389_v42 }
0x1170   :  { %v19996_v52 = vsel %vm3914_vm4, %v6390_v46, 0 }
0x1171   :  { %14893 = vmatprep.subr.msk.bf16.mxu0 %vm3914_vm4, %v19991_v50  ;;  %14898 = vmatprep.subr.msk.bf16.mxu1 %vm3914_vm4, %v19991_v50 }
0x1172   :  { %6409 = vmatpush1.bf16.msra.mxu0 %v19996_v52  ;;  %6529 = vmatpush1.bf16.msra.mxu1 %v19996_v52 }
0x1173   :  { %6894 = vmatprep.subr.bf16.mxu0 %v17960_v16  ;;  %16409 = vmatprep.subr.bf16.mxu1 %v17985_v17 }
0x1175   :  { %14899 = vmatmul.mubr.msk.bf16.vlgmr.msra.gmra.mrb[96].mxu1 %vm3910_vm5, %v17956_v54  ;;  %14894 = vmatmul.mubr.msk.bf16.vlgmr.msra.gmra.mrb[96].mxu0 %vm3910_vm5, %v17957_v55 }
0x1176   :  { %6895 = vmatpush1.bf16.msra.mxu0 %v17958_v56  ;;  %16410 = vmatpush3.bf16.msra.mxu1 %v17986_v57 }
0x1177   :  { %6896 = vmatprep.subr.bf16.mxu0 %v17963_v58  ;;  %16411 = vmatprep.subr.bf16.mxu1 %v17990_v59 }
0x117a   :  { %6897 = vmatpush1.bf16.msra.mxu0 %v17961_v60  ;;  %16412 = vmatpush3.bf16.msra.mxu1 %v17991_v61  ;;  %v18022_v60 = vld [vmem:[%s21016_s29] ss:$12 sps:$4 sm:$0xff]   ;;  %v18026_v61 = vld [vmem:[%s21016_s29 + $0x8] ss:$12 sps:$4 sm:$0xff]  }
0x117b   :  { %6898 = vmatprep.subr.bf16.mxu0 %v17966_v62  ;;  %16413 = vmatprep.subr.bf16.mxu1 %v17995_v0  ;;  %v18029_v0 = vld [vmem:[%s21016_s29 + $0x1c] ss:$12 sps:$4 sm:$0xff]  }
0x117e   :  { %6899 = vmatpush1.bf16.msra.mxu0 %v17964_v1  ;;  %16414 = vmatpush3.bf16.msra.mxu1 %v17996_v3  ;;  %v18030_v1 = vld [vmem:[%s21016_s29 + $0xe0] ss:$12 sps:$4 sm:$0xff]   ;;  %v18027_v3 = vld [vmem:[%s21016_s29 + $0x18] ss:$12 sps:$4 sm:$0xff]  }
0x117f   :  { %6900 = vmatprep.subr.bf16.mxu0 %v17969_v4  ;;  %16415 = vmatprep.subr.bf16.mxu1 %v18000_v5  ;;  %v18031_v4 = vld [vmem:[%s21016_s29 + $0x20] ss:$12 sps:$4 sm:$0xff]  }
0x1180   :  { %v18034_v5 = vld [vmem:[%s21016_s29 + $0x34] ss:$12 sps:$4 sm:$0xff]  }
0x1182   :  { %6901 = vmatpush1.bf16.msra.mxu0 %v17967_v6  ;;  %16416 = vmatpush3.bf16.msra.mxu1 %v18001_v7  ;;  %v18035_v6 = vld [vmem:[%s21016_s29 + $0xf8] ss:$12 sps:$4 sm:$0xff]   ;;  %v18032_v7 = vld [vmem:[%s21016_s29 + $0x30] ss:$12 sps:$4 sm:$0xff]  }
0x1183   :  { %6902 = vmatprep.subr.bf16.mxu0 %v17972_v8  ;;  %16417 = vmatprep.subr.bf16.mxu1 %v18005_v14  ;;  %v18036_v8 = vld [vmem:[%s21016_s29 + $0x38] ss:$12 sps:$4 sm:$0xff]  }
0x1184   :  { %v18039_v14 = vld [vmem:[%s21016_s29 + $0x4c] ss:$12 sps:$4 sm:$0xff]  }
0x1186   :  { %6903 = vmatpush1.bf16.msra.mxu0 %v17970_v15  ;;  %16418 = vmatpush3.bf16.msra.mxu1 %v18006_v9  ;;  %v18040_v15 = vld [vmem:[%s21016_s29 + $0x110] ss:$12 sps:$4 sm:$0xff]   ;;  %v18037_v9 = vld [vmem:[%s21016_s29 + $0x48] ss:$12 sps:$4 sm:$0xff]  }
0x1187   :  { %6904 = vmatprep.subr.bf16.mxu0 %v17975_v10  ;;  %16419 = vmatprep.subr.bf16.mxu1 %v18010_v11  ;;  %v18041_v10 = vld [vmem:[%s21016_s29 + $0x50] ss:$12 sps:$4 sm:$0xff]  }
0x1188   :  { %v18044_v11 = vld [vmem:[%s21016_s29 + $0x64] ss:$12 sps:$4 sm:$0xff]  }
0x118a   :  { %6905 = vmatpush1.bf16.msra.mxu0 %v17973_v12  ;;  %16420 = vmatpush3.bf16.msra.mxu1 %v18011_v34  ;;  %v18045_v12 = vld [vmem:[%s21016_s29 + $0x128] ss:$12 sps:$4 sm:$0xff]   ;;  %v18042_v34 = vld [vmem:[%s21016_s29 + $0x60] ss:$12 sps:$4 sm:$0xff]  }
0x118b   :  { %6906 = vmatprep.subr.bf16.mxu0 %v17978_v36  ;;  %16421 = vmatprep.subr.bf16.mxu1 %v18015_v13  ;;  %v18046_v36 = vld [vmem:[%s21016_s29 + $0x68] ss:$12 sps:$4 sm:$0xff]  }
0x118c   :  { %v18049_v13 = vld [vmem:[%s21016_s29 + $0x7c] ss:$12 sps:$4 sm:$0xff]  }
0x118e   :  { %6907 = vmatpush1.bf16.msra.mxu0 %v17976_v18  ;;  %16422 = vmatpush3.bf16.msra.mxu1 %v18016_v19  ;;  %v18050_v18 = vld [vmem:[%s21016_s29 + $0x140] ss:$12 sps:$4 sm:$0xff]   ;;  %v18047_v19 = vld [vmem:[%s21016_s29 + $0x78] ss:$12 sps:$4 sm:$0xff]  }
0x118f   :  { %6908 = vmatprep.subr.bf16.mxu0 %v17981_v20  ;;  %16423 = vmatprep.subr.bf16.mxu1 %v18020_v51  ;;  %v18051_v20 = vld [vmem:[%s21016_s29 + $0x80] ss:$12 sps:$4 sm:$0xff]   ;;  %v18073_v51 = vld [vmem:[%s21016_s29 + $0x308] ss:$12 sps:$4 sm:$0xff]  }
0x1192   :  { %6909 = vmatpush1.bf16.msra.mxu0 %v17979_v22  ;;  %16424 = vmatpush3.bf16.msra.mxu1 %v18021_v39  ;;  %v18054_v22 = vld [vmem:[%s21016_s29 + $0x94] ss:$12 sps:$4 sm:$0xff]   ;;  %v18077_v39 = vld [vmem:[%s21016_s29 + $0x10c] ss:$12 sps:$4 sm:$0xff]  }
0x1193   :  { %6910 = vmatprep.subr.bf16.mxu0 %v17984_v23  ;;  %16431 = vmatprep.subr.bf16.mxu1 %v18025_v2  ;;  %v18055_v23 = vld [vmem:[%s21016_s29 + $0x158] ss:$12 sps:$4 sm:$0xff]   ;;  %v18078_v2 = vld [vmem:[%s21016_s29 + $0x320] ss:$12 sps:$4 sm:$0xff]  }
0x1196   :  { %6911 = vmatpush1.bf16.msra.mxu0 %v17982_v24  ;;  %v18052_v24 = vld [vmem:[%s21016_s29 + $0x90] ss:$12 sps:$4 sm:$0xff]  }
0x1197   :  { %6912 = vmatprep.subr.bf16.mxu0 %v17989_v25  ;;  %v18056_v25 = vld [vmem:[%s21016_s29 + $0x98] ss:$12 sps:$4 sm:$0xff]  }
0x119a   :  { %6913 = vmatpush1.bf16.msra.mxu0 %v17987_v27  ;;  %v18059_v27 = vld [vmem:[%s21016_s29 + $0xac] ss:$12 sps:$4 sm:$0xff]  }
0x119b   :  { %6914 = vmatprep.subr.bf16.mxu0 %v17994_v28  ;;  %v18060_v28 = vld [vmem:[%s21016_s29 + $0x170] ss:$12 sps:$4 sm:$0xff]  }
0x119e   :  { %6915 = vmatpush1.bf16.msra.mxu0 %v17992_v29  ;;  %v18057_v29 = vld [vmem:[%s21016_s29 + $0xa8] ss:$12 sps:$4 sm:$0xff]  }
0x119f   :  { %6916 = vmatprep.subr.bf16.mxu0 %v17999_v30  ;;  %v18061_v30 = vld [vmem:[%s21016_s29 + $0xb0] ss:$12 sps:$4 sm:$0xff]  }
0x11a2   :  { %6917 = vmatpush1.bf16.msra.mxu0 %v17997_v26  ;;  %v18064_v26 = vld [vmem:[%s21016_s29 + $0xc4] ss:$12 sps:$4 sm:$0xff]  }
0x11a3   :  { %6918 = vmatprep.subr.bf16.mxu0 %v18004_v31  ;;  %v18062_v31 = vld [vmem:[%s21016_s29 + $0xc0] ss:$12 sps:$4 sm:$0xff]  }
0x11a6   :  { %6919 = vmatpush1.bf16.msra.mxu0 %v18002_v32  ;;  %v18067_v32 = vld [vmem:[%s21016_s29 + $0xdc] ss:$12 sps:$4 sm:$0xff]  }
0x11a7   :  { %6920 = vmatprep.subr.bf16.mxu0 %v18009_v33  ;;  %v18068_v33 = vld [vmem:[%s21016_s29 + $0x3c8] ss:$12 sps:$4 sm:$0xff]  }
0x11aa   :  { %6921 = vmatpush1.bf16.msra.mxu0 %v18007_v63  ;;  %v18065_v63 = vld [vmem:[%s21016_s29 + $0xd8] ss:$12 sps:$4 sm:$0xff]  }
0x11ab   :  { %6922 = vmatprep.subr.bf16.mxu0 %v18014_v37  ;;  %v18071_v37 = vld [vmem:[%s21016_s29 + $0xf4] ss:$12 sps:$4 sm:$0xff]  }
0x11ae   :  { %6923 = vmatpush1.bf16.msra.mxu0 %v18012_v35  ;;  %v18072_v35 = vld [vmem:[%s21017_s3 + $0x10] sm:$0x1f]  }
0x11af   :  { %6924 = vmatprep.subr.bf16.mxu0 %v18019_v38  ;;  %v18069_v38 = vld [vmem:[%s21016_s29 + $0xf0] ss:$12 sps:$4 sm:$0xff]  }
0x11b2   :  { %6925 = vmatpush1.bf16.msra.mxu0 %v18017_v53  ;;  %v18074_v53 = vld [vmem:[%s21016_s29 + $0x3e0] ss:$12 sps:$4 sm:$0xff]  }
0x11b3   :  { %7234 = vmatprep.subr.bf16.mxu0 %v18024_v40  ;;  %v18075_v40 = vld [vmem:[%s21016_s29 + $0x108] ss:$12 sps:$4 sm:$0xff]  }
0x1248   :  { %v6562_v41 = vpop.f32.mrb[96].mxu1  ;;  %v6442_v42 = vpop.f32.mrb[96].mxu0 }
0x1249   :  { %v6564_v46 = vpop.f32.mrb[97].mxu1  ;;  %v6444_v16 = vpop.f32.mrb[97].mxu0 }
0x124a   :  { %v6566_v17 = vpop.f32.mrb[98].mxu1  ;;  %v6446_v54 = vpop.f32.mrb[98].mxu0 }
0x124b   :  { %v6571_v55 = vpack.c.bf16 %v6566_v17, %v6562_v41  ;;  %v6568_v56 = vpop.f32.mrb[99].mxu1  ;;  %v20056_v57 = vpack.c.bf16 %v6446_v54, %v6442_v42  ;;  %v6448_v58 = vpop.f32.mrb[99].mxu0  ;;  %v18079_v41 = vld [vmem:[%s21016_s29 + $0x3f8] ss:$12 sps:$4 sm:$0xff]   ;;  %v18084_v17 = vld [vmem:[%s21016_s29 + $0x410] ss:$12 sps:$4 sm:$0xff]  }
0x124c   :  { %v6572_v59 = vpack.c.bf16 %v6568_v56, %v6564_v46  ;;  %v6452_v62 = vpack.c.bf16 %v6448_v58, %v6444_v16  ;;  %v18082_v42 = vld [vmem:[%s21016_s29 + $0x124] ss:$12 sps:$4 sm:$0xff]   ;;  %v18080_v46 = vld [vmem:[%s21016_s29 + $0x120] ss:$12 sps:$4 sm:$0xff]   ;;  %v18087_v54 = vld [vmem:[%s21016_s29 + $0x13c] ss:$12 sps:$4 sm:$0xff]  }
0x124d   :  { %v18083_v16 = vld [vmem:[%s21016_s29 + $0x338] ss:$12 sps:$4 sm:$0xff]   ;;  %v18088_v56 = vld [vmem:[%s21016_s29 + $0x350] ss:$12 sps:$4 sm:$0xff]   ;;  %v18089_v58 = vld [vmem:[%s21016_s29 + $0x428] ss:$12 sps:$4 sm:$0xff]  }
0x124e   :  { %6926 = vmatprep.mubr.bf16.mxu0 %v6572_v59  ;;  %6969 = vmatprep.mubr.bf16.mxu1 %v6572_v59  ;;  %v18092_v59 = vld [vmem:[%s21016_s29 + $0x154] ss:$12 sps:$4 sm:$0xff]  }
0x124f   :  { %6927 = vmatmul.mubr.bf16.vlgmr.msra.gmra.mrb[100].mxu0 %v6571_v55  ;;  %6970 = vmatmul.mubr.bf16.vlgmr.msra.gmra.mrb[100].mxu1 %v6571_v55  ;;  %v18085_v55 = vld [vmem:[%s21016_s29 + $0x138] ss:$12 sps:$4 sm:$0xff]  }
0x1250   :  { %7235 = vmatpush1.bf16.msra.mxu0 %v18022_v60  ;;  %16432 = vmatpush3.bf16.msra.mxu1 %v18026_v61  ;;  %v18090_v60 = vld [vmem:[%s21016_s29 + $0x150] ss:$12 sps:$4 sm:$0xff]   ;;  %v18093_v61 = vld [vmem:[%s21016_s29 + $0x368] ss:$12 sps:$4 sm:$0xff]  }
0x1251   :  { %7236 = vmatprep.subr.bf16.mxu0 %v18029_v0  ;;  %16433 = vmatprep.subr.bf16.mxu1 %v18030_v1  ;;  %v18097_v0 = vld [vmem:[%s21016_s29 + $0x16c] ss:$12 sps:$4 sm:$0xff]   ;;  %v18095_v1 = vld [vmem:[%s21016_s29 + $0x168] ss:$12 sps:$4 sm:$0xff]  }
0x1252   :  { %7266 = vmatprep.mubr.bf16.mxu0 %v6452_v62  ;;  %7309 = vmatprep.mubr.bf16.mxu1 %v6452_v62  ;;  %v18094_v62 = vld [vmem:[%s21016_s29 + $0x440] ss:$12 sps:$4 sm:$0xff]  }
0x1254   :  { %7237 = vmatpush1.bf16.msra.mxu0 %v18027_v3  ;;  %16434 = vmatpush3.bf16.msra.mxu1 %v18031_v4  ;;  %v18098_v3 = vld [vmem:[%s21016_s29 + $0x380] ss:$12 sps:$4 sm:$0xff]   ;;  %v18099_v4 = vld [vmem:[%s21016_s29 + $0x458] ss:$12 sps:$4 sm:$0xff]  }
0x1255   :  { %7238 = vmatprep.subr.bf16.mxu0 %v18034_v5  ;;  %16435 = vmatprep.subr.bf16.mxu1 %v18035_v6  ;;  %v18105_v5 = vld [vmem:[%s21016_s29 + $0x304] ss:$12 sps:$4 sm:$0xff]  }
0x1256   :  { %v18100_v6 = vld [vmem:[%s21016_s29 + $0x398] ss:$12 sps:$4 sm:$0xff]  }
0x1258   :  { %7239 = vmatpush1.bf16.msra.mxu0 %v18032_v7  ;;  %16436 = vmatpush3.bf16.msra.mxu1 %v18036_v8  ;;  %v18103_v7 = vld [vmem:[%s21016_s29 + $0x300] ss:$12 sps:$4 sm:$0xff]   ;;  %v18101_v8 = vld [vmem:[%s21016_s29 + $0x470] ss:$12 sps:$4 sm:$0xff]  }
0x1259   :  { %7240 = vmatprep.subr.bf16.mxu0 %v18039_v14  ;;  %16437 = vmatprep.subr.bf16.mxu1 %v18040_v15  ;;  %v18108_v14 = vld [vmem:[%s21016_s29 + $0x31c] ss:$12 sps:$4 sm:$0xff]  }
0x125a   :  { %v18102_v15 = vld [vmem:[%s21016_s29 + $0x3b0] ss:$12 sps:$4 sm:$0xff]  }
0x125c   :  { %7241 = vmatpush1.bf16.msra.mxu0 %v18037_v9  ;;  %16438 = vmatpush3.bf16.msra.mxu1 %v18041_v10  ;;  %v18106_v9 = vld [vmem:[%s21016_s29 + $0x318] ss:$12 sps:$4 sm:$0xff]   ;;  %v18111_v10 = vld [vmem:[%s21016_s29 + $0x334] ss:$12 sps:$4 sm:$0xff]  }
0x125d   :  { %7242 = vmatprep.subr.bf16.mxu0 %v18044_v11  ;;  %16439 = vmatprep.subr.bf16.mxu1 %v18045_v12  ;;  %v18109_v11 = vld [vmem:[%s21016_s29 + $0x330] ss:$12 sps:$4 sm:$0xff]   ;;  %v18112_v12 = vld [vmem:[%s21016_s29 + $0x348] ss:$12 sps:$4 sm:$0xff]  }
0x1260   :  { %7243 = vmatpush1.bf16.msra.mxu0 %v18042_v34  ;;  %16440 = vmatpush3.bf16.msra.mxu1 %v18046_v36  ;;  %v18117_v34 = vld [vmem:[%s21016_s29 + $0x364] ss:$12 sps:$4 sm:$0xff]   ;;  %v18115_v36 = vld [vmem:[%s21016_s29 + $0x360] ss:$12 sps:$4 sm:$0xff]  }
0x1261   :  { %7244 = vmatprep.subr.bf16.mxu0 %v18049_v13  ;;  %16441 = vmatprep.subr.bf16.mxu1 %v18050_v18  ;;  %v18118_v13 = vld [vmem:[%s21016_s29 + $0x378] ss:$12 sps:$4 sm:$0xff]   ;;  %v18120_v18 = vld [vmem:[%s21016_s29 + $0x37c] ss:$12 sps:$4 sm:$0xff]  }
0x1264   :  { %7245 = vmatpush1.bf16.msra.mxu0 %v18047_v19  ;;  %16442 = vmatpush3.bf16.msra.mxu1 %v18051_v20  ;;  %v18121_v19 = vld [vmem:[%s21016_s29 + $0x390] ss:$12 sps:$4 sm:$0xff]   ;;  %v18126_v20 = vld [vmem:[%s21016_s29 + $0x3ac] ss:$12 sps:$4 sm:$0xff]  }
0x1265   :  { %7246 = vmatprep.subr.bf16.mxu0 %v18054_v22  ;;  %16443 = vmatprep.subr.bf16.mxu1 %v18055_v23  ;;  %v18124_v22 = vld [vmem:[%s21016_s29 + $0x3a8] ss:$12 sps:$4 sm:$0xff]   ;;  %v18129_v23 = vld [vmem:[%s21016_s29 + $0x3c4] ss:$12 sps:$4 sm:$0xff]  }
0x1268   :  { %7247 = vmatpush1.bf16.msra.mxu0 %v18052_v24  ;;  %16444 = vmatpush3.bf16.msra.mxu1 %v18056_v25  ;;  %v18127_v24 = vld [vmem:[%s21016_s29 + $0x3c0] ss:$12 sps:$4 sm:$0xff]   ;;  %v18132_v25 = vld [vmem:[%s21016_s29 + $0x3dc] ss:$12 sps:$4 sm:$0xff]  }
0x1269   :  { %7248 = vmatprep.subr.bf16.mxu0 %v18059_v27  ;;  %16445 = vmatprep.subr.bf16.mxu1 %v18060_v28  ;;  %v18130_v27 = vld [vmem:[%s21016_s29 + $0x3d8] ss:$12 sps:$4 sm:$0xff]   ;;  %v18135_v28 = vld [vmem:[%s21016_s29 + $0x3f4] ss:$12 sps:$4 sm:$0xff]  }
0x126c   :  { %7249 = vmatpush1.bf16.msra.mxu0 %v18057_v29  ;;  %16446 = vmatpush3.bf16.msra.mxu1 %v18061_v30  ;;  %v18133_v29 = vld [vmem:[%s21016_s29 + $0x3f0] ss:$12 sps:$4 sm:$0xff]   ;;  %v18138_v30 = vld [vmem:[%s21016_s29 + $0x40c] ss:$12 sps:$4 sm:$0xff]  }
0x126d   :  { %15063 = vmatprep.subr.msk.bf16.mxu1 %vm3914_vm4, %v19991_v50  ;;  %7250 = vmatprep.subr.bf16.mxu0 %v18064_v26  ;;  %v18136_v26 = vld [vmem:[%s21016_s29 + $0x408] ss:$12 sps:$4 sm:$0xff]  }
0x126f   :  { %7310 = vmatmul.mubr.bf16.vlgmr.msra.gmra.mrb[104].mxu1 %v20056_v57 }
0x1270   :  { %7251 = vmatpush1.bf16.msra.mxu0 %v18062_v31  ;;  %7330 = vmatpush1.bf16.msra.mxu1 %v19996_v52  ;;  %v18141_v31 = vld [vmem:[%s21016_s29 + $0x424] ss:$12 sps:$4 sm:$0xff]  }
0x1271   :  { %7252 = vmatprep.subr.bf16.mxu0 %v18067_v32  ;;  %7361 = vmatprep.mubr.bf16.mxu1 %v19152_v47  ;;  %v18139_v32 = vld [vmem:[%s21016_s29 + $0x420] ss:$12 sps:$4 sm:$0xff]  }
0x1272   :  { %16453 = vmatprep.subr.bf16.mxu1 %v18068_v33  ;;  %v18144_v33 = vld [vmem:[%s21016_s29 + $0x43c] ss:$12 sps:$4 sm:$0xff]  }
0x1274   :  { %7253 = vmatpush1.bf16.msra.mxu0 %v18065_v63  ;;  %v18142_v63 = vld [vmem:[%s21016_s29 + $0x438] ss:$12 sps:$4 sm:$0xff]  }
0x1275   :  { %7254 = vmatprep.subr.bf16.mxu0 %v18071_v37  ;;  %v18145_v37 = vld [vmem:[%s21016_s29 + $0x450] ss:$12 sps:$4 sm:$0xff]  }
0x1277   :  { %15064 = vmatmul.mubr.msk.bf16.vlgmr.msra.gmra.mrb[108].mxu1 %vm3910_vm5, %v18072_v35  ;;  %v18147_v35 = vld [vmem:[%s21016_s29 + $0x454] ss:$12 sps:$4 sm:$0xff]  }
0x1278   :  { %16454 = vmatpush3.bf16.msra.mxu1 %v18073_v51  ;;  %7255 = vmatpush1.bf16.msra.mxu0 %v18069_v38  ;;  %v18150_v38 = vld [vmem:[%s21016_s29 + $0x46c] ss:$12 sps:$4 sm:$0xff]   ;;  %v18148_v51 = vld [vmem:[%s21016_s29 + $0x468] ss:$12 sps:$4 sm:$0xff]  }
0x1279   :  { %16455 = vmatprep.subr.bf16.mxu1 %v18074_v53  ;;  %7256 = vmatprep.subr.bf16.mxu0 %v18077_v39  ;;  %v18154_v53 = vld [vmem:[%s21016_s29 + $0x484] ss:$12 sps:$4 sm:$0xff]  }
0x127c   :  { %16456 = vmatpush3.bf16.msra.mxu1 %v18078_v2  ;;  %7257 = vmatpush1.bf16.msra.mxu0 %v18075_v40 }
0x127d   :  { %16457 = vmatprep.subr.bf16.mxu1 %v18079_v41  ;;  %7258 = vmatprep.subr.bf16.mxu0 %v18082_v42 }
0x1280   :  { %16458 = vmatpush3.bf16.msra.mxu1 %v18083_v16  ;;  %7259 = vmatpush1.bf16.msra.mxu0 %v18080_v46 }
0x1281   :  { %16459 = vmatprep.subr.bf16.mxu1 %v18084_v17  ;;  %7260 = vmatprep.subr.bf16.mxu0 %v18087_v54 }
0x1284   :  { %16460 = vmatpush3.bf16.msra.mxu1 %v18088_v56  ;;  %7261 = vmatpush1.bf16.msra.mxu0 %v18085_v55 }
0x1285   :  { %16461 = vmatprep.subr.bf16.mxu1 %v18089_v58  ;;  %7262 = vmatprep.subr.bf16.mxu0 %v18092_v59 }
0x1288   :  { %16462 = vmatpush3.bf16.msra.mxu1 %v18093_v61  ;;  %7263 = vmatpush1.bf16.msra.mxu0 %v18090_v60 }
0x1289   :  { %16463 = vmatprep.subr.bf16.mxu1 %v18094_v62  ;;  %7264 = vmatprep.subr.bf16.mxu0 %v18097_v0 }
0x128c   :  { %16464 = vmatpush3.bf16.msra.mxu1 %v18098_v3  ;;  %7265 = vmatpush1.bf16.msra.mxu0 %v18095_v1 }
0x128d   :  { %16465 = vmatprep.subr.bf16.mxu1 %v18099_v4  ;;  %7695 = vmatprep.subr.bf16.mxu0 %v18105_v5  ;;  %v18152_v5 = vld [vmem:[%s21016_s29 + $0x480] ss:$12 sps:$4 sm:$0xff]  }
0x128f   :  { %7267 = vmatmul.mubr.bf16.vlgmr.msra.gmra.mrb[100].mxu0 %v20056_v57  ;;  %v18114_v57 = vld [vmem:[%s21016_s29 + $0x34c] ss:$12 sps:$4 sm:$0xff]  }
0x1290   :  { %16466 = vmatpush3.bf16.msra.mxu1 %v18100_v6  ;;  %7696 = vmatpush1.bf16.msra.mxu0 %v18103_v7  ;;  %v18179_v6 = vld [vmem:[%s21016_s29 + $0x548] ss:$12 sps:$4 sm:$0xff]  }
0x1291   :  { %16467 = vmatprep.subr.bf16.mxu1 %v18101_v8  ;;  %7697 = vmatprep.subr.bf16.mxu0 %v18108_v14  ;;  %v18157_v7 = vld [vmem:[%s21016_s29 + $0x49c] ss:$12 sps:$4 sm:$0xff]   ;;  %v18155_v8 = vld [vmem:[%s21016_s29 + $0x498] ss:$12 sps:$4 sm:$0xff]   ;;  %v18160_v14 = vld [vmem:[%s21016_s29 + $0x4b4] ss:$12 sps:$4 sm:$0xff]  }
0x1294   :  { %16468 = vmatpush3.bf16.msra.mxu1 %v18102_v15  ;;  %7698 = vmatpush1.bf16.msra.mxu0 %v18106_v9  ;;  %v18151_v15 = vld [vmem:[%s21017_s3 + $0x18] sm:$0x1f]   ;;  %v18180_v9 = vld [vmem:[%s21016_s29 + $0x488] ss:$12 sps:$4 sm:$0xff]  }
0x1295   :  { %15180 = vmatprep.subr.msk.bf16.mxu1 %vm3914_vm4, %v19991_v50  ;;  %7699 = vmatprep.subr.bf16.mxu0 %v18111_v10  ;;  %v18123_v50 = vld [vmem:[%s21016_s29 + $0x394] ss:$12 sps:$4 sm:$0xff]   ;;  %v18158_v10 = vld [vmem:[%s21016_s29 + $0x4b0] ss:$12 sps:$4 sm:$0xff]  }
0x1298   :  { %7700 = vmatpush1.bf16.msra.mxu0 %v18109_v11  ;;  %v18184_v11 = vld [vmem:[%s21016_s29 + $0x560] ss:$12 sps:$4 sm:$0xff]  }
0x1299   :  { %7701 = vmatprep.subr.bf16.mxu0 %v18114_v57  ;;  %v18185_v57 = vld [vmem:[%s21016_s29 + $0x4a0] ss:$12 sps:$4 sm:$0xff]  }
0x129c   :  { %7702 = vmatpush1.bf16.msra.mxu0 %v18112_v12  ;;  %v18161_v12 = vld [vmem:[%s21016_s29 + $0x4c8] ss:$12 sps:$4 sm:$0xff]  }
0x129d   :  { %7703 = vmatprep.subr.bf16.mxu0 %v18117_v34  ;;  %v18189_v34 = vld [vmem:[%s21016_s29 + $0x578] ss:$12 sps:$4 sm:$0xff]  }
0x12a0   :  { %7704 = vmatpush1.bf16.msra.mxu0 %v18115_v36  ;;  %v18166_v36 = vld [vmem:[%s21016_s29 + $0x4e4] ss:$12 sps:$4 sm:$0xff]  }
0x12a1   :  { %7705 = vmatprep.subr.bf16.mxu0 %v18120_v18  ;;  %v18164_v18 = vld [vmem:[%s21016_s29 + $0x4e0] ss:$12 sps:$4 sm:$0xff]  }
0x12a4   :  { %7706 = vmatpush1.bf16.msra.mxu0 %v18118_v13  ;;  %v18190_v13 = vld [vmem:[%s21016_s29 + $0x4b8] ss:$12 sps:$4 sm:$0xff]  }
0x12a5   :  { %7707 = vmatprep.subr.bf16.mxu0 %v18123_v50  ;;  %v18194_v50 = vld [vmem:[%s21016_s29 + $0x590] ss:$12 sps:$4 sm:$0xff]  }
0x12a8   :  { %7708 = vmatpush1.bf16.msra.mxu0 %v18121_v19  ;;  %v18169_v19 = vld [vmem:[%s21016_s29 + $0x4fc] ss:$12 sps:$4 sm:$0xff]  }
0x12a9   :  { %7709 = vmatprep.subr.bf16.mxu0 %v18126_v20  ;;  %v18195_v20 = vld [vmem:[%s21016_s29 + $0x4d0] ss:$12 sps:$4 sm:$0xff]  }
0x12ac   :  { %7710 = vmatpush1.bf16.msra.mxu0 %v18124_v22  ;;  %v18167_v22 = vld [vmem:[%s21016_s29 + $0x4f8] ss:$12 sps:$4 sm:$0xff]  }
0x12ad   :  { %7711 = vmatprep.subr.bf16.mxu0 %v18129_v23  ;;  %v18199_v23 = vld [vmem:[%s21016_s29 + $0x5a8] ss:$12 sps:$4 sm:$0xff]  }
0x12b0   :  { %7712 = vmatpush1.bf16.msra.mxu0 %v18127_v24  ;;  %v18172_v24 = vld [vmem:[%s21016_s29 + $0x514] ss:$12 sps:$4 sm:$0xff]  }
0x12b1   :  { %7713 = vmatprep.subr.bf16.mxu0 %v18132_v25  ;;  %v18170_v25 = vld [vmem:[%s21016_s29 + $0x510] ss:$12 sps:$4 sm:$0xff]  }
0x12b4   :  { %7714 = vmatpush1.bf16.msra.mxu0 %v18130_v27  ;;  %v18175_v27 = vld [vmem:[%s21016_s29 + $0x52c] ss:$12 sps:$4 sm:$0xff]  }
0x12b5   :  { %7715 = vmatprep.subr.bf16.mxu0 %v18135_v28  ;;  %v18173_v28 = vld [vmem:[%s21016_s29 + $0x528] ss:$12 sps:$4 sm:$0xff]  }
0x12b8   :  { %7716 = vmatpush1.bf16.msra.mxu0 %v18133_v29  ;;  %v18178_v29 = vld [vmem:[%s21016_s29 + $0x544] ss:$12 sps:$4 sm:$0xff]  }
0x12b9   :  { %7717 = vmatprep.subr.bf16.mxu0 %v18138_v30  ;;  %v18176_v30 = vld [vmem:[%s21016_s29 + $0x540] ss:$12 sps:$4 sm:$0xff]  }
0x12bc   :  { %7718 = vmatpush1.bf16.msra.mxu0 %v18136_v26  ;;  %v18183_v26 = vld [vmem:[%s21016_s29 + $0x55c] ss:$12 sps:$4 sm:$0xff]  }
0x12bd   :  { %7719 = vmatprep.subr.bf16.mxu0 %v18141_v31  ;;  %v18181_v31 = vld [vmem:[%s21016_s29 + $0x558] ss:$12 sps:$4 sm:$0xff]  }
0x12c0   :  { %7720 = vmatpush1.bf16.msra.mxu0 %v18139_v32  ;;  %v18188_v32 = vld [vmem:[%s21016_s29 + $0x574] ss:$12 sps:$4 sm:$0xff]  }
0x12c1   :  { %7721 = vmatprep.subr.bf16.mxu0 %v18144_v33  ;;  %v18186_v33 = vld [vmem:[%s21016_s29 + $0x570] ss:$12 sps:$4 sm:$0xff]  }
0x12c4   :  { %7722 = vmatpush1.bf16.msra.mxu0 %v18142_v63  ;;  %v18193_v63 = vld [vmem:[%s21016_s29 + $0x58c] ss:$12 sps:$4 sm:$0xff]  }
0x12c5   :  { %7723 = vmatprep.subr.bf16.mxu0 %v18147_v35  ;;  %v18198_v35 = vld [vmem:[%s21016_s29 + $0x5a4] ss:$12 sps:$4 sm:$0xff]  }
0x12c8   :  { %7724 = vmatpush1.bf16.msra.mxu0 %v18145_v37  ;;  %v18191_v37 = vld [vmem:[%s21016_s29 + $0x588] ss:$12 sps:$4 sm:$0xff]  }
0x12c9   :  { %7725 = vmatprep.subr.bf16.mxu0 %v18150_v38  ;;  %v18196_v38 = vld [vmem:[%s21016_s29 + $0x5a0] ss:$12 sps:$4 sm:$0xff]  }
0x12cc   :  { %7726 = vmatpush1.bf16.msra.mxu0 %v18148_v51  ;;  %v18200_v51 = vld [vmem:[%s21016_s29 + $0x4e8] ss:$12 sps:$4 sm:$0xff]  }
0x12cd   :  { %8162 = vmatprep.subr.bf16.mxu0 %v18154_v53  ;;  %v18203_v53 = vld [vmem:[%s21016_s29 + $0x5bc] ss:$12 sps:$4 sm:$0xff]  }
0x1322   :  { %v16425_v39 = vpop.f32.mrb[100].mxu1 }
0x1323   :  { %v16426_v40 = vpop.f32.mrb[101].mxu1 }
0x1324   :  { %v16427_v2 = vadd.f32 %v16426_v40, %v16425_v39  ;;  %v16428_v41 = vpop.f32.mrb[102].mxu1  ;;  %v18204_v39 = vld [vmem:[%s21016_s29 + $0x5c0] ss:$12 sps:$4 sm:$0xff]   ;;  %v18201_v40 = vld [vmem:[%s21016_s29 + $0x5b8] ss:$12 sps:$4 sm:$0xff]  }
0x1325   :  { %v16429_v42 = vpop.f32.mrb[103].mxu1 }
0x1326   :  { %v16430_v46 = vadd.f32 %v16429_v42, %v16428_v41  ;;  %v18206_v41 = vld [vmem:[%s21016_s29 + $0x5d0] ss:$12 sps:$4 sm:$0xff]   ;;  %v18208_v42 = vld [vmem:[%s21016_s29 + $0x5d4] ss:$12 sps:$4 sm:$0xff]  }
0x1342   :  { %v16447_v16 = vpop.f32.mrb[104].mxu1 }
0x1343   :  { %v16448_v17 = vpop.f32.mrb[105].mxu1 }
0x1344   :  { %v16449_v54 = vadd.f32 %v16448_v17, %v16447_v16  ;;  %v16450_v55 = vpop.f32.mrb[106].mxu1  ;;  %v18210_v16 = vld [vmem:[%s21016_s29 + $0x518] ss:$12 sps:$4 sm:$0xff]  }
0x1345   :  { %v16451_v56 = vpop.f32.mrb[107].mxu1  ;;  %v18213_v17 = vld [vmem:[%s21016_s29 + $0x5ec] ss:$12 sps:$4 sm:$0xff]  }
0x1346   :  { %v20163_v58 = vadd.f32 %v16449_v54, %v16427_v2  ;;  %v16452_v59 = vadd.f32 %v16451_v56, %v16450_v55  ;;  %v18205_v2 = vld [vmem:[%s21016_s29 + $0x500] ss:$12 sps:$4 sm:$0xff]   ;;  %v18214_v54 = vld [vmem:[%s21016_s29 + $0x5f0] ss:$12 sps:$4 sm:$0xff]   ;;  %v18211_v55 = vld [vmem:[%s21016_s29 + $0x5e8] ss:$12 sps:$4 sm:$0xff]  }
0x1347   :  { %v18215_v56 = vld [vmem:[%s21016_s29 + $0x530] ss:$12 sps:$4 sm:$0xff]  }
0x1348   :  { %v20165_v60 = vadd.f32 %v16452_v59, %v16430_v46  ;;  %v18209_v46 = vld [vmem:[%s21016_s29 + $0x5d8] ss:$12 sps:$4 sm:$0xff]  }
0x134a   :  { %v7363_v61 = vpop.f32.mrb[108].mxu1 }
0x134b   :  { %v7365_v62 = vpop.f32.mrb[109].mxu1 }
0x134c   :  { %v7367_v0 = vpop.f32.mrb[110].mxu1 }
0x134d   :  { %v7372_v1 = vpack.c.bf16 %v7367_v0, %v7363_v61  ;;  %v7369_v3 = vpop.f32.mrb[111].mxu1 }
0x134e   :  { %v7373_v4 = vpack.c.bf16 %v7369_v3, %v7365_v62 }
0x1350   :  { %7727 = vmatprep.mubr.bf16.mxu0 %v7373_v4  ;;  %7770 = vmatprep.mubr.bf16.mxu1 %v7373_v4 }
0x1351   :  { %7728 = vmatmul.mubr.bf16.vlgmr.msra.gmra.mrb[100].mxu0 %v7372_v1  ;;  %7771 = vmatmul.mubr.bf16.vlgmr.msra.gmra.mrb[112].mxu1 %v7372_v1 }
0x1352   :  { %7797 = vmatpush1.bf16.msra.mxu1 %v19996_v52  ;;  %7828 = vmatprep.mubr.bf16.mxu1 %v19152_v47  ;;  %v18163_v52 = vld [vmem:[%s21016_s29 + $0x4cc] ss:$12 sps:$4 sm:$0xff]  }
0x1353   :  { %8163 = vmatpush1.bf16.msra.mxu0 %v18152_v5  ;;  %16475 = vmatprep.subr.bf16.mxu1 %v18179_v6 }
0x1354   :  { %8164 = vmatprep.subr.bf16.mxu0 %v18157_v7 }
0x1357   :  { %8165 = vmatpush1.bf16.msra.mxu0 %v18155_v8 }
0x1358   :  { %8166 = vmatprep.subr.bf16.mxu0 %v18160_v14 }
0x1359   :  { %15181 = vmatmul.mubr.msk.bf16.vlgmr.msra.gmra.mrb[116].mxu1 %vm3910_vm5, %v18151_v15 }
0x135a   :  { %16476 = vmatpush3.bf16.msra.mxu1 %v18180_v9 }
0x135b   :  { %8167 = vmatpush1.bf16.msra.mxu0 %v18158_v10  ;;  %16477 = vmatprep.subr.bf16.mxu1 %v18184_v11  ;;  %v18229_v10 = vld [vmem:[%s21018_s30 + $0x2ac] ss:$16 sps:$4 sm:$0xff]   ;;  %v18227_v11 = vld [vmem:[%s21018_s30 + $0x2a8] ss:$16 sps:$4 sm:$0xff]  }
0x135c   :  { %8168 = vmatprep.subr.bf16.mxu0 %v18163_v52  ;;  %v18235_v52 = vld [vmem:[%s21018_s30 + $0x2cc] ss:$16 sps:$4 sm:$0xff]  }
0x135e   :  { %16478 = vmatpush3.bf16.msra.mxu1 %v18185_v57  ;;  %v18233_v57 = vld [vmem:[%s21018_s30 + $0x2c8] ss:$16 sps:$4 sm:$0xff]  }
0x135f   :  { %8169 = vmatpush1.bf16.msra.mxu0 %v18161_v12  ;;  %16479 = vmatprep.subr.bf16.mxu1 %v18189_v34  ;;  %v18241_v12 = vld [vmem:[%s21018_s30 + $0x2ec] ss:$16 sps:$4 sm:$0xff]   ;;  %v18239_v34 = vld [vmem:[%s21018_s30 + $0x2e8] ss:$16 sps:$4 sm:$0xff]  }
0x1360   :  { %8170 = vmatprep.subr.bf16.mxu0 %v18166_v36  ;;  %v18247_v36 = vld [vmem:[%s21018_s30 + $0x30c] ss:$16 sps:$4 sm:$0xff]  }
0x1362   :  { %16480 = vmatpush3.bf16.msra.mxu1 %v18190_v13  ;;  %v18245_v13 = vld [vmem:[%s21018_s30 + $0x308] ss:$16 sps:$4 sm:$0xff]  }
0x1363   :  { %8171 = vmatpush1.bf16.msra.mxu0 %v18164_v18  ;;  %16481 = vmatprep.subr.bf16.mxu1 %v18194_v50  ;;  %v18253_v18 = vld [vmem:[%s21018_s30 + $0x32c] ss:$16 sps:$4 sm:$0xff]   ;;  %v18251_v50 = vld [vmem:[%s21018_s30 + $0x328] ss:$16 sps:$4 sm:$0xff]  }
0x1364   :  { %8172 = vmatprep.subr.bf16.mxu0 %v18169_v19  ;;  %v18259_v19 = vld [vmem:[%s21018_s30 + $0x34c] ss:$16 sps:$4 sm:$0xff]  }
0x1366   :  { %16482 = vmatpush3.bf16.msra.mxu1 %v18195_v20  ;;  %v18257_v20 = vld [vmem:[%s21018_s30 + $0x348] ss:$16 sps:$4 sm:$0xff]  }
0x1367   :  { %8173 = vmatpush1.bf16.msra.mxu0 %v18167_v22  ;;  %16483 = vmatprep.subr.bf16.mxu1 %v18199_v23  ;;  %v18265_v22 = vld [vmem:[%s21018_s30 + $0x36c] ss:$16 sps:$4 sm:$0xff]   ;;  %v18263_v23 = vld [vmem:[%s21018_s30 + $0x368] ss:$16 sps:$4 sm:$0xff]  }
0x1368   :  { %8174 = vmatprep.subr.bf16.mxu0 %v18172_v24  ;;  %v18271_v24 = vld [vmem:[%s21018_s30 + $0x38c] ss:$16 sps:$4 sm:$0xff]  }
0x136a   :  { %16484 = vmatpush3.bf16.msra.mxu1 %v18200_v51 }
0x136b   :  { %8175 = vmatpush1.bf16.msra.mxu0 %v18170_v25  ;;  %16485 = vmatprep.subr.bf16.mxu1 %v18204_v39  ;;  %v18269_v25 = vld [vmem:[%s21018_s30 + $0x388] ss:$16 sps:$4 sm:$0xff]  }
0x136c   :  { %8176 = vmatprep.subr.bf16.mxu0 %v18175_v27  ;;  %v18277_v27 = vld [vmem:[%s21018_s30 + $0x3ac] ss:$16 sps:$4 sm:$0xff]  }
0x136e   :  { %16486 = vmatpush3.bf16.msra.mxu1 %v18205_v2 }
0x136f   :  { %8177 = vmatpush1.bf16.msra.mxu0 %v18173_v28  ;;  %16487 = vmatprep.subr.bf16.mxu1 %v18209_v46  ;;  %v18275_v28 = vld [vmem:[%s21018_s30 + $0x3a8] ss:$16 sps:$4 sm:$0xff]  }
0x1370   :  { %8178 = vmatprep.subr.bf16.mxu0 %v18178_v29  ;;  %v18283_v29 = vld [vmem:[%s21018_s30 + $0x3cc] ss:$16 sps:$4 sm:$0xff]  }
0x1372   :  { %16488 = vmatpush3.bf16.msra.mxu1 %v18210_v16 }
0x1373   :  { %8179 = vmatpush1.bf16.msra.mxu0 %v18176_v30  ;;  %16489 = vmatprep.subr.bf16.mxu1 %v18214_v54  ;;  %v18281_v30 = vld [vmem:[%s21018_s30 + $0x3c8] ss:$16 sps:$4 sm:$0xff]  }
0x1374   :  { %8180 = vmatprep.subr.bf16.mxu0 %v18183_v26  ;;  %v8252_v26 = vld [vmem:[%s21019_s22] sm:$0x7] }
0x1375   :  { %v8265_v39 = vrot.slane %v8252_v26, %v19497_v45 }
0x1376   :  { %16490 = vmatpush3.bf16.msra.mxu1 %v18215_v56 }
0x1377   :  { %8181 = vmatpush1.bf16.msra.mxu0 %v18181_v31  ;;  %v8257_v31 = vrot.slane %v8252_v26, %v19494_v44 }
0x1378   :  { %8182 = vmatprep.subr.bf16.mxu0 %v18188_v32  ;;  %v8261_v32 = vrot.slane %v8252_v26, %v19500_v48  ;;  %v18286_v26 = vld [vmem:[%s21018_s30 + $0x3e4] ss:$16 sps:$4 sm:$0xff]  }
0x137b   :  { %8183 = vmatpush1.bf16.msra.mxu0 %v18186_v33 }
0x137c   :  { %8184 = vmatprep.subr.bf16.mxu0 %v18193_v63 }
0x137f   :  { %8185 = vmatpush1.bf16.msra.mxu0 %v18191_v37 }
0x1380   :  { %8186 = vmatprep.subr.bf16.mxu0 %v18198_v35 }
0x1383   :  { %8187 = vmatpush1.bf16.msra.mxu0 %v18196_v38 }
0x1384   :  { %8188 = vmatprep.subr.bf16.mxu0 %v18203_v53 }
0x1387   :  { %8189 = vmatpush1.bf16.msra.mxu0 %v18201_v40 }
0x1388   :  { %8190 = vmatprep.subr.bf16.mxu0 %v18208_v42 }
0x138b   :  { %8191 = vmatpush1.bf16.msra.mxu0 %v18206_v41 }
0x138c   :  { %8192 = vmatprep.subr.bf16.mxu0 %v18213_v17 }
0x138f   :  { %8193 = vmatpush1.bf16.msra.mxu0 %v18211_v55 }
0x1424   :  { %v16469_v59 = vpop.f32.mrb[112].mxu1 }
0x1425   :  { %v16470_v61 = vpop.f32.mrb[113].mxu1 }
0x1426   :  { %v16471_v62 = vadd.f32 %v16470_v61, %v16469_v59  ;;  %v16472_v0 = vpop.f32.mrb[114].mxu1 }
0x1427   :  { %v16473_v1 = vpop.f32.mrb[115].mxu1 }
0x1428   :  { %v20219_v3 = vadd.f32 %v16471_v62, %v20163_v58  ;;  %v16474_v4 = vadd.f32 %v16473_v1, %v16472_v0  ;;  %v18221_v58 = vld [vmem:[%s21018_s30 + $0x288] ss:$16 sps:$4 sm:$0xff]  }
0x142a   :  { %v20222_v5 = vadd.f32 %v16474_v4, %v20165_v60  ;;  %v18223_v60 = vld [vmem:[%s21018_s30 + $0x28c] ss:$16 sps:$4 sm:$0xff]  }
0x142b   :  { %9141 = vmatprep.subr.bf16.mxu0 %v18223_v60  ;;  %v18218_v60 = vld [vmem:[%s21018_s30 + $0x280] ss:$16 sps:$4 sm:$0xff]  }
0x142c   :  { %v7830_v6 = vpop.f32.mrb[116].mxu1 }
0x142d   :  { %v7832_v7 = vpop.f32.mrb[117].mxu1 }
0x142e   :  { %v7834_v8 = vpop.f32.mrb[118].mxu1 }
0x142f   :  { %v7839_v14 = vpack.c.bf16 %v7834_v8, %v7830_v6  ;;  %v7836_v15 = vpop.f32.mrb[119].mxu1 }
0x1430   :  { %v7840_v9 = vpack.c.bf16 %v7836_v15, %v7832_v7 }
0x1432   :  { %8194 = vmatprep.mubr.bf16.mxu0 %v7840_v9  ;;  %8237 = vmatprep.mubr.bf16.mxu1 %v7840_v9  ;;  %v18217_v9 = vld [vmem:[%s21020_s23 + $0x8] sm:$0xff]  }
0x1433   :  { %8195 = vmatmul.mubr.bf16.vlgmr.msra.gmra.mrb[100].mxu0 %v7839_v14  ;;  %8238 = vmatmul.mubr.bf16.vlgmr.msra.gmra.mrb[120].mxu1 %v7839_v14  ;;  %v18216_v14 = vld [vmem:[%s21020_s23] sm:$0xff]  }
0x1434   :  { %8337 = vmatprep.mubr.bf16.mxu1 %v19152_v47  ;;  %9142 = vmatpush1.bf16.msra.mxu0 %v18221_v58  ;;  %v18220_v58 = vld [vmem:[%s21018_s30 + $0x284] ss:$16 sps:$4 sm:$0xff]  }
0x1435   :  { %9143 = vmatprep.subr.bf16.mxu0 %v18229_v10  ;;  %v18226_v10 = vld [vmem:[%s21018_s30 + $0x2a4] ss:$16 sps:$4 sm:$0xff]  }
0x1438   :  { %9144 = vmatpush1.bf16.msra.mxu0 %v18227_v11  ;;  %v18224_v11 = vld [vmem:[%s21018_s30 + $0x2a0] ss:$16 sps:$4 sm:$0xff]  }
0x1439   :  { %9145 = vmatprep.subr.bf16.mxu0 %v18235_v52  ;;  %v18232_v52 = vld [vmem:[%s21018_s30 + $0x2c4] ss:$16 sps:$4 sm:$0xff]  }
0x143c   :  { %9146 = vmatpush1.bf16.msra.mxu0 %v18233_v57  ;;  %v18230_v57 = vld [vmem:[%s21018_s30 + $0x2c0] ss:$16 sps:$4 sm:$0xff]  }
0x143d   :  { %9147 = vmatprep.subr.bf16.mxu0 %v18241_v12  ;;  %v18238_v12 = vld [vmem:[%s21018_s30 + $0x2e4] ss:$16 sps:$4 sm:$0xff]  }
0x1440   :  { %9148 = vmatpush1.bf16.msra.mxu0 %v18239_v34  ;;  %v18236_v34 = vld [vmem:[%s21018_s30 + $0x2e0] ss:$16 sps:$4 sm:$0xff]  }
0x1441   :  { %9149 = vmatprep.subr.bf16.mxu0 %v18247_v36  ;;  %v18244_v36 = vld [vmem:[%s21018_s30 + $0x304] ss:$16 sps:$4 sm:$0xff]  }
0x1444   :  { %9150 = vmatpush1.bf16.msra.mxu0 %v18245_v13  ;;  %v18242_v13 = vld [vmem:[%s21018_s30 + $0x300] ss:$16 sps:$4 sm:$0xff]  }
0x1445   :  { %9151 = vmatprep.subr.bf16.mxu0 %v18253_v18  ;;  %v18250_v18 = vld [vmem:[%s21018_s30 + $0x324] ss:$16 sps:$4 sm:$0xff]  }
0x1448   :  { %9152 = vmatpush1.bf16.msra.mxu0 %v18251_v50  ;;  %v18248_v50 = vld [vmem:[%s21018_s30 + $0x320] ss:$16 sps:$4 sm:$0xff]  }
0x1449   :  { %9153 = vmatprep.subr.bf16.mxu0 %v18259_v19  ;;  %v18256_v19 = vld [vmem:[%s21018_s30 + $0x344] ss:$16 sps:$4 sm:$0xff]  }
0x144c   :  { %9154 = vmatpush1.bf16.msra.mxu0 %v18257_v20  ;;  %v18254_v20 = vld [vmem:[%s21018_s30 + $0x340] ss:$16 sps:$4 sm:$0xff]  }
0x144d   :  { %9155 = vmatprep.subr.bf16.mxu0 %v18265_v22  ;;  %v18262_v22 = vld [vmem:[%s21018_s30 + $0x364] ss:$16 sps:$4 sm:$0xff]  }
0x1450   :  { %9156 = vmatpush1.bf16.msra.mxu0 %v18263_v23  ;;  %v18260_v23 = vld [vmem:[%s21018_s30 + $0x360] ss:$16 sps:$4 sm:$0xff]  }
0x1451   :  { %9157 = vmatprep.subr.bf16.mxu0 %v18271_v24  ;;  %v18268_v24 = vld [vmem:[%s21018_s30 + $0x384] ss:$16 sps:$4 sm:$0xff]  }
0x1454   :  { %9158 = vmatpush1.bf16.msra.mxu0 %v18269_v25  ;;  %v18266_v25 = vld [vmem:[%s21018_s30 + $0x380] ss:$16 sps:$4 sm:$0xff]  }
0x1455   :  { %9159 = vmatprep.subr.bf16.mxu0 %v18277_v27  ;;  %v18274_v27 = vld [vmem:[%s21018_s30 + $0x3a4] ss:$16 sps:$4 sm:$0xff]  }
0x1458   :  { %9160 = vmatpush1.bf16.msra.mxu0 %v18275_v28  ;;  %v18272_v28 = vld [vmem:[%s21018_s30 + $0x3a0] ss:$16 sps:$4 sm:$0xff]  }
0x1459   :  { %9161 = vmatprep.subr.bf16.mxu0 %v18283_v29  ;;  %v18280_v29 = vld [vmem:[%s21018_s30 + $0x3c4] ss:$16 sps:$4 sm:$0xff]  }
0x145c   :  { %9162 = vmatpush1.bf16.msra.mxu0 %v18281_v30  ;;  %v18278_v30 = vld [vmem:[%s21018_s30 + $0x3c0] ss:$16 sps:$4 sm:$0xff]  }
0x1506   :  { %v8196_v33 = vpop.f32.mrb[100].mxu0  ;;  %v16491_v63 = vpop.f32.mrb[120].mxu1 }
0x1507   :  { %v8269_v37 = vadd.f32 %v8257_v31, %v8196_v33  ;;  %v8198_v35 = vpop.f32.mrb[101].mxu0  ;;  %v16492_v38 = vpop.f32.mrb[121].mxu1  ;;  %v18287_v33 = vld [vmem:[%s21018_s30 + $0x3e8] ss:$16 sps:$4 sm:$0xff]  }
0x1508   :  { %v8270_v51 = vadd.f32 %v8261_v32, %v8198_v35  ;;  %v16493_v53 = vadd.f32 %v16492_v38, %v16491_v63  ;;  %v8200_v40 = vpop.f32.mrb[102].mxu0  ;;  %v16494_v2 = vpop.f32.mrb[122].mxu1  ;;  %v18290_v63 = vld [vmem:[%s21018_s30 + $0x400] ss:$16 sps:$4 sm:$0xff]   ;;  %v18293_v35 = vld [vmem:[%s21018_s30 + $0x408] ss:$16 sps:$4 sm:$0xff]  }
0x1509   :  { %v8272_v41 = vadd.f32 %v8257_v31, %v8200_v40  ;;  %v8202_v42 = vpop.f32.mrb[103].mxu0  ;;  %v16495_v46 = vpop.f32.mrb[123].mxu1  ;;  %v8275_v55 = vmax.f32 %v8269_v37, 0.0  ;;  %v18289_v31 = vld [vmem:[%s21018_s30 + $0x3ec] ss:$16 sps:$4 sm:$0xff]  }
0x150a   :  { %v8248_v16 = vadd.f32 %v16493_v53, %v20219_v3  ;;  %v8273_v17 = vadd.f32 %v8261_v32, %v8202_v42  ;;  %v16496_v54 = vadd.f32 %v16495_v46, %v16494_v2  ;;  %v8276_v59 = vmax.f32 %v8270_v51, 0.0  ;;  %v18284_v32 = vld [vmem:[%s21018_s30 + $0x3e0] ss:$16 sps:$4 sm:$0xff]   ;;  %9163 = vmatprep.subr.bf16.mxu0 %v18289_v31  ;;  %v18292_v37 = vld [vmem:[%s21018_s30 + $0x404] ss:$16 sps:$4 sm:$0xff]  }
0x150b   :  { %v8278_v56 = vmax.f32 %v8272_v41, 0.0  ;;  %9164 = vmatpush1.bf16.msra.mxu0 %v18287_v33  ;;  %v18295_v38 = vld [vmem:[%s21018_s30 + $0x40c] ss:$16 sps:$4 sm:$0xff]   ;;  %v18298_v51 = vld [vmem:[%s21018_s30 + $0x424] ss:$16 sps:$4 sm:$0xff]  }
0x150c   :  { %v8271_v61 = vadd.f32 %v8265_v39, %v8248_v16  ;;  %v8279_v62 = vmax.f32 %v8273_v17, 0.0  ;;  %v8251_v0 = vadd.f32 %v16496_v54, %v20222_v5  ;;  %9165 = vmatprep.subr.bf16.mxu0 %v18295_v38  ;;  %v18301_v53 = vld [vmem:[%s21018_s30 + $0x42c] ss:$16 sps:$4 sm:$0xff]   ;;  %v18299_v40 = vld [vmem:[%s21018_s30 + $0x428] ss:$16 sps:$4 sm:$0xff]  }
0x150d   :  { %v8281_v1 = vpack.c.bf16 %v8278_v56, %v8275_v55  ;;  %v18304_v2 = vld [vmem:[%s21018_s30 + $0x444] ss:$16 sps:$4 sm:$0xff]   ;;  %v18302_v41 = vld [vmem:[%s21018_s30 + $0x440] ss:$16 sps:$4 sm:$0xff]   ;;  %v18305_v42 = vld [vmem:[%s21018_s30 + $0x448] ss:$16 sps:$4 sm:$0xff]  }
0x150e   :  { %v20253_v4 = vpack.c.bf16 %v8279_v62, %v8276_v59  ;;  %v8274_v6 = vadd.f32 %v8265_v39, %v8251_v0  ;;  %v8277_v8 = vmax.f32 %v8271_v61, 0.0  ;;  %v18296_v39 = vld [vmem:[%s21018_s30 + $0x420] ss:$16 sps:$4 sm:$0xff]   ;;  %v18307_v46 = vld [vmem:[%s21018_s30 + $0x44c] ss:$16 sps:$4 sm:$0xff]  }
0x150f   :  { %v20256_v7 = vsel %vm8295_vm9, %v8281_v1, 0  ;;  %9166 = vmatpush1.bf16.msra.mxu0 %v18293_v35  ;;  %v18310_v16 = vld [vmem:[%s21018_s30 + $0x464] ss:$16 sps:$4 sm:$0xff]   ;;  %v18313_v17 = vld [vmem:[%s21018_s30 + $0x46c] ss:$16 sps:$4 sm:$0xff]  }
0x1510   :  { %v8280_v3 = vmax.f32 %v8274_v6, 0.0  ;;  %15295 = vmatprep.subr.msk.bf16.mxu1 %vm8295_vm9, %v20253_v4  ;;  %9167 = vmatprep.subr.bf16.mxu0 %v18301_v53  ;;  %v18308_v54 = vld [vmem:[%s21018_s30 + $0x460] ss:$16 sps:$4 sm:$0xff]   ;;  %v18311_v55 = vld [vmem:[%s21018_s30 + $0x468] ss:$16 sps:$4 sm:$0xff]  }
0x1511   :  { %8306 = vmatpush1.bf16.msra.mxu1 %v20256_v7  ;;  %v18316_v56 = vld [vmem:[%s21018_s30 + $0x484] ss:$16 sps:$4 sm:$0xff]   ;;  %v18319_v59 = vld [vmem:[%s21018_s30 + $0x48c] ss:$16 sps:$4 sm:$0xff]   ;;  %v18335_v33 = vld [vmem:[%s21018_s30 + $0x4e8] ss:$16 sps:$4 sm:$0xff]  }
0x1512   :  { %16875 = vmatprep.subr.bf16.mxu1 %v19150_v21  ;;  %v8283_v5 = vpack.c.bf16 %v8280_v3, %v8277_v8  ;;  %v18337_v31 = vld [vmem:[%s21018_s30 + $0x4ec] ss:$16 sps:$4 sm:$0xff]   ;;  %v18338_v35 = vld [vmem:[%s21018_s30] ss:$16 sps:$4 sm:$0xff]   ;;  %v18341_v38 = vld [vmem:[%s21018_s30 + $0x8] ss:$16 sps:$4 sm:$0xff]  }
0x1513   :  { %9168 = vmatpush1.bf16.msra.mxu0 %v18299_v40  ;;  %v18349_v53 = vld [vmem:[%s21018_s30 + $0x2c] ss:$16 sps:$4 sm:$0xff]   ;;  %v18347_v40 = vld [vmem:[%s21018_s30 + $0x28] ss:$16 sps:$4 sm:$0xff]  }
0x1514   :  { %15296 = vmatmul.mubr.msk.bf16.vlgmr.msra.gmra.mrb[124].mxu1 %vm8291_vm10, %v18216_v14  ;;  %v20265_v15 = vsel %vm8295_vm9, %v8283_v5, 0  ;;  %9169 = vmatprep.subr.bf16.mxu0 %v18307_v46  ;;  %v18353_v46 = vld [vmem:[%s21018_s30 + $0x48] ss:$16 sps:$4 sm:$0xff]  }
0x1515   :  { %16876 = vmatpush3.bf16.msra.mxu1 %v20265_v15  ;;  %16877 = vmatprep.mubr.msk.bf16.mxu1 %vm19151_vm1, %v19150_v21 }
0x1516   :  { %15301 = vmatprep.subr.msk.bf16.mxu1 %vm8295_vm9, %v20253_v4 }
0x1517   :  { %9170 = vmatpush1.bf16.msra.mxu0 %v18305_v42  ;;  %v18350_v42 = vld [vmem:[%s21018_s30 + $0x40] ss:$16 sps:$4 sm:$0xff]  }
0x1518   :  { %9171 = vmatprep.subr.bf16.mxu0 %v18313_v17  ;;  %v18361_v17 = vld [vmem:[%s21018_s30 + $0x6c] ss:$16 sps:$4 sm:$0xff]  }
0x151b   :  { %9172 = vmatpush1.bf16.msra.mxu0 %v18311_v55  ;;  %v18359_v55 = vld [vmem:[%s21018_s30 + $0x68] ss:$16 sps:$4 sm:$0xff]  }
0x151c   :  { %16878 = vmatmul.mubr.msk.bf16.vlgmr.msra.gmra.mrb[128].mxu1 %vm8291_vm10, %v18216_v14  ;;  %9184 = vmatprep.subr.bf16.mxu0 %v18319_v59  ;;  %v18367_v59 = vld [vmem:[%s21018_s30 + $0x8c] ss:$16 sps:$4 sm:$0xff]  }
0x151d   :  { %8484 = vmatpush1.bf16.msra.mxu1 %v20256_v7  ;;  %8515 = vmatprep.mubr.bf16.mxu1 %v19152_v47 }
0x151e   :  { %16881 = vmatprep.subr.bf16.mxu1 %v19150_v21 }
0x1524   :  { %15302 = vmatmul.mubr.msk.bf16.vlgmr.msra.gmra.mrb[132].mxu1 %vm8291_vm10, %v18217_v9 }
0x1525   :  { %16882 = vmatpush3.bf16.msra.mxu1 %v20265_v15  ;;  %16883 = vmatprep.mubr.msk.bf16.mxu1 %vm19151_vm1, %v19150_v21 }
0x1526   :  { %9055 = vmatprep.subr.bf16.mxu1 %v18220_v58 }
0x152c   :  { %16884 = vmatmul.mubr.msk.bf16.vlgmr.msra.gmra.mrb[136].mxu1 %vm8291_vm10, %v18217_v9 }
0x152d   :  { %9056 = vmatpush1.bf16.msra.mxu1 %v18218_v60 }
0x152e   :  { %9057 = vmatprep.subr.bf16.mxu1 %v18226_v10 }
0x1531   :  { %9058 = vmatpush1.bf16.msra.mxu1 %v18224_v11 }
0x1532   :  { %9059 = vmatprep.subr.bf16.mxu1 %v18232_v52 }
0x1535   :  { %9060 = vmatpush1.bf16.msra.mxu1 %v18230_v57 }
0x1536   :  { %9061 = vmatprep.subr.bf16.mxu1 %v18238_v12 }
0x1539   :  { %9062 = vmatpush1.bf16.msra.mxu1 %v18236_v34  ;;  %v18314_v34 = vld [vmem:[%s21018_s30 + $0x480] ss:$16 sps:$4 sm:$0xff]  }
0x153a   :  { %9063 = vmatprep.subr.bf16.mxu1 %v18244_v36  ;;  %v18317_v36 = vld [vmem:[%s21018_s30 + $0x488] ss:$16 sps:$4 sm:$0xff]  }
0x153d   :  { %9064 = vmatpush1.bf16.msra.mxu1 %v18242_v13  ;;  %v18322_v13 = vld [vmem:[%s21018_s30 + $0x4a4] ss:$16 sps:$4 sm:$0xff]  }
0x153e   :  { %9065 = vmatprep.subr.bf16.mxu1 %v18250_v18  ;;  %v18325_v18 = vld [vmem:[%s21018_s30 + $0x4ac] ss:$16 sps:$4 sm:$0xff]  }
0x1541   :  { %9066 = vmatpush1.bf16.msra.mxu1 %v18248_v50  ;;  %v18320_v50 = vld [vmem:[%s21018_s30 + $0x4a0] ss:$16 sps:$4 sm:$0xff]  }
0x1542   :  { %9067 = vmatprep.subr.bf16.mxu1 %v18256_v19  ;;  %v18323_v19 = vld [vmem:[%s21018_s30 + $0x4a8] ss:$16 sps:$4 sm:$0xff]  }
0x1545   :  { %9068 = vmatpush1.bf16.msra.mxu1 %v18254_v20 }
0x1546   :  { %9069 = vmatprep.subr.bf16.mxu1 %v18262_v22  ;;  %v18328_v22 = vld [vmem:[%s21018_s30 + $0x4c4] ss:$16 sps:$4 sm:$0xff]  }
0x1549   :  { %9070 = vmatpush1.bf16.msra.mxu1 %v18260_v23  ;;  %v18331_v23 = vld [vmem:[%s21018_s30 + $0x4cc] ss:$16 sps:$4 sm:$0xff]  }
0x154a   :  { %9071 = vmatprep.subr.bf16.mxu1 %v18268_v24 }
0x154d   :  { %9072 = vmatpush1.bf16.msra.mxu1 %v18266_v25 }
0x154e   :  { %9073 = vmatprep.subr.bf16.mxu1 %v18274_v27 }
0x1551   :  { %9074 = vmatpush1.bf16.msra.mxu1 %v18272_v28 }
0x1552   :  { %9075 = vmatprep.subr.bf16.mxu1 %v18280_v29  ;;  %v18326_v29 = vld [vmem:[%s21018_s30 + $0x4c0] ss:$16 sps:$4 sm:$0xff]  }
0x1555   :  { %9076 = vmatpush1.bf16.msra.mxu1 %v18278_v30  ;;  %v18329_v30 = vld [vmem:[%s21018_s30 + $0x4c8] ss:$16 sps:$4 sm:$0xff]  }
0x1556   :  { %9077 = vmatprep.subr.bf16.mxu1 %v18286_v26  ;;  %v18334_v26 = vld [vmem:[%s21018_s30 + $0x4e4] ss:$16 sps:$4 sm:$0xff]  }
0x1559   :  { %9078 = vmatpush1.bf16.msra.mxu1 %v18284_v32  ;;  %v18332_v32 = vld [vmem:[%s21018_s30 + $0x4e0] ss:$16 sps:$4 sm:$0xff]  }
0x155a   :  { %9079 = vmatprep.subr.bf16.mxu1 %v18292_v37  ;;  %v18343_v37 = vld [vmem:[%s21018_s30 + $0xc] ss:$16 sps:$4 sm:$0xff]  }
0x155d   :  { %9080 = vmatpush1.bf16.msra.mxu1 %v18290_v63  ;;  %v18340_v63 = vld [vmem:[%s21018_s30 + $0x4] ss:$16 sps:$4 sm:$0xff]  }
0x155e   :  { %9081 = vmatprep.subr.bf16.mxu1 %v18298_v51  ;;  %v18346_v51 = vld [vmem:[%s21018_s30 + $0x24] ss:$16 sps:$4 sm:$0xff]  }
0x1561   :  { %9082 = vmatpush1.bf16.msra.mxu1 %v18296_v39  ;;  %v18344_v39 = vld [vmem:[%s21018_s30 + $0x20] ss:$16 sps:$4 sm:$0xff]  }
0x1562   :  { %9083 = vmatprep.subr.bf16.mxu1 %v18304_v2  ;;  %v18352_v2 = vld [vmem:[%s21018_s30 + $0x44] ss:$16 sps:$4 sm:$0xff]  }
0x1565   :  { %9084 = vmatpush1.bf16.msra.mxu1 %v18302_v41  ;;  %v18355_v41 = vld [vmem:[%s21018_s30 + $0x4c] ss:$16 sps:$4 sm:$0xff]  }
0x1566   :  { %9085 = vmatprep.subr.bf16.mxu1 %v18310_v16  ;;  %v18358_v16 = vld [vmem:[%s21018_s30 + $0x64] ss:$16 sps:$4 sm:$0xff]  }
0x1569   :  { %9086 = vmatpush1.bf16.msra.mxu1 %v18308_v54  ;;  %v18356_v54 = vld [vmem:[%s21018_s30 + $0x60] ss:$16 sps:$4 sm:$0xff]  }
0x156a   :  { %9098 = vmatprep.subr.bf16.mxu1 %v18316_v56  ;;  %v18364_v56 = vld [vmem:[%s21018_s30 + $0x84] ss:$16 sps:$4 sm:$0xff]  }
0x15e7   :  { %v8339_v61 = vpop.f32.mrb[124].mxu1 }
0x15e8   :  { %v8341_v62 = vpop.f32.mrb[125].mxu1 }
0x15e9   :  { %v8343_v0 = vpop.f32.mrb[126].mxu1 }
0x15ea   :  { %v20326_v1 = vpack.c.bf16 %v8343_v0, %v8339_v61  ;;  %v8345_v6 = vpop.f32.mrb[127].mxu1  ;;  %v18362_v61 = vld [vmem:[%s21018_s30 + $0x80] ss:$16 sps:$4 sm:$0xff]   ;;  %v18370_v0 = vld [vmem:[%s21018_s30 + $0xa4] ss:$16 sps:$4 sm:$0xff]  }
0x15eb   :  { %v20328_v8 = vpack.c.bf16 %v8345_v6, %v8341_v62  ;;  %v18365_v62 = vld [vmem:[%s21018_s30 + $0x88] ss:$16 sps:$4 sm:$0xff]   ;;  %v18373_v6 = vld [vmem:[%s21018_s30 + $0xac] ss:$16 sps:$4 sm:$0xff]  }
0x15ef   :  { %v8382_v3 = vpop.f32.mrb[128].mxu1 }
0x15f0   :  { %v16879_v14 = vpop.f32.mrb[129].mxu1 }
0x15f1   :  { %v8385_v5 = vpop.f32.mrb[130].mxu1  ;;  %v18376_v14 = vld [vmem:[%s21018_s30 + $0xc4] ss:$16 sps:$4 sm:$0xff]  }
0x15f2   :  { %v20330_v9 = vpack.c.bf16 %v8385_v5, %v8382_v3  ;;  %v16880_v58 = vpop.f32.mrb[131].mxu1  ;;  %v18371_v3 = vld [vmem:[%s21018_s30 + $0xa8] ss:$16 sps:$4 sm:$0xff]   ;;  %v18379_v5 = vld [vmem:[%s21018_s30 + $0xcc] ss:$16 sps:$4 sm:$0xff]  }
0x15f3   :  { %v18374_v58 = vld [vmem:[%s21018_s30 + $0xc0] ss:$16 sps:$4 sm:$0xff]  }
0x15f7   :  { %v8517_v60 = vpop.f32.mrb[132].mxu1 }
0x15f8   :  { %v8519_v10 = vpop.f32.mrb[133].mxu1 }
0x15f9   :  { %v8521_v11 = vpop.f32.mrb[134].mxu1 }
0x15fa   :  { %v8567_v52 = vpack.c.bf16 %v8521_v11, %v8517_v60  ;;  %v8523_v57 = vpop.f32.mrb[135].mxu1  ;;  %v18377_v60 = vld [vmem:[%s21018_s30 + $0xc8] ss:$16 sps:$4 sm:$0xff]   ;;  %v18385_v11 = vld [vmem:[%s21018_s30 + $0xec] ss:$16 sps:$4 sm:$0xff]  }
0x15fb   :  { %v8568_v12 = vpack.c.bf16 %v8523_v57, %v8519_v10  ;;  %v18382_v10 = vld [vmem:[%s21018_s30 + $0xe4] ss:$16 sps:$4 sm:$0xff]   ;;  %v18383_v57 = vld [vmem:[%s21018_s30 + $0xe8] ss:$16 sps:$4 sm:$0xff]  }
0x15fd   :  { %9087 = vmatprep.mubr.bf16.mxu1 %v8568_v12  ;;  %9173 = vmatprep.mubr.bf16.mxu0 %v8568_v12  ;;  %v18388_v12 = vld [vmem:[%s21018_s30 + $0x104] ss:$16 sps:$4 sm:$0xff]  }
0x15fe   :  { %9088 = vmatmul.mubr.bf16.vlgmr.msra.gmra.mrb[140].mxu1 %v8567_v52  ;;  %9174 = vmatmul.mubr.bf16.vlgmr.msra.gmra.mrb[104].mxu0 %v8567_v52  ;;  %v18380_v52 = vld [vmem:[%s21018_s30 + $0xe0] ss:$16 sps:$4 sm:$0xff]  }
0x15ff   :  { %9099 = vmatpush1.bf16.msra.mxu1 %v18314_v34  ;;  %9185 = vmatpush1.bf16.msra.mxu0 %v18317_v36  ;;  %v8560_v20 = vpop.f32.mrb[136].mxu1  ;;  %v18391_v34 = vld [vmem:[%s21018_s30 + $0x10c] ss:$16 sps:$4 sm:$0xff]   ;;  %v18386_v36 = vld [vmem:[%s21018_s30 + $0x100] ss:$16 sps:$4 sm:$0xff]  }
0x1600   :  { %9100 = vmatprep.subr.bf16.mxu1 %v18322_v13  ;;  %9186 = vmatprep.subr.bf16.mxu0 %v18325_v18  ;;  %v16885_v24 = vpop.f32.mrb[137].mxu1  ;;  %v18389_v13 = vld [vmem:[%s21018_s30 + $0x108] ss:$16 sps:$4 sm:$0xff]   ;;  %v18394_v18 = vld [vmem:[%s21018_s30 + $0x124] ss:$16 sps:$4 sm:$0xff]  }
0x1601   :  { %v8563_v25 = vpop.f32.mrb[138].mxu1  ;;  %9130 = vmatprep.mubr.bf16.mxu1 %v19152_v47  ;;  %9216 = vmatprep.mubr.bf16.mxu0 %v19152_v47  ;;  %v18398_v24 = vld [vmem:[%s21018_s30 + $0x140] ss:$16 sps:$4 sm:$0xff]  }
0x1602   :  { %v8569_v27 = vpack.c.bf16 %v8563_v25, %v8560_v20  ;;  %v16886_v28 = vpop.f32.mrb[139].mxu1  ;;  %v18395_v20 = vld [vmem:[%s21018_s30 + $0x128] ss:$16 sps:$4 sm:$0xff]  }
0x1603   :  { %9101 = vmatpush1.bf16.msra.mxu1 %v18320_v50  ;;  %9187 = vmatpush1.bf16.msra.mxu0 %v18323_v19  ;;  %v18397_v50 = vld [vmem:[%s21018_s30 + $0x12c] ss:$16 sps:$4 sm:$0xff]   ;;  %v18392_v19 = vld [vmem:[%s21018_s30 + $0x120] ss:$16 sps:$4 sm:$0xff]   ;;  %v18401_v25 = vld [vmem:[%s21018_s30 + $0x148] ss:$16 sps:$4 sm:$0xff]  }
0x1604   :  { %9102 = vmatprep.subr.bf16.mxu1 %v18328_v22  ;;  %9188 = vmatprep.subr.bf16.mxu0 %v18331_v23  ;;  %v18400_v22 = vld [vmem:[%s21018_s30 + $0x144] ss:$16 sps:$4 sm:$0xff]   ;;  %v18403_v23 = vld [vmem:[%s21018_s30 + $0x14c] ss:$16 sps:$4 sm:$0xff]  }
0x1605   :  { %v18409_v28 = vld [vmem:[%s21018_s30 + $0x16c] ss:$16 sps:$4 sm:$0xff]  }
0x1607   :  { %9103 = vmatpush1.bf16.msra.mxu1 %v18326_v29  ;;  %9189 = vmatpush1.bf16.msra.mxu0 %v18329_v30  ;;  %v18404_v29 = vld [vmem:[%s21018_s30 + $0x160] ss:$16 sps:$4 sm:$0xff]   ;;  %v18407_v30 = vld [vmem:[%s21018_s30 + $0x168] ss:$16 sps:$4 sm:$0xff]  }
0x1608   :  { %9104 = vmatprep.subr.bf16.mxu1 %v18334_v26  ;;  %9190 = vmatprep.subr.bf16.mxu0 %v18337_v31  ;;  %v18412_v26 = vld [vmem:[%s21018_s30 + $0x184] ss:$16 sps:$4 sm:$0xff]   ;;  %v18415_v31 = vld [vmem:[%s21018_s30 + $0x18c] ss:$16 sps:$4 sm:$0xff]  }
0x160b   :  { %9105 = vmatpush1.bf16.msra.mxu1 %v18332_v32  ;;  %9191 = vmatpush1.bf16.msra.mxu0 %v18335_v33  ;;  %v18410_v32 = vld [vmem:[%s21018_s30 + $0x180] ss:$16 sps:$4 sm:$0xff]   ;;  %v18413_v33 = vld [vmem:[%s21018_s30 + $0x188] ss:$16 sps:$4 sm:$0xff]  }
0x160c   :  { %9630 = vmatprep.subr.bf16.mxu1 %v18340_v63  ;;  %9716 = vmatprep.subr.bf16.mxu0 %v18343_v37  ;;  %v18418_v63 = vld [vmem:[%s21018_s30 + $0x1a4] ss:$16 sps:$4 sm:$0xff]   ;;  %v18421_v37 = vld [vmem:[%s21018_s30 + $0x1ac] ss:$16 sps:$4 sm:$0xff]  }
0x160e   :  { %15464 = vmatmul.mubr.msk.bf16.vlgmr.msra.gmra.mrb[140].mxu1 %vm9051_vm11, %v8569_v27  ;;  %15465 = vmatmul.mubr.msk.bf16.vlgmr.msra.gmra.mrb[104].mxu0 %vm9051_vm11, %v8569_v27  ;;  %v18406_v27 = vld [vmem:[%s21018_s30 + $0x164] ss:$16 sps:$4 sm:$0xff]  }
0x160f   :  { %9631 = vmatpush1.bf16.msra.mxu1 %v18338_v35  ;;  %9662 = vmatprep.mubr.bf16.mxu1 %v20328_v8  ;;  %v18416_v35 = vld [vmem:[%s21018_s30 + $0x1a0] ss:$16 sps:$4 sm:$0xff]  }
0x1610   :  { %9717 = vmatpush1.bf16.msra.mxu0 %v18341_v38  ;;  %9748 = vmatprep.mubr.bf16.mxu0 %v20328_v8  ;;  %v18368_v8 = vld [vmem:[%s21018_s30 + $0xa0] ss:$16 sps:$4 sm:$0xff]   ;;  %v18419_v38 = vld [vmem:[%s21018_s30 + $0x1a8] ss:$16 sps:$4 sm:$0xff]  }
0x1611   :  { %9632 = vmatprep.subr.bf16.mxu1 %v18346_v51  ;;  %9718 = vmatprep.subr.bf16.mxu0 %v18349_v53  ;;  %v18424_v51 = vld [vmem:[%s21018_s30 + $0x1c4] ss:$16 sps:$4 sm:$0xff]   ;;  %v18427_v53 = vld [vmem:[%s21018_s30 + $0x1cc] ss:$16 sps:$4 sm:$0xff]  }
0x1613   :  { %9633 = vmatpush1.bf16.msra.mxu1 %v18344_v39  ;;  %v18422_v39 = vld [vmem:[%s21018_s30 + $0x1c0] ss:$16 sps:$4 sm:$0xff]  }
0x1614   :  { %9719 = vmatpush1.bf16.msra.mxu0 %v18347_v40  ;;  %9634 = vmatprep.subr.bf16.mxu1 %v18352_v2  ;;  %v18425_v40 = vld [vmem:[%s21018_s30 + $0x1c8] ss:$16 sps:$4 sm:$0xff]   ;;  %v18430_v2 = vld [vmem:[%s21018_s30 + $0x1e4] ss:$16 sps:$4 sm:$0xff]  }
0x1615   :  { %9720 = vmatprep.subr.bf16.mxu0 %v18355_v41  ;;  %v18433_v41 = vld [vmem:[%s21018_s30 + $0x1ec] ss:$16 sps:$4 sm:$0xff]  }
0x1617   :  { %9635 = vmatpush1.bf16.msra.mxu1 %v18350_v42  ;;  %v18428_v42 = vld [vmem:[%s21018_s30 + $0x1e0] ss:$16 sps:$4 sm:$0xff]  }
0x1618   :  { %9721 = vmatpush1.bf16.msra.mxu0 %v18353_v46  ;;  %9636 = vmatprep.subr.bf16.mxu1 %v18358_v16  ;;  %v18431_v46 = vld [vmem:[%s21018_s30 + $0x1e8] ss:$16 sps:$4 sm:$0xff]   ;;  %v18436_v16 = vld [vmem:[%s21018_s30 + $0x204] ss:$16 sps:$4 sm:$0xff]  }
0x1619   :  { %9722 = vmatprep.subr.bf16.mxu0 %v18361_v17  ;;  %v18439_v17 = vld [vmem:[%s21018_s30 + $0x20c] ss:$16 sps:$4 sm:$0xff]  }
0x161b   :  { %9637 = vmatpush1.bf16.msra.mxu1 %v18356_v54  ;;  %v18434_v54 = vld [vmem:[%s21018_s30 + $0x200] ss:$16 sps:$4 sm:$0xff]  }
0x161c   :  { %9723 = vmatpush1.bf16.msra.mxu0 %v18359_v55  ;;  %9638 = vmatprep.subr.bf16.mxu1 %v18364_v56  ;;  %v18437_v55 = vld [vmem:[%s21018_s30 + $0x208] ss:$16 sps:$4 sm:$0xff]   ;;  %v18442_v56 = vld [vmem:[%s21018_s30 + $0x224] ss:$16 sps:$4 sm:$0xff]  }
0x161d   :  { %9724 = vmatprep.subr.bf16.mxu0 %v18367_v59  ;;  %v18445_v59 = vld [vmem:[%s21018_s30 + $0x22c] ss:$16 sps:$4 sm:$0xff]  }
0x161f   :  { %9639 = vmatpush1.bf16.msra.mxu1 %v18362_v61  ;;  %v18440_v61 = vld [vmem:[%s21018_s30 + $0x220] ss:$16 sps:$4 sm:$0xff]  }
0x1620   :  { %9725 = vmatpush1.bf16.msra.mxu0 %v18365_v62  ;;  %9640 = vmatprep.subr.bf16.mxu1 %v18370_v0  ;;  %v18443_v62 = vld [vmem:[%s21018_s30 + $0x228] ss:$16 sps:$4 sm:$0xff]   ;;  %v18448_v0 = vld [vmem:[%s21018_s30 + $0x244] ss:$16 sps:$4 sm:$0xff]  }
0x1621   :  { %9726 = vmatprep.subr.bf16.mxu0 %v18373_v6  ;;  %v18451_v6 = vld [vmem:[%s21018_s30 + $0x24c] ss:$16 sps:$4 sm:$0xff]  }
0x1623   :  { %9641 = vmatpush1.bf16.msra.mxu1 %v18368_v8  ;;  %v18446_v8 = vld [vmem:[%s21018_s30 + $0x240] ss:$16 sps:$4 sm:$0xff]  }
0x1624   :  { %9727 = vmatpush1.bf16.msra.mxu0 %v18371_v3  ;;  %9642 = vmatprep.subr.bf16.mxu1 %v18376_v14  ;;  %v18454_v3 = vld [vmem:[%s21018_s30 + $0x264] ss:$16 sps:$4 sm:$0xff]   ;;  %v18457_v14 = vld [vmem:[%s21018_s30 + $0x26c] ss:$16 sps:$4 sm:$0xff]  }
0x1625   :  { %9728 = vmatprep.subr.bf16.mxu0 %v18379_v5  ;;  %v18452_v5 = vld [vmem:[%s21018_s30 + $0x260] ss:$16 sps:$4 sm:$0xff]  }
0x1627   :  { %9643 = vmatpush1.bf16.msra.mxu1 %v18374_v58  ;;  %v18455_v58 = vld [vmem:[%s21018_s30 + $0x268] ss:$16 sps:$4 sm:$0xff]  }
0x1628   :  { %9729 = vmatpush1.bf16.msra.mxu0 %v18377_v60  ;;  %9644 = vmatprep.subr.bf16.mxu1 %v18382_v10  ;;  %v18464_v60 = vld [vmem:[%s21018_s30 + $0x50c] ss:$16 sps:$4 sm:$0xff]   ;;  %v18462_v10 = vld [vmem:[%s21018_s30 + $0x508] ss:$16 sps:$4 sm:$0xff]  }
0x1629   :  { %9730 = vmatprep.subr.bf16.mxu0 %v18385_v11  ;;  %v18470_v11 = vld [vmem:[%s21018_s30 + $0x52c] ss:$16 sps:$4 sm:$0xff]  }
0x162b   :  { %9645 = vmatpush1.bf16.msra.mxu1 %v18380_v52  ;;  %v18468_v52 = vld [vmem:[%s21018_s30 + $0x528] ss:$16 sps:$4 sm:$0xff]  }
0x162c   :  { %9731 = vmatpush1.bf16.msra.mxu0 %v18383_v57  ;;  %9646 = vmatprep.subr.bf16.mxu1 %v18388_v12  ;;  %v18458_v57 = vld [vmem:[%s21020_s23 + $0x10] sm:$0xff]   ;;  %v18476_v12 = vld [vmem:[%s21018_s30 + $0x54c] ss:$16 sps:$4 sm:$0xff]  }
0x162d   :  { %9732 = vmatprep.subr.bf16.mxu0 %v18391_v34  ;;  %v18461_v34 = vld [vmem:[%s21018_s30 + $0x504] ss:$16 sps:$4 sm:$0xff]  }
0x162f   :  { %9647 = vmatpush1.bf16.msra.mxu1 %v18386_v36  ;;  %v18474_v36 = vld [vmem:[%s21018_s30 + $0x548] ss:$16 sps:$4 sm:$0xff]  }
0x1630   :  { %9733 = vmatpush1.bf16.msra.mxu0 %v18389_v13  ;;  %9648 = vmatprep.subr.bf16.mxu1 %v18394_v18  ;;  %v18480_v13 = vld [vmem:[%s21018_s30 + $0x568] ss:$16 sps:$4 sm:$0xff]   ;;  %v18488_v18 = vld [vmem:[%s21018_s30 + $0x58c] ss:$16 sps:$4 sm:$0xff]  }
0x1631   :  { %9734 = vmatprep.subr.bf16.mxu0 %v18397_v50  ;;  %v18459_v50 = vld [vmem:[%s21018_s30 + $0x500] ss:$16 sps:$4 sm:$0xff]  }
0x1633   :  { %9649 = vmatpush1.bf16.msra.mxu1 %v18392_v19  ;;  %v18467_v19 = vld [vmem:[%s21018_s30 + $0x524] ss:$16 sps:$4 sm:$0xff]  }
0x1634   :  { %9735 = vmatpush1.bf16.msra.mxu0 %v18395_v20  ;;  %9650 = vmatprep.subr.bf16.mxu1 %v18400_v22  ;;  %v18486_v20 = vld [vmem:[%s21018_s30 + $0x588] ss:$16 sps:$4 sm:$0xff]   ;;  %v18494_v22 = vld [vmem:[%s21018_s30 + $0x5ac] ss:$16 sps:$4 sm:$0xff]  }
0x1635   :  { %9736 = vmatprep.subr.bf16.mxu0 %v18403_v23  ;;  %v18465_v23 = vld [vmem:[%s21018_s30 + $0x520] ss:$16 sps:$4 sm:$0xff]  }
0x1637   :  { %9651 = vmatpush1.bf16.msra.mxu1 %v18398_v24  ;;  %v18473_v24 = vld [vmem:[%s21018_s30 + $0x544] ss:$16 sps:$4 sm:$0xff]  }
0x1638   :  { %9737 = vmatpush1.bf16.msra.mxu0 %v18401_v25  ;;  %9652 = vmatprep.subr.bf16.mxu1 %v18406_v27  ;;  %v18492_v25 = vld [vmem:[%s21018_s30 + $0x5a8] ss:$16 sps:$4 sm:$0xff]   ;;  %v18500_v27 = vld [vmem:[%s21018_s30 + $0x5cc] ss:$16 sps:$4 sm:$0xff]  }
0x1639   :  { %9738 = vmatprep.subr.bf16.mxu0 %v18409_v28  ;;  %v18471_v28 = vld [vmem:[%s21018_s30 + $0x540] ss:$16 sps:$4 sm:$0xff]  }
0x163b   :  { %9653 = vmatpush1.bf16.msra.mxu1 %v18404_v29  ;;  %v18479_v29 = vld [vmem:[%s21018_s30 + $0x564] ss:$16 sps:$4 sm:$0xff]  }
0x163c   :  { %9739 = vmatpush1.bf16.msra.mxu0 %v18407_v30  ;;  %9654 = vmatprep.subr.bf16.mxu1 %v18412_v26  ;;  %v18498_v30 = vld [vmem:[%s21018_s30 + $0x5c8] ss:$16 sps:$4 sm:$0xff]   ;;  %v18506_v26 = vld [vmem:[%s21018_s30 + $0x5ec] ss:$16 sps:$4 sm:$0xff]  }
0x163d   :  { %9740 = vmatprep.subr.bf16.mxu0 %v18415_v31  ;;  %v18477_v31 = vld [vmem:[%s21018_s30 + $0x560] ss:$16 sps:$4 sm:$0xff]  }
0x163f   :  { %9655 = vmatpush1.bf16.msra.mxu1 %v18410_v32  ;;  %v18485_v32 = vld [vmem:[%s21018_s30 + $0x584] ss:$16 sps:$4 sm:$0xff]  }
0x1640   :  { %9741 = vmatpush1.bf16.msra.mxu0 %v18413_v33  ;;  %9656 = vmatprep.subr.bf16.mxu1 %v18418_v63  ;;  %v18504_v33 = vld [vmem:[%s21018_s30 + $0x5e8] ss:$16 sps:$4 sm:$0xff]   ;;  %v18512_v63 = vld [vmem:[%s21018_s30 + $0x60c] ss:$16 sps:$4 sm:$0xff]  }
0x1641   :  { %9742 = vmatprep.subr.bf16.mxu0 %v18421_v37  ;;  %v18483_v37 = vld [vmem:[%s21018_s30 + $0x580] ss:$16 sps:$4 sm:$0xff]  }
0x1643   :  { %9657 = vmatpush1.bf16.msra.mxu1 %v18416_v35  ;;  %v18491_v35 = vld [vmem:[%s21018_s30 + $0x5a4] ss:$16 sps:$4 sm:$0xff]  }
0x1644   :  { %9743 = vmatpush1.bf16.msra.mxu0 %v18419_v38  ;;  %9658 = vmatprep.subr.bf16.mxu1 %v18424_v51  ;;  %v18510_v38 = vld [vmem:[%s21018_s30 + $0x608] ss:$16 sps:$4 sm:$0xff]   ;;  %v18518_v51 = vld [vmem:[%s21018_s30 + $0x62c] ss:$16 sps:$4 sm:$0xff]  }
0x1645   :  { %9744 = vmatprep.subr.bf16.mxu0 %v18427_v53  ;;  %v18489_v53 = vld [vmem:[%s21018_s30 + $0x5a0] ss:$16 sps:$4 sm:$0xff]  }
0x1647   :  { %9659 = vmatpush1.bf16.msra.mxu1 %v18422_v39  ;;  %v18497_v39 = vld [vmem:[%s21018_s30 + $0x5c4] ss:$16 sps:$4 sm:$0xff]  }
0x1648   :  { %9745 = vmatpush1.bf16.msra.mxu0 %v18425_v40  ;;  %9660 = vmatprep.subr.bf16.mxu1 %v18430_v2  ;;  %v18516_v40 = vld [vmem:[%s21018_s30 + $0x628] ss:$16 sps:$4 sm:$0xff]   ;;  %v18524_v2 = vld [vmem:[%s21018_s30 + $0x64c] ss:$16 sps:$4 sm:$0xff]  }
0x1649   :  { %9746 = vmatprep.subr.bf16.mxu0 %v18433_v41  ;;  %v18495_v41 = vld [vmem:[%s21018_s30 + $0x5c0] ss:$16 sps:$4 sm:$0xff]  }
0x164b   :  { %9661 = vmatpush1.bf16.msra.mxu1 %v18428_v42  ;;  %v18503_v42 = vld [vmem:[%s21018_s30 + $0x5e4] ss:$16 sps:$4 sm:$0xff]  }
0x164c   :  { %9747 = vmatpush1.bf16.msra.mxu0 %v18431_v46  ;;  %9673 = vmatprep.subr.bf16.mxu1 %v18436_v16  ;;  %v18522_v46 = vld [vmem:[%s21018_s30 + $0x648] ss:$16 sps:$4 sm:$0xff]   ;;  %v18530_v16 = vld [vmem:[%s21018_s30 + $0x66c] ss:$16 sps:$4 sm:$0xff]  }
0x164d   :  { %9759 = vmatprep.subr.bf16.mxu0 %v18439_v17  ;;  %v18501_v17 = vld [vmem:[%s21018_s30 + $0x5e0] ss:$16 sps:$4 sm:$0xff]  }
0x164e   :  { %9663 = vmatmul.mubr.bf16.vlgmr.msra.gmra.mrb[140].mxu1 %v20326_v1 }
0x164f   :  { %9749 = vmatmul.mubr.bf16.vlgmr.msra.gmra.mrb[104].mxu0 %v20326_v1  ;;  %9674 = vmatpush1.bf16.msra.mxu1 %v18434_v54  ;;  %v18449_v1 = vld [vmem:[%s21018_s30 + $0x248] ss:$16 sps:$4 sm:$0xff]   ;;  %v18509_v54 = vld [vmem:[%s21018_s30 + $0x604] ss:$16 sps:$4 sm:$0xff]  }
0x1650   :  { %9760 = vmatpush1.bf16.msra.mxu0 %v18437_v55  ;;  %9675 = vmatprep.subr.bf16.mxu1 %v18442_v56  ;;  %v18528_v55 = vld [vmem:[%s21018_s30 + $0x668] ss:$16 sps:$4 sm:$0xff]   ;;  %v18536_v56 = vld [vmem:[%s21018_s30 + $0x68c] ss:$16 sps:$4 sm:$0xff]  }
0x1651   :  { %9761 = vmatprep.subr.bf16.mxu0 %v18445_v59  ;;  %9705 = vmatprep.mubr.bf16.mxu1 %v19152_v47  ;;  %v18507_v59 = vld [vmem:[%s21018_s30 + $0x600] ss:$16 sps:$4 sm:$0xff]  }
0x1652   :  { %9791 = vmatprep.mubr.bf16.mxu0 %v19152_v47 }
0x1653   :  { %9676 = vmatpush1.bf16.msra.mxu1 %v18440_v61  ;;  %v18515_v61 = vld [vmem:[%s21018_s30 + $0x624] ss:$16 sps:$4 sm:$0xff]  }
0x1654   :  { %9762 = vmatpush1.bf16.msra.mxu0 %v18443_v62  ;;  %9677 = vmatprep.subr.bf16.mxu1 %v18448_v0  ;;  %v18534_v62 = vld [vmem:[%s21018_s30 + $0x688] ss:$16 sps:$4 sm:$0xff]   ;;  %v18542_v0 = vld [vmem:[%s21018_s30 + $0x6ac] ss:$16 sps:$4 sm:$0xff]  }
0x1655   :  { %9763 = vmatprep.subr.bf16.mxu0 %v18451_v6  ;;  %v18513_v6 = vld [vmem:[%s21018_s30 + $0x620] ss:$16 sps:$4 sm:$0xff]  }
0x1657   :  { %9678 = vmatpush1.bf16.msra.mxu1 %v18446_v8  ;;  %v18521_v8 = vld [vmem:[%s21018_s30 + $0x644] ss:$16 sps:$4 sm:$0xff]  }
0x1658   :  { %9764 = vmatpush1.bf16.msra.mxu0 %v18449_v1  ;;  %9679 = vmatprep.subr.bf16.mxu1 %v18454_v3  ;;  %v18540_v1 = vld [vmem:[%s21018_s30 + $0x6a8] ss:$16 sps:$4 sm:$0xff]   ;;  %v18548_v3 = vld [vmem:[%s21018_s30 + $0x6cc] ss:$16 sps:$4 sm:$0xff]  }
0x1659   :  { %9765 = vmatprep.subr.bf16.mxu0 %v18457_v14  ;;  %v18519_v14 = vld [vmem:[%s21018_s30 + $0x640] ss:$16 sps:$4 sm:$0xff]  }
0x165b   :  { %9680 = vmatpush1.bf16.msra.mxu1 %v18452_v5  ;;  %v18527_v5 = vld [vmem:[%s21018_s30 + $0x664] ss:$16 sps:$4 sm:$0xff]  }
0x165c   :  { %9766 = vmatpush1.bf16.msra.mxu0 %v18455_v58  ;;  %15551 = vmatprep.subr.msk.bf16.mxu1 %vm8295_vm9, %v20253_v4  ;;  %v18546_v58 = vld [vmem:[%s21018_s30 + $0x6c8] ss:$16 sps:$4 sm:$0xff]  }
0x165d   :  { %10470 = vmatprep.subr.bf16.mxu0 %v18464_v60  ;;  %v18525_v60 = vld [vmem:[%s21018_s30 + $0x660] ss:$16 sps:$4 sm:$0xff]  }
0x165e   :  { %15546 = vmatmul.mubr.msk.bf16.vlgmr.msra.gmra.mrb[140].mxu1 %vm9051_vm11, %v20330_v9 }
0x165f   :  { %15547 = vmatmul.mubr.msk.bf16.vlgmr.msra.gmra.mrb[104].mxu0 %vm9051_vm11, %v20330_v9  ;;  %9814 = vmatpush1.bf16.msra.mxu1 %v20256_v7  ;;  %v18482_v9 = vld [vmem:[%s21018_s30 + $0x56c] ss:$16 sps:$4 sm:$0xff]  }
0x1660   :  { %9845 = vmatprep.mubr.bf16.mxu1 %v19152_v47  ;;  %16887 = vmatprep.subr.bf16.mxu1 %v19150_v21 }
0x1661   :  { %10471 = vmatpush1.bf16.msra.mxu0 %v18462_v10  ;;  %v18533_v10 = vld [vmem:[%s21018_s30 + $0x684] ss:$16 sps:$4 sm:$0xff]  }
0x1662   :  { %10472 = vmatprep.subr.bf16.mxu0 %v18470_v11  ;;  %v18531_v11 = vld [vmem:[%s21018_s30 + $0x680] ss:$16 sps:$4 sm:$0xff]  }
0x1665   :  { %10473 = vmatpush1.bf16.msra.mxu0 %v18468_v52  ;;  %v18539_v52 = vld [vmem:[%s21018_s30 + $0x6a4] ss:$16 sps:$4 sm:$0xff]  }
0x1666   :  { %15552 = vmatmul.mubr.msk.bf16.vlgmr.msra.gmra.mrb[144].mxu1 %vm8291_vm10, %v18458_v57  ;;  %10474 = vmatprep.subr.bf16.mxu0 %v18476_v12  ;;  %v18545_v12 = vld [vmem:[%s21018_s30 + $0x6c4] ss:$16 sps:$4 sm:$0xff]  }
0x1667   :  { %16888 = vmatpush3.bf16.msra.mxu1 %v20265_v15  ;;  %16889 = vmatprep.mubr.msk.bf16.mxu1 %vm19151_vm1, %v19150_v21 }
0x1668   :  { %10384 = vmatprep.subr.bf16.mxu1 %v18461_v34  ;;  %v18543_v34 = vld [vmem:[%s21018_s30 + $0x6c0] ss:$16 sps:$4 sm:$0xff]  }
0x1669   :  { %10475 = vmatpush1.bf16.msra.mxu0 %v18474_v36  ;;  %v18551_v36 = vld [vmem:[%s21018_s30 + $0x6e4] ss:$16 sps:$4 sm:$0xff]  }
0x166a   :  { %10476 = vmatprep.subr.bf16.mxu0 %v18482_v9  ;;  %v18554_v9 = vld [vmem:[%s21018_s30 + $0x6ec] ss:$16 sps:$4 sm:$0xff]  }
0x166d   :  { %10477 = vmatpush1.bf16.msra.mxu0 %v18480_v13  ;;  %v18549_v13 = vld [vmem:[%s21018_s30 + $0x6e0] ss:$16 sps:$4 sm:$0xff]  }
0x166e   :  { %16890 = vmatmul.mubr.msk.bf16.vlgmr.msra.gmra.mrb[148].mxu1 %vm8291_vm10, %v18458_v57  ;;  %10478 = vmatprep.subr.bf16.mxu0 %v18488_v18  ;;  %v18537_v57 = vld [vmem:[%s21018_s30 + $0x6a0] ss:$16 sps:$4 sm:$0xff]   ;;  %v18552_v18 = vld [vmem:[%s21018_s30 + $0x6e8] ss:$16 sps:$4 sm:$0xff]  }
0x166f   :  { %10385 = vmatpush1.bf16.msra.mxu1 %v18459_v50  ;;  %v18557_v50 = vld [vmem:[%s21018_s30 + $0x704] ss:$16 sps:$4 sm:$0xff]  }
0x1670   :  { %10386 = vmatprep.subr.bf16.mxu1 %v18467_v19  ;;  %v18560_v19 = vld [vmem:[%s21018_s30 + $0x70c] ss:$16 sps:$4 sm:$0xff]  }
0x1671   :  { %10479 = vmatpush1.bf16.msra.mxu0 %v18486_v20 }
0x1672   :  { %10480 = vmatprep.subr.bf16.mxu0 %v18494_v22 }
0x1673   :  { %10387 = vmatpush1.bf16.msra.mxu1 %v18465_v23 }
0x1674   :  { %10388 = vmatprep.subr.bf16.mxu1 %v18473_v24 }
0x1675   :  { %10481 = vmatpush1.bf16.msra.mxu0 %v18492_v25 }
0x1676   :  { %10482 = vmatprep.subr.bf16.mxu0 %v18500_v27 }
0x1677   :  { %10389 = vmatpush1.bf16.msra.mxu1 %v18471_v28  ;;  %v18555_v28 = vld [vmem:[%s21018_s30 + $0x700] ss:$16 sps:$4 sm:$0xff]  }
0x1678   :  { %10390 = vmatprep.subr.bf16.mxu1 %v18479_v29  ;;  %v18558_v29 = vld [vmem:[%s21018_s30 + $0x708] ss:$16 sps:$4 sm:$0xff]  }
0x1679   :  { %10483 = vmatpush1.bf16.msra.mxu0 %v18498_v30  ;;  %v18563_v30 = vld [vmem:[%s21018_s30 + $0x724] ss:$16 sps:$4 sm:$0xff]  }
0x167a   :  { %10484 = vmatprep.subr.bf16.mxu0 %v18506_v26  ;;  %v18566_v26 = vld [vmem:[%s21018_s30 + $0x72c] ss:$16 sps:$4 sm:$0xff]  }
0x167b   :  { %10391 = vmatpush1.bf16.msra.mxu1 %v18477_v31  ;;  %v18561_v31 = vld [vmem:[%s21018_s30 + $0x720] ss:$16 sps:$4 sm:$0xff]  }
0x167c   :  { %10392 = vmatprep.subr.bf16.mxu1 %v18485_v32  ;;  %v18564_v32 = vld [vmem:[%s21018_s30 + $0x728] ss:$16 sps:$4 sm:$0xff]  }
0x167d   :  { %10485 = vmatpush1.bf16.msra.mxu0 %v18504_v33 }
0x167e   :  { %10486 = vmatprep.subr.bf16.mxu0 %v18512_v63  ;;  %v18569_v63 = vld [vmem:[%s21018_s30 + $0x744] ss:$16 sps:$4 sm:$0xff]  }
0x167f   :  { %10393 = vmatpush1.bf16.msra.mxu1 %v18483_v37  ;;  %v18572_v37 = vld [vmem:[%s21018_s30 + $0x74c] ss:$16 sps:$4 sm:$0xff]  }
0x1680   :  { %10394 = vmatprep.subr.bf16.mxu1 %v18491_v35 }
0x1681   :  { %10487 = vmatpush1.bf16.msra.mxu0 %v18510_v38 }
0x1682   :  { %10488 = vmatprep.subr.bf16.mxu0 %v18518_v51 }
0x1683   :  { %10395 = vmatpush1.bf16.msra.mxu1 %v18489_v53 }
0x1684   :  { %10396 = vmatprep.subr.bf16.mxu1 %v18497_v39  ;;  %v18567_v39 = vld [vmem:[%s21018_s30 + $0x740] ss:$16 sps:$4 sm:$0xff]  }
0x1685   :  { %10489 = vmatpush1.bf16.msra.mxu0 %v18516_v40  ;;  %v18570_v40 = vld [vmem:[%s21018_s30 + $0x748] ss:$16 sps:$4 sm:$0xff]  }
0x1686   :  { %10490 = vmatprep.subr.bf16.mxu0 %v18524_v2  ;;  %v18575_v2 = vld [vmem:[%s21018_s30 + $0x764] ss:$16 sps:$4 sm:$0xff]  }
0x1687   :  { %10397 = vmatpush1.bf16.msra.mxu1 %v18495_v41  ;;  %v18578_v41 = vld [vmem:[%s21018_s30 + $0x76c] ss:$16 sps:$4 sm:$0xff]  }
0x1688   :  { %10398 = vmatprep.subr.bf16.mxu1 %v18503_v42  ;;  %v18573_v42 = vld [vmem:[%s21018_s30 + $0x760] ss:$16 sps:$4 sm:$0xff]  }
0x1689   :  { %10491 = vmatpush1.bf16.msra.mxu0 %v18522_v46  ;;  %v18576_v46 = vld [vmem:[%s21018_s30 + $0x768] ss:$16 sps:$4 sm:$0xff]  }
0x168a   :  { %10492 = vmatprep.subr.bf16.mxu0 %v18530_v16  ;;  %v18585_v16 = vld [vmem:[%s21018_s30 + $0x78c] ss:$16 sps:$4 sm:$0xff]  }
0x168b   :  { %10399 = vmatpush1.bf16.msra.mxu1 %v18501_v17  ;;  %v18583_v17 = vld [vmem:[%s21018_s30 + $0x788] ss:$16 sps:$4 sm:$0xff]  }
0x168c   :  { %10400 = vmatprep.subr.bf16.mxu1 %v18509_v54  ;;  %v18591_v54 = vld [vmem:[%s21018_s30 + $0x7ac] ss:$16 sps:$4 sm:$0xff]  }
0x168d   :  { %10493 = vmatpush1.bf16.msra.mxu0 %v18528_v55  ;;  %v18589_v55 = vld [vmem:[%s21018_s30 + $0x7a8] ss:$16 sps:$4 sm:$0xff]  }
0x168e   :  { %10494 = vmatprep.subr.bf16.mxu0 %v18536_v56  ;;  %v18579_v56 = vld [vmem:[%s21020_s23 + $0x18] sm:$0xff]  }
0x168f   :  { %10401 = vmatpush1.bf16.msra.mxu1 %v18507_v59  ;;  %v18582_v59 = vld [vmem:[%s21018_s30 + $0x784] ss:$16 sps:$4 sm:$0xff]  }
0x1690   :  { %10402 = vmatprep.subr.bf16.mxu1 %v18515_v61  ;;  %v18595_v61 = vld [vmem:[%s21018_s30 + $0x7c8] ss:$16 sps:$4 sm:$0xff]  }
0x1691   :  { %10495 = vmatpush1.bf16.msra.mxu0 %v18534_v62  ;;  %v18601_v62 = vld [vmem:[%s21018_s30 + $0x7e8] ss:$16 sps:$4 sm:$0xff]  }
0x1692   :  { %10496 = vmatprep.subr.bf16.mxu0 %v18542_v0  ;;  %v18609_v0 = vld [vmem:[%s21018_s30 + $0x80c] ss:$16 sps:$4 sm:$0xff]  }
0x1693   :  { %10403 = vmatpush1.bf16.msra.mxu1 %v18513_v6  ;;  %v18580_v6 = vld [vmem:[%s21018_s30 + $0x780] ss:$16 sps:$4 sm:$0xff]  }
0x1694   :  { %10404 = vmatprep.subr.bf16.mxu1 %v18521_v8  ;;  %v18588_v8 = vld [vmem:[%s21018_s30 + $0x7a4] ss:$16 sps:$4 sm:$0xff]  }
0x1695   :  { %10497 = vmatpush1.bf16.msra.mxu0 %v18540_v1  ;;  %v18607_v1 = vld [vmem:[%s21018_s30 + $0x808] ss:$16 sps:$4 sm:$0xff]  }
0x1696   :  { %10498 = vmatprep.subr.bf16.mxu0 %v18548_v3  ;;  %v18594_v3 = vld [vmem:[%s21018_s30 + $0x7c4] ss:$16 sps:$4 sm:$0xff]  }
0x1697   :  { %10405 = vmatpush1.bf16.msra.mxu1 %v18519_v14  ;;  %v18613_v14 = vld [vmem:[%s21018_s30 + $0x828] ss:$16 sps:$4 sm:$0xff]  }
0x1698   :  { %10406 = vmatprep.subr.bf16.mxu1 %v18527_v5  ;;  %v18621_v5 = vld [vmem:[%s21018_s30 + $0x84c] ss:$16 sps:$4 sm:$0xff]  }
0x1699   :  { %10499 = vmatpush1.bf16.msra.mxu0 %v18546_v58  ;;  %v18592_v58 = vld [vmem:[%s21018_s30 + $0x7c0] ss:$16 sps:$4 sm:$0xff]  }
0x169a   :  { %10500 = vmatprep.subr.bf16.mxu0 %v18554_v9  ;;  %v18612_v9 = vld [vmem:[%s21018_s30 + $0x824] ss:$16 sps:$4 sm:$0xff]  }
0x169b   :  { %10407 = vmatpush1.bf16.msra.mxu1 %v18525_v60  ;;  %v18600_v60 = vld [vmem:[%s21018_s30 + $0x7e4] ss:$16 sps:$4 sm:$0xff]  }
0x169c   :  { %10408 = vmatprep.subr.bf16.mxu1 %v18533_v10  ;;  %v18619_v10 = vld [vmem:[%s21018_s30 + $0x848] ss:$16 sps:$4 sm:$0xff]  }
0x169d   :  { %10501 = vmatpush1.bf16.msra.mxu0 %v18552_v18  ;;  %v18639_v18 = vld [vmem:[%s21018_s30 + $0x8ac] ss:$16 sps:$4 sm:$0xff]  }
0x169e   :  { %10513 = vmatprep.subr.bf16.mxu0 %v18560_v19  ;;  %v18618_v19 = vld [vmem:[%s21018_s30 + $0x844] ss:$16 sps:$4 sm:$0xff]  }
0x169f   :  { %10409 = vmatpush1.bf16.msra.mxu1 %v18531_v11  ;;  %v18627_v11 = vld [vmem:[%s21018_s30 + $0x86c] ss:$16 sps:$4 sm:$0xff]  }
0x16a0   :  { %10410 = vmatprep.subr.bf16.mxu1 %v18539_v52  ;;  %v18598_v52 = vld [vmem:[%s21018_s30 + $0x7e0] ss:$16 sps:$4 sm:$0xff]  }
0x16a3   :  { %10411 = vmatpush1.bf16.msra.mxu1 %v18537_v57  ;;  %v18606_v57 = vld [vmem:[%s21018_s30 + $0x804] ss:$16 sps:$4 sm:$0xff]  }
0x16a4   :  { %10412 = vmatprep.subr.bf16.mxu1 %v18545_v12  ;;  %v18625_v12 = vld [vmem:[%s21018_s30 + $0x868] ss:$16 sps:$4 sm:$0xff]  }
0x16a7   :  { %10413 = vmatpush1.bf16.msra.mxu1 %v18543_v34  ;;  %v18633_v34 = vld [vmem:[%s21018_s30 + $0x88c] ss:$16 sps:$4 sm:$0xff]  }
0x16a8   :  { %10414 = vmatprep.subr.bf16.mxu1 %v18551_v36  ;;  %v18604_v36 = vld [vmem:[%s21018_s30 + $0x800] ss:$16 sps:$4 sm:$0xff]  }
0x16ab   :  { %10415 = vmatpush1.bf16.msra.mxu1 %v18549_v13  ;;  %v18631_v13 = vld [vmem:[%s21018_s30 + $0x888] ss:$16 sps:$4 sm:$0xff]  }
0x16ac   :  { %10427 = vmatprep.subr.bf16.mxu1 %v18557_v50  ;;  %v18610_v50 = vld [vmem:[%s21018_s30 + $0x820] ss:$16 sps:$4 sm:$0xff]  }
0x1739   :  { %v9847_v20 = vpop.f32.mrb[144].mxu1 }
0x173a   :  { %v9849_v22 = vpop.f32.mrb[145].mxu1 }
0x173b   :  { %v9851_v23 = vpop.f32.mrb[146].mxu1 }
0x173c   :  { %v9897_v24 = vpack.c.bf16 %v9851_v23, %v9847_v20  ;;  %v9853_v25 = vpop.f32.mrb[147].mxu1  ;;  %v18637_v20 = vld [vmem:[%s21018_s30 + $0x8a8] ss:$16 sps:$4 sm:$0xff]   ;;  %v18616_v23 = vld [vmem:[%s21018_s30 + $0x840] ss:$16 sps:$4 sm:$0xff]  }
0x173d   :  { %v9898_v27 = vpack.c.bf16 %v9853_v25, %v9849_v22  ;;  %v18645_v22 = vld [vmem:[%s21018_s30 + $0x8cc] ss:$16 sps:$4 sm:$0xff]   ;;  %v18643_v25 = vld [vmem:[%s21018_s30 + $0x8c8] ss:$16 sps:$4 sm:$0xff]  }
0x173f   :  { %10416 = vmatprep.mubr.bf16.mxu1 %v9898_v27  ;;  %10502 = vmatprep.mubr.bf16.mxu0 %v9898_v27  ;;  %v18651_v27 = vld [vmem:[%s21018_s30 + $0x8ec] ss:$16 sps:$4 sm:$0xff]  }
0x1740   :  { %10417 = vmatmul.mubr.bf16.vlgmr.msra.gmra.mrb[140].mxu1 %v9897_v24  ;;  %10503 = vmatmul.mubr.bf16.vlgmr.msra.gmra.mrb[104].mxu0 %v9897_v24  ;;  %v18624_v24 = vld [vmem:[%s21018_s30 + $0x864] ss:$16 sps:$4 sm:$0xff]  }
0x1741   :  { %10428 = vmatpush1.bf16.msra.mxu1 %v18555_v28  ;;  %10514 = vmatpush1.bf16.msra.mxu0 %v18558_v29  ;;  %v9890_v33 = vpop.f32.mrb[148].mxu1  ;;  %v18622_v28 = vld [vmem:[%s21018_s30 + $0x860] ss:$16 sps:$4 sm:$0xff]   ;;  %v18630_v29 = vld [vmem:[%s21018_s30 + $0x884] ss:$16 sps:$4 sm:$0xff]  }
0x1742   :  { %10429 = vmatprep.subr.bf16.mxu1 %v18563_v30  ;;  %10515 = vmatprep.subr.bf16.mxu0 %v18566_v26  ;;  %v16891_v35 = vpop.f32.mrb[149].mxu1  ;;  %v18649_v30 = vld [vmem:[%s21018_s30 + $0x8e8] ss:$16 sps:$4 sm:$0xff]   ;;  %v18657_v26 = vld [vmem:[%s21018_s30 + $0x90c] ss:$16 sps:$4 sm:$0xff]  }
0x1743   :  { %v9893_v38 = vpop.f32.mrb[150].mxu1  ;;  %10459 = vmatprep.mubr.bf16.mxu1 %v19152_v47  ;;  %10545 = vmatprep.mubr.bf16.mxu0 %v19152_v47  ;;  %v18642_v35 = vld [vmem:[%s21018_s30 + $0x8c4] ss:$16 sps:$4 sm:$0xff]  }
0x1744   :  { %v9899_v51 = vpack.c.bf16 %v9893_v38, %v9890_v33  ;;  %v16892_v53 = vpop.f32.mrb[151].mxu1  ;;  %v18655_v33 = vld [vmem:[%s21018_s30 + $0x908] ss:$16 sps:$4 sm:$0xff]  }
0x1745   :  { %10430 = vmatpush1.bf16.msra.mxu1 %v18561_v31  ;;  %10516 = vmatpush1.bf16.msra.mxu0 %v18564_v32  ;;  %v18628_v31 = vld [vmem:[%s21018_s30 + $0x880] ss:$16 sps:$4 sm:$0xff]   ;;  %v18636_v32 = vld [vmem:[%s21018_s30 + $0x8a4] ss:$16 sps:$4 sm:$0xff]   ;;  %v18661_v38 = vld [vmem:[%s21018_s30 + $0x928] ss:$16 sps:$4 sm:$0xff]  }
0x1746   :  { %10431 = vmatprep.subr.bf16.mxu1 %v18569_v63  ;;  %10517 = vmatprep.subr.bf16.mxu0 %v18572_v37  ;;  %v18663_v63 = vld [vmem:[%s21018_s30 + $0x92c] ss:$16 sps:$4 sm:$0xff]   ;;  %v18634_v37 = vld [vmem:[%s21018_s30 + $0x8a0] ss:$16 sps:$4 sm:$0xff]  }
0x1747   :  { %v18640_v53 = vld [vmem:[%s21018_s30 + $0x8c0] ss:$16 sps:$4 sm:$0xff]  }
0x1749   :  { %10432 = vmatpush1.bf16.msra.mxu1 %v18567_v39  ;;  %10518 = vmatpush1.bf16.msra.mxu0 %v18570_v40  ;;  %v18648_v39 = vld [vmem:[%s21018_s30 + $0x8e4] ss:$16 sps:$4 sm:$0xff]   ;;  %v18667_v40 = vld [vmem:[%s21018_s30 + $0x948] ss:$16 sps:$4 sm:$0xff]  }
0x174a   :  { %10433 = vmatprep.subr.bf16.mxu1 %v18575_v2  ;;  %10519 = vmatprep.subr.bf16.mxu0 %v18578_v41  ;;  %v18646_v2 = vld [vmem:[%s21018_s30 + $0x8e0] ss:$16 sps:$4 sm:$0xff]   ;;  %v18654_v41 = vld [vmem:[%s21018_s30 + $0x904] ss:$16 sps:$4 sm:$0xff]  }
0x174d   :  { %10434 = vmatpush1.bf16.msra.mxu1 %v18573_v42  ;;  %10520 = vmatpush1.bf16.msra.mxu0 %v18576_v46  ;;  %v18652_v42 = vld [vmem:[%s21018_s30 + $0x900] ss:$16 sps:$4 sm:$0xff]   ;;  %v18660_v46 = vld [vmem:[%s21018_s30 + $0x924] ss:$16 sps:$4 sm:$0xff]  }
0x174e   :  { %15719 = vmatprep.subr.msk.bf16.mxu1 %vm8295_vm9, %v20253_v4  ;;  %11232 = vmatprep.subr.bf16.mxu0 %v18585_v16  ;;  %v18597_v4 = vld [vmem:[%s21018_s30 + $0x7cc] ss:$16 sps:$4 sm:$0xff]   ;;  %v18658_v16 = vld [vmem:[%s21018_s30 + $0x920] ss:$16 sps:$4 sm:$0xff]  }
0x1750   :  { %15714 = vmatmul.mubr.msk.bf16.vlgmr.msra.gmra.mrb[140].mxu1 %vm9051_vm11, %v9899_v51  ;;  %15715 = vmatmul.mubr.msk.bf16.vlgmr.msra.gmra.mrb[104].mxu0 %vm9051_vm11, %v9899_v51  ;;  %v18669_v51 = vld [vmem:[%s21018_s30 + $0x94c] ss:$16 sps:$4 sm:$0xff]  }
0x1751   :  { %10576 = vmatpush1.bf16.msra.mxu1 %v20256_v7  ;;  %10607 = vmatprep.mubr.bf16.mxu1 %v19152_v47  ;;  %v18603_v7 = vld [vmem:[%s21018_s30 + $0x7ec] ss:$16 sps:$4 sm:$0xff]  }
0x1752   :  { %16893 = vmatprep.subr.bf16.mxu1 %v19150_v21  ;;  %11233 = vmatpush1.bf16.msra.mxu0 %v18583_v17  ;;  %v18666_v17 = vld [vmem:[%s21018_s30 + $0x944] ss:$16 sps:$4 sm:$0xff]  }
0x1753   :  { %11234 = vmatprep.subr.bf16.mxu0 %v18591_v54  ;;  %v18664_v54 = vld [vmem:[%s21018_s30 + $0x940] ss:$16 sps:$4 sm:$0xff]  }
0x1756   :  { %11235 = vmatpush1.bf16.msra.mxu0 %v18589_v55  ;;  %v18672_v55 = vld [vmem:[%s21018_s30 + $0x964] ss:$16 sps:$4 sm:$0xff]  }
0x1757   :  { %11236 = vmatprep.subr.bf16.mxu0 %v18597_v4  ;;  %v18675_v4 = vld [vmem:[%s21018_s30 + $0x96c] ss:$16 sps:$4 sm:$0xff]  }
0x1758   :  { %15720 = vmatmul.mubr.msk.bf16.vlgmr.msra.gmra.mrb[152].mxu1 %vm8291_vm10, %v18579_v56 }
0x1759   :  { %16894 = vmatpush3.bf16.msra.mxu1 %v20265_v15  ;;  %16895 = vmatprep.mubr.msk.bf16.mxu1 %vm19151_vm1, %v19150_v21  ;;  %v18615_v15 = vld [vmem:[%s21018_s30 + $0x82c] ss:$16 sps:$4 sm:$0xff]   ;;  %v18586_v21 = vld [vmem:[%s21018_s30 + $0x7a0] ss:$16 sps:$4 sm:$0xff]  }
0x175a   :  { %11146 = vmatprep.subr.bf16.mxu1 %v18582_v59  ;;  %11237 = vmatpush1.bf16.msra.mxu0 %v18595_v61  ;;  %v18673_v59 = vld [vmem:[%s21018_s30 + $0x968] ss:$16 sps:$4 sm:$0xff]   ;;  %v18678_v61 = vld [vmem:[%s21018_s30 + $0x984] ss:$16 sps:$4 sm:$0xff]  }
0x175b   :  { %11238 = vmatprep.subr.bf16.mxu0 %v18603_v7  ;;  %v18681_v7 = vld [vmem:[%s21018_s30 + $0x98c] ss:$16 sps:$4 sm:$0xff]  }
0x175e   :  { %11239 = vmatpush1.bf16.msra.mxu0 %v18601_v62 }
0x175f   :  { %11240 = vmatprep.subr.bf16.mxu0 %v18609_v0 }
0x1760   :  { %16896 = vmatmul.mubr.msk.bf16.vlgmr.msra.gmra.mrb[156].mxu1 %vm8291_vm10, %v18579_v56  ;;  %v18670_v56 = vld [vmem:[%s21018_s30 + $0x960] ss:$16 sps:$4 sm:$0xff]  }
0x1761   :  { %11147 = vmatpush1.bf16.msra.mxu1 %v18580_v6 }
0x1762   :  { %11148 = vmatprep.subr.bf16.mxu1 %v18588_v8  ;;  %11241 = vmatpush1.bf16.msra.mxu0 %v18607_v1 }
0x1763   :  { %11242 = vmatprep.subr.bf16.mxu0 %v18615_v15 }
0x1765   :  { %11149 = vmatpush1.bf16.msra.mxu1 %v18586_v21  ;;  %v18676_v21 = vld [vmem:[%s21018_s30 + $0x980] ss:$16 sps:$4 sm:$0xff]  }
0x1766   :  { %11150 = vmatprep.subr.bf16.mxu1 %v18594_v3  ;;  %11243 = vmatpush1.bf16.msra.mxu0 %v18613_v14  ;;  %v18679_v3 = vld [vmem:[%s21018_s30 + $0x988] ss:$16 sps:$4 sm:$0xff]   ;;  %v18684_v14 = vld [vmem:[%s21018_s30 + $0x9a4] ss:$16 sps:$4 sm:$0xff]  }
0x1767   :  { %11244 = vmatprep.subr.bf16.mxu0 %v18621_v5  ;;  %v18687_v5 = vld [vmem:[%s21018_s30 + $0x9ac] ss:$16 sps:$4 sm:$0xff]  }
0x1769   :  { %11151 = vmatpush1.bf16.msra.mxu1 %v18592_v58  ;;  %v18682_v58 = vld [vmem:[%s21018_s30 + $0x9a0] ss:$16 sps:$4 sm:$0xff]  }
0x176a   :  { %11152 = vmatprep.subr.bf16.mxu1 %v18600_v60  ;;  %11245 = vmatpush1.bf16.msra.mxu0 %v18619_v10  ;;  %v18685_v60 = vld [vmem:[%s21018_s30 + $0x9a8] ss:$16 sps:$4 sm:$0xff]  }
0x176b   :  { %11246 = vmatprep.subr.bf16.mxu0 %v18627_v11  ;;  %v18690_v11 = vld [vmem:[%s21018_s30 + $0x9c4] ss:$16 sps:$4 sm:$0xff]  }
0x176d   :  { %11153 = vmatpush1.bf16.msra.mxu1 %v18598_v52  ;;  %v18693_v52 = vld [vmem:[%s21018_s30 + $0x9cc] ss:$16 sps:$4 sm:$0xff]  }
0x176e   :  { %11154 = vmatprep.subr.bf16.mxu1 %v18606_v57  ;;  %11247 = vmatpush1.bf16.msra.mxu0 %v18625_v12 }
0x176f   :  { %11248 = vmatprep.subr.bf16.mxu0 %v18633_v34 }
0x1771   :  { %11155 = vmatpush1.bf16.msra.mxu1 %v18604_v36 }
0x1772   :  { %11156 = vmatprep.subr.bf16.mxu1 %v18612_v9  ;;  %11249 = vmatpush1.bf16.msra.mxu0 %v18631_v13  ;;  %v18688_v9 = vld [vmem:[%s21018_s30 + $0x9c0] ss:$16 sps:$4 sm:$0xff]   ;;  %v18691_v13 = vld [vmem:[%s21018_s30 + $0x9c8] ss:$16 sps:$4 sm:$0xff]  }
0x1773   :  { %11250 = vmatprep.subr.bf16.mxu0 %v18639_v18  ;;  %v18696_v18 = vld [vmem:[%s21018_s30 + $0x9e4] ss:$16 sps:$4 sm:$0xff]  }
0x1775   :  { %11157 = vmatpush1.bf16.msra.mxu1 %v18610_v50  ;;  %v18699_v50 = vld [vmem:[%s21018_s30 + $0x9ec] ss:$16 sps:$4 sm:$0xff]  }
0x1776   :  { %11158 = vmatprep.subr.bf16.mxu1 %v18618_v19  ;;  %11251 = vmatpush1.bf16.msra.mxu0 %v18637_v20  ;;  %v18694_v19 = vld [vmem:[%s21018_s30 + $0x9e0] ss:$16 sps:$4 sm:$0xff]   ;;  %v18697_v20 = vld [vmem:[%s21018_s30 + $0x9e8] ss:$16 sps:$4 sm:$0xff]  }
0x1777   :  { %11252 = vmatprep.subr.bf16.mxu0 %v18645_v22  ;;  %v11326_v22 = vld [vmem:[#allocation13] sm:$0xf] }
0x1779   :  { %11159 = vmatpush1.bf16.msra.mxu1 %v18616_v23  ;;  %v11331_v23 = vrot.slane %v11326_v22, %v19494_v44 }
0x177a   :  { %11160 = vmatprep.subr.bf16.mxu1 %v18624_v24  ;;  %11253 = vmatpush1.bf16.msra.mxu0 %v18643_v25  ;;  %v11339_v24 = vrot.slane %v11326_v22, %v19497_v45  ;;  %v11335_v25 = vrot.slane %v11326_v22, %v19500_v48 }
0x177b   :  { %11254 = vmatprep.subr.bf16.mxu0 %v18651_v27  ;;  %v11343_v27 = vrot.slane %v11326_v22, %v1631_v49  ;;  %v18738_v22 = vld [vmem:[%s21021_s0 + $0x120] sm:$0xff]  }
0x177d   :  { %11161 = vmatpush1.bf16.msra.mxu1 %v18622_v28 }
0x177e   :  { %11162 = vmatprep.subr.bf16.mxu1 %v18630_v29  ;;  %11255 = vmatpush1.bf16.msra.mxu0 %v18649_v30 }
0x177f   :  { %11256 = vmatprep.subr.bf16.mxu0 %v18657_v26 }
0x1781   :  { %11163 = vmatpush1.bf16.msra.mxu1 %v18628_v31 }
0x1782   :  { %11164 = vmatprep.subr.bf16.mxu1 %v18636_v32  ;;  %11257 = vmatpush1.bf16.msra.mxu0 %v18655_v33 }
0x1783   :  { %11258 = vmatprep.subr.bf16.mxu0 %v18663_v63 }
0x1785   :  { %11165 = vmatpush1.bf16.msra.mxu1 %v18634_v37 }
0x1786   :  { %11166 = vmatprep.subr.bf16.mxu1 %v18642_v35  ;;  %11259 = vmatpush1.bf16.msra.mxu0 %v18661_v38 }
0x1787   :  { %11260 = vmatprep.subr.bf16.mxu0 %v18669_v51 }
0x1789   :  { %11167 = vmatpush1.bf16.msra.mxu1 %v18640_v53 }
0x178a   :  { %11168 = vmatprep.subr.bf16.mxu1 %v18648_v39  ;;  %11261 = vmatpush1.bf16.msra.mxu0 %v18667_v40 }
0x178b   :  { %11262 = vmatprep.subr.bf16.mxu0 %v18675_v4  ;;  %v18704_v4 = vld [vmem:[%s21021_s0 + $0x1c0] sm:$0xff]  }
0x178d   :  { %11169 = vmatpush1.bf16.msra.mxu1 %v18646_v2 }
0x178e   :  { %11170 = vmatprep.subr.bf16.mxu1 %v18654_v41  ;;  %11263 = vmatpush1.bf16.msra.mxu0 %v18673_v59  ;;  %v18701_v59 = vld [vmem:[%s21022_s26 + $0x10] sm:$0xff]  }
0x178f   :  { %11275 = vmatprep.subr.bf16.mxu0 %v18681_v7  ;;  %v18706_v7 = vld [vmem:[%s21021_s0 + $0x1c8] sm:$0xff]  }
0x1791   :  { %11171 = vmatpush1.bf16.msra.mxu1 %v18652_v42 }
0x1792   :  { %11172 = vmatprep.subr.bf16.mxu1 %v18660_v46 }
0x1795   :  { %11173 = vmatpush1.bf16.msra.mxu1 %v18658_v16 }
0x1796   :  { %11174 = vmatprep.subr.bf16.mxu1 %v18666_v17 }
0x1799   :  { %11175 = vmatpush1.bf16.msra.mxu1 %v18664_v54 }
0x179a   :  { %11176 = vmatprep.subr.bf16.mxu1 %v18672_v55 }
0x179d   :  { %11177 = vmatpush1.bf16.msra.mxu1 %v18670_v56  ;;  %v18700_v56 = vld [vmem:[%s21022_s26] sm:$0xff]  }
0x179e   :  { %11189 = vmatprep.subr.bf16.mxu1 %v18678_v61  ;;  %v18705_v61 = vld [vmem:[%s21021_s0 + $0x180] sm:$0xff]  }
0x182b   :  { %v10609_v62 = vpop.f32.mrb[152].mxu1 }
0x182c   :  { %v10611_v0 = vpop.f32.mrb[153].mxu1 }
0x182d   :  { %v10613_v6 = vpop.f32.mrb[154].mxu1 }
0x182e   :  { %v10659_v8 = vpack.c.bf16 %v10613_v6, %v10609_v62  ;;  %v10615_v1 = vpop.f32.mrb[155].mxu1  ;;  %v18707_v62 = vld [vmem:[%s21021_s0 + $0x188] sm:$0xff]   ;;  %v18703_v6 = vld [vmem:[%s21022_s26 + $0x18] sm:$0xff]  }
0x182f   :  { %v10660_v15 = vpack.c.bf16 %v10615_v1, %v10611_v0  ;;  %v18702_v0 = vld [vmem:[%s21022_s26 + $0x8] sm:$0xff]   ;;  %v18709_v1 = vld [vmem:[%s21021_s0 + $0x190] sm:$0xff]  }
0x1831   :  { %11178 = vmatprep.mubr.bf16.mxu1 %v10660_v15  ;;  %11264 = vmatprep.mubr.bf16.mxu0 %v10660_v15  ;;  %v18710_v15 = vld [vmem:[%s21021_s0 + $0x1d8] sm:$0xff]  }
0x1832   :  { %11179 = vmatmul.mubr.bf16.vlgmr.msra.gmra.mrb[140].mxu1 %v10659_v8  ;;  %11265 = vmatmul.mubr.bf16.vlgmr.msra.gmra.mrb[104].mxu0 %v10659_v8  ;;  %v18708_v8 = vld [vmem:[%s21021_s0 + $0x1d0] sm:$0xff]  }
0x1833   :  { %11190 = vmatpush1.bf16.msra.mxu1 %v18676_v21  ;;  %11276 = vmatpush1.bf16.msra.mxu0 %v18679_v3  ;;  %v10652_v10 = vpop.f32.mrb[156].mxu1  ;;  %v18711_v21 = vld [vmem:[%s21021_s0 + $0x198] sm:$0xff]   ;;  %v18712_v3 = vld [vmem:[%s21021_s0 + $0x1e0] sm:$0xff]  }
0x1834   :  { %11191 = vmatprep.subr.bf16.mxu1 %v18684_v14  ;;  %11277 = vmatprep.subr.bf16.mxu0 %v18687_v5  ;;  %v16897_v57 = vpop.f32.mrb[157].mxu1  ;;  %v18713_v14 = vld [vmem:[%s21021_s0 + $0x1a0] sm:$0xff]   ;;  %v18714_v5 = vld [vmem:[%s21021_s0 + $0x1e8] sm:$0xff]  }
0x1835   :  { %v10655_v12 = vpop.f32.mrb[158].mxu1  ;;  %11221 = vmatprep.mubr.bf16.mxu1 %v19152_v47  ;;  %11307 = vmatprep.mubr.bf16.mxu0 %v19152_v47  ;;  %v18720_v57 = vld [vmem:[%s21021_s0 + $0x140] sm:$0xff]  }
0x1836   :  { %v10661_v34 = vpack.c.bf16 %v10655_v12, %v10652_v10  ;;  %v16898_v36 = vpop.f32.mrb[159].mxu1  ;;  %v18717_v10 = vld [vmem:[%s21021_s0 + $0x1b0] sm:$0xff]   ;;  %v18721_v12 = vld [vmem:[%s21021_s0 + $0xc0] sm:$0xff]  }
0x1837   :  { %11192 = vmatpush1.bf16.msra.mxu1 %v18682_v58  ;;  %11278 = vmatpush1.bf16.msra.mxu0 %v18685_v60  ;;  %v18715_v58 = vld [vmem:[%s21021_s0 + $0x1a8] sm:$0xff]   ;;  %v18716_v60 = vld [vmem:[%s21021_s0 + $0x1f0] sm:$0xff]  }
0x1838   :  { %11193 = vmatprep.subr.bf16.mxu1 %v18690_v11  ;;  %11279 = vmatprep.subr.bf16.mxu0 %v18693_v52  ;;  %v18718_v11 = vld [vmem:[%s21021_s0 + $0x1f8] sm:$0xff]   ;;  %v18724_v36 = vld [vmem:[%s21021_s0 + $0x148] sm:$0xff]  }
0x1839   :  { %v18719_v52 = vld [vmem:[%s21021_s0 + $0x1b8] sm:$0xff]  }
0x183b   :  { %11194 = vmatpush1.bf16.msra.mxu1 %v18688_v9  ;;  %11280 = vmatpush1.bf16.msra.mxu0 %v18691_v13  ;;  %v18726_v9 = vld [vmem:[%s21021_s0 + $0x108] sm:$0xff]   ;;  %v18728_v13 = vld [vmem:[%s21021_s0 + $0x150] sm:$0xff]  }
0x183c   :  { %11195 = vmatprep.subr.bf16.mxu1 %v18696_v18  ;;  %11281 = vmatprep.subr.bf16.mxu0 %v18699_v50  ;;  %v18730_v18 = vld [vmem:[%s21021_s0 + $0x110] sm:$0xff]   ;;  %v18732_v50 = vld [vmem:[%s21021_s0 + $0x158] sm:$0xff]  }
0x183f   :  { %11196 = vmatpush1.bf16.msra.mxu1 %v18694_v19  ;;  %11282 = vmatpush1.bf16.msra.mxu0 %v18697_v20  ;;  %v18734_v19 = vld [vmem:[%s21021_s0 + $0x118] sm:$0xff]   ;;  %v18736_v20 = vld [vmem:[%s21021_s0 + $0x160] sm:$0xff]  }
0x1842   :  { %15882 = vmatmul.mubr.msk.bf16.vlgmr.msra.gmra.mrb[140].mxu1 %vm9051_vm11, %v10661_v34  ;;  %15883 = vmatmul.mubr.msk.bf16.vlgmr.msra.gmra.mrb[104].mxu0 %vm9051_vm11, %v10661_v34  ;;  %v18722_v34 = vld [vmem:[%s21021_s0 + $0x100] sm:$0xff]  }
0x1843   :  { %11420 = vmatprep.mubr.bf16.mxu1 %v19152_v47  ;;  %11672 = vmatprep.mubr.bf16.mxu0 %v19152_v47 }
0x1915   :  { %v11223_v28 = vpop.f32.mrb[140].mxu1  ;;  %v11309_v29 = vpop.f32.mrb[104].mxu0 }
0x1916   :  { %v11348_v30 = vadd.f32 %v11331_v23, %v11223_v28  ;;  %v11350_v26 = vadd.f32 %v11339_v24, %v11309_v29  ;;  %v11225_v31 = vpop.f32.mrb[141].mxu1  ;;  %v11311_v32 = vpop.f32.mrb[105].mxu0  ;;  %v18748_v28 = vld [vmem:[%s21021_s0 + $0x178] sm:$0xff]  }
0x1917   :  { %v11349_v33 = vadd.f32 %v11335_v25, %v11225_v31  ;;  %v11351_v63 = vadd.f32 %v11343_v27, %v11311_v32  ;;  %v11227_v37 = vpop.f32.mrb[142].mxu1  ;;  %v11313_v35 = vpop.f32.mrb[106].mxu0  ;;  %v18750_v29 = vld [vmem:[%s21021_s0 + $0x138] sm:$0xff]  }
0x1918   :  { %v11352_v38 = vadd.f32 %v11331_v23, %v11227_v37  ;;  %v11354_v51 = vadd.f32 %v11339_v24, %v11313_v35  ;;  %v11229_v44 = vpop.f32.mrb[143].mxu1  ;;  %v11315_v45 = vpop.f32.mrb[107].mxu0  ;;  %v11356_v43 = vmax.f32 %v11348_v30, 0.0  ;;  %v11358_v49 = vmax.f32 %v11350_v26, 0.0  ;;  %v18740_v23 = vld [vmem:[%s21021_s0 + $0x168] sm:$0xff]   ;;  %v18752_v30 = vld [vmem:[%s21021_s0 + $0x40] sm:$0xff]  }
0x1919   :  { %v11353_v53 = vadd.f32 %v11335_v25, %v11229_v44  ;;  %v11355_v48 = vadd.f32 %v11343_v27, %v11315_v45  ;;  %v11357_v2 = vmax.f32 %v11349_v33, 0.0  ;;  %v11359_v41 = vmax.f32 %v11351_v63, 0.0  ;;  %v18742_v24 = vld [vmem:[%s21021_s0 + $0x128] sm:$0xff]   ;;  %v18744_v25 = vld [vmem:[%s21021_s0 + $0x170] sm:$0xff]  }
0x191a   :  { %v11360_v39 = vmax.f32 %v11352_v38, 0.0  ;;  %v11362_v40 = vmax.f32 %v11354_v51, 0.0  ;;  %v18746_v27 = vld [vmem:[%s21021_s0 + $0x130] sm:$0xff]  }
0x191b   :  { %v11361_v42 = vmax.f32 %v11353_v53, 0.0  ;;  %v11363_v46 = vmax.f32 %v11355_v48, 0.0  ;;  %v18723_v48 = vld [vmem:[%s21021_s0 + $0x80] sm:$0xff]  }
0x191c   :  { %v20637_v16 = vpack.c.bf16 %v11360_v39, %v11356_v43  ;;  %v20639_v17 = vpack.c.bf16 %v11362_v40, %v11358_v49  ;;  %v18725_v43 = vld [vmem:[%s21021_s0 + $0xc8] sm:$0xff]  }
0x191d   :  { %v20641_v54 = vpack.c.bf16 %v11361_v42, %v11357_v2  ;;  %v20643_v55 = vpack.c.bf16 %v11363_v46, %v11359_v41  ;;  %v18727_v39 = vld [vmem:[%s21021_s0 + $0x88] sm:$0xff]   ;;  %v18729_v41 = vld [vmem:[%s21021_s0 + $0xd0] sm:$0xff]  }
0x191f   :  { %11388 = vmatprep.subr.bf16.mxu1 %v20641_v54  ;;  %11640 = vmatprep.subr.bf16.mxu0 %v20643_v55 }
0x1920   :  { %11389 = vmatpush1.bf16.msra.mxu1 %v20637_v16  ;;  %11641 = vmatpush1.bf16.msra.mxu0 %v20639_v17 }
0x1921   :  { %11441 = vmatprep.subr.bf16.mxu1 %v20643_v55  ;;  %16533 = vmatprep.subr.bf16.mxu0 %v18704_v4 }
0x1923   :  { %15886 = vmatmul.mubr.msk.bf16.vlgmr.msra.gmra.mrb[160].mxu1 %vm231_vm0, %v18700_v56  ;;  %15898 = vmatmul.mubr.msk.bf16.vlgmr.msra.gmra.mrb[108].mxu0 %vm231_vm0, %v18701_v59 }
0x1924   :  { %11442 = vmatpush1.bf16.msra.mxu1 %v20639_v17  ;;  %11430 = vmatprep.mubr.bf16.mxu1 %v19152_v47 }
0x1925   :  { %11587 = vmatprep.subr.bf16.mxu1 %v20641_v54  ;;  %11682 = vmatprep.mubr.bf16.mxu0 %v19152_v47 }
0x1926   :  { %16534 = vmatpush3.bf16.msra.mxu0 %v18705_v61 }
0x1927   :  { %16535 = vmatprep.subr.bf16.mxu0 %v18706_v7 }
0x192a   :  { %16536 = vmatpush3.bf16.msra.mxu0 %v18707_v62 }
0x192b   :  { %15887 = vmatmul.mubr.msk.bf16.gmra.mrb[164].mxu1 %vm231_vm0, %v18702_v0  ;;  %15899 = vmatmul.mubr.msk.bf16.gmra.mrb[112].mxu0 %vm231_vm0, %v18703_v6 }
0x192c   :  { %11473 = vmatprep.mubr.bf16.mxu1 %v19152_v47  ;;  %16537 = vmatprep.subr.bf16.mxu0 %v18708_v8  ;;  %v18733_v8 = vld [vmem:[%s21021_s0 + $0xd8] sm:$0xff]  }
0x192e   :  { %16538 = vmatpush3.bf16.msra.mxu0 %v18709_v1 }
0x192f   :  { %16539 = vmatprep.subr.bf16.mxu0 %v18710_v15  ;;  %v18735_v15 = vld [vmem:[%s21021_s0 + $0x98] sm:$0xff]  }
0x1932   :  { %16540 = vmatpush3.bf16.msra.mxu0 %v18711_v21 }
0x1933   :  { %15888 = vmatmul.mubr.msk.bf16.vlgmr.msra.gmra.mrb[168].mxu1 %vm231_vm0, %v18700_v56  ;;  %16541 = vmatprep.subr.bf16.mxu0 %v18712_v3  ;;  %v18737_v3 = vld [vmem:[%s21021_s0 + $0xe0] sm:$0xff]  }
0x1934   :  { %11588 = vmatpush1.bf16.msra.mxu1 %v20637_v16  ;;  %11483 = vmatprep.mubr.bf16.mxu1 %v19152_v47 }
0x1935   :  { %16505 = vmatprep.subr.bf16.mxu1 %v18720_v57  ;;  %v18743_v57 = vld [vmem:[%s21021_s0 + $0xa8] sm:$0xff]  }
0x1936   :  { %16542 = vmatpush3.bf16.msra.mxu0 %v18713_v14 }
0x1937   :  { %16543 = vmatprep.subr.bf16.mxu0 %v18714_v5 }
0x193a   :  { %16544 = vmatpush3.bf16.msra.mxu0 %v18715_v58 }
0x193b   :  { %15889 = vmatmul.mubr.msk.bf16.gmra.mrb[172].mxu1 %vm231_vm0, %v18702_v0  ;;  %16545 = vmatprep.subr.bf16.mxu0 %v18716_v60  ;;  %v18731_v0 = vld [vmem:[%s21021_s0 + $0x90] sm:$0xff]  }
0x193c   :  { %11619 = vmatprep.mubr.bf16.mxu1 %v19152_v47 }
0x193e   :  { %16546 = vmatpush3.bf16.msra.mxu0 %v18717_v10  ;;  %v18739_v10 = vld [vmem:[%s21021_s0 + $0xa0] sm:$0xff]  }
0x193f   :  { %16547 = vmatprep.subr.bf16.mxu0 %v18718_v11  ;;  %v18741_v11 = vld [vmem:[%s21021_s0 + $0xe8] sm:$0xff]  }
0x1942   :  { %16548 = vmatpush3.bf16.msra.mxu0 %v18719_v52 }
0x1943   :  { %15896 = vmatmul.mubr.msk.bf16.vlgmr.msra.gmra.mrb[176].mxu1 %vm231_vm0, %v18701_v59  ;;  %16589 = vmatprep.subr.bf16.mxu0 %v18721_v12 }
0x1944   :  { %11629 = vmatprep.mubr.bf16.mxu1 %v19152_v47  ;;  %16506 = vmatpush3.bf16.msra.mxu1 %v18722_v34  ;;  %v18745_v34 = vld [vmem:[%s21021_s0 + $0xf0] sm:$0xff]  }
0x1945   :  { %16507 = vmatprep.subr.bf16.mxu1 %v18724_v36 }
0x1948   :  { %16508 = vmatpush3.bf16.msra.mxu1 %v18726_v9 }
0x1949   :  { %16509 = vmatprep.subr.bf16.mxu1 %v18728_v13 }
0x194b   :  { %15897 = vmatmul.mubr.msk.bf16.gmra.mrb[180].mxu1 %vm231_vm0, %v18703_v6 }
0x194c   :  { %16510 = vmatpush3.bf16.msra.mxu1 %v18730_v18 }
0x194d   :  { %16511 = vmatprep.subr.bf16.mxu1 %v18732_v50  ;;  %v18747_v50 = vld [vmem:[%s21021_s0 + $0xb0] sm:$0xff]  }
0x1950   :  { %16512 = vmatpush3.bf16.msra.mxu1 %v18734_v19  ;;  %v18749_v19 = vld [vmem:[%s21021_s0 + $0xf8] sm:$0xff]  }
0x1951   :  { %16513 = vmatprep.subr.bf16.mxu1 %v18736_v20 }
0x1954   :  { %16514 = vmatpush3.bf16.msra.mxu1 %v18738_v22  ;;  %v18751_v22 = vld [vmem:[%s21021_s0 + $0xb8] sm:$0xff]  }
0x1955   :  { %16515 = vmatprep.subr.bf16.mxu1 %v18740_v23 }
0x1958   :  { %16516 = vmatpush3.bf16.msra.mxu1 %v18742_v24 }
0x1959   :  { %16517 = vmatprep.subr.bf16.mxu1 %v18744_v25 }
0x195c   :  { %16518 = vmatpush3.bf16.msra.mxu1 %v18746_v27 }
0x195d   :  { %16519 = vmatprep.subr.bf16.mxu1 %v18748_v28 }
0x1960   :  { %16520 = vmatpush3.bf16.msra.mxu1 %v18750_v29  ;;  %v18753_v29 = vld [vmem:[%s21021_s0] sm:$0xff]  }
0x1961   :  { %16561 = vmatprep.subr.bf16.mxu1 %v18752_v30  ;;  %v18754_v30 = vld [vmem:[%s21021_s0 + $0x48] sm:$0xff]  }
0x19f6   :  { %v11674_v26 = vpop.f32.mrb[108].mxu0  ;;  %v20705_v31 = vpop.f32.mrb[160].mxu1 }
0x19f7   :  { %v11676_v32 = vpop.f32.mrb[109].mxu0  ;;  %v20707_v33 = vpop.f32.mrb[161].mxu1 }
0x19f8   :  { %v11678_v63 = vpop.f32.mrb[110].mxu0  ;;  %v20709_v37 = vpop.f32.mrb[162].mxu1 }
0x19f9   :  { %v11695_v35 = vpack.c.bf16 %v11678_v63, %v11674_v26  ;;  %v11494_v38 = vpack.c.bf16 %v20709_v37, %v20705_v31  ;;  %v11680_v51 = vpop.f32.mrb[111].mxu0  ;;  %v20713_v44 = vpop.f32.mrb[163].mxu1  ;;  %v18760_v26 = vld [vmem:[%s21021_s0 + $0x2c0] sm:$0xff]   ;;  %v18755_v63 = vld [vmem:[%s21021_s0 + $0x8] sm:$0xff]   ;;  %v18783_v31 = vld [vmem:[%s21021_s0 + $0x2f8] sm:$0xff]  }
0x19fa   :  { %v11696_v45 = vpack.c.bf16 %v11680_v51, %v11676_v32  ;;  %v11495_v53 = vpack.c.bf16 %v20713_v44, %v20707_v33  ;;  %v18756_v51 = vld [vmem:[%s21021_s0 + $0x50] sm:$0xff]   ;;  %v18766_v33 = vld [vmem:[%s21021_s0 + $0x68] sm:$0xff]   ;;  %v18784_v37 = vld [vmem:[%s21021_s0 + $0x2b8] sm:$0xff]  }
0x19fb   :  { %v18767_v44 = vld [vmem:[%s21021_s0 + $0x288] sm:$0xff]  }
0x19fc   :  { %12039 = vmatprep.mubr.bf16.mxu0 %v11696_v45 }
0x19fd   :  { %12040 = vmatmul.mubr.bf16.vlgmr.msra.gmra.mrb[116].mxu0 %v11695_v35 }
0x19fe   :  { %16590 = vmatpush3.bf16.msra.mxu0 %v18723_v48  ;;  %v20719_v49 = vpop.f32.mrb[164].mxu1  ;;  %v11684_v40 = vpop.f32.mrb[112].mxu0 }
0x19ff   :  { %v20722_v2 = vpop.f32.mrb[165].mxu1  ;;  %16591 = vmatprep.subr.bf16.mxu0 %v18725_v43  ;;  %v11686_v42 = vpop.f32.mrb[113].mxu0 }
0x1a00   :  { %v20725_v46 = vpop.f32.mrb[166].mxu1  ;;  %v11688_v4 = vpop.f32.mrb[114].mxu0 }
0x1a01   :  { %v11498_v56 = vpack.c.bf16 %v20725_v46, %v20719_v49  ;;  %v20729_v59 = vpop.f32.mrb[167].mxu1  ;;  %v11699_v61 = vpack.c.bf16 %v11688_v4, %v11684_v40  ;;  %v11690_v7 = vpop.f32.mrb[115].mxu0  ;;  %v18757_v40 = vld [vmem:[%s21021_s0 + $0x10] sm:$0xff]   ;;  %v18761_v4 = vld [vmem:[%s21021_s0 + $0x60] sm:$0xff]   ;;  %v18788_v49 = vld [vmem:[%s21021_s0 + $0x208] sm:$0xff]  }
0x1a02   :  { %16592 = vmatpush3.bf16.msra.mxu0 %v18727_v39  ;;  %v11499_v62 = vpack.c.bf16 %v20729_v59, %v20722_v2  ;;  %v11700_v6 = vpack.c.bf16 %v11690_v7, %v11686_v42  ;;  %v18759_v42 = vld [vmem:[%s21021_s0 + $0x18] sm:$0xff]   ;;  %v18763_v7 = vld [vmem:[%s21021_s0 + $0x280] sm:$0xff]   ;;  %v18787_v2 = vld [vmem:[%s21021_s0 + $0x248] sm:$0xff]  }
0x1a03   :  { %16593 = vmatprep.subr.bf16.mxu0 %v18729_v41  ;;  %v18758_v41 = vld [vmem:[%s21021_s0 + $0x58] sm:$0xff]   ;;  %v18790_v46 = vld [vmem:[%s21021_s0 + $0x250] sm:$0xff]  }
0x1a04   :  { %12047 = vmatprep.mubr.bf16.mxu0 %v11700_v6  ;;  %v18765_v6 = vld [vmem:[%s21021_s0 + $0x2c8] sm:$0xff]   ;;  %v18792_v59 = vld [vmem:[%s21021_s0 + $0x258] sm:$0xff]  }
0x1a05   :  { %12048 = vmatmul.mubr.bf16.gmra.mrb[120].mxu0 %v11699_v61  ;;  %v18762_v61 = vld [vmem:[%s21022_s26 + $0x20] sm:$0xff]  }
0x1a06   :  { %16594 = vmatpush3.bf16.msra.mxu0 %v18731_v0  ;;  %v11475_v1 = vpop.f32.mrb[168].mxu1  ;;  %v18764_v0 = vld [vmem:[%s21021_s0 + $0x20] sm:$0xff]  }
0x1a07   :  { %v11477_v21 = vpop.f32.mrb[169].mxu1  ;;  %16595 = vmatprep.subr.bf16.mxu0 %v18733_v8  ;;  %v18769_v8 = vld [vmem:[%s21021_s0 + $0x2d0] sm:$0xff]  }
0x1a08   :  { %v11479_v14 = vpop.f32.mrb[170].mxu1 }
0x1a09   :  { %v11496_v5 = vpack.c.bf16 %v11479_v14, %v11475_v1  ;;  %v11481_v58 = vpop.f32.mrb[171].mxu1  ;;  %v18770_v1 = vld [vmem:[%s21021_s0 + $0x70] sm:$0xff]   ;;  %v18773_v14 = vld [vmem:[%s21021_s0 + $0x2d8] sm:$0xff]  }
0x1a0a   :  { %16596 = vmatpush3.bf16.msra.mxu0 %v18735_v15  ;;  %v11497_v60 = vpack.c.bf16 %v11481_v58, %v11477_v21  ;;  %v18789_v15 = vld [vmem:[%s21022_s26 + $0x28] sm:$0xff]   ;;  %v18771_v21 = vld [vmem:[%s21021_s0 + $0x290] sm:$0xff]   ;;  %v18775_v58 = vld [vmem:[%s21021_s0 + $0x298] sm:$0xff]  }
0x1a0b   :  { %16597 = vmatprep.subr.bf16.mxu0 %v18737_v3  ;;  %v18772_v3 = vld [vmem:[%s21021_s0 + $0x30] sm:$0xff]  }
0x1a0c   :  { %12329 = vmatprep.mubr.bf16.mxu0 %v11497_v60  ;;  %v18776_v60 = vld [vmem:[%s21021_s0 + $0x38] sm:$0xff]  }
0x1a0e   :  { %16598 = vmatpush3.bf16.msra.mxu0 %v18739_v10  ;;  %v11485_v52 = vpop.f32.mrb[172].mxu1  ;;  %v18777_v10 = vld [vmem:[%s21021_s0 + $0x2e0] sm:$0xff]  }
0x1a0f   :  { %v11487_v12 = vpop.f32.mrb[173].mxu1  ;;  %16599 = vmatprep.subr.bf16.mxu0 %v18741_v11  ;;  %v18778_v11 = vld [vmem:[%s21021_s0 + $0x2a0] sm:$0xff]  }
0x1a10   :  { %v11489_v36 = vpop.f32.mrb[174].mxu1 }
0x1a11   :  { %v11500_v9 = vpack.c.bf16 %v11489_v36, %v11485_v52  ;;  %v11491_v13 = vpop.f32.mrb[175].mxu1  ;;  %v18779_v52 = vld [vmem:[%s21021_s0 + $0x2e8] sm:$0xff]   ;;  %v18782_v36 = vld [vmem:[%s21021_s0 + $0x2b0] sm:$0xff]  }
0x1a12   :  { %16600 = vmatpush3.bf16.msra.mxu0 %v18743_v57  ;;  %v11501_v18 = vpack.c.bf16 %v11491_v13, %v11487_v12  ;;  %v18785_v57 = vld [vmem:[%s21021_s0 + $0x240] sm:$0xff]   ;;  %v18780_v12 = vld [vmem:[%s21021_s0 + $0x2a8] sm:$0xff]  }
0x1a13   :  { %16601 = vmatprep.subr.bf16.mxu0 %v18745_v34  ;;  %v18781_v34 = vld [vmem:[%s21021_s0 + $0x2f0] sm:$0xff]   ;;  %v18796_v13 = vld [vmem:[%s21021_s0 + $0x268] sm:$0xff]  }
0x1a16   :  { %16602 = vmatpush3.bf16.msra.mxu0 %v18747_v50  ;;  %v11621_v20 = vpop.f32.mrb[176].mxu1  ;;  %v18798_v50 = vld [vmem:[%s21021_s0 + $0x270] sm:$0xff]  }
0x1a17   :  { %v11623_v23 = vpop.f32.mrb[177].mxu1  ;;  %16603 = vmatprep.subr.bf16.mxu0 %v18749_v19  ;;  %v18799_v19 = vld [vmem:[%s21021_s0 + $0x230] sm:$0xff]  }
0x1a18   :  { %v11625_v24 = vpop.f32.mrb[178].mxu1 }
0x1a19   :  { %v11693_v25 = vpack.c.bf16 %v11625_v24, %v11621_v20  ;;  %v11627_v27 = vpop.f32.mrb[179].mxu1  ;;  %v18800_v20 = vld [vmem:[%s21021_s0 + $0x278] sm:$0xff]  }
0x1a1a   :  { %v11694_v28 = vpack.c.bf16 %v11627_v27, %v11623_v23  ;;  %16604 = vmatpush3.bf16.msra.mxu0 %v18751_v22  ;;  %v18801_v22 = vld [vmem:[%s21021_s0 + $0x238] sm:$0xff]  }
0x1a1b   :  { %12420 = vmatprep.subr.bf16.mxu0 %v20643_v55 }
0x1a1c   :  { %11990 = vmatprep.mubr.bf16.mxu1 %v11694_v28 }
0x1a1d   :  { %12330 = vmatmul.mubr.bf16.vlgmr.msra.gmra.mrb[124].mxu0 %v11496_v5  ;;  %11991 = vmatmul.mubr.bf16.vlgmr.msra.gmra.mrb[184].mxu1 %v11693_v25  ;;  %v18774_v5 = vld [vmem:[%s21021_s0 + $0x78] sm:$0xff]  }
0x1a1e   :  { %16562 = vmatpush3.bf16.msra.mxu1 %v18753_v29  ;;  %12337 = vmatprep.mubr.bf16.mxu0 %v11501_v18  ;;  %v11631_v32 = vpop.f32.mrb[180].mxu1  ;;  %v18797_v18 = vld [vmem:[%s21021_s0 + $0x228] sm:$0xff]  }
0x1a1f   :  { %12421 = vmatpush1.bf16.msra.mxu0 %v20639_v17  ;;  %v11633_v35 = vpop.f32.mrb[181].mxu1  ;;  %16563 = vmatprep.subr.bf16.mxu1 %v18754_v30 }
0x1a20   :  { %v11635_v45 = vpop.f32.mrb[182].mxu1  ;;  %16645 = vmatprep.subr.bf16.mxu0 %v18760_v26 }
0x1a21   :  { %v11697_v48 = vpack.c.bf16 %v11635_v45, %v11631_v32  ;;  %v11637_v43 = vpop.f32.mrb[183].mxu1 }
0x1a22   :  { %v11698_v39 = vpack.c.bf16 %v11637_v43, %v11633_v35  ;;  %16564 = vmatpush3.bf16.msra.mxu1 %v18755_v63 }
0x1a23   :  { %16565 = vmatprep.subr.bf16.mxu1 %v18756_v51 }
0x1a24   :  { %11998 = vmatprep.mubr.bf16.mxu1 %v11698_v39 }
0x1a25   :  { %12338 = vmatmul.mubr.bf16.gmra.mrb[128].mxu0 %v11500_v9  ;;  %11999 = vmatmul.mubr.bf16.gmra.mrb[188].mxu1 %v11697_v48  ;;  %v18795_v9 = vld [vmem:[%s21021_s0 + $0x220] sm:$0xff]  }
0x1a26   :  { %16566 = vmatpush3.bf16.msra.mxu1 %v18757_v40  ;;  %12280 = vmatprep.mubr.bf16.mxu1 %v11495_v53  ;;  %v18768_v53 = vld [vmem:[%s21021_s0 + $0x28] sm:$0xff]  }
0x1a27   :  { %16567 = vmatprep.subr.bf16.mxu1 %v18758_v41  ;;  %12452 = vmatprep.mubr.bf16.mxu0 %v19152_v47 }
0x1a2a   :  { %16568 = vmatpush3.bf16.msra.mxu1 %v18759_v42 }
0x1a2b   :  { %16569 = vmatprep.subr.bf16.mxu1 %v18761_v4 }
0x1a2d   :  { %16036 = vmatmul.mubr.msk.bf16.vlgmr.msra.gmra.mrb[132].mxu0 %vm231_vm0, %v18762_v61 }
0x1a2e   :  { %16646 = vmatpush3.bf16.msra.mxu0 %v18763_v7  ;;  %16570 = vmatpush3.bf16.msra.mxu1 %v18764_v0 }
0x1a2f   :  { %16647 = vmatprep.subr.bf16.mxu0 %v18765_v6  ;;  %16571 = vmatprep.subr.bf16.mxu1 %v18766_v33 }
0x1a30   :  { %12462 = vmatprep.mubr.bf16.mxu0 %v19152_v47 }
0x1a32   :  { %16648 = vmatpush3.bf16.msra.mxu0 %v18767_v44  ;;  %16572 = vmatpush3.bf16.msra.mxu1 %v18768_v53 }
0x1a33   :  { %16649 = vmatprep.subr.bf16.mxu0 %v18769_v8  ;;  %16573 = vmatprep.subr.bf16.mxu1 %v18770_v1 }
0x1a35   :  { %16037 = vmatmul.mubr.msk.bf16.gmra.mrb[136].mxu0 %vm231_vm0, %v18789_v15 }
0x1a36   :  { %16650 = vmatpush3.bf16.msra.mxu0 %v18771_v21  ;;  %16574 = vmatpush3.bf16.msra.mxu1 %v18772_v3 }
0x1a37   :  { %16651 = vmatprep.subr.bf16.mxu0 %v18773_v14  ;;  %16575 = vmatprep.subr.bf16.mxu1 %v18774_v5 }
0x1a3a   :  { %16652 = vmatpush3.bf16.msra.mxu0 %v18775_v58  ;;  %16576 = vmatpush3.bf16.msra.mxu1 %v18776_v60 }
0x1a3b   :  { %12367 = vmatprep.subr.bf16.mxu1 %v20641_v54  ;;  %16653 = vmatprep.subr.bf16.mxu0 %v18777_v10 }
0x1a3d   :  { %12281 = vmatmul.mubr.bf16.vlgmr.msra.gmra.mrb[192].mxu1 %v11494_v38  ;;  %v18786_v38 = vld [vmem:[%s21021_s0 + $0x200] sm:$0xff]  }
0x1a3e   :  { %16654 = vmatpush3.bf16.msra.mxu0 %v18778_v11  ;;  %12288 = vmatprep.mubr.bf16.mxu1 %v11499_v62  ;;  %v18794_v62 = vld [vmem:[%s21021_s0 + $0x260] sm:$0xff]  }
0x1a3f   :  { %12368 = vmatpush1.bf16.msra.mxu1 %v20637_v16  ;;  %16655 = vmatprep.subr.bf16.mxu0 %v18779_v52 }
0x1a40   :  { %16617 = vmatprep.subr.bf16.mxu1 %v18785_v57 }
0x1a42   :  { %16656 = vmatpush3.bf16.msra.mxu0 %v18780_v12 }
0x1a43   :  { %16657 = vmatprep.subr.bf16.mxu0 %v18781_v34 }
0x1a45   :  { %12289 = vmatmul.mubr.bf16.gmra.mrb[196].mxu1 %v11498_v56  ;;  %v18791_v56 = vld [vmem:[%s21021_s0 + $0x210] sm:$0xff]  }
0x1a46   :  { %16658 = vmatpush3.bf16.msra.mxu0 %v18782_v36  ;;  %12399 = vmatprep.mubr.bf16.mxu1 %v19152_v47 }
0x1a47   :  { %16659 = vmatprep.subr.bf16.mxu0 %v18783_v31 }
0x1a4a   :  { %16660 = vmatpush3.bf16.msra.mxu0 %v18784_v37 }
0x1a4b   :  { %12914 = vmatprep.subr.bf16.mxu0 %v20643_v55  ;;  %v18793_v55 = vld [vmem:[%s21021_s0 + $0x218] sm:$0xff]  }
0x1a4d   :  { %16034 = vmatmul.mubr.msk.bf16.vlgmr.msra.gmra.mrb[200].mxu1 %vm231_vm0, %v18762_v61 }
0x1a4e   :  { %16618 = vmatpush3.bf16.msra.mxu1 %v18786_v38  ;;  %12409 = vmatprep.mubr.bf16.mxu1 %v19152_v47  ;;  %v18804_v38 = vld [vmem:[%s21021_s0 + $0x3c0] sm:$0xff]  }
0x1a4f   :  { %16619 = vmatprep.subr.bf16.mxu1 %v18787_v2 }
0x1a52   :  { %16620 = vmatpush3.bf16.msra.mxu1 %v18788_v49 }
0x1a53   :  { %16621 = vmatprep.subr.bf16.mxu1 %v18790_v46 }
0x1a55   :  { %16035 = vmatmul.mubr.msk.bf16.gmra.mrb[204].mxu1 %vm231_vm0, %v18789_v15 }
0x1a56   :  { %16622 = vmatpush3.bf16.msra.mxu1 %v18791_v56 }
0x1a57   :  { %16623 = vmatprep.subr.bf16.mxu1 %v18792_v59 }
0x1a5a   :  { %16624 = vmatpush3.bf16.msra.mxu1 %v18793_v55 }
0x1a5b   :  { %16625 = vmatprep.subr.bf16.mxu1 %v18794_v62 }
0x1a5e   :  { %16626 = vmatpush3.bf16.msra.mxu1 %v18795_v9 }
0x1a5f   :  { %16627 = vmatprep.subr.bf16.mxu1 %v18796_v13 }
0x1a62   :  { %16628 = vmatpush3.bf16.msra.mxu1 %v18797_v18 }
0x1a63   :  { %16629 = vmatprep.subr.bf16.mxu1 %v18798_v50  ;;  %v18802_v50 = vld [vmem:[%s21022_s26 + $0x30] sm:$0xff]  }
0x1a66   :  { %16630 = vmatpush3.bf16.msra.mxu1 %v18799_v19 }
0x1a67   :  { %16631 = vmatprep.subr.bf16.mxu1 %v18800_v20 }
0x1a6a   :  { %16632 = vmatpush3.bf16.msra.mxu1 %v18801_v22  ;;  %v18805_v22 = vld [vmem:[%s21021_s0 + $0x380] sm:$0xff]  }
0x1a6b   :  { %12861 = vmatprep.subr.bf16.mxu1 %v20641_v54 }
0x1ad0   :  { %v16549_v23 = vpop.f32.mrb[116].mxu0 }
0x1ad1   :  { %v16550_v24 = vpop.f32.mrb[117].mxu0 }
0x1ad2   :  { %v16551_v25 = vadd.f32 %v16550_v24, %v16549_v23  ;;  %v16552_v27 = vpop.f32.mrb[118].mxu0  ;;  %v18808_v23 = vld [vmem:[%s21021_s0 + $0x3c8] sm:$0xff]  }
0x1ad3   :  { %v16553_v28 = vpop.f32.mrb[119].mxu0 }
0x1ad4   :  { %v16554_v29 = vadd.f32 %v16553_v28, %v16552_v27 }
0x1ad8   :  { %v16555_v30 = vpop.f32.mrb[120].mxu0 }
0x1ad9   :  { %v16556_v26 = vpop.f32.mrb[121].mxu0 }
0x1ada   :  { %v16557_v32 = vadd.f32 %v16556_v26, %v16555_v30  ;;  %v16558_v63 = vpop.f32.mrb[122].mxu0  ;;  %v18812_v26 = vld [vmem:[%s21021_s0 + $0x3d0] sm:$0xff]  }
0x1adb   :  { %v16559_v35 = vpop.f32.mrb[123].mxu0 }
0x1adc   :  { %v16560_v51 = vadd.f32 %v16559_v35, %v16558_v63 }
0x1af0   :  { %v16605_v45 = vpop.f32.mrb[124].mxu0  ;;  %v16521_v48 = vpop.f32.mrb[184].mxu1 }
0x1af1   :  { %v16606_v43 = vpop.f32.mrb[125].mxu0  ;;  %v16522_v39 = vpop.f32.mrb[185].mxu1 }
0x1af2   :  { %v16607_v40 = vadd.f32 %v16606_v43, %v16605_v45  ;;  %v16523_v41 = vadd.f32 %v16522_v39, %v16521_v48  ;;  %v16608_v42 = vpop.f32.mrb[126].mxu0  ;;  %v16524_v54 = vpop.f32.mrb[186].mxu1 }
0x1af3   :  { %v16609_v4 = vpop.f32.mrb[127].mxu0  ;;  %v16525_v61 = vpop.f32.mrb[187].mxu1 }
0x1af4   :  { %v12042_v7 = vadd.f32 %v16551_v25, %v16523_v41  ;;  %v16610_v0 = vadd.f32 %v16609_v4, %v16608_v42  ;;  %v16526_v6 = vadd.f32 %v16525_v61, %v16524_v54 }
0x1af6   :  { %v12045_v33 = vadd.f32 %v16554_v29, %v16526_v6  ;;  %v18809_v29 = vld [vmem:[%s21021_s0 + $0x388] sm:$0xff]  }
0x1af8   :  { %v16611_v44 = vpop.f32.mrb[128].mxu0  ;;  %v16527_v53 = vpop.f32.mrb[188].mxu1 }
0x1af9   :  { %v16612_v8 = vpop.f32.mrb[129].mxu0  ;;  %v16528_v1 = vpop.f32.mrb[189].mxu1 }
0x1afa   :  { %v16613_v15 = vadd.f32 %v16612_v8, %v16611_v44  ;;  %v16614_v21 = vpop.f32.mrb[130].mxu0  ;;  %v16529_v3 = vadd.f32 %v16528_v1, %v16527_v53  ;;  %v16530_v14 = vpop.f32.mrb[190].mxu1 }
0x1afb   :  { %v16615_v5 = vpop.f32.mrb[131].mxu0  ;;  %v16531_v58 = vpop.f32.mrb[191].mxu1 }
0x1afc   :  { %v16616_v60 = vadd.f32 %v16615_v5, %v16614_v21  ;;  %v12050_v10 = vadd.f32 %v16557_v32, %v16529_v3  ;;  %v16532_v11 = vadd.f32 %v16531_v58, %v16530_v14  ;;  %v18810_v21 = vld [vmem:[%s21021_s0 + $0x348] sm:$0xff]   ;;  %v18813_v3 = vld [vmem:[%s21021_s0 + $0x390] sm:$0xff]   ;;  %v18816_v5 = vld [vmem:[%s21021_s0 + $0x3d8] sm:$0xff]  }
0x1afd   :  { %v18814_v14 = vld [vmem:[%s21021_s0 + $0x350] sm:$0xff]   ;;  %v18817_v58 = vld [vmem:[%s21021_s0 + $0x398] sm:$0xff]  }
0x1afe   :  { %v12053_v52 = vadd.f32 %v16560_v51, %v16532_v11  ;;  %v18803_v51 = vld [vmem:[%s21022_s26 + $0x38] sm:$0xff]  }
0x1aff   :  { %v18818_v11 = vld [vmem:[%s21021_s0 + $0x358] sm:$0xff]  }
0x1b00   :  { %v12454_v57 = vpop.f32.mrb[132].mxu0 }
0x1b01   :  { %v12456_v12 = vpop.f32.mrb[133].mxu0 }
0x1b02   :  { %v12458_v34 = vpop.f32.mrb[134].mxu0 }
0x1b03   :  { %v12475_v36 = vpack.c.bf16 %v12458_v34, %v12454_v57  ;;  %v12460_v31 = vpop.f32.mrb[135].mxu0  ;;  %v18824_v57 = vld [vmem:[%s21021_s0 + $0x3e8] sm:$0xff]   ;;  %v18822_v34 = vld [vmem:[%s21021_s0 + $0x360] sm:$0xff]  }
0x1b04   :  { %v12476_v37 = vpack.c.bf16 %v12460_v31, %v12456_v12  ;;  %v18825_v12 = vld [vmem:[%s21021_s0 + $0x3a8] sm:$0xff]   ;;  %v18828_v31 = vld [vmem:[%s21021_s0 + $0x3f0] sm:$0xff]  }
0x1b06   :  { %12819 = vmatprep.mubr.bf16.mxu0 %v12476_v37  ;;  %v18829_v37 = vld [vmem:[%s21021_s0 + $0x3b0] sm:$0xff]  }
0x1b07   :  { %12820 = vmatmul.mubr.bf16.vlgmr.msra.gmra.mrb[140].mxu0 %v12475_v36  ;;  %v18823_v36 = vld [vmem:[%s21021_s0 + $0x320] sm:$0xff]  }
0x1b08   :  { %12915 = vmatpush1.bf16.msra.mxu0 %v20639_v17  ;;  %v12464_v2 = vpop.f32.mrb[136].mxu0 }
0x1b09   :  { %v12466_v49 = vpop.f32.mrb[137].mxu0  ;;  %16701 = vmatprep.subr.bf16.mxu0 %v18804_v38  ;;  %v18826_v38 = vld [vmem:[%s21021_s0 + $0x368] sm:$0xff]  }
0x1b0a   :  { %v12468_v46 = vpop.f32.mrb[138].mxu0 }
0x1b0b   :  { %v12479_v56 = vpack.c.bf16 %v12468_v46, %v12464_v2  ;;  %v12470_v59 = vpop.f32.mrb[139].mxu0  ;;  %v18827_v2 = vld [vmem:[%s21021_s0 + $0x328] sm:$0xff]   ;;  %v18833_v46 = vld [vmem:[%s21021_s0 + $0x3b8] sm:$0xff]  }
0x1b0c   :  { %v12480_v55 = vpack.c.bf16 %v12470_v59, %v12466_v49  ;;  %v18832_v49 = vld [vmem:[%s21021_s0 + $0x3f8] sm:$0xff]   ;;  %v18831_v59 = vld [vmem:[%s21021_s0 + $0x330] sm:$0xff]  }
0x1b0e   :  { %12827 = vmatprep.mubr.bf16.mxu0 %v12480_v55  ;;  %v18834_v55 = vld [vmem:[%s21021_s0 + $0x378] sm:$0xff]  }
0x1b0f   :  { %12828 = vmatmul.mubr.bf16.gmra.mrb[144].mxu0 %v12479_v56  ;;  %v18830_v56 = vld [vmem:[%s21021_s0 + $0x370] sm:$0xff]  }
0x1b10   :  { %v16577_v62 = vpop.f32.mrb[192].mxu1  ;;  %12946 = vmatprep.mubr.bf16.mxu0 %v19152_v47 }
0x1b11   :  { %v16578_v9 = vpop.f32.mrb[193].mxu1 }
0x1b12   :  { %v16579_v13 = vadd.f32 %v16578_v9, %v16577_v62  ;;  %v16580_v18 = vpop.f32.mrb[194].mxu1  ;;  %v18835_v62 = vld [vmem:[%s21021_s0 + $0x338] sm:$0xff]  }
0x1b13   :  { %v16581_v17 = vpop.f32.mrb[195].mxu1 }
0x1b14   :  { %v12283_v19 = vadd.f32 %v16579_v13, %v12042_v7  ;;  %v16582_v20 = vadd.f32 %v16581_v17, %v16580_v18 }
0x1b16   :  { %v20825_v24 = vadd.f32 %v16607_v40, %v12283_v19  ;;  %v12286_v25 = vadd.f32 %v16582_v20, %v12045_v33 }
0x1b17   :  { %16142 = vmatmul.mubr.msk.bf16.vlgmr.msra.gmra.mrb[148].mxu0 %vm231_vm0, %v18802_v50 }
0x1b18   :  { %v20828_v27 = vadd.f32 %v16610_v0, %v12286_v25  ;;  %v16583_v28 = vpop.f32.mrb[196].mxu1  ;;  %12956 = vmatprep.mubr.bf16.mxu0 %v19152_v47  ;;  %16702 = vmatpush3.bf16.msra.mxu0 %v18805_v22  ;;  %v18806_v0 = vld [vmem:[%s21021_s0 + $0x340] sm:$0xff]  }
0x1b19   :  { %v16584_v30 = vpop.f32.mrb[197].mxu1  ;;  %16703 = vmatprep.subr.bf16.mxu0 %v18808_v23 }
0x1b1a   :  { %v16585_v32 = vadd.f32 %v16584_v30, %v16583_v28  ;;  %v16586_v63 = vpop.f32.mrb[198].mxu1 }
0x1b1b   :  { %v16587_v35 = vpop.f32.mrb[199].mxu1 }
0x1b1c   :  { %v12291_v45 = vadd.f32 %v16585_v32, %v12050_v10  ;;  %v16588_v48 = vadd.f32 %v16587_v35, %v16586_v63  ;;  %16704 = vmatpush3.bf16.msra.mxu0 %v18809_v29  ;;  %v18821_v10 = vld [vmem:[%s21021_s0 + $0x3a0] sm:$0xff]  }
0x1b1d   :  { %16705 = vmatprep.subr.bf16.mxu0 %v18812_v26 }
0x1b1e   :  { %v20834_v43 = vadd.f32 %v16613_v15, %v12291_v45  ;;  %v12294_v39 = vadd.f32 %v16588_v48, %v12053_v52  ;;  %v18807_v15 = vld [vmem:[%s21021_s0 + $0x300] sm:$0xff]   ;;  %v18819_v52 = vld [vmem:[%s21021_s0 + $0x318] sm:$0xff]  }
0x1b1f   :  { %16143 = vmatmul.mubr.msk.bf16.gmra.mrb[152].mxu0 %vm231_vm0, %v18803_v51 }
0x1b20   :  { %v20837_v40 = vadd.f32 %v16616_v60, %v12294_v39  ;;  %v12401_v41 = vpop.f32.mrb[200].mxu1  ;;  %16706 = vmatpush3.bf16.msra.mxu0 %v18813_v3  ;;  %v18820_v60 = vld [vmem:[%s21021_s0 + $0x3e0] sm:$0xff]  }
0x1b21   :  { %v12403_v42 = vpop.f32.mrb[201].mxu1  ;;  %16707 = vmatprep.subr.bf16.mxu0 %v18816_v5 }
0x1b22   :  { %v12405_v54 = vpop.f32.mrb[202].mxu1 }
0x1b23   :  { %v12473_v4 = vpack.c.bf16 %v12405_v54, %v12401_v41  ;;  %v12407_v61 = vpop.f32.mrb[203].mxu1 }
0x1b24   :  { %v12474_v7 = vpack.c.bf16 %v12407_v61, %v12403_v42  ;;  %16708 = vmatpush3.bf16.msra.mxu0 %v18817_v58 }
0x1b25   :  { %16709 = vmatprep.subr.bf16.mxu0 %v18820_v60 }
0x1b26   :  { %12770 = vmatprep.mubr.bf16.mxu1 %v12474_v7 }
0x1b27   :  { %12771 = vmatmul.mubr.bf16.vlgmr.msra.gmra.mrb[208].mxu1 %v12473_v4 }
0x1b28   :  { %12862 = vmatpush1.bf16.msra.mxu1 %v20637_v16  ;;  %v12411_v6 = vpop.f32.mrb[204].mxu1  ;;  %v18811_v16 = vld [vmem:[%s21021_s0 + $0x308] sm:$0xff]   ;;  %16710 = vmatpush3.bf16.msra.mxu0 %v18821_v10 }
0x1b29   :  { %v12413_v33 = vpop.f32.mrb[205].mxu1  ;;  %16673 = vmatprep.subr.bf16.mxu1 %v18806_v0  ;;  %16711 = vmatprep.subr.bf16.mxu0 %v18824_v57 }
0x1b2a   :  { %v12415_v44 = vpop.f32.mrb[206].mxu1 }
0x1b2b   :  { %v12477_v53 = vpack.c.bf16 %v12415_v44, %v12411_v6  ;;  %v12417_v8 = vpop.f32.mrb[207].mxu1 }
0x1b2c   :  { %v12478_v1 = vpack.c.bf16 %v12417_v8, %v12413_v33  ;;  %16712 = vmatpush3.bf16.msra.mxu0 %v18825_v12 }
0x1b2d   :  { %16713 = vmatprep.subr.bf16.mxu0 %v18828_v31 }
0x1b2e   :  { %12778 = vmatprep.mubr.bf16.mxu1 %v12478_v1 }
0x1b2f   :  { %12779 = vmatmul.mubr.bf16.gmra.mrb[212].mxu1 %v12477_v53 }
0x1b30   :  { %12893 = vmatprep.mubr.bf16.mxu1 %v19152_v47  ;;  %16714 = vmatpush3.bf16.msra.mxu0 %v18829_v37 }
0x1b31   :  { %16715 = vmatprep.subr.bf16.mxu0 %v18832_v49  ;;  %v16251_v49 = vld [vmem:[%s21023_s28 + $0x60] sm:$0xff] }
0x1b34   :  { %16716 = vmatpush3.bf16.msra.mxu0 %v18833_v46 }
0x1b37   :  { %16140 = vmatmul.mubr.msk.bf16.vlgmr.msra.gmra.mrb[216].mxu1 %vm231_vm0, %v18802_v50 }
0x1b38   :  { %12903 = vmatprep.mubr.bf16.mxu1 %v19152_v47  ;;  %16674 = vmatpush3.bf16.msra.mxu1 %v18807_v15  ;;  %v18815_v47 = vld [vmem:[%s21021_s0 + $0x310] sm:$0xff]  }
0x1b39   :  { %16675 = vmatprep.subr.bf16.mxu1 %v18810_v21 }
0x1b3c   :  { %16676 = vmatpush3.bf16.msra.mxu1 %v18811_v16 }
0x1b3d   :  { %16677 = vmatprep.subr.bf16.mxu1 %v18814_v14 }
0x1b3f   :  { %16141 = vmatmul.mubr.msk.bf16.gmra.mrb[220].mxu1 %vm231_vm0, %v18803_v51 }
0x1b40   :  { %16678 = vmatpush3.bf16.msra.mxu1 %v18815_v47 }
0x1b41   :  { %16679 = vmatprep.subr.bf16.mxu1 %v18818_v11 }
0x1b44   :  { %16680 = vmatpush3.bf16.msra.mxu1 %v18819_v52 }
0x1b45   :  { %16681 = vmatprep.subr.bf16.mxu1 %v18822_v34 }
0x1b48   :  { %16682 = vmatpush3.bf16.msra.mxu1 %v18823_v36 }
0x1b49   :  { %16683 = vmatprep.subr.bf16.mxu1 %v18826_v38  ;;  %v13369_v38 = vld [vmem:[%s21023_s28] sm:$0xff] }
0x1b4c   :  { %16684 = vmatpush3.bf16.msra.mxu1 %v18827_v2  ;;  %v13370_v2 = vld [vmem:[%s21023_s28 + $0x8] sm:$0xff] }
0x1b4d   :  { %16685 = vmatprep.subr.bf16.mxu1 %v18830_v56  ;;  %v20886_v46 = vpack.c.bf16 %v13370_v2, %v13369_v38  ;;  %v16252_v56 = vld [vmem:[%s21023_s28 + $0x68] sm:$0xff] }
0x1b50   :  { %16686 = vmatpush3.bf16.msra.mxu1 %v18831_v59  ;;  %v20889_v59 = vpack.c.bf16 %v16252_v56, %v16251_v49 }
0x1b51   :  { %16687 = vmatprep.subr.bf16.mxu1 %v18834_v55  ;;  %v13371_v55 = vld [vmem:[%s21023_s28 + $0x10] sm:$0xff] }
0x1b52   :  { %17038 = vmatprep.subr.bf16.mxu0 %v20889_v59 }
0x1b54   :  { %16688 = vmatpush3.bf16.msra.mxu1 %v18835_v62  ;;  %v13372_v62 = vld [vmem:[%s21023_s28 + $0x18] sm:$0xff] }
0x1b55   :  { %17014 = vmatprep.subr.bf16.mxu1 %v20886_v46 }
0x1bda   :  { %v16661_v9 = vpop.f32.mrb[140].mxu0 }
0x1bdb   :  { %v16662_v13 = vpop.f32.mrb[141].mxu0 }
0x1bdc   :  { %v16663_v18 = vadd.f32 %v16662_v13, %v16661_v9  ;;  %v16664_v17 = vpop.f32.mrb[142].mxu0  ;;  %v16253_v9 = vld [vmem:[%s21023_s28 + $0x70] sm:$0xff]  ;;  %v20898_v13 = vpack.c.bf16 %v13372_v62, %v13371_v55 }
0x1bdd   :  { %v16665_v50 = vpop.f32.mrb[143].mxu0 }
0x1bde   :  { %v16666_v19 = vadd.f32 %v16665_v50, %v16664_v17  ;;  %v13373_v50 = vld [vmem:[%s21023_s28 + $0x20] sm:$0xff] }
0x1be2   :  { %v16667_v20 = vpop.f32.mrb[144].mxu0 }
0x1be3   :  { %v16668_v22 = vpop.f32.mrb[145].mxu0 }
0x1be4   :  { %v16669_v23 = vadd.f32 %v16668_v22, %v16667_v20  ;;  %v16670_v25 = vpop.f32.mrb[146].mxu0  ;;  %v16255_v20 = vld [vmem:[%s21023_s28 + $0x80] sm:$0xff] }
0x1be5   :  { %v16671_v28 = vpop.f32.mrb[147].mxu0 }
0x1be6   :  { %v16672_v29 = vadd.f32 %v16671_v28, %v16670_v25  ;;  %v16243_v28 = vld [vmem:[%s21023_s28 + $0x30] sm:$0xff] }
0x1bea   :  { %v12948_v30 = vpop.f32.mrb[148].mxu0 }
0x1beb   :  { %v12950_v26 = vpop.f32.mrb[149].mxu0 }
0x1bec   :  { %v12952_v32 = vpop.f32.mrb[150].mxu0 }
0x1bed   :  { %v12969_v63 = vpack.c.bf16 %v12952_v32, %v12948_v30  ;;  %v12954_v35 = vpop.f32.mrb[151].mxu0 }
0x1bee   :  { %v12970_v51 = vpack.c.bf16 %v12954_v35, %v12950_v26 }
0x1bf0   :  { %13313 = vmatprep.mubr.bf16.mxu0 %v12970_v51 }
0x1bf1   :  { %13314 = vmatmul.mubr.bf16.vlgmr.msra.gmra.mrb[156].mxu0 %v12969_v63 }
0x1bf2   :  { %v12958_v45 = vpop.f32.mrb[152].mxu0  ;;  %17040 = vmatpush3.bf16.msra.mxu0 %v20889_v59 }
0x1bf3   :  { %v12960_v48 = vpop.f32.mrb[153].mxu0 }
0x1bf4   :  { %v12962_v39 = vpop.f32.mrb[154].mxu0 }
0x1bf5   :  { %v12973_v41 = vpack.c.bf16 %v12962_v39, %v12958_v45  ;;  %v12964_v42 = vpop.f32.mrb[155].mxu0 }
0x1bf6   :  { %v12974_v54 = vpack.c.bf16 %v12964_v42, %v12960_v48 }
0x1bf8   :  { %13321 = vmatprep.mubr.bf16.mxu0 %v12974_v54 }
0x1bf9   :  { %13322 = vmatmul.mubr.bf16.gmra.mrb[160].mxu0 %v12973_v41 }
0x1bfa   :  { %v16633_v4 = vpop.f32.mrb[208].mxu1 }
0x1bfb   :  { %v16634_v61 = vpop.f32.mrb[209].mxu1 }
0x1bfc   :  { %v16635_v7 = vadd.f32 %v16634_v61, %v16633_v4  ;;  %v16636_v0 = vpop.f32.mrb[210].mxu1 }
0x1bfd   :  { %v16637_v6 = vpop.f32.mrb[211].mxu1 }
0x1bfe   :  { %v12822_v33 = vadd.f32 %v16663_v18, %v16635_v7  ;;  %v16638_v44 = vadd.f32 %v16637_v6, %v16636_v0  ;;  %v16254_v18 = vld [vmem:[%s21023_s28 + $0x78] sm:$0xff] }
0x1bff   :  { %v20901_v17 = vpack.c.bf16 %v16254_v18, %v16253_v9 }
0x1c00   :  { %v20872_v53 = vadd.f32 %v12822_v33, %v20825_v24  ;;  %v12825_v8 = vadd.f32 %v16666_v19, %v16638_v44  ;;  %v13374_v19 = vld [vmem:[%s21023_s28 + $0x28] sm:$0xff] }
0x1c01   :  { %17042 = vmatprep.subr.bf16.mxu0 %v20901_v17  ;;  %v20910_v22 = vpack.c.bf16 %v13374_v19, %v13373_v50  ;;  %v16245_v19 = vld [vmem:[%s21023_s28 + $0x40] sm:$0xff] }
0x1c02   :  { %v20875_v1 = vadd.f32 %v12825_v8, %v20828_v27  ;;  %v16639_v15 = vpop.f32.mrb[212].mxu1  ;;  %17044 = vmatpush3.bf16.msra.mxu0 %v20901_v17 }
0x1c03   :  { %v16640_v21 = vpop.f32.mrb[213].mxu1 }
0x1c04   :  { %v16641_v16 = vadd.f32 %v16640_v21, %v16639_v15  ;;  %v16642_v3 = vpop.f32.mrb[214].mxu1  ;;  %v16240_v15 = vld [vmem:[#allocation14] ss:$0 sm:$0xff] }
0x1c05   :  { %v16643_v14 = vpop.f32.mrb[215].mxu1 }
0x1c06   :  { %v12830_v5 = vadd.f32 %v16669_v23, %v16641_v16  ;;  %v16644_v58 = vadd.f32 %v16643_v14, %v16642_v3  ;;  %v16256_v23 = vld [vmem:[%s21023_s28 + $0x88] sm:$0xff] }
0x1c07   :  { %v20913_v25 = vpack.c.bf16 %v16256_v23, %v16255_v20  ;;  %v16246_v20 = vld [vmem:[%s21023_s28 + $0x48] sm:$0xff] }
0x1c08   :  { %v20878_v47 = vadd.f32 %v12830_v5, %v20834_v43  ;;  %v12833_v60 = vadd.f32 %v16672_v29, %v16644_v58  ;;  %v16244_v29 = vld [vmem:[%s21023_s28 + $0x38] sm:$0xff] }
0x1c09   :  { %17046 = vmatprep.subr.bf16.mxu0 %v20913_v25  ;;  %v20921_v30 = vpack.c.bf16 %v16244_v29, %v16243_v28  ;;  %v17029_v29 = vpack.c.bf16 %v16246_v20, %v16245_v19 }
0x1c0a   :  { %v20881_v10 = vadd.f32 %v12833_v60, %v20837_v40  ;;  %v12895_v24 = vpop.f32.mrb[216].mxu1  ;;  %17048 = vmatpush3.bf16.msra.mxu0 %v20913_v25 }
0x1c0b   :  { %v12897_v11 = vpop.f32.mrb[217].mxu1  ;;  %17062 = vmatprep.subr.bf16.mxu0 %v20921_v30 }
0x1c0c   :  { %v12899_v27 = vpop.f32.mrb[218].mxu1 }
0x1c0d   :  { %v12967_v52 = vpack.c.bf16 %v12899_v27, %v12895_v24  ;;  %v12901_v57 = vpop.f32.mrb[219].mxu1 }
0x1c0e   :  { %v12968_v12 = vpack.c.bf16 %v12901_v57, %v12897_v11 }
0x1c10   :  { %13264 = vmatprep.mubr.bf16.mxu1 %v12968_v12 }
0x1c11   :  { %13265 = vmatmul.mubr.bf16.vlgmr.msra.gmra.mrb[224].mxu1 %v12967_v52 }
0x1c12   :  { %v12905_v34 = vpop.f32.mrb[220].mxu1  ;;  %17016 = vmatpush3.bf16.msra.mxu1 %v20886_v46 }
0x1c13   :  { %v12907_v36 = vpop.f32.mrb[221].mxu1  ;;  %17018 = vmatprep.subr.bf16.mxu1 %v20898_v13 }
0x1c14   :  { %v12909_v43 = vpop.f32.mrb[222].mxu1 }
0x1c15   :  { %v12971_v31 = vpack.c.bf16 %v12909_v43, %v12905_v34  ;;  %v12911_v40 = vpop.f32.mrb[223].mxu1 }
0x1c16   :  { %v12972_v37 = vpack.c.bf16 %v12911_v40, %v12907_v36  ;;  %17020 = vmatpush3.bf16.msra.mxu1 %v20898_v13 }
0x1c17   :  { %17022 = vmatprep.subr.bf16.mxu1 %v20910_v22 }
0x1c18   :  { %13272 = vmatprep.mubr.bf16.mxu1 %v12972_v37 }
0x1c19   :  { %13273 = vmatmul.mubr.bf16.gmra.mrb[228].mxu1 %v12971_v31 }
0x1c1a   :  { %17024 = vmatpush3.bf16.msra.mxu1 %v20910_v22 }
0x1c1b   :  { %17026 = vmatprep.subr.bf16.mxu1 %v20921_v30 }
0x1cc4   :  { %v16717_v26 = vpop.f32.mrb[156].mxu0 }
0x1cc5   :  { %v16718_v32 = vpop.f32.mrb[157].mxu0 }
0x1cc6   :  { %v16719_v63 = vadd.f32 %v16718_v32, %v16717_v26  ;;  %v16720_v35 = vpop.f32.mrb[158].mxu0  ;;  %v16247_v32 = vld [vmem:[%s21023_s28 + $0x50] sm:$0xff] }
0x1cc7   :  { %v16721_v51 = vpop.f32.mrb[159].mxu0 }
0x1cc8   :  { %v16722_v45 = vadd.f32 %v16721_v51, %v16720_v35 }
0x1ccc   :  { %v16723_v48 = vpop.f32.mrb[160].mxu0 }
0x1ccd   :  { %v16724_v39 = vpop.f32.mrb[161].mxu0 }
0x1cce   :  { %v16725_v41 = vadd.f32 %v16724_v39, %v16723_v48  ;;  %v16726_v42 = vpop.f32.mrb[162].mxu0 }
0x1ccf   :  { %v16727_v54 = vpop.f32.mrb[163].mxu0 }
0x1cd0   :  { %v16728_v4 = vadd.f32 %v16727_v54, %v16726_v42 }
0x1ce4   :  { %v16689_v61 = vpop.f32.mrb[224].mxu1 }
0x1ce5   :  { %v16690_v7 = vpop.f32.mrb[225].mxu1 }
0x1ce6   :  { %v16691_v0 = vadd.f32 %v16690_v7, %v16689_v61  ;;  %v16692_v6 = vpop.f32.mrb[226].mxu1 }
0x1ce7   :  { %v16693_v33 = vpop.f32.mrb[227].mxu1 }
0x1ce8   :  { %v13316_v44 = vadd.f32 %v16719_v63, %v16691_v0  ;;  %v16694_v8 = vadd.f32 %v16693_v33, %v16692_v6  ;;  %v16248_v63 = vld [vmem:[%s21023_s28 + $0x58] sm:$0xff] }
0x1ce9   :  { %v17033_v35 = vpack.c.bf16 %v16248_v63, %v16247_v32 }
0x1cea   :  { %v13330_v21 = vadd.f32 %v13316_v44, %v20872_v53  ;;  %v13319_v16 = vadd.f32 %v16722_v45, %v16694_v8 }
0x1cec   :  { %v13341_v3 = vadd.f32 %v16240_v15, %v13330_v21  ;;  %v13331_v14 = vadd.f32 %v13319_v16, %v20875_v1  ;;  %v16695_v5 = vpop.f32.mrb[228].mxu1 }
0x1ced   :  { %v16696_v58 = vpop.f32.mrb[229].mxu1 }
0x1cee   :  { %v13345_v60 = vsub.f32 0.0, %v13341_v3  ;;  %v13342_v24 = vadd.f32 %v16240_v15, %v13331_v14  ;;  %v16697_v11 = vadd.f32 %v16696_v58, %v16695_v5  ;;  %v16698_v27 = vpop.f32.mrb[230].mxu1 }
0x1cef   :  { %v16699_v52 = vpop.f32.mrb[231].mxu1 }
0x1cf0   :  { %v13349_v57 = vmul.f32 1.442695, %v13345_v60  ;;  %v13346_v12 = vsub.f32 0.0, %v13342_v24  ;;  %v13324_v34 = vadd.f32 %v16725_v41, %v16697_v11  ;;  %v16700_v36 = vadd.f32 %v16699_v52, %v16698_v27 }
0x1cf2   :  { %18838 = vpow2.f32 %v13349_v57  ;;  %v13351_v43 = vmul.f32 1.442695, %v13346_v12  ;;  %v13332_v31 = vadd.f32 %v13324_v34, %v20878_v47  ;;  %v13327_v53 = vadd.f32 %v16728_v4, %v16700_v36 }
0x1cf4   :  { %18840 = vpow2.f32 %v13351_v43  ;;  %v13343_v40 = vadd.f32 %v16240_v15, %v13332_v31  ;;  %v13333_v1 = vadd.f32 %v13327_v53, %v20881_v10 }
0x1cf6   :  { %v13347_v37 = vsub.f32 0.0, %v13343_v40  ;;  %v13344_v38 = vadd.f32 %v16240_v15, %v13333_v1 }
0x1cf8   :  { %v13353_v2 = vmul.f32 1.442695, %v13347_v37  ;;  %v13348_v49 = vsub.f32 0.0, %v13344_v38 }
0x1cfa   :  { %18842 = vpow2.f32 %v13353_v2  ;;  %v13355_v56 = vmul.f32 1.442695, %v13348_v49 }
0x1cfc   :  { %v18839_v55 = vpop.eup %18838  ;;  %18844 = vpow2.f32 %v13355_v56 }
0x1cfd   :  { %v13357_v62 = vadd.f32 1.0, %v18839_v55 }
0x1cfe   :  { %v18841_v9 = vpop.eup %18840 }
0x1cff   :  { %18846 = vrcp.f32 %v13357_v62  ;;  %v13358_v47 = vadd.f32 1.0, %v18841_v9 }
0x1d01   :  { %18848 = vrcp.f32 %v13358_v47 }
0x1d04   :  { %v18843_v18 = vpop.eup %18842 }
0x1d05   :  { %v13359_v50 = vadd.f32 1.0, %v18843_v18 }
0x1d06   :  { %v18845_v10 = vpop.eup %18844 }
0x1d07   :  { %18850 = vrcp.f32 %v13359_v50  ;;  %v13360_v28 = vadd.f32 1.0, %v18845_v10 }
0x1d09   :  { %v18847_v23 = vpop.eup %18846  ;;  %18852 = vrcp.f32 %v13360_v28 }
0x1d0a   :  { %16911 = vmatprep.mubr.msk.f32.mxu1 %vm930_vm3, %v18847_v23  ;;  %16941 = vmatprep.mubr.msk.f32.mxu0 %vm930_vm3, %v18847_v23 }
0x1d0b   :  { %v18849_v26 = vpop.eup %18848 }
0x1d0c   :  { %16912 = vmatmul.mubr.msk.f32.vlgmr.msra.gmra.mrb[2].mxu1 %vm930_vm3, %v18849_v26  ;;  %16942 = vmatmul.mubr.msk.f32.vlgmr.msra.gmra.mrb[164].mxu0 %vm930_vm3, %v18849_v26 }
0x1d0d   :  { %17028 = vmatpush3.bf16.msra.mxu1 %v20921_v30  ;;  %17064 = vmatpush3.bf16.msra.mxu0 %v20921_v30 }
0x1d0e   :  { %16926 = vmatprep.mubr.msk.f32.mxu1 %vm930_vm3, %v18847_v23  ;;  %17030 = vmatprep.subr.bf16.mxu1 %v17029_v29 }
0x1d0f   :  { %17066 = vmatprep.subr.bf16.mxu0 %v17029_v29 }
0x1d11   :  { %v18851_v51 = vpop.eup %18850  ;;  %17032 = vmatpush3.bf16.msra.mxu1 %v17029_v29  ;;  %17068 = vmatpush3.bf16.msra.mxu0 %v17029_v29 }
0x1d12   :  { %16971 = vmatprep.mubr.msk.f32.mxu0 %vm930_vm3, %v18851_v51  ;;  %17034 = vmatprep.subr.bf16.mxu1 %v17033_v35 }
0x1d13   :  { %17070 = vmatprep.subr.bf16.mxu0 %v17033_v35  ;;  %v18853_v45 = vpop.eup %18852 }
0x1d15   :  { %17036 = vmatpush3.bf16.msra.mxu1 %v17033_v35  ;;  %17072 = vmatpush3.bf16.msra.mxu0 %v17033_v35 }
0x1d16   :  { %17050 = vmatprep.subr.bf16.mxu1 %v20886_v46 }
0x1d18   :  { %16927 = vmatmul.mubr.msk.f32.vlgmr.msra.gmra.mrb[232].mxu1 %vm930_vm3, %v18849_v26  ;;  %16972 = vmatmul.mubr.msk.f32.vlgmr.msra.gmra.mrb[166].mxu0 %vm930_vm3, %v18853_v45 }
0x1d19   :  { %17052 = vmatpush3.bf16.msra.mxu1 %v20886_v46  ;;  %16956 = vmatprep.mubr.msk.f32.mxu1 %vm930_vm3, %v18851_v51 }
0x1d1a   :  { %17054 = vmatprep.subr.bf16.mxu1 %v20898_v13 }
0x1d1d   :  { %17056 = vmatpush3.bf16.msra.mxu1 %v20898_v13 }
0x1d1e   :  { %17058 = vmatprep.subr.bf16.mxu1 %v20910_v22 }
0x1d21   :  { %17060 = vmatpush3.bf16.msra.mxu1 %v20910_v22 }
0x1d22   :  { %17074 = vmatprep.subr.bf16.mxu1 %v20889_v59 }
0x1d24   :  { %16957 = vmatmul.mubr.msk.f32.vlgmr.msra.gmra.mrb[234].mxu1 %vm930_vm3, %v18853_v45 }
0x1d25   :  { %17076 = vmatpush3.bf16.msra.mxu1 %v20889_v59  ;;  %16986 = vmatprep.mubr.msk.f32.mxu1 %vm930_vm3, %v18851_v51 }
0x1d26   :  { %17078 = vmatprep.subr.bf16.mxu1 %v20901_v17 }
0x1d29   :  { %17080 = vmatpush3.bf16.msra.mxu1 %v20901_v17 }
0x1d2a   :  { %17082 = vmatprep.subr.bf16.mxu1 %v20913_v25 }
0x1d2d   :  { %17084 = vmatpush3.bf16.msra.mxu1 %v20913_v25 }
0x1d30   :  { %16987 = vmatmul.mubr.msk.f32.vlgmr.msra.gmra.mrb[236].mxu1 %vm930_vm3, %v18853_v45 }
0x1d31   :  { %19041 = shalt.err (!%p19038_p12)
}
0x1d32   :  { %s19042_s7 = scalar_lea.hbm %s19310_s24, 32 }
0x1d33   :  { %p19043_p13 = scmp.ne.s32.totalorder %s19310_s24, %s19042_s7  ;;  %p19046_p0 = scmp.lt.u32.totalorder %s19042_s7, %s19310_s24 }
0x1d35   :  { %p19048_p1 = pnand %p19046_p0, %p19043_p13 }
0x1d37   :  { %19051 = shalt.err (!%p19048_p1)
}
0x1d38   :  { %13905 = dma.vmem_to_hbm [thread:$0]  %s13903_s1, 32, %s19310_s24, [#allocation18]  }
0x1d39   :  { %s19052_s10 = scalar_lea.vmem %s13893_s27, 32  ;;  %p19057_p3 = scmp.lt.s32.totalorder %s13893_s27, %s13893_s27 }
0x1d3a   :  { %p19053_p2 = scmp.ne.s32.totalorder %s13893_s27, %s19052_s10  ;;  %p19058_p4 = scmp.lt.s32.totalorder %s19052_s10, %s19052_s10 }
0x1d3c   :  { %p19059_p5 = por %p19058_p4, %p19057_p3 }
0x1d3e   :  { %p19060_p6 = pnand %p19059_p5, %p19053_p2 }
0x1d40   :  { %19063 = shalt.err (!%p19060_p6)
}
0x1d41   :  { %s19064_s11 = scalar_lea.hbm %s19305_s14, 32 }
0x1d42   :  { %p19065_p7 = scmp.ne.s32.totalorder %s19305_s14, %s19064_s11  ;;  %p19068_p8 = scmp.lt.u32.totalorder %s19064_s11, %s19305_s14 }
0x1d44   :  { %p19070_p9 = pnand %p19068_p8, %p19065_p7 }
0x1d46   :  { %19073 = shalt.err (!%p19070_p9)
}
0x1d47   :  { %13895 = dma.vmem_to_hbm [thread:$0]  %s13893_s27, 32, %s19305_s14, [#allocation4]  }
0x1d48   :  { %s19156_s14 = smov [#allocation19]  }
0x1d49   :  { %s13911_s24 = sshll.u32 %s19156_s14, 4  ;;  %s13912_s24 = int_to_ptr.vmem [resolvable:$true] %s13911_s24 }
0x1d4a   :  { %s19074_s6 = scalar_lea.vmem %s13912_s24, 1536  ;;  %p19079_p11 = scmp.lt.s32.totalorder %s13912_s24, %s13912_s24 }
0x1d4b   :  { %p19075_p10 = scmp.ne.s32.totalorder %s13912_s24, %s19074_s6  ;;  %p19080_p12 = scmp.lt.s32.totalorder %s19074_s6, %s19074_s6 }
0x1d4d   :  { %p19081_p13 = por %p19080_p12, %p19079_p11 }
0x1d4f   :  { %p19082_p0 = pnand %p19081_p13, %p19075_p10 }
0x1ddf   :  { %v16913_v46 = vpop.f32.mrb[2].mxu1  ;;  %v16943_v59 = vpop.f32.mrb[164].mxu0 }
0x1de0   :  { %13457 = vst.msk [vmem:[#allocation19 + $0x8] sm:$0xff] %vm231_vm0, %v16913_v46  ;;  %13627 = vst.msk [vmem:[#allocation19 + $0x28] sm:$0xff] %vm231_vm0, %v16943_v59  ;;  %v13447_v13 = vpop.f32.mrb[3].mxu1  ;;  %v13616_v17 = vpop.f32.mrb[165].mxu0 }
0x1de1   :  { %13456 = vst.msk [vmem:[#allocation19] sm:$0xff] %vm231_vm0, %v13447_v13  ;;  %13626 = vst.msk [vmem:[#allocation19 + $0x20] sm:$0xff] %vm231_vm0, %v13616_v17 }
0x1deb   :  { %v16928_v22 = vpop.f32.mrb[232].mxu1  ;;  %v16973_v25 = vpop.f32.mrb[166].mxu0 }
0x1dec   :  { %13542 = vst.msk [vmem:[#allocation19 + $0x18] sm:$0xff] %vm231_vm0, %v16928_v22  ;;  %13801 = vst.msk [vmem:[#allocation19 + $0x48] sm:$0xff] %vm231_vm0, %v16973_v25  ;;  %v13531_v30 = vpop.f32.mrb[233].mxu1  ;;  %v13790_v48 = vpop.f32.mrb[167].mxu0 }
0x1ded   :  { %13541 = vst.msk [vmem:[#allocation19 + $0x10] sm:$0xff] %vm231_vm0, %v13531_v30  ;;  %13800 = vst.msk [vmem:[#allocation19 + $0x40] sm:$0xff] %vm231_vm0, %v13790_v48 }
0x1df7   :  { %v16958_v39 = vpop.f32.mrb[234].mxu1 }
0x1df8   :  { %13717 = vst.msk [vmem:[#allocation19 + $0x38] sm:$0xff] %vm231_vm0, %v16958_v39  ;;  %v13706_v41 = vpop.f32.mrb[235].mxu1 }
0x1df9   :  { %13716 = vst.msk [vmem:[#allocation19 + $0x30] sm:$0xff] %vm231_vm0, %v13706_v41 }
0x1e03   :  { %v16988_v42 = vpop.f32.mrb[236].mxu1 }
0x1e04   :  { %13885 = vst.msk [vmem:[#allocation19 + $0x58] sm:$0xff] %vm231_vm0, %v16988_v42  ;;  %v13874_v54 = vpop.f32.mrb[237].mxu1 }
0x1e05   :  { %13884 = vst.msk [vmem:[#allocation19 + $0x50] sm:$0xff] %vm231_vm0, %v13874_v54 }
0x1e06   :  { %19085 = shalt.err (!%p19082_p0)
}
0x1e07   :  { %s19086_s20 = scalar_lea.hbm %s19315_s19, 1536 }
0x1e08   :  { %p19087_p1 = scmp.ne.s32.totalorder %s19315_s19, %s19086_s20  ;;  %p19090_p2 = scmp.lt.u32.totalorder %s19086_s20, %s19315_s19 }
0x1e0a   :  { %p19092_p3 = pnand %p19090_p2, %p19087_p1 }
0x1e0c   :  { %19095 = shalt.err (!%p19092_p3)
}
0x1e0d   :  { %13917 = dma.vmem_to_hbm [thread:$0]  %s13912_s24, 1536, %s19315_s19, [#allocation18], %s19144_s16, %s19144_s16, %s19145_s12  }
0x1e0e   :  { %19106 = dma.done.wait [#allocation4], 32  }
0x1e0f   :  { %19107 = vsyncadd [#allocation4], 4294967264 }
0x1e10   :  { %19108 = dma.done.wait [#allocation18], 1568  }
0x1e11   :  { %19109 = vsyncadd [#allocation18], 4294965728 }
0x1e12   :  { %13927 = vsyncpa [#allocation3], 1 }
0x1e13   :  { %13928 = vsyncpa [#allocation6], 1 }
0x1e14   :  { %13929 = vsyncpa [#allocation9], 1 }
0x1e15   :  { %13930 = vsyncpa [#allocation12], 1 }
0x1e16   :  { %13931 = vsyncpa [#allocation15], 1 }
0x1e17   :  { %13932 = vsyncpa [#allocation4], 1 }
0x1e18   :  { %13933 = vsyncpa [#allocation18], 1 }

</bundles_post_ra>
